<compile_context>
chip_gen: v6e
topology: v6e:2x2x1
jax: 0.10.0
libtpu: 0.0.40
codegen_flags: <defaults>
</compile_context>

<pallas_src>
import functools

import jax
import jax.numpy as jnp
from jax import lax
from jax.experimental import pallas as pl
from jax.experimental.pallas import tpu as pltpu

EPS = 1e-5
LANES = 128
VMEM_LIMIT = 48 * 1024 * 1024   # ample headroom on v5e/v6e (128 MiB) and v7x (64 MiB)


def _round_up(x, m):
    return (x + m - 1) // m * m


# ----------------------------- Pallas kernels ------------------------------ #

def _conv3x3_windows(src_ref, w_ref, Wa, L):
    """3x3 conv as 9 contiguous-window MXU matmuls accumulated as a value.

    src_ref : (P, Cp) bf16 ref holding the spatially padded activation in
              flattened row-major form (row pitch Wa; halo: 1 top row, 1 left
              col, >=1 right cols, >=2 bottom rows for the window overhang).
    Returns a (L, Cp) float32 accumulator; columns j % Wa >= W are garbage
    (masked / discarded by the callers).
    """
    acc = None
    for dy in range(3):
        for dx in range(3):
            t = dy * 3 + dx
            win = src_ref[pl.ds(dy * Wa + dx, L), :]
            d = jnp.dot(win, w_ref[t], preferred_element_type=jnp.float32)
            acc = d if acc is None else acc + d
    return acc


def _conv1_stats_kernel(H, W, Wa, Cp, xp_ref, w_ref, y_ref, s_ref, q_ref):
    # conv1 on one image + per-image partial BN statistics (sum, sum^2).
    L = H * Wa
    acc = _conv3x3_windows(xp_ref, w_ref, Wa, L)              # (L, Cp) f32
    y3 = acc.reshape(H, Wa, Cp)
    y_ref[...] = y3.astype(jnp.bfloat16)
    mask = lax.broadcasted_iota(jnp.int32, (Wa, Cp), 0) < W   # valid columns only
    yv = jnp.where(mask, y3, 0.0).reshape(L, Cp)
    s_ref[...] = jnp.sum(yv, axis=0, keepdims=True)
    q_ref[...] = jnp.sum(yv * yv, axis=0, keepdims=True)


def _bn_relu_conv2_stats_kernel(H, W, Wa, Cp, y1_ref, a_ref, c_ref, w_ref,
                                y2_ref, s_ref, q_ref, hp_ref):
    # bn1 (folded scale/shift) + relu, embed into padded-flat layout in VMEM,
    # conv2, and per-image partial BN statistics for bn2.
    L = H * Wa
    P = (H + 3) * Wa
    # Zero only the halo strips, every step (self-contained steps are required
    # because a 'parallel' grid axis may be split across TensorCores).
    hp_ref[0:Wa + 1, :] = jnp.zeros((Wa + 1, Cp), jnp.bfloat16)
    hp_ref[(H + 1) * Wa + 1:P, :] = jnp.zeros((P - (H + 1) * Wa - 1, Cp), jnp.bfloat16)

    mask = lax.broadcasted_iota(jnp.int32, (Wa, Cp), 0) < W
    h = jnp.where(
        mask,
        jnp.maximum(y1_ref[...].astype(jnp.float32) * a_ref[...] + c_ref[...], 0.0),
        0.0)                                                   # (H, Wa, Cp) f32, halo cols = 0
    # Single interior store; column shift +1 places data at padded columns 1..W.
    hp_ref[Wa + 1:Wa + 1 + L, :] = h.astype(jnp.bfloat16).reshape(L, Cp)

    acc = _conv3x3_windows(hp_ref, w_ref, Wa, L)
    y3 = acc.reshape(H, Wa, Cp)
    y2_ref[...] = y3.astype(jnp.bfloat16)
    yv = jnp.where(mask, y3, 0.0).reshape(L, Cp)
    s_ref[...] = jnp.sum(yv, axis=0, keepdims=True)
    q_ref[...] = jnp.sum(yv * yv, axis=0, keepdims=True)


def _bn_add_relu_kernel(W, C, y_ref, a_ref, c_ref, x_ref, o_ref):
    # bn2 (folded scale/shift) + residual add + relu, on a flattened row tile.
    y = y_ref[:, :W, :C].astype(jnp.float32)                   # (R, W, C)
    a = a_ref[:, :C]                                           # (1, C)
    c = c_ref[:, :C]
    o_ref[...] = jnp.maximum(y * a + c + x_ref[...], 0.0)


# ---------------------------- pallas_call wrappers -------------------------- #

def _compiler_params():
    return pltpu.CompilerParams(dimension_semantics=("parallel",),
                                vmem_limit_bytes=VMEM_LIMIT)


def _conv1_call(xp, w, N, H, W, Wa, Cp, C):
    P = (H + 3) * Wa
    flops = 2 * N * H * W * 9 * C * C
    bytes_accessed = (xp.size * 2 + w.size * 2 + N * H * Wa * Cp * 2 + 2 * N * Cp * 4)
    return pl.pallas_call(
        functools.partial(_conv1_stats_kernel, H, W, Wa, Cp),
        out_shape=(jax.ShapeDtypeStruct((N, H, Wa, Cp), jnp.bfloat16),
                   jax.ShapeDtypeStruct((N, 1, Cp), jnp.float32),
                   jax.ShapeDtypeStruct((N, 1, Cp), jnp.float32)),
        grid=(N,),
        in_specs=[pl.BlockSpec((None, P, Cp), lambda i: (i, 0, 0)),
                  pl.BlockSpec((9, Cp, Cp), lambda i: (0, 0, 0))],
        out_specs=(pl.BlockSpec((None, H, Wa, Cp), lambda i: (i, 0, 0, 0)),
                   pl.BlockSpec((None, 1, Cp), lambda i: (i, 0, 0)),
                   pl.BlockSpec((None, 1, Cp), lambda i: (i, 0, 0))),
        compiler_params=_compiler_params(),
        cost_estimate=pl.CostEstimate(flops=flops, transcendentals=0,
                                      bytes_accessed=bytes_accessed),
    )(xp, w)


def _conv2_call(y1, a, c, w, N, H, W, Wa, Cp, C):
    P = (H + 3) * Wa
    flops = 2 * N * H * W * 9 * C * C
    bytes_accessed = (y1.size * 2 + 2 * Cp * 4 + w.size * 2
                      + N * H * Wa * Cp * 2 + 2 * N * Cp * 4)
    return pl.pallas_call(
        functools.partial(_bn_relu_conv2_stats_kernel, H, W, Wa, Cp),
        out_shape=(jax.ShapeDtypeStruct((N, H, Wa, Cp), jnp.bfloat16),
                   jax.ShapeDtypeStruct((N, 1, Cp), jnp.float32),
                   jax.ShapeDtypeStruct((N, 1, Cp), jnp.float32)),
        grid=(N,),
        in_specs=[pl.BlockSpec((None, H, Wa, Cp), lambda i: (i, 0, 0, 0)),
                  pl.BlockSpec((1, Cp), lambda i: (0, 0)),
                  pl.BlockSpec((1, Cp), lambda i: (0, 0)),
                  pl.BlockSpec((9, Cp, Cp), lambda i: (0, 0, 0))],
        out_specs=(pl.BlockSpec((None, H, Wa, Cp), lambda i: (i, 0, 0, 0)),
                   pl.BlockSpec((None, 1, Cp), lambda i: (i, 0, 0)),
                   pl.BlockSpec((None, 1, Cp), lambda i: (i, 0, 0))),
        scratch_shapes=[pltpu.VMEM((P, Cp), jnp.bfloat16)],
        compiler_params=_compiler_params(),
        cost_estimate=pl.CostEstimate(flops=flops, transcendentals=0,
                                      bytes_accessed=bytes_accessed),
    )(y1, a, c, w)


def _pick_row_block(rows, wa, max_rows=2048):
    # Largest divisor of `rows` keeping tiles <= max_rows of pitch `wa` rows,
    # while leaving >= 2 grid steps (so both v7x TensorCores get work).
    cands = [r for r in range(1, rows + 1)
             if rows % r == 0 and r * wa <= max_rows and rows // r >= 2]
    return max(cands) if cands else rows


def _bn_add_relu_call(y2, a, c, x, N, H, W, Wa, Cp, C):
    NH = N * H
    y2f = y2.reshape(NH, Wa, Cp)
    xf = x.reshape(NH, W, C)
    R = _pick_row_block(NH, Wa)
    out = pl.pallas_call(
        functools.partial(_bn_add_relu_kernel, W, C),
        out_shape=jax.ShapeDtypeStruct((NH, W, C), jnp.float32),
        grid=(NH // R,),
        in_specs=[pl.BlockSpec((R, Wa, Cp), lambda i: (i, 0, 0)),
                  pl.BlockSpec((1, Cp), lambda i: (0, 0)),
                  pl.BlockSpec((1, Cp), lambda i: (0, 0)),
                  pl.BlockSpec((R, W, C), lambda i: (i, 0, 0))],
        out_specs=pl.BlockSpec((R, W, C), lambda i: (i, 0, 0)),
        compiler_params=_compiler_params(),
    )(y2f, a, c, xf)
    return out.reshape(N, H, W, C)


# ------------------------------ JAX glue ----------------------------------- #

def _prep_weight(w_oihw, Cp):
    """PyTorch (Cout,Cin,3,3) -> (9, Cp, Cp) bf16, tap-major (t = dy*3+dx)."""
    Cout, Cin = int(w_oihw.shape[0]), int(w_oihw.shape[1])
    wt = jnp.transpose(w_oihw.astype(jnp.float32), (2, 3, 1, 0)).reshape(9, Cin, Cout)
    wt = jnp.pad(wt, ((0, 0), (0, Cp - Cin), (0, Cp - Cout)))
    return wt.astype(jnp.bfloat16)


def _bn_scale_shift(psum, psq, gamma, beta, M, C, Cp):
    """Fold training-mode BN into per-channel (scale, shift) from partial sums.

    Padded channels: gamma/beta zero-padded => a = 0, c = 0, so they contribute
    nothing downstream (this padding policy is relied upon for correctness).
    """
    total = jnp.sum(psum[:, 0, :], axis=0, keepdims=True)      # (1, Cp)
    total_sq = jnp.sum(psq[:, 0, :], axis=0, keepdims=True)    # (1, Cp)
    mean = total / M
    var = jnp.maximum(total_sq / M - mean * mean, 0.0)         # biased variance
    g = jnp.pad(gamma.astype(jnp.float32), (0, Cp - C)).reshape(1, Cp)
    b = jnp.pad(beta.astype(jnp.float32), (0, Cp - C)).reshape(1, Cp)
    a = g * lax.rsqrt(var + EPS)
    return a, b - mean * a


def basic_block_forward(x_nchw, w1, g1, b1, w2, g2, b2):
    """Forward pass of _BasicBlock (stride=1, downsample=None). x is NCHW."""
    x = jnp.transpose(x_nchw, (0, 2, 3, 1)).astype(jnp.float32)    # NHWC
    N, H, W, C = x.shape
    assert int(w1.shape[0]) == C and int(w1.shape[1]) == C, \
        "default _BasicBlock: inplanes == planes, stride == 1"
    Cp = _round_up(C, LANES)           # lane-dense channels for the MXU
    Wa = _round_up(W + 2, 8)           # 8-aligned row pitch (>= W + 2)
    P = (H + 3) * Wa                   # 1 top halo row, >= 2 bottom (overhang)
    M = N * H * W

    # bf16 padded-flat view of x (consumed once by conv1's tap windows).
    xp = jnp.pad(x.astype(jnp.bfloat16),
                 ((0, 0), (1, 2), (1, Wa - W - 1), (0, Cp - C))).reshape(N, P, Cp)

    w1m = _prep_weight(w1, Cp)
    w2m = _prep_weight(w2, Cp)

    # stage 1: conv1 + per-image partial BN stats
    y1, s1, q1 = _conv1_call(xp, w1m, N, H, W, Wa, Cp, C)
    a1, c1 = _bn_scale_shift(s1, q1, g1, b1, M, C, Cp)

    # stage 2: bn1 + relu fused with conv2 (+ partial BN stats for bn2)
    y2, s2, q2 = _conv2_call(y1, a1, c1, w2m, N, H, W, Wa, Cp, C)
    a2, c2 = _bn_scale_shift(s2, q2, g2, b2, M, C, Cp)

    # stage 3: bn2 + residual add + relu (identity read from the un-padded x)
    out = _bn_add_relu_call(y2, a2, c2, x, N, H, W, Wa, Cp, C)
    return jnp.transpose(out, (0, 3, 1, 2))                        # back to NCHW


# ------------------------- pure-JAX reference ------------------------------ #

def _reference_forward(x_nchw, w1, g1, b1, w2, g2, b2, operand_dtype=jnp.float32):
    def conv(x_, w_):
        return lax.conv_general_dilated(
            x_.astype(operand_dtype), w_.astype(operand_dtype),
            window_strides=(1, 1), padding=((1, 1), (1, 1)),
            dimension_numbers=('NCHW', 'OIHW', 'NCHW'),
            preferred_element_type=jnp.float32)

    def bn(t, g, b):
        mu = jnp.mean(t, axis=(0, 2, 3), keepdims=True)
        var = jnp.mean((t - mu) ** 2, axis=(0, 2, 3), keepdims=True)
        return ((t - mu) * lax.rsqrt(var + EPS) * g.reshape(1, -1, 1, 1)
                + b.reshape(1, -1, 1, 1))

    h = jnp.maximum(bn(conv(x_nchw, w1), g1, b1), 0.0)
    o = bn(conv(h, w2), g2, b2) + x_nchw.astype(jnp.float32)
    return jnp.maximum(o, 0.0)


# --------------------------------- main ------------------------------------ #

if __name__ == "__main__":
    N, C, H, W = 2, 4, 16, 16          # inplanes = planes = 4, stride = 1
    key = jax.random.PRNGKey(0)
    kx, kw1, kw2, kg1, kb1, kg2, kb2 = jax.random.split(key, 7)

    x = jax.random.normal(kx, (N, C, H, W), dtype=jnp.float32)
    w1 = 0.1 * jax.random.normal(kw1, (C, C, 3, 3), dtype=jnp.float32)   # conv1.weight
    w2 = 0.1 * jax.random.normal(kw2, (C, C, 3, 3), dtype=jnp.float32)   # conv2.weight
    g1 = 1.0 + 0.1 * jax.random.normal(kg1, (C,), dtype=jnp.float32)     # bn1.weight
    b1 = 0.1 * jax.random.normal(kb1, (C,), dtype=jnp.float32)           # bn1.bias
    g2 = 1.0 + 0.1 * jax.random.normal(kg2, (C,), dtype=jnp.float32)     # bn2.weight
    b2 = 0.1 * jax.random.normal(kb2, (C,), dtype=jnp.float32)           # bn2.bias

    fwd = jax.jit(basic_block_forward)
    out = jax.block_until_ready(fwd(x, w1, g1, b1, w2, g2, b2))
    assert out.shape == (N, C, H, W) and out.dtype == jnp.float32

    # Check vs a reference using bf16 matmul operands (same precision policy;
    # the kernel additionally stores y1/y2 in bf16 -> slightly looser atol).
    ref_bf16 = jax.block_until_ready(
        _reference_forward(x, w1, g1, b1, w2, g2, b2, operand_dtype=jnp.bfloat16))
    assert jnp.allclose(out, ref_bf16, atol=3e-2, rtol=3e-2), \
        "mismatch vs bf16-operand reference"

    # Looser check vs the full-f32 reference (gap = deliberate bf16 rounding).
    ref_f32 = jax.block_until_ready(
        _reference_forward(x, w1, g1, b1, w2, g2, b2, operand_dtype=jnp.float32))
    assert jnp.allclose(out, ref_f32, atol=1e-1, rtol=1e-1), \
        "mismatch vs f32 reference"

    print("KERNEL_OK")
</pallas_src>

<mosaic_0001>
module attributes {stable_mosaic.version = 11 : i64} {
  func.func @_conv1_stats_kernel(%arg0: i32, %arg1: memref<1x456x128xbf16, #tpu.memory_space<vmem>>, %arg2: memref<9x128x128xbf16, #tpu.memory_space<vmem>>, %arg3: memref<1x16x24x128xbf16, #tpu.memory_space<vmem>>, %arg4: memref<1x1x128xf32, #tpu.memory_space<vmem>>, %arg5: memref<1x1x128xf32, #tpu.memory_space<vmem>>) attributes {dimension_semantics = [#tpu.dimension_semantics<parallel>], iteration_bounds = array<i64: 2>, scalar_prefetch = 0 : i64, scratch_operands = 0 : i64, tpu.core_type = #tpu.core_type<tc>, window_params = [{transform_indices = @transform_0, window_bounds = array<i64: 1, 456, 128>}, {pipeline_mode = #tpu.pipeline_mode<synchronous>, transform_indices = @transform_1, window_bounds = array<i64: 9, 128, 128>}, {transform_indices = @transform_2, window_bounds = array<i64: 1, 16, 24, 128>}, {transform_indices = @transform_3, window_bounds = array<i64: 1, 1, 128>}, {transform_indices = @transform_4, window_bounds = array<i64: 1, 1, 128>}]} {
    %c0 = arith.constant 0 : index
    %c0_0 = arith.constant 0 : index
    %c0_1 = arith.constant 0 : index
    %0 = vector.load %arg1[%c0, %c0_0, %c0_1] : memref<1x456x128xbf16, #tpu.memory_space<vmem>>, vector<1x384x128xbf16>
    %1 = vector.shape_cast %0 : vector<1x384x128xbf16> to vector<384x128xbf16>
    %c0_2 = arith.constant 0 : index
    %c0_3 = arith.constant 0 : index
    %c0_4 = arith.constant 0 : index
    %2 = vector.load %arg2[%c0_2, %c0_3, %c0_4] : memref<9x128x128xbf16, #tpu.memory_space<vmem>>, vector<1x128x128xbf16>
    %3 = vector.shape_cast %2 : vector<1x128x128xbf16> to vector<128x128xbf16>
    %cst = arith.constant dense<0.000000e+00> : vector<384x128xf32>
    %4 = tpu.matmul %1, %3, %cst {dimension_numbers = #tpu.dot_dimension_numbers<[1], [0], [0], [1], [0, 0, 1, 1], [], []>} : vector<384x128xbf16>, vector<128x128xbf16>, vector<384x128xf32> -> vector<384x128xf32>
    %c0_5 = arith.constant 0 : index
    %c1 = arith.constant 1 : index
    %c0_6 = arith.constant 0 : index
    %5 = vector.load %arg1[%c0_5, %c1, %c0_6] : memref<1x456x128xbf16, #tpu.memory_space<vmem>>, vector<1x384x128xbf16>
    %6 = vector.shape_cast %5 : vector<1x384x128xbf16> to vector<384x128xbf16>
    %c1_7 = arith.constant 1 : index
    %c0_8 = arith.constant 0 : index
    %c0_9 = arith.constant 0 : index
    %7 = vector.load %arg2[%c1_7, %c0_8, %c0_9] : memref<9x128x128xbf16, #tpu.memory_space<vmem>>, vector<1x128x128xbf16>
    %8 = vector.shape_cast %7 : vector<1x128x128xbf16> to vector<128x128xbf16>
    %cst_10 = arith.constant dense<0.000000e+00> : vector<384x128xf32>
    %9 = tpu.matmul %6, %8, %cst_10 {dimension_numbers = #tpu.dot_dimension_numbers<[1], [0], [0], [1], [0, 0, 1, 1], [], []>} : vector<384x128xbf16>, vector<128x128xbf16>, vector<384x128xf32> -> vector<384x128xf32>
    %10 = arith.addf %4, %9 : vector<384x128xf32>
    %c0_11 = arith.constant 0 : index
    %c2 = arith.constant 2 : index
    %c0_12 = arith.constant 0 : index
    %11 = vector.load %arg1[%c0_11, %c2, %c0_12] : memref<1x456x128xbf16, #tpu.memory_space<vmem>>, vector<1x384x128xbf16>
    %12 = vector.shape_cast %11 : vector<1x384x128xbf16> to vector<384x128xbf16>
    %c2_13 = arith.constant 2 : index
    %c0_14 = arith.constant 0 : index
    %c0_15 = arith.constant 0 : index
    %13 = vector.load %arg2[%c2_13, %c0_14, %c0_15] : memref<9x128x128xbf16, #tpu.memory_space<vmem>>, vector<1x128x128xbf16>
    %14 = vector.shape_cast %13 : vector<1x128x128xbf16> to vector<128x128xbf16>
    %cst_16 = arith.constant dense<0.000000e+00> : vector<384x128xf32>
    %15 = tpu.matmul %12, %14, %cst_16 {dimension_numbers = #tpu.dot_dimension_numbers<[1], [0], [0], [1], [0, 0, 1, 1], [], []>} : vector<384x128xbf16>, vector<128x128xbf16>, vector<384x128xf32> -> vector<384x128xf32>
    %16 = arith.addf %10, %15 : vector<384x128xf32>
    %c0_17 = arith.constant 0 : index
    %c24 = arith.constant 24 : index
    %c0_18 = arith.constant 0 : index
    %17 = vector.load %arg1[%c0_17, %c24, %c0_18] : memref<1x456x128xbf16, #tpu.memory_space<vmem>>, vector<1x384x128xbf16>
    %18 = vector.shape_cast %17 : vector<1x384x128xbf16> to vector<384x128xbf16>
    %c3 = arith.constant 3 : index
    %c0_19 = arith.constant 0 : index
    %c0_20 = arith.constant 0 : index
    %19 = vector.load %arg2[%c3, %c0_19, %c0_20] : memref<9x128x128xbf16, #tpu.memory_space<vmem>>, vector<1x128x128xbf16>
    %20 = vector.shape_cast %19 : vector<1x128x128xbf16> to vector<128x128xbf16>
    %cst_21 = arith.constant dense<0.000000e+00> : vector<384x128xf32>
    %21 = tpu.matmul %18, %20, %cst_21 {dimension_numbers = #tpu.dot_dimension_numbers<[1], [0], [0], [1], [0, 0, 1, 1], [], []>} : vector<384x128xbf16>, vector<128x128xbf16>, vector<384x128xf32> -> vector<384x128xf32>
    %22 = arith.addf %16, %21 : vector<384x128xf32>
    %c0_22 = arith.constant 0 : index
    %c25 = arith.constant 25 : index
    %c0_23 = arith.constant 0 : index
    %23 = vector.load %arg1[%c0_22, %c25, %c0_23] : memref<1x456x128xbf16, #tpu.memory_space<vmem>>, vector<1x384x128xbf16>
    %24 = vector.shape_cast %23 : vector<1x384x128xbf16> to vector<384x128xbf16>
    %c4 = arith.constant 4 : index
    %c0_24 = arith.constant 0 : index
    %c0_25 = arith.constant 0 : index
    %25 = vector.load %arg2[%c4, %c0_24, %c0_25] : memref<9x128x128xbf16, #tpu.memory_space<vmem>>, vector<1x128x128xbf16>
    %26 = vector.shape_cast %25 : vector<1x128x128xbf16> to vector<128x128xbf16>
    %cst_26 = arith.constant dense<0.000000e+00> : vector<384x128xf32>
    %27 = tpu.matmul %24, %26, %cst_26 {dimension_numbers = #tpu.dot_dimension_numbers<[1], [0], [0], [1], [0, 0, 1, 1], [], []>} : vector<384x128xbf16>, vector<128x128xbf16>, vector<384x128xf32> -> vector<384x128xf32>
    %28 = arith.addf %22, %27 : vector<384x128xf32>
    %c0_27 = arith.constant 0 : index
    %c26 = arith.constant 26 : index
    %c0_28 = arith.constant 0 : index
    %29 = vector.load %arg1[%c0_27, %c26, %c0_28] : memref<1x456x128xbf16, #tpu.memory_space<vmem>>, vector<1x384x128xbf16>
    %30 = vector.shape_cast %29 : vector<1x384x128xbf16> to vector<384x128xbf16>
    %c5 = arith.constant 5 : index
    %c0_29 = arith.constant 0 : index
    %c0_30 = arith.constant 0 : index
    %31 = vector.load %arg2[%c5, %c0_29, %c0_30] : memref<9x128x128xbf16, #tpu.memory_space<vmem>>, vector<1x128x128xbf16>
    %32 = vector.shape_cast %31 : vector<1x128x128xbf16> to vector<128x128xbf16>
    %cst_31 = arith.constant dense<0.000000e+00> : vector<384x128xf32>
    %33 = tpu.matmul %30, %32, %cst_31 {dimension_numbers = #tpu.dot_dimension_numbers<[1], [0], [0], [1], [0, 0, 1, 1], [], []>} : vector<384x128xbf16>, vector<128x128xbf16>, vector<384x128xf32> -> vector<384x128xf32>
    %34 = arith.addf %28, %33 : vector<384x128xf32>
    %c0_32 = arith.constant 0 : index
    %c48 = arith.constant 48 : index
    %c0_33 = arith.constant 0 : index
    %35 = vector.load %arg1[%c0_32, %c48, %c0_33] : memref<1x456x128xbf16, #tpu.memory_space<vmem>>, vector<1x384x128xbf16>
    %36 = vector.shape_cast %35 : vector<1x384x128xbf16> to vector<384x128xbf16>
    %c6 = arith.constant 6 : index
    %c0_34 = arith.constant 0 : index
    %c0_35 = arith.constant 0 : index
    %37 = vector.load %arg2[%c6, %c0_34, %c0_35] : memref<9x128x128xbf16, #tpu.memory_space<vmem>>, vector<1x128x128xbf16>
    %38 = vector.shape_cast %37 : vector<1x128x128xbf16> to vector<128x128xbf16>
    %cst_36 = arith.constant dense<0.000000e+00> : vector<384x128xf32>
    %39 = tpu.matmul %36, %38, %cst_36 {dimension_numbers = #tpu.dot_dimension_numbers<[1], [0], [0], [1], [0, 0, 1, 1], [], []>} : vector<384x128xbf16>, vector<128x128xbf16>, vector<384x128xf32> -> vector<384x128xf32>
    %40 = arith.addf %34, %39 : vector<384x128xf32>
    %c0_37 = arith.constant 0 : index
    %c49 = arith.constant 49 : index
    %c0_38 = arith.constant 0 : index
    %41 = vector.load %arg1[%c0_37, %c49, %c0_38] : memref<1x456x128xbf16, #tpu.memory_space<vmem>>, vector<1x384x128xbf16>
    %42 = vector.shape_cast %41 : vector<1x384x128xbf16> to vector<384x128xbf16>
    %c7 = arith.constant 7 : index
    %c0_39 = arith.constant 0 : index
    %c0_40 = arith.constant 0 : index
    %43 = vector.load %arg2[%c7, %c0_39, %c0_40] : memref<9x128x128xbf16, #tpu.memory_space<vmem>>, vector<1x128x128xbf16>
    %44 = vector.shape_cast %43 : vector<1x128x128xbf16> to vector<128x128xbf16>
    %cst_41 = arith.constant dense<0.000000e+00> : vector<384x128xf32>
    %45 = tpu.matmul %42, %44, %cst_41 {dimension_numbers = #tpu.dot_dimension_numbers<[1], [0], [0], [1], [0, 0, 1, 1], [], []>} : vector<384x128xbf16>, vector<128x128xbf16>, vector<384x128xf32> -> vector<384x128xf32>
    %46 = arith.addf %40, %45 : vector<384x128xf32>
    %c0_42 = arith.constant 0 : index
    %c50 = arith.constant 50 : index
    %c0_43 = arith.constant 0 : index
    %47 = vector.load %arg1[%c0_42, %c50, %c0_43] : memref<1x456x128xbf16, #tpu.memory_space<vmem>>, vector<1x384x128xbf16>
    %48 = vector.shape_cast %47 : vector<1x384x128xbf16> to vector<384x128xbf16>
    %c8 = arith.constant 8 : index
    %c0_44 = arith.constant 0 : index
    %c0_45 = arith.constant 0 : index
    %49 = vector.load %arg2[%c8, %c0_44, %c0_45] : memref<9x128x128xbf16, #tpu.memory_space<vmem>>, vector<1x128x128xbf16>
    %50 = vector.shape_cast %49 : vector<1x128x128xbf16> to vector<128x128xbf16>
    %cst_46 = arith.constant dense<0.000000e+00> : vector<384x128xf32>
    %51 = tpu.matmul %48, %50, %cst_46 {dimension_numbers = #tpu.dot_dimension_numbers<[1], [0], [0], [1], [0, 0, 1, 1], [], []>} : vector<384x128xbf16>, vector<128x128xbf16>, vector<384x128xf32> -> vector<384x128xf32>
    %52 = arith.addf %46, %51 : vector<384x128xf32>
    %53 = vector.shape_cast %52 : vector<384x128xf32> to vector<16x24x128xf32>
    %54 = arith.truncf %53 : vector<16x24x128xf32> to vector<16x24x128xbf16>
    %c0_47 = arith.constant 0 : index
    %c0_48 = arith.constant 0 : index
    %c0_49 = arith.constant 0 : index
    %c0_50 = arith.constant 0 : index
    %55 = vector.load %arg3[%c0_47, %c0_48, %c0_49, %c0_50] : memref<1x16x24x128xbf16, #tpu.memory_space<vmem>>, vector<1x16x24x128xbf16>
    %56 = vector.shape_cast %55 : vector<1x16x24x128xbf16> to vector<16x24x128xbf16>
    %57 = vector.shape_cast %54 : vector<16x24x128xbf16> to vector<1x16x24x128xbf16>
    tpu.vector_store %arg3[%c0_47, %c0_48, %c0_49, %c0_50], %57 {strides = array<i32>} : memref<1x16x24x128xbf16, #tpu.memory_space<vmem>>, vector<1x16x24x128xbf16>,
    %58 = tpu.iota {dimensions = array<i32: 0>} : vector<24x128xi32>
    %c16_i32 = arith.constant 16 : i32
    %59 = vector.broadcast %c16_i32 : i32 to vector<24x128xi32>
    %60 = arith.cmpi slt, %58, %59 : vector<24x128xi32>
    %cst_51 = arith.constant 0.000000e+00 : f32
    %61 = vector.shape_cast %60 : vector<24x128xi1> to vector<1x24x128xi1>
    %62 = vector.broadcast %61 : vector<1x24x128xi1> to vector<16x24x128xi1>
    %63 = vector.broadcast %cst_51 : f32 to vector<16x24x128xf32>
    %64 = arith.select %62, %53, %63 : vector<16x24x128xi1>, vector<16x24x128xf32>
    %65 = vector.shape_cast %64 : vector<16x24x128xf32> to vector<384x128xf32>
    %cst_52 = arith.constant dense<0.000000e+00> : vector<128xf32>
    %66 = vector.multi_reduction <add>, %65, %cst_52 [0] : vector<384x128xf32> to vector<128xf32>
    %67 = vector.shape_cast %66 : vector<128xf32> to vector<1x128xf32>
    %c0_53 = arith.constant 0 : index
    %c0_54 = arith.constant 0 : index
    %c0_55 = arith.constant 0 : index
    %68 = vector.load %arg4[%c0_53, %c0_54, %c0_55] : memref<1x1x128xf32, #tpu.memory_space<vmem>>, vector<1x1x128xf32>
    %69 = vector.shape_cast %68 : vector<1x1x128xf32> to vector<1x128xf32>
    %70 = vector.shape_cast %67 : vector<1x128xf32> to vector<1x1x128xf32>
    tpu.vector_store %arg4[%c0_53, %c0_54, %c0_55], %70 {strides = array<i32>} : memref<1x1x128xf32, #tpu.memory_space<vmem>>, vector<1x1x128xf32>,
    %71 = arith.mulf %65, %65 : vector<384x128xf32>
    %cst_56 = arith.constant dense<0.000000e+00> : vector<128xf32>
    %72 = vector.multi_reduction <add>, %71, %cst_56 [0] : vector<384x128xf32> to vector<128xf32>
    %73 = vector.shape_cast %72 : vector<128xf32> to vector<1x128xf32>
    %c0_57 = arith.constant 0 : index
    %c0_58 = arith.constant 0 : index
    %c0_59 = arith.constant 0 : index
    %74 = vector.load %arg5[%c0_57, %c0_58, %c0_59] : memref<1x1x128xf32, #tpu.memory_space<vmem>>, vector<1x1x128xf32>
    %75 = vector.shape_cast %74 : vector<1x1x128xf32> to vector<1x128xf32>
    %76 = vector.shape_cast %73 : vector<1x128xf32> to vector<1x1x128xf32>
    tpu.vector_store %arg5[%c0_57, %c0_58, %c0_59], %76 {strides = array<i32>} : memref<1x1x128xf32, #tpu.memory_space<vmem>>, vector<1x1x128xf32>,
    return
  }
  func.func @transform_0(%arg0: i32) -> (i32, i32, i32) {
    %c0_i32 = arith.constant 0 : i32
    %c0_i32_0 = arith.constant 0 : i32
    %c0_i32_1 = arith.constant 0 : i32
    return %arg0, %c0_i32, %c0_i32_0 : i32, i32, i32
  }
  func.func @transform_1(%arg0: i32) -> (i32, i32, i32) {
    %c0_i32 = arith.constant 0 : i32
    %c0_i32_0 = arith.constant 0 : i32
    %c0_i32_1 = arith.constant 0 : i32
    %c0_i32_2 = arith.constant 0 : i32
    return %c0_i32, %c0_i32_0, %c0_i32_1 : i32, i32, i32
  }
  func.func @transform_2(%arg0: i32) -> (i32, i32, i32, i32) {
    %c0_i32 = arith.constant 0 : i32
    %c0_i32_0 = arith.constant 0 : i32
    %c0_i32_1 = arith.constant 0 : i32
    %c0_i32_2 = arith.constant 0 : i32
    return %arg0, %c0_i32, %c0_i32_0, %c0_i32_1 : i32, i32, i32, i32
  }
  func.func @transform_3(%arg0: i32) -> (i32, i32, i32) {
    %c0_i32 = arith.constant 0 : i32
    %c0_i32_0 = arith.constant 0 : i32
    %c0_i32_1 = arith.constant 0 : i32
    return %arg0, %c0_i32, %c0_i32_0 : i32, i32, i32
  }
  func.func @transform_4(%arg0: i32) -> (i32, i32, i32) {
    %c0_i32 = arith.constant 0 : i32
    %c0_i32_0 = arith.constant 0 : i32
    %c0_i32_1 = arith.constant 0 : i32
    return %arg0, %c0_i32, %c0_i32_0 : i32, i32, i32
  }
}

module attributes {stable_mosaic.version = 11 : i64} {
  func.func @_bn_relu_conv2_stats_kernel(%arg0: i32, %arg1: memref<1x16x24x128xbf16, #tpu.memory_space<vmem>>, %arg2: memref<1x128xf32, #tpu.memory_space<vmem>>, %arg3: memref<1x128xf32, #tpu.memory_space<vmem>>, %arg4: memref<9x128x128xbf16, #tpu.memory_space<vmem>>, %arg5: memref<1x16x24x128xbf16, #tpu.memory_space<vmem>>, %arg6: memref<1x1x128xf32, #tpu.memory_space<vmem>>, %arg7: memref<1x1x128xf32, #tpu.memory_space<vmem>>, %arg8: memref<456x128xbf16, #tpu.memory_space<vmem>>) attributes {dimension_semantics = [#tpu.dimension_semantics<parallel>], iteration_bounds = array<i64: 2>, scalar_prefetch = 0 : i64, scratch_operands = 1 : i64, tpu.core_type = #tpu.core_type<tc>, window_params = [{transform_indices = @transform_0, window_bounds = array<i64: 1, 16, 24, 128>}, {pipeline_mode = #tpu.pipeline_mode<synchronous>, transform_indices = @transform_1, window_bounds = array<i64: 1, 128>}, {pipeline_mode = #tpu.pipeline_mode<synchronous>, transform_indices = @transform_2, window_bounds = array<i64: 1, 128>}, {pipeline_mode = #tpu.pipeline_mode<synchronous>, transform_indices = @transform_3, window_bounds = array<i64: 9, 128, 128>}, {transform_indices = @transform_4, window_bounds = array<i64: 1, 16, 24, 128>}, {transform_indices = @transform_5, window_bounds = array<i64: 1, 1, 128>}, {transform_indices = @transform_6, window_bounds = array<i64: 1, 1, 128>}]} {
    %cst = arith.constant 0.000000e+00 : bf16
    %0 = vector.broadcast %cst : bf16 to vector<25x128xbf16>
    %c0 = arith.constant 0 : index
    %c0_0 = arith.constant 0 : index
    %1 = vector.load %arg8[%c0, %c0_0] : memref<456x128xbf16, #tpu.memory_space<vmem>>, vector<25x128xbf16>
    tpu.vector_store %arg8[%c0, %c0_0], %0 {strides = array<i32>} : memref<456x128xbf16, #tpu.memory_space<vmem>>, vector<25x128xbf16>,
    %cst_1 = arith.constant 0.000000e+00 : bf16
    %2 = vector.broadcast %cst_1 : bf16 to vector<47x128xbf16>
    %c409 = arith.constant 409 : index
    %c0_2 = arith.constant 0 : index
    %3 = vector.load %arg8[%c409, %c0_2] : memref<456x128xbf16, #tpu.memory_space<vmem>>, vector<47x128xbf16>
    tpu.vector_store %arg8[%c409, %c0_2], %2 {strides = array<i32>} : memref<456x128xbf16, #tpu.memory_space<vmem>>, vector<47x128xbf16>,
    %4 = tpu.iota {dimensions = array<i32: 0>} : vector<24x128xi32>
    %c16_i32 = arith.constant 16 : i32
    %5 = vector.broadcast %c16_i32 : i32 to vector<24x128xi32>
    %6 = arith.cmpi slt, %4, %5 : vector<24x128xi32>
    %c0_3 = arith.constant 0 : index
    %c0_4 = arith.constant 0 : index
    %c0_5 = arith.constant 0 : index
    %c0_6 = arith.constant 0 : index
    %7 = vector.load %arg1[%c0_3, %c0_4, %c0_5, %c0_6] : memref<1x16x24x128xbf16, #tpu.memory_space<vmem>>, vector<1x16x24x128xbf16>
    %8 = vector.shape_cast %7 : vector<1x16x24x128xbf16> to vector<16x24x128xbf16>
    %9 = arith.extf %8 : vector<16x24x128xbf16> to vector<16x24x128xf32>
    %c0_7 = arith.constant 0 : index
    %c0_8 = arith.constant 0 : index
    %10 = vector.load %arg2[%c0_7, %c0_8] : memref<1x128xf32, #tpu.memory_space<vmem>>, vector<1x128xf32>
    %11 = vector.shape_cast %10 : vector<1x128xf32> to vector<1x1x128xf32>
    %12 = vector.broadcast %11 : vector<1x1x128xf32> to vector<16x24x128xf32>
    %13 = arith.mulf %9, %12 : vector<16x24x128xf32>
    %c0_9 = arith.constant 0 : index
    %c0_10 = arith.constant 0 : index
    %14 = vector.load %arg3[%c0_9, %c0_10] : memref<1x128xf32, #tpu.memory_space<vmem>>, vector<1x128xf32>
    %15 = vector.shape_cast %14 : vector<1x128xf32> to vector<1x1x128xf32>
    %16 = vector.broadcast %15 : vector<1x1x128xf32> to vector<16x24x128xf32>
    %17 = arith.addf %13, %16 : vector<16x24x128xf32>
    %cst_11 = arith.constant 0.000000e+00 : f32
    %18 = vector.broadcast %cst_11 : f32 to vector<16x24x128xf32>
    %19 = arith.maximumf %17, %18 : vector<16x24x128xf32>
    %cst_12 = arith.constant 0.000000e+00 : f32
    %20 = vector.shape_cast %6 : vector<24x128xi1> to vector<1x24x128xi1>
    %21 = vector.broadcast %20 : vector<1x24x128xi1> to vector<16x24x128xi1>
    %22 = vector.broadcast %cst_12 : f32 to vector<16x24x128xf32>
    %23 = arith.select %21, %19, %22 : vector<16x24x128xi1>, vector<16x24x128xf32>
    %24 = arith.truncf %23 : vector<16x24x128xf32> to vector<16x24x128xbf16>
    %25 = vector.shape_cast %24 : vector<16x24x128xbf16> to vector<384x128xbf16>
    %c25 = arith.constant 25 : index
    %c0_13 = arith.constant 0 : index
    %26 = vector.load %arg8[%c25, %c0_13] : memref<456x128xbf16, #tpu.memory_space<vmem>>, vector<384x128xbf16>
    tpu.vector_store %arg8[%c25, %c0_13], %25 {strides = array<i32>} : memref<456x128xbf16, #tpu.memory_space<vmem>>, vector<384x128xbf16>,
    %c0_14 = arith.constant 0 : index
    %c0_15 = arith.constant 0 : index
    %27 = vector.load %arg8[%c0_14, %c0_15] : memref<456x128xbf16, #tpu.memory_space<vmem>>, vector<384x128xbf16>
    %c0_16 = arith.constant 0 : index
    %c0_17 = arith.constant 0 : index
    %c0_18 = arith.constant 0 : index
    %28 = vector.load %arg4[%c0_16, %c0_17, %c0_18] : memref<9x128x128xbf16, #tpu.memory_space<vmem>>, vector<1x128x128xbf16>
    %29 = vector.shape_cast %28 : vector<1x128x128xbf16> to vector<128x128xbf16>
    %cst_19 = arith.constant dense<0.000000e+00> : vector<384x128xf32>
    %30 = tpu.matmul %27, %29, %cst_19 {dimension_numbers = #tpu.dot_dimension_numbers<[1], [0], [0], [1], [0, 0, 1, 1], [], []>} : vector<384x128xbf16>, vector<128x128xbf16>, vector<384x128xf32> -> vector<384x128xf32>
    %c1 = arith.constant 1 : index
    %c0_20 = arith.constant 0 : index
    %31 = vector.load %arg8[%c1, %c0_20] : memref<456x128xbf16, #tpu.memory_space<vmem>>, vector<384x128xbf16>
    %c1_21 = arith.constant 1 : index
    %c0_22 = arith.constant 0 : index
    %c0_23 = arith.constant 0 : index
    %32 = vector.load %arg4[%c1_21, %c0_22, %c0_23] : memref<9x128x128xbf16, #tpu.memory_space<vmem>>, vector<1x128x128xbf16>
    %33 = vector.shape_cast %32 : vector<1x128x128xbf16> to vector<128x128xbf16>
    %cst_24 = arith.constant dense<0.000000e+00> : vector<384x128xf32>
    %34 = tpu.matmul %31, %33, %cst_24 {dimension_numbers = #tpu.dot_dimension_numbers<[1], [0], [0], [1], [0, 0, 1, 1], [], []>} : vector<384x128xbf16>, vector<128x128xbf16>, vector<384x128xf32> -> vector<384x128xf32>
    %35 = arith.addf %30, %34 : vector<384x128xf32>
    %c2 = arith.constant 2 : index
    %c0_25 = arith.constant 0 : index
    %36 = vector.load %arg8[%c2, %c0_25] : memref<456x128xbf16, #tpu.memory_space<vmem>>, vector<384x128xbf16>
    %c2_26 = arith.constant 2 : index
    %c0_27 = arith.constant 0 : index
    %c0_28 = arith.constant 0 : index
    %37 = vector.load %arg4[%c2_26, %c0_27, %c0_28] : memref<9x128x128xbf16, #tpu.memory_space<vmem>>, vector<1x128x128xbf16>
    %38 = vector.shape_cast %37 : vector<1x128x128xbf16> to vector<128x128xbf16>
    %cst_29 = arith.constant dense<0.000000e+00> : vector<384x128xf32>
    %39 = tpu.matmul %36, %38, %cst_29 {dimension_numbers = #tpu.dot_dimension_numbers<[1], [0], [0], [1], [0, 0, 1, 1], [], []>} : vector<384x128xbf16>, vector<128x128xbf16>, vector<384x128xf32> -> vector<384x128xf32>
    %40 = arith.addf %35, %39 : vector<384x128xf32>
    %c24 = arith.constant 24 : index
    %c0_30 = arith.constant 0 : index
    %41 = vector.load %arg8[%c24, %c0_30] : memref<456x128xbf16, #tpu.memory_space<vmem>>, vector<384x128xbf16>
    %c3 = arith.constant 3 : index
    %c0_31 = arith.constant 0 : index
    %c0_32 = arith.constant 0 : index
    %42 = vector.load %arg4[%c3, %c0_31, %c0_32] : memref<9x128x128xbf16, #tpu.memory_space<vmem>>, vector<1x128x128xbf16>
    %43 = vector.shape_cast %42 : vector<1x128x128xbf16> to vector<128x128xbf16>
    %cst_33 = arith.constant dense<0.000000e+00> : vector<384x128xf32>
    %44 = tpu.matmul %41, %43, %cst_33 {dimension_numbers = #tpu.dot_dimension_numbers<[1], [0], [0], [1], [0, 0, 1, 1], [], []>} : vector<384x128xbf16>, vector<128x128xbf16>, vector<384x128xf32> -> vector<384x128xf32>
    %45 = arith.addf %40, %44 : vector<384x128xf32>
    %c25_34 = arith.constant 25 : index
    %c0_35 = arith.constant 0 : index
    %46 = vector.load %arg8[%c25_34, %c0_35] : memref<456x128xbf16, #tpu.memory_space<vmem>>, vector<384x128xbf16>
    %c4 = arith.constant 4 : index
    %c0_36 = arith.constant 0 : index
    %c0_37 = arith.constant 0 : index
    %47 = vector.load %arg4[%c4, %c0_36, %c0_37] : memref<9x128x128xbf16, #tpu.memory_space<vmem>>, vector<1x128x128xbf16>
    %48 = vector.shape_cast %47 : vector<1x128x128xbf16> to vector<128x128xbf16>
    %cst_38 = arith.constant dense<0.000000e+00> : vector<384x128xf32>
    %49 = tpu.matmul %46, %48, %cst_38 {dimension_numbers = #tpu.dot_dimension_numbers<[1], [0], [0], [1], [0, 0, 1, 1], [], []>} : vector<384x128xbf16>, vector<128x128xbf16>, vector<384x128xf32> -> vector<384x128xf32>
    %50 = arith.addf %45, %49 : vector<384x128xf32>
    %c26 = arith.constant 26 : index
    %c0_39 = arith.constant 0 : index
    %51 = vector.load %arg8[%c26, %c0_39] : memref<456x128xbf16, #tpu.memory_space<vmem>>, vector<384x128xbf16>
    %c5 = arith.constant 5 : index
    %c0_40 = arith.constant 0 : index
    %c0_41 = arith.constant 0 : index
    %52 = vector.load %arg4[%c5, %c0_40, %c0_41] : memref<9x128x128xbf16, #tpu.memory_space<vmem>>, vector<1x128x128xbf16>
    %53 = vector.shape_cast %52 : vector<1x128x128xbf16> to vector<128x128xbf16>
    %cst_42 = arith.constant dense<0.000000e+00> : vector<384x128xf32>
    %54 = tpu.matmul %51, %53, %cst_42 {dimension_numbers = #tpu.dot_dimension_numbers<[1], [0], [0], [1], [0, 0, 1, 1], [], []>} : vector<384x128xbf16>, vector<128x128xbf16>, vector<384x128xf32> -> vector<384x128xf32>
    %55 = arith.addf %50, %54 : vector<384x128xf32>
    %c48 = arith.constant 48 : index
    %c0_43 = arith.constant 0 : index
    %56 = vector.load %arg8[%c48, %c0_43] : memref<456x128xbf16, #tpu.memory_space<vmem>>, vector<384x128xbf16>
    %c6 = arith.constant 6 : index
    %c0_44 = arith.constant 0 : index
    %c0_45 = arith.constant 0 : index
    %57 = vector.load %arg4[%c6, %c0_44, %c0_45] : memref<9x128x128xbf16, #tpu.memory_space<vmem>>, vector<1x128x128xbf16>
    %58 = vector.shape_cast %57 : vector<1x128x128xbf16> to vector<128x128xbf16>
    %cst_46 = arith.constant dense<0.000000e+00> : vector<384x128xf32>
    %59 = tpu.matmul %56, %58, %cst_46 {dimension_numbers = #tpu.dot_dimension_numbers<[1], [0], [0], [1], [0, 0, 1, 1], [], []>} : vector<384x128xbf16>, vector<128x128xbf16>, vector<384x128xf32> -> vector<384x128xf32>
    %60 = arith.addf %55, %59 : vector<384x128xf32>
    %c49 = arith.constant 49 : index
    %c0_47 = arith.constant 0 : index
    %61 = vector.load %arg8[%c49, %c0_47] : memref<456x128xbf16, #tpu.memory_space<vmem>>, vector<384x128xbf16>
    %c7 = arith.constant 7 : index
    %c0_48 = arith.constant 0 : index
    %c0_49 = arith.constant 0 : index
    %62 = vector.load %arg4[%c7, %c0_48, %c0_49] : memref<9x128x128xbf16, #tpu.memory_space<vmem>>, vector<1x128x128xbf16>
    %63 = vector.shape_cast %62 : vector<1x128x128xbf16> to vector<128x128xbf16>
    %cst_50 = arith.constant dense<0.000000e+00> : vector<384x128xf32>
    %64 = tpu.matmul %61, %63, %cst_50 {dimension_numbers = #tpu.dot_dimension_numbers<[1], [0], [0], [1], [0, 0, 1, 1], [], []>} : vector<384x128xbf16>, vector<128x128xbf16>, vector<384x128xf32> -> vector<384x128xf32>
    %65 = arith.addf %60, %64 : vector<384x128xf32>
    %c50 = arith.constant 50 : index
    %c0_51 = arith.constant 0 : index
    %66 = vector.load %arg8[%c50, %c0_51] : memref<456x128xbf16, #tpu.memory_space<vmem>>, vector<384x128xbf16>
    %c8 = arith.constant 8 : index
    %c0_52 = arith.constant 0 : index
    %c0_53 = arith.constant 0 : index
    %67 = vector.load %arg4[%c8, %c0_52, %c0_53] : memref<9x128x128xbf16, #tpu.memory_space<vmem>>, vector<1x128x128xbf16>
    %68 = vector.shape_cast %67 : vector<1x128x128xbf16> to vector<128x128xbf16>
    %cst_54 = arith.constant dense<0.000000e+00> : vector<384x128xf32>
    %69 = tpu.matmul %66, %68, %cst_54 {dimension_numbers = #tpu.dot_dimension_numbers<[1], [0], [0], [1], [0, 0, 1, 1], [], []>} : vector<384x128xbf16>, vector<128x128xbf16>, vector<384x128xf32> -> vector<384x128xf32>
    %70 = arith.addf %65, %69 : vector<384x128xf32>
    %71 = vector.shape_cast %70 : vector<384x128xf32> to vector<16x24x128xf32>
    %72 = arith.truncf %71 : vector<16x24x128xf32> to vector<16x24x128xbf16>
    %c0_55 = arith.constant 0 : index
    %c0_56 = arith.constant 0 : index
    %c0_57 = arith.constant 0 : index
    %c0_58 = arith.constant 0 : index
    %73 = vector.load %arg5[%c0_55, %c0_56, %c0_57, %c0_58] : memref<1x16x24x128xbf16, #tpu.memory_space<vmem>>, vector<1x16x24x128xbf16>
    %74 = vector.shape_cast %73 : vector<1x16x24x128xbf16> to vector<16x24x128xbf16>
    %75 = vector.shape_cast %72 : vector<16x24x128xbf16> to vector<1x16x24x128xbf16>
    tpu.vector_store %arg5[%c0_55, %c0_56, %c0_57, %c0_58], %75 {strides = array<i32>} : memref<1x16x24x128xbf16, #tpu.memory_space<vmem>>, vector<1x16x24x128xbf16>,
    %cst_59 = arith.constant 0.000000e+00 : f32
    %76 = vector.shape_cast %6 : vector<24x128xi1> to vector<1x24x128xi1>
    %77 = vector.broadcast %76 : vector<1x24x128xi1> to vector<16x24x128xi1>
    %78 = vector.broadcast %cst_59 : f32 to vector<16x24x128xf32>
    %79 = arith.select %77, %71, %78 : vector<16x24x128xi1>, vector<16x24x128xf32>
    %80 = vector.shape_cast %79 : vector<16x24x128xf32> to vector<384x128xf32>
    %cst_60 = arith.constant dense<0.000000e+00> : vector<128xf32>
    %81 = vector.multi_reduction <add>, %80, %cst_60 [0] : vector<384x128xf32> to vector<128xf32>
    %82 = vector.shape_cast %81 : vector<128xf32> to vector<1x128xf32>
    %c0_61 = arith.constant 0 : index
    %c0_62 = arith.constant 0 : index
    %c0_63 = arith.constant 0 : index
    %83 = vector.load %arg6[%c0_61, %c0_62, %c0_63] : memref<1x1x128xf32, #tpu.memory_space<vmem>>, vector<1x1x128xf32>
    %84 = vector.shape_cast %83 : vector<1x1x128xf32> to vector<1x128xf32>
    %85 = vector.shape_cast %82 : vector<1x128xf32> to vector<1x1x128xf32>
    tpu.vector_store %arg6[%c0_61, %c0_62, %c0_63], %85 {strides = array<i32>} : memref<1x1x128xf32, #tpu.memory_space<vmem>>, vector<1x1x128xf32>,
    %86 = arith.mulf %80, %80 : vector<384x128xf32>
    %cst_64 = arith.constant dense<0.000000e+00> : vector<128xf32>
    %87 = vector.multi_reduction <add>, %86, %cst_64 [0] : vector<384x128xf32> to vector<128xf32>
    %88 = vector.shape_cast %87 : vector<128xf32> to vector<1x128xf32>
    %c0_65 = arith.constant 0 : index
    %c0_66 = arith.constant 0 : index
    %c0_67 = arith.constant 0 : index
    %89 = vector.load %arg7[%c0_65, %c0_66, %c0_67] : memref<1x1x128xf32, #tpu.memory_space<vmem>>, vector<1x1x128xf32>
    %90 = vector.shape_cast %89 : vector<1x1x128xf32> to vector<1x128xf32>
    %91 = vector.shape_cast %88 : vector<1x128xf32> to vector<1x1x128xf32>
    tpu.vector_store %arg7[%c0_65, %c0_66, %c0_67], %91 {strides = array<i32>} : memref<1x1x128xf32, #tpu.memory_space<vmem>>, vector<1x1x128xf32>,
    return
  }
  func.func @transform_0(%arg0: i32) -> (i32, i32, i32, i32) {
    %c0_i32 = arith.constant 0 : i32
    %c0_i32_0 = arith.constant 0 : i32
    %c0_i32_1 = arith.constant 0 : i32
    %c0_i32_2 = arith.constant 0 : i32
    return %arg0, %c0_i32, %c0_i32_0, %c0_i32_1 : i32, i32, i32, i32
  }
  func.func @transform_1(%arg0: i32) -> (i32, i32) {
    %c0_i32 = arith.constant 0 : i32
    %c0_i32_0 = arith.constant 0 : i32
    %c0_i32_1 = arith.constant 0 : i32
    return %c0_i32, %c0_i32_0 : i32, i32
  }
  func.func @transform_2(%arg0: i32) -> (i32, i32) {
    %c0_i32 = arith.constant 0 : i32
    %c0_i32_0 = arith.constant 0 : i32
    %c0_i32_1 = arith.constant 0 : i32
    return %c0_i32, %c0_i32_0 : i32, i32
  }
  func.func @transform_3(%arg0: i32) -> (i32, i32, i32) {
    %c0_i32 = arith.constant 0 : i32
    %c0_i32_0 = arith.constant 0 : i32
    %c0_i32_1 = arith.constant 0 : i32
    %c0_i32_2 = arith.constant 0 : i32
    return %c0_i32, %c0_i32_0, %c0_i32_1 : i32, i32, i32
  }
  func.func @transform_4(%arg0: i32) -> (i32, i32, i32, i32) {
    %c0_i32 = arith.constant 0 : i32
    %c0_i32_0 = arith.constant 0 : i32
    %c0_i32_1 = arith.constant 0 : i32
    %c0_i32_2 = arith.constant 0 : i32
    return %arg0, %c0_i32, %c0_i32_0, %c0_i32_1 : i32, i32, i32, i32
  }
  func.func @transform_5(%arg0: i32) -> (i32, i32, i32) {
    %c0_i32 = arith.constant 0 : i32
    %c0_i32_0 = arith.constant 0 : i32
    %c0_i32_1 = arith.constant 0 : i32
    return %arg0, %c0_i32, %c0_i32_0 : i32, i32, i32
  }
  func.func @transform_6(%arg0: i32) -> (i32, i32, i32) {
    %c0_i32 = arith.constant 0 : i32
    %c0_i32_0 = arith.constant 0 : i32
    %c0_i32_1 = arith.constant 0 : i32
    return %arg0, %c0_i32, %c0_i32_0 : i32, i32, i32
  }
}

module attributes {stable_mosaic.version = 11 : i64} {
  func.func @_bn_add_relu_kernel(%arg0: i32, %arg1: memref<16x24x128xbf16, #tpu.memory_space<vmem>>, %arg2: memref<1x128xf32, #tpu.memory_space<vmem>>, %arg3: memref<1x128xf32, #tpu.memory_space<vmem>>, %arg4: memref<16x16x4xf32, #tpu.memory_space<vmem>>, %arg5: memref<16x16x4xf32, #tpu.memory_space<vmem>>) attributes {dimension_semantics = [#tpu.dimension_semantics<parallel>], iteration_bounds = array<i64: 2>, scalar_prefetch = 0 : i64, scratch_operands = 0 : i64, tpu.core_type = #tpu.core_type<tc>, window_params = [{transform_indices = @transform_0, window_bounds = array<i64: 16, 24, 128>}, {pipeline_mode = #tpu.pipeline_mode<synchronous>, transform_indices = @transform_1, window_bounds = array<i64: 1, 128>}, {pipeline_mode = #tpu.pipeline_mode<synchronous>, transform_indices = @transform_2, window_bounds = array<i64: 1, 128>}, {transform_indices = @transform_3, window_bounds = array<i64: 16, 16, 4>}, {transform_indices = @transform_4, window_bounds = array<i64: 16, 16, 4>}]} {
    %c0 = arith.constant 0 : index
    %c0_0 = arith.constant 0 : index
    %c0_1 = arith.constant 0 : index
    %0 = vector.load %arg1[%c0, %c0_0, %c0_1] : memref<16x24x128xbf16, #tpu.memory_space<vmem>>, vector<16x16x4xbf16>
    %1 = arith.extf %0 : vector<16x16x4xbf16> to vector<16x16x4xf32>
    %c0_2 = arith.constant 0 : index
    %c0_3 = arith.constant 0 : index
    %2 = vector.load %arg2[%c0_2, %c0_3] : memref<1x128xf32, #tpu.memory_space<vmem>>, vector<1x4xf32>
    %c0_4 = arith.constant 0 : index
    %c0_5 = arith.constant 0 : index
    %3 = vector.load %arg3[%c0_4, %c0_5] : memref<1x128xf32, #tpu.memory_space<vmem>>, vector<1x4xf32>
    %4 = vector.shape_cast %2 : vector<1x4xf32> to vector<1x1x4xf32>
    %5 = vector.broadcast %4 : vector<1x1x4xf32> to vector<16x16x4xf32>
    %6 = arith.mulf %1, %5 : vector<16x16x4xf32>
    %7 = vector.shape_cast %3 : vector<1x4xf32> to vector<1x1x4xf32>
    %8 = vector.broadcast %7 : vector<1x1x4xf32> to vector<16x16x4xf32>
    %9 = arith.addf %6, %8 : vector<16x16x4xf32>
    %c0_6 = arith.constant 0 : index
    %c0_7 = arith.constant 0 : index
    %c0_8 = arith.constant 0 : index
    %10 = vector.load %arg4[%c0_6, %c0_7, %c0_8] : memref<16x16x4xf32, #tpu.memory_space<vmem>>, vector<16x16x4xf32>
    %11 = arith.addf %9, %10 : vector<16x16x4xf32>
    %cst = arith.constant 0.000000e+00 : f32
    %12 = vector.broadcast %cst : f32 to vector<16x16x4xf32>
    %13 = arith.maximumf %11, %12 : vector<16x16x4xf32>
    %c0_9 = arith.constant 0 : index
    %c0_10 = arith.constant 0 : index
    %c0_11 = arith.constant 0 : index
    %14 = vector.load %arg5[%c0_9, %c0_10, %c0_11] : memref<16x16x4xf32, #tpu.memory_space<vmem>>, vector<16x16x4xf32>
    tpu.vector_store %arg5[%c0_9, %c0_10, %c0_11], %13 {strides = array<i32>} : memref<16x16x4xf32, #tpu.memory_space<vmem>>, vector<16x16x4xf32>,
    return
  }
  func.func @transform_0(%arg0: i32) -> (i32, i32, i32) {
    %c0_i32 = arith.constant 0 : i32
    %c0_i32_0 = arith.constant 0 : i32
    %c0_i32_1 = arith.constant 0 : i32
    return %arg0, %c0_i32, %c0_i32_0 : i32, i32, i32
  }
  func.func @transform_1(%arg0: i32) -> (i32, i32) {
    %c0_i32 = arith.constant 0 : i32
    %c0_i32_0 = arith.constant 0 : i32
    %c0_i32_1 = arith.constant 0 : i32
    return %c0_i32, %c0_i32_0 : i32, i32
  }
  func.func @transform_2(%arg0: i32) -> (i32, i32) {
    %c0_i32 = arith.constant 0 : i32
    %c0_i32_0 = arith.constant 0 : i32
    %c0_i32_1 = arith.constant 0 : i32
    return %c0_i32, %c0_i32_0 : i32, i32
  }
  func.func @transform_3(%arg0: i32) -> (i32, i32, i32) {
    %c0_i32 = arith.constant 0 : i32
    %c0_i32_0 = arith.constant 0 : i32
    %c0_i32_1 = arith.constant 0 : i32
    return %arg0, %c0_i32, %c0_i32_0 : i32, i32, i32
  }
  func.func @transform_4(%arg0: i32) -> (i32, i32, i32) {
    %c0_i32 = arith.constant 0 : i32
    %c0_i32_0 = arith.constant 0 : i32
    %c0_i32_1 = arith.constant 0 : i32
    return %arg0, %c0_i32, %c0_i32_0 : i32, i32, i32
  }
}

</mosaic_0001>

<bundles_post_ra>
// kernel: basic_block_forward.5
= control target key start
LH: loop header
LB: loop body
LE: loop exit
PB: predicated region body
PF: predicated region fallthrough
CT: control target
= control target key end

     0   :  { %s672_s15 = smov 0   ;;  %s892_s0 = inlined_call_operand.vmem [shape: bf16[32,24,128], index: 0, kind: input, shape index: {}]   ;;  %s893_s1 = inlined_call_operand.vmem [shape: f32[1,128], index: 1, kind: input, shape index: {}]   ;;  %s894_s2 = inlined_call_operand.vmem [shape: f32[1,128], index: 2, kind: input, shape index: {}]   ;;  %s895_s3 = inlined_call_operand.vmem [shape: f32[32,16,4], index: 3, kind: input, shape index: {}]   ;;  %s896_s4 = inlined_call_operand.vmem [shape: f32[32,16,4], index: 4, kind: output, shape index: {}]  }
   0x1 LB: > { %s572_s16 = sadd.s32 4294967295, %s645_s15   ;;  %p576_p0 = scmp.ge.s32.totalorder %s645_s15, 1  ;;  %s645_s15 = sphi %s672_s15, %s14_s15  }
   0x2   : > { %p176_p1 = scmp.lt.s32.totalorder %s645_s15, 3 }
   0x4   : > { %p177_p2 = pnand %p576_p0, %p176_p1 }
   0x5   : > { %s577_s17 = sshll.u32 (!%p177_p2), %s572_s16, 4 }
   0x6   : > { %180 = sbr.rel (%p177_p2) target bundleno = 60 (0x3c), region = 36  ;;  %p211_p3 = scmp.lt.s32.totalorder (!%p177_p2), %s577_s17, 31 }
   0xb   : > { %s898_s17 = smov (!%p211_p3, %s577_s17), 31  ;;  %v700_v1 = vld [vmem:[%s893_s1] ss:$0 sm:$0xff]  ;;  %vm469_vm0 = vcmask 31744  }
   0xc   : > { %s630_s18 = smul.u32 12, %s898_s17  ;;  %s589_s19 = sshll.u32 %s898_s17, 4  ;;  %v707_v8 = vld [vmem:[%s894_s2] ss:$0 sm:$0xff] }
   0xd   : > { %s694_s25 = scalar_lea.vmem %s895_s3, %s589_s19  ;;  %s737_s6 = scalar_lea.vmem %s896_s4, %s589_s19 }
   0xe   : > { %s687_s22 = scalar_lea.vmem %s892_s0, %s630_s18  ;;  %v373_v13 = vld [vmem:[%s694_s25] sm:$0xff]  ;;  %v374_v17 = vld [vmem:[%s694_s25 + $0x8] sm:$0xff]  ;;  %v375_v18 = vld [vmem:[%s694_s25 + $0x10] sm:$0xff] }
   0xf   : > { %v592_v0 = vld [vmem:[%s687_s22] sm:$0xff]   ;;  %v233_v2 = vld [vmem:[%s687_s22 + $0xc] sm:$0xff]   ;;  %v623_v7 = vld [vmem:[%s687_s22 + $0x18] sm:$0xff]  }
  0x10   : > { %v593_v3 = vunpack.c.l.bf16 %v592_v0  ;;  %v594_v4 = vunpack.c.h.bf16 %v592_v0  ;;  %v265_v5 = vunpack.c.l.bf16 %v233_v2  ;;  %v266_v6 = vunpack.c.h.bf16 %v233_v2  ;;  %v237_v11 = vld [vmem:[%s687_s22 + $0x24] sm:$0xff]   ;;  %v376_v19 = vld [vmem:[%s694_s25 + $0x18] sm:$0xff]  ;;  %v379_v38 = vld [vmem:[%s694_s25 + $0x30] sm:$0xff] }
  0x11   : > { %v597_v9 = vunpack.c.l.bf16 %v623_v7  ;;  %v598_v10 = vunpack.c.h.bf16 %v623_v7  ;;  %v269_v22 = vunpack.c.l.bf16 %v237_v11  ;;  %v270_v23 = vunpack.c.h.bf16 %v237_v11  ;;  %v377_v28 = vld [vmem:[%s694_s25 + $0x20] sm:$0xff]  ;;  %v378_v29 = vld [vmem:[%s694_s25 + $0x28] sm:$0xff]  ;;  %v380_v39 = vld [vmem:[%s694_s25 + $0x38] sm:$0xff] }
  0x12   : > { %v303_v12 = vmul.f32 %v593_v3, %v700_v1  ;;  %v304_v14 = vmul.f32 %v594_v4, %v700_v1  ;;  %v305_v15 = vmul.f32 %v700_v1, %v265_v5  ;;  %v306_v16 = vmul.f32 %v700_v1, %v266_v6  ;;  %v624_v44 = vld [vmem:[%s687_s22 + $0x30] sm:$0xff]   ;;  %v241_v45 = vld [vmem:[%s687_s22 + $0x3c] sm:$0xff]   ;;  %v625_v50 = vld [vmem:[%s687_s22 + $0x48] sm:$0xff]  }
  0x13   : > { %v307_v20 = vmul.f32 %v597_v9, %v700_v1  ;;  %v308_v21 = vmul.f32 %v598_v10, %v700_v1  ;;  %v309_v32 = vmul.f32 %v700_v1, %v269_v22  ;;  %v310_v33 = vmul.f32 %v700_v1, %v270_v23  ;;  %v245_v59 = vld [vmem:[%s687_s22 + $0x54] sm:$0xff]   ;;  %v381_v2 = vld [vmem:[%s694_s25 + $0x40] sm:$0xff]  ;;  %v382_v6 = vld [vmem:[%s694_s25 + $0x48] sm:$0xff] }
  0x14   : > { %v341_v24 = vadd.f32 %v707_v8, %v303_v12  ;;  %v342_v25 = vadd.f32 %v707_v8, %v304_v14  ;;  %v343_v26 = vadd.f32 %v707_v8, %v305_v15  ;;  %v344_v27 = vadd.f32 %v707_v8, %v306_v16  ;;  %v383_v7 = vld [vmem:[%s694_s25 + $0x50] sm:$0xff]  ;;  %v384_v9 = vld [vmem:[%s694_s25 + $0x58] sm:$0xff] }
  0x15   : > { %v345_v30 = vadd.f32 %v707_v8, %v307_v20  ;;  %v346_v31 = vadd.f32 %v707_v8, %v308_v21  ;;  %v347_v42 = vadd.f32 %v707_v8, %v309_v32  ;;  %v348_v43 = vadd.f32 %v707_v8, %v310_v33 }
  0x16   : > { %v405_v34 = vadd.f32 %v373_v13, %v341_v24  ;;  %v406_v35 = vadd.f32 %v374_v17, %v342_v25  ;;  %v407_v36 = vadd.f32 %v375_v18, %v343_v26  ;;  %v408_v37 = vadd.f32 %v376_v19, %v344_v27  ;;  %v385_v18 = vld [vmem:[%s694_s25 + $0x60] sm:$0xff]  ;;  %v386_v19 = vld [vmem:[%s694_s25 + $0x68] sm:$0xff] }
  0x17   : > { %v409_v40 = vadd.f32 %v377_v28, %v345_v30  ;;  %v410_v41 = vadd.f32 %v378_v29, %v346_v31  ;;  %v411_v53 = vadd.f32 %v379_v38, %v347_v42  ;;  %v412_v54 = vadd.f32 %v380_v39, %v348_v43  ;;  %v387_v28 = vld [vmem:[%s694_s25 + $0x70] sm:$0xff]  ;;  %v388_v29 = vld [vmem:[%s694_s25 + $0x78] sm:$0xff] }
  0x18   : > { %v437_v46 = vmax.f32 %v405_v34, 0.0  ;;  %v438_v47 = vmax.f32 %v406_v35, 0.0  ;;  %v439_v48 = vmax.f32 %v407_v36, 0.0  ;;  %v440_v49 = vmax.f32 %v408_v37, 0.0  ;;  %v626_v34 = vld [vmem:[%s687_s22 + $0x60] sm:$0xff]   ;;  %v249_v35 = vld [vmem:[%s687_s22 + $0x6c] sm:$0xff]  }
  0x19   : > { %v441_v51 = vmax.f32 %v409_v40, 0.0  ;;  %v442_v52 = vmax.f32 %v410_v41, 0.0  ;;  %v601_v55 = vunpack.c.l.bf16 %v624_v44  ;;  %v602_v56 = vunpack.c.h.bf16 %v624_v44  ;;  %v627_v40 = vld [vmem:[%s687_s22 + $0x78] sm:$0xff]  }
  0x1a   : > { %470 = vst.msk [vmem:[%s737_s6] sm:$0xff] %vm469_vm0, %v437_v46  ;;  %471 = vst.msk [vmem:[%s737_s6 + $0x8] sm:$0xff] %vm469_vm0, %v438_v47  ;;  %v273_v57 = vunpack.c.l.bf16 %v241_v45  ;;  %v274_v58 = vunpack.c.h.bf16 %v241_v45  ;;  %v443_v60 = vmax.f32 %v411_v53, 0.0  ;;  %v444_v61 = vmax.f32 %v412_v54, 0.0 }
  0x1b   : > { %472 = vst.msk [vmem:[%s737_s6 + $0x10] sm:$0xff] %vm469_vm0, %v439_v48  ;;  %473 = vst.msk [vmem:[%s737_s6 + $0x18] sm:$0xff] %vm469_vm0, %v440_v49  ;;  %v605_v62 = vunpack.c.l.bf16 %v625_v50  ;;  %v606_v63 = vunpack.c.h.bf16 %v625_v50  ;;  %v311_v0 = vmul.f32 %v601_v55, %v700_v1  ;;  %v312_v3 = vmul.f32 %v602_v56, %v700_v1  ;;  %v253_v49 = vld [vmem:[%s687_s22 + $0x84] sm:$0xff]  }
  0x1c   : > { %474 = vst.msk [vmem:[%s737_s6 + $0x20] sm:$0xff] %vm469_vm0, %v441_v51  ;;  %475 = vst.msk [vmem:[%s737_s6 + $0x28] sm:$0xff] %vm469_vm0, %v442_v52  ;;  %v313_v4 = vmul.f32 %v700_v1, %v273_v57  ;;  %v314_v5 = vmul.f32 %v700_v1, %v274_v58  ;;  %v277_v12 = vunpack.c.l.bf16 %v245_v59  ;;  %v278_v13 = vunpack.c.h.bf16 %v245_v59  ;;  %v389_v55 = vld [vmem:[%s694_s25 + $0x80] sm:$0xff]  ;;  %v390_v59 = vld [vmem:[%s694_s25 + $0x88] sm:$0xff] }
  0x1d   : > { %476 = vst.msk [vmem:[%s737_s6 + $0x30] sm:$0xff] %vm469_vm0, %v443_v60  ;;  %477 = vst.msk [vmem:[%s737_s6 + $0x38] sm:$0xff] %vm469_vm0, %v444_v61  ;;  %v315_v10 = vmul.f32 %v605_v62, %v700_v1  ;;  %v316_v11 = vmul.f32 %v606_v63, %v700_v1  ;;  %v349_v14 = vadd.f32 %v707_v8, %v311_v0  ;;  %v609_v45 = vunpack.c.l.bf16 %v626_v34  ;;  %v391_v60 = vld [vmem:[%s694_s25 + $0x90] sm:$0xff]  ;;  %v392_v61 = vld [vmem:[%s694_s25 + $0x98] sm:$0xff] }
  0x1e   : > { %v350_v15 = vadd.f32 %v707_v8, %v312_v3  ;;  %v351_v16 = vadd.f32 %v707_v8, %v313_v4  ;;  %v352_v17 = vadd.f32 %v707_v8, %v314_v5  ;;  %v317_v22 = vmul.f32 %v700_v1, %v277_v12 }
  0x1f   : > { %v353_v20 = vadd.f32 %v707_v8, %v315_v10  ;;  %v354_v21 = vadd.f32 %v707_v8, %v316_v11  ;;  %v318_v23 = vmul.f32 %v700_v1, %v278_v13  ;;  %v413_v24 = vadd.f32 %v381_v2, %v349_v14 }
  0x20   : > { %v414_v25 = vadd.f32 %v382_v6, %v350_v15  ;;  %v415_v26 = vadd.f32 %v383_v7, %v351_v16  ;;  %v416_v27 = vadd.f32 %v384_v9, %v352_v17  ;;  %v355_v32 = vadd.f32 %v707_v8, %v317_v22  ;;  %v393_v7 = vld [vmem:[%s694_s25 + $0xa0] sm:$0xff]  ;;  %v394_v9 = vld [vmem:[%s694_s25 + $0xa8] sm:$0xff] }
  0x21   : > { %v417_v30 = vadd.f32 %v385_v18, %v353_v20  ;;  %v418_v31 = vadd.f32 %v386_v19, %v354_v21  ;;  %v356_v33 = vadd.f32 %v707_v8, %v318_v23  ;;  %v445_v36 = vmax.f32 %v413_v24, 0.0  ;;  %v395_v18 = vld [vmem:[%s694_s25 + $0xb0] sm:$0xff]  ;;  %v396_v19 = vld [vmem:[%s694_s25 + $0xb8] sm:$0xff] }
  0x22   : > { %v446_v37 = vmax.f32 %v414_v25, 0.0  ;;  %v447_v38 = vmax.f32 %v415_v26, 0.0  ;;  %v448_v39 = vmax.f32 %v416_v27, 0.0  ;;  %v419_v43 = vadd.f32 %v387_v28, %v355_v32  ;;  %v628_v24 = vld [vmem:[%s687_s22 + $0x90] sm:$0xff]   ;;  %v257_v25 = vld [vmem:[%s687_s22 + $0x9c] sm:$0xff]  }
  0x23   : > { %v449_v41 = vmax.f32 %v417_v30, 0.0  ;;  %v450_v42 = vmax.f32 %v418_v31, 0.0  ;;  %v420_v44 = vadd.f32 %v388_v29, %v356_v33  ;;  %478 = vst.msk [vmem:[%s737_s6 + $0x40] sm:$0xff] %vm469_vm0, %v445_v36  ;;  %v610_v46 = vunpack.c.h.bf16 %v626_v34  ;;  %v629_v30 = vld [vmem:[%s687_s22 + $0xa8] sm:$0xff]  }
  0x24   : > { %479 = vst.msk [vmem:[%s737_s6 + $0x48] sm:$0xff] %vm469_vm0, %v446_v37  ;;  %480 = vst.msk [vmem:[%s737_s6 + $0x50] sm:$0xff] %vm469_vm0, %v447_v38  ;;  %v281_v47 = vunpack.c.l.bf16 %v249_v35  ;;  %v282_v48 = vunpack.c.h.bf16 %v249_v35  ;;  %v451_v50 = vmax.f32 %v419_v43, 0.0  ;;  %v613_v52 = vunpack.c.l.bf16 %v627_v40 }
  0x25   : > { %481 = vst.msk [vmem:[%s737_s6 + $0x58] sm:$0xff] %vm469_vm0, %v448_v39  ;;  %482 = vst.msk [vmem:[%s737_s6 + $0x60] sm:$0xff] %vm469_vm0, %v449_v41  ;;  %v452_v51 = vmax.f32 %v420_v44, 0.0  ;;  %v614_v53 = vunpack.c.h.bf16 %v627_v40  ;;  %v319_v54 = vmul.f32 %v609_v45, %v700_v1  ;;  %v320_v56 = vmul.f32 %v610_v46, %v700_v1  ;;  %v261_v39 = vld [vmem:[%s687_s22 + $0xb4] sm:$0xff]   ;;  %v397_v45 = vld [vmem:[%s694_s25 + $0xc0] sm:$0xff] }
  0x26   : > { %483 = vst.msk [vmem:[%s737_s6 + $0x68] sm:$0xff] %vm469_vm0, %v450_v42  ;;  %v321_v57 = vmul.f32 %v700_v1, %v281_v47  ;;  %v322_v58 = vmul.f32 %v700_v1, %v282_v48  ;;  %484 = vst.msk [vmem:[%s737_s6 + $0x70] sm:$0xff] %vm469_vm0, %v451_v50  ;;  %v323_v62 = vmul.f32 %v613_v52, %v700_v1  ;;  %v285_v0 = vunpack.c.l.bf16 %v253_v49  ;;  %v399_v50 = vld [vmem:[%s694_s25 + $0xd0] sm:$0xff] }
  0x27   : > { %485 = vst.msk [vmem:[%s737_s6 + $0x78] sm:$0xff] %vm469_vm0, %v452_v51  ;;  %v324_v63 = vmul.f32 %v614_v53, %v700_v1  ;;  %v286_v2 = vunpack.c.h.bf16 %v253_v49  ;;  %v357_v3 = vadd.f32 %v707_v8, %v319_v54  ;;  %v358_v4 = vadd.f32 %v707_v8, %v320_v56  ;;  %v398_v49 = vld [vmem:[%s694_s25 + $0xc8] sm:$0xff]  ;;  %v400_v51 = vld [vmem:[%s694_s25 + $0xd8] sm:$0xff] }
  0x28   : > { %v359_v5 = vadd.f32 %v707_v8, %v321_v57  ;;  %v360_v6 = vadd.f32 %v707_v8, %v322_v58  ;;  %v361_v10 = vadd.f32 %v707_v8, %v323_v62  ;;  %v325_v12 = vmul.f32 %v700_v1, %v285_v0 }
  0x29   : > { %v362_v11 = vadd.f32 %v707_v8, %v324_v63  ;;  %v326_v13 = vmul.f32 %v700_v1, %v286_v2  ;;  %v421_v14 = vadd.f32 %v389_v55, %v357_v3  ;;  %v422_v15 = vadd.f32 %v390_v59, %v358_v4 }
  0x2a   : > { %v423_v16 = vadd.f32 %v391_v60, %v359_v5  ;;  %v424_v17 = vadd.f32 %v392_v61, %v360_v6  ;;  %v425_v20 = vadd.f32 %v393_v7, %v361_v10  ;;  %v363_v22 = vadd.f32 %v707_v8, %v325_v12  ;;  %v401_v60 = vld [vmem:[%s694_s25 + $0xe0] sm:$0xff]  ;;  %v402_v61 = vld [vmem:[%s694_s25 + $0xe8] sm:$0xff]  ;;  %v403_v7 = vld [vmem:[%s694_s25 + $0xf0] sm:$0xff] }
  0x2b   : > { %v426_v21 = vadd.f32 %v394_v9, %v362_v11  ;;  %v364_v23 = vadd.f32 %v707_v8, %v326_v13  ;;  %v453_v26 = vmax.f32 %v421_v14, 0.0  ;;  %v454_v27 = vmax.f32 %v422_v15, 0.0  ;;  %v404_v9 = vld [vmem:[%s694_s25 + $0xf8] sm:$0xff] }
  0x2c   : > { %v455_v28 = vmax.f32 %v423_v16, 0.0  ;;  %v456_v29 = vmax.f32 %v424_v17, 0.0  ;;  %v457_v31 = vmax.f32 %v425_v20, 0.0  ;;  %v427_v33 = vadd.f32 %v395_v18, %v363_v22 }
  0x2d   : > { %v458_v32 = vmax.f32 %v426_v21, 0.0  ;;  %v428_v34 = vadd.f32 %v396_v19, %v364_v23  ;;  %486 = vst.msk [vmem:[%s737_s6 + $0x80] sm:$0xff] %vm469_vm0, %v453_v26  ;;  %487 = vst.msk [vmem:[%s737_s6 + $0x88] sm:$0xff] %vm469_vm0, %v454_v27  ;;  %v617_v35 = vunpack.c.l.bf16 %v628_v24  ;;  %v618_v36 = vunpack.c.h.bf16 %v628_v24 }
  0x2e   : > { %488 = vst.msk [vmem:[%s737_s6 + $0x90] sm:$0xff] %vm469_vm0, %v455_v28  ;;  %489 = vst.msk [vmem:[%s737_s6 + $0x98] sm:$0xff] %vm469_vm0, %v456_v29  ;;  %v289_v37 = vunpack.c.l.bf16 %v257_v25  ;;  %v290_v38 = vunpack.c.h.bf16 %v257_v25  ;;  %v459_v40 = vmax.f32 %v427_v33, 0.0  ;;  %v621_v42 = vunpack.c.l.bf16 %v629_v30 }
  0x2f   : > { %490 = vst.msk [vmem:[%s737_s6 + $0xa0] sm:$0xff] %vm469_vm0, %v457_v31  ;;  %491 = vst.msk [vmem:[%s737_s6 + $0xa8] sm:$0xff] %vm469_vm0, %v458_v32  ;;  %v460_v41 = vmax.f32 %v428_v34, 0.0  ;;  %v622_v43 = vunpack.c.h.bf16 %v629_v30  ;;  %v327_v44 = vmul.f32 %v617_v35, %v700_v1  ;;  %v328_v46 = vmul.f32 %v618_v36, %v700_v1 }
  0x30   : > { %v329_v47 = vmul.f32 %v700_v1, %v289_v37  ;;  %v330_v48 = vmul.f32 %v700_v1, %v290_v38  ;;  %492 = vst.msk [vmem:[%s737_s6 + $0xb0] sm:$0xff] %vm469_vm0, %v459_v40  ;;  %v331_v52 = vmul.f32 %v621_v42, %v700_v1  ;;  %v293_v54 = vunpack.c.l.bf16 %v261_v39 }
  0x31   : > { %493 = vst.msk [vmem:[%s737_s6 + $0xb8] sm:$0xff] %vm469_vm0, %v460_v41  ;;  %v332_v53 = vmul.f32 %v622_v43, %v700_v1  ;;  %v294_v55 = vunpack.c.h.bf16 %v261_v39  ;;  %v365_v56 = vadd.f32 %v707_v8, %v327_v44  ;;  %v366_v57 = vadd.f32 %v707_v8, %v328_v46 }
  0x32   : > { %v367_v58 = vadd.f32 %v707_v8, %v329_v47  ;;  %v368_v59 = vadd.f32 %v707_v8, %v330_v48  ;;  %v369_v62 = vadd.f32 %v707_v8, %v331_v52  ;;  %v333_v0 = vmul.f32 %v700_v1, %v293_v54 }
  0x33   : > { %v370_v63 = vadd.f32 %v707_v8, %v332_v53  ;;  %v334_v2 = vmul.f32 %v700_v1, %v294_v55  ;;  %v429_v3 = vadd.f32 %v397_v45, %v365_v56  ;;  %v430_v4 = vadd.f32 %v398_v49, %v366_v57 }
  0x34   : > { %v431_v5 = vadd.f32 %v399_v50, %v367_v58  ;;  %v432_v6 = vadd.f32 %v400_v51, %v368_v59  ;;  %v433_v10 = vadd.f32 %v401_v60, %v369_v62  ;;  %v371_v12 = vadd.f32 %v707_v8, %v333_v0 }
  0x35   : > { %v434_v11 = vadd.f32 %v402_v61, %v370_v63  ;;  %v372_v13 = vadd.f32 %v707_v8, %v334_v2  ;;  %v461_v14 = vmax.f32 %v429_v3, 0.0  ;;  %v462_v1 = vmax.f32 %v430_v4, 0.0 }
  0x36   : > { %v463_v15 = vmax.f32 %v431_v5, 0.0  ;;  %v464_v16 = vmax.f32 %v432_v6, 0.0  ;;  %v465_v17 = vmax.f32 %v433_v10, 0.0  ;;  %v435_v19 = vadd.f32 %v403_v7, %v371_v12 }
  0x37   : > { %v466_v18 = vmax.f32 %v434_v11, 0.0  ;;  %v436_v20 = vadd.f32 %v404_v9, %v372_v13  ;;  %494 = vst.msk [vmem:[%s737_s6 + $0xc0] sm:$0xff] %vm469_vm0, %v461_v14  ;;  %495 = vst.msk [vmem:[%s737_s6 + $0xc8] sm:$0xff] %vm469_vm0, %v462_v1 }
  0x38   : > { %496 = vst.msk [vmem:[%s737_s6 + $0xd0] sm:$0xff] %vm469_vm0, %v463_v15  ;;  %497 = vst.msk [vmem:[%s737_s6 + $0xd8] sm:$0xff] %vm469_vm0, %v464_v16  ;;  %v467_v8 = vmax.f32 %v435_v19, 0.0 }
  0x39   : > { %498 = vst.msk [vmem:[%s737_s6 + $0xe0] sm:$0xff] %vm469_vm0, %v465_v17  ;;  %499 = vst.msk [vmem:[%s737_s6 + $0xe8] sm:$0xff] %vm469_vm0, %v466_v18  ;;  %v468_v21 = vmax.f32 %v436_v20, 0.0 }
  0x3a   : > { %500 = vst.msk [vmem:[%s737_s6 + $0xf0] sm:$0xff] %vm469_vm0, %v467_v8 }
  0x3b   : > { %501 = vst.msk [vmem:[%s737_s6 + $0xf8] sm:$0xff] %vm469_vm0, %v468_v21 }
  0x3c PF: > { %s14_s15 = sadd.s32 1, %s645_s15  }
  0x3d   : > { %p11_p4 = scmp.ge.s32.totalorder %s14_s15, 4  }
  0x3f   :  { %13 = sbr.rel (!%p11_p4) target bundleno = 1 (0x1), region = 69 }

// kernel: basic_block_forward.3
= control target key start
LH: loop header
LB: loop body
LE: loop exit
PB: predicated region body
PF: predicated region fallthrough
CT: control target
= control target key end

     0   :  { %s7256_s15 = smov 0   ;;  %s8772_s0 = inlined_call_operand.vmem [shape: bf16[2,456,128], index: 0, kind: input, shape index: {}]   ;;  %s8773_s1 = inlined_call_operand.vmem [shape: bf16[9,128,128], index: 1, kind: input, shape index: {}]   ;;  %s8774_s2 = inlined_call_operand.vmem [shape: bf16[2,16,24,128], index: 2, kind: output, shape index: {0}]   ;;  %s8775_s3 = inlined_call_operand.vmem [shape: f32[2,1,128], index: 3, kind: output, shape index: {1}]   ;;  %s8776_s4 = inlined_call_operand.vmem [shape: f32[2,1,128], index: 4, kind: output, shape index: {2}]  }
   0x1 LB: > { %s5556_s16 = sadd.s32 4294967295, %s7229_s15   ;;  %p5560_p0 = scmp.ge.s32.totalorder %s7229_s15, 1  ;;  %s7229_s15 = sphi %s7256_s15, %s15_s15  }
   0x2   : > { %p167_p1 = scmp.lt.s32.totalorder %s7229_s15, 3 }
   0x4   : > { %p168_p2 = pnand %p5560_p0, %p167_p1 }
   0x6   : > { %171 = sbr.rel (%p168_p2) target bundleno = 690 (0x2b2), region = 28 }
   0xb   : > { %v7020_v0 = vld [vmem:[%s8773_s1 + $0x78] sm:$0xff]   ;;  %p199_p3 = scmp.lt.s32.totalorder %s5556_s16, 1  ;;  %v7021_v1 = vld [vmem:[%s8773_s1 + $0x70] sm:$0xff]   ;;  %v7022_v2 = vld [vmem:[%s8773_s1 + $0x68] sm:$0xff]   ;;  %vm421_vm0 = vsmask.f32 7424 }
   0xc   : > { %6418 = vmatprep.subr.bf16.mxu0 %v7020_v0  ;;  %6994 = vmatprep.subr.bf16.mxu1 %v7020_v0  ;;  %v7023_v3 = vld [vmem:[%s8773_s1 + $0x60] sm:$0xff]   ;;  %v7024_v9 = vld [vmem:[%s8773_s1 + $0x58] sm:$0xff]   ;;  %v7025_v20 = vld [vmem:[%s8773_s1 + $0x50] sm:$0xff]   ;;  %vm1233_vm1 = vcmask 1046528  }
   0xd   : > { %s8869_s16 = smov (!%p199_p3, %s5556_s16), 1  ;;  %6419 = vmatpush3.bf16.msra.mxu0 %v7020_v0  ;;  %7002 = vmatpush3.bf16.msra.mxu1 %v7020_v0  ;;  %v7026_v28 = vld [vmem:[%s8773_s1 + $0x48] sm:$0xff]   ;;  %v7027_v33 = vld [vmem:[%s8773_s1 + $0x40] sm:$0xff]   ;;  %v7034_v41 = vld [vmem:[%s8773_s1 + $0x38] sm:$0xff]  }
   0xe   : > { %6420 = vmatprep.subr.bf16.mxu0 %v7021_v1  ;;  %6995 = vmatprep.subr.bf16.mxu1 %v7021_v1  ;;  %s7010_s23 = smul.u32 228, %s8869_s16  ;;  %v7035_v42 = vld [vmem:[%s8773_s1 + $0xb8] sm:$0xff]   ;;  %v7036_v54 = vld [vmem:[%s8773_s1 + $0x30] sm:$0xff]   ;;  %s211_s6 = scalar_lea.vmem %s8775_s3, %s8869_s16 }
   0xf   : > { %v7041_v61 = vld [vmem:[%s8773_s1 + $0xb0] sm:$0xff]   ;;  %s214_s9 = scalar_lea.vmem %s8776_s4, %s8869_s16 }
  0x10   : > { %s7279_s26 = scalar_lea.vmem %s8772_s0, %s7010_s23 }
  0x11   : > { %6421 = vmatpush3.bf16.msra.mxu0 %v7021_v1  ;;  %7003 = vmatpush3.bf16.msra.mxu1 %v7021_v1  ;;  %v216_v4 = vld [vmem:[%s7279_s26] sm:$0xf]  ;;  %v7286_v5 = vld [vmem:[%s7279_s26 + $0x4] sm:$0xf]  ;;  %v7292_v7 = vld [vmem:[%s7279_s26 + $0x8] sm:$0xff]  }
  0x12   : > { %6422 = vmatprep.subr.bf16.mxu0 %v7022_v2  ;;  %6996 = vmatprep.subr.bf16.mxu1 %v7022_v2  ;;  %v7289_v6 = vcombine.low %v216_v4, %v7286_v5  ;;  %v7030_v8 = vld [vmem:[%s7279_s26 + $0x60] sm:$0xff]   ;;  %v430_v12 = vshll.u32 %v7292_v7, 16  ;;  %v7031_v13 = vld [vmem:[%s7279_s26 + $0x68] sm:$0xff]   ;;  %v7309_v24 = vld [vmem:[%s7279_s26 + $0x10] sm:$0xff]   ;;  %v434_v31 = vshrl.u32 %v7292_v7, 16 }
  0x13   : > { %v518_v14 = vshll.u32 %v7030_v8, 16  ;;  %v522_v15 = vshrl.u32 %v7030_v8, 16  ;;  %v526_v18 = vshll.u32 %v7031_v13, 16  ;;  %v7314_v27 = vld [vmem:[%s7279_s26 + $0x70] sm:$0xff]   ;;  %v438_v29 = vshll.u32 %v7309_v24, 16  ;;  %v7321_v30 = vld [vmem:[%s7279_s26 + $0x18] sm:$0xff]  }
  0x14   : > { %v423_v10 = vshrl.u32 %v7289_v6, 16  ;;  %v425_v11 = vshll.u32 %v7289_v6, 16  ;;  %v432_v17 = vrot.slane %v430_v12, 1  ;;  %v7325_v32 = vld [vmem:[%s7279_s26 + $0x78] sm:$0xff]   ;;  %v530_v34 = vshrl.u32 %v7031_v13, 16  ;;  %v7342_v44 = vld [vmem:[%s7279_s26 + $0x20] sm:$0xff]  }
  0x15   : > { %6423 = vmatpush3.bf16.msra.mxu0 %v7022_v2  ;;  %7004 = vmatpush3.bf16.msra.mxu1 %v7022_v2  ;;  %v7302_v19 = vrot.slane %v518_v14, 1  ;;  %v528_v22 = vrot.slane %v526_v18, 1  ;;  %v534_v35 = vshll.u32 %v7314_v27, 16  ;;  %v440_v36 = vrot.slane %v438_v29, 1  ;;  %v7345_v47 = vld [vmem:[%s7279_s26 + $0x80] sm:$0xff]   ;;  %v7348_v48 = vld [vmem:[%s7279_s26 + $0x28] sm:$0xff]  }
  0x16   : > { %6424 = vmatprep.subr.bf16.mxu0 %v7023_v3  ;;  %6997 = vmatprep.subr.bf16.mxu1 %v7023_v3  ;;  %v427_v16 = vrot.slane %v425_v11, 1  ;;  %v442_v37 = vshrl.u32 %v7309_v24, 16  ;;  %v446_v38 = vshll.u32 %v7321_v30, 16  ;;  %v538_v39 = vshrl.u32 %v7314_v27, 16  ;;  %v7352_v52 = vld [vmem:[%s7279_s26 + $0x88] sm:$0xff]   ;;  %v7387_v18 = vld [vmem:[%s7279_s26 + $0x98] sm:$0xff]  }
  0x17   : > { %v524_v23 = vor.u32 %v522_v15, %v7302_v19  ;;  %v436_v40 = vor.u32 %v434_v31, %v432_v17  ;;  %v542_v43 = vshll.u32 %v7325_v32, 16  ;;  %v532_v45 = vor.u32 %v530_v34, %v528_v22  ;;  %v7043_v14 = vld [vmem:[%s8773_s1 + $0xa8] sm:$0xff]   ;;  %v7048_v31 = vld [vmem:[%s8773_s1 + $0x20] sm:$0xff]  }
  0x18   : > { %v428_v21 = vor.u32 %v427_v16, %v423_v10  ;;  %v536_v46 = vrot.slane %v534_v35, 1  ;;  %v444_v49 = vor.u32 %v442_v37, %v440_v36  ;;  %v448_v50 = vrot.slane %v446_v38, 1  ;;  %v7378_v10 = vld [vmem:[%s7279_s26 + $0x90] sm:$0xff]  }
  0x19   : > { %6425 = vmatpush3.bf16.msra.mxu0 %v7023_v3  ;;  %7005 = vmatpush3.bf16.msra.mxu1 %v7023_v3  ;;  %v529_v26 = vsel %vm421_vm0, %v524_v23, %v528_v22  ;;  %v450_v51 = vshrl.u32 %v7321_v30, 16  ;;  %v441_v53 = vsel %vm421_vm0, %v436_v40, %v440_v36  ;;  %v544_v56 = vrot.slane %v542_v43, 1  ;;  %v7371_v3 = vld [vmem:[%s7279_s26 + $0x30] sm:$0xff]   ;;  %v7411_v43 = vld [vmem:[%s7279_s26 + $0xa0] sm:$0xff]  }
  0x1a   : > { %6426 = vmatprep.subr.bf16.mxu0 %v7024_v9  ;;  %6998 = vmatprep.subr.bf16.mxu1 %v7024_v9  ;;  %v433_v25 = vsel %vm421_vm0, %v428_v21, %v432_v17  ;;  %v540_v55 = vor.u32 %v538_v39, %v536_v46  ;;  %v454_v57 = vshll.u32 %v7342_v44, 16  ;;  %v537_v58 = vsel %vm421_vm0, %v532_v45, %v536_v46  ;;  %v7384_v17 = vld [vmem:[%s7279_s26 + $0x38] sm:$0xff]  }
  0x1b   : > { %6434 = vmatprep.mubr.bf16.mxu0 %v433_v25  ;;  %6458 = vmatprep.mubr.bf16.mxu1 %v529_v26  ;;  %v546_v59 = vshrl.u32 %v7325_v32, 16  ;;  %v550_v60 = vshll.u32 %v7345_v47, 16  ;;  %v458_v62 = vshrl.u32 %v7342_v44, 16  ;;  %v462_v63 = vshll.u32 %v7348_v48, 16 }
  0x1c   : > { %v554_v0 = vshrl.u32 %v7345_v47, 16  ;;  %v449_v1 = vsel %vm421_vm0, %v444_v49, %v448_v50  ;;  %v558_v2 = vshll.u32 %v7352_v52, 16  ;;  %v545_v4 = vsel %vm421_vm0, %v540_v55, %v544_v56 }
  0x1d   : > { %6427 = vmatpush3.bf16.msra.mxu0 %v7024_v9  ;;  %7006 = vmatpush3.bf16.msra.mxu1 %v7024_v9  ;;  %v456_v8 = vrot.slane %v454_v57, 1  ;;  %v7042_v9 = vld [vmem:[%s8773_s1 + $0x28] sm:$0xff]   ;;  %v452_v11 = vor.u32 %v450_v51, %v448_v50  ;;  %v548_v12 = vor.u32 %v546_v59, %v544_v56  ;;  %v552_v13 = vrot.slane %v550_v60, 1  ;;  %v7054_v56 = vld [vmem:[%s8773_s1 + $0x18] sm:$0xff]  }
  0x1e   : > { %6428 = vmatprep.subr.bf16.mxu0 %v7025_v20  ;;  %6999 = vmatprep.subr.bf16.mxu1 %v7025_v20  ;;  %v464_v16 = vrot.slane %v462_v63, 1  ;;  %v560_v21 = vrot.slane %v558_v2, 1  ;;  %v470_v22 = vshll.u32 %v7371_v3, 16  ;;  %v466_v23 = vshrl.u32 %v7348_v48, 16  ;;  %v7415_v50 = vld [vmem:[%s7279_s26 + $0x48] sm:$0xff]   ;;  %v7055_v59 = vld [vmem:[%s8773_s1 + $0x98] sm:$0xff]  }
  0x1f   : > { %v460_v15 = vor.u32 %v458_v62, %v456_v8  ;;  %v562_v25 = vshrl.u32 %v7352_v52, 16  ;;  %v566_v26 = vshll.u32 %v7378_v10, 16  ;;  %v553_v29 = vsel %vm421_vm0, %v548_v12, %v552_v13  ;;  %v7421_v57 = vld [vmem:[%s7279_s26 + $0xa8] sm:$0xff]   ;;  %v7056_v2 = vld [vmem:[%s8773_s1 + $0x10] sm:$0xff]  }
  0x20   : > { %v474_v34 = vshrl.u32 %v7371_v3, 16  ;;  %v570_v35 = vshrl.u32 %v7378_v10, 16  ;;  %v478_v37 = vshll.u32 %v7384_v17, 16  ;;  %v574_v38 = vshll.u32 %v7387_v18, 16 }
  0x21   : > { %6429 = vmatpush3.bf16.msra.mxu0 %v7025_v20  ;;  %7007 = vmatpush3.bf16.msra.mxu1 %v7025_v20  ;;  %v556_v20 = vor.u32 %v554_v0, %v552_v13  ;;  %v465_v36 = vsel %vm421_vm0, %v460_v15, %v464_v16  ;;  %v472_v40 = vrot.slane %v470_v22, 1  ;;  %v468_v45 = vor.u32 %v466_v23, %v464_v16  ;;  %v7444_v13 = vld [vmem:[%s7279_s26 + $0xb0] sm:$0xff]   ;;  %v7450_v23 = vld [vmem:[%s7279_s26 + $0x58] sm:$0xff]  }
  0x22   : > { %6430 = vmatprep.subr.bf16.mxu0 %v7026_v28  ;;  %7000 = vmatprep.subr.bf16.mxu1 %v7026_v28  ;;  %v564_v46 = vor.u32 %v562_v25, %v560_v21  ;;  %v482_v49 = vshrl.u32 %v7384_v17, 16  ;;  %v576_v55 = vrot.slane %v574_v38, 1  ;;  %v586_v63 = vshrl.u32 %v7411_v43, 16 }
  0x23   : > { %v561_v39 = vsel %vm421_vm0, %v556_v20, %v560_v21  ;;  %v476_v51 = vor.u32 %v474_v34, %v472_v40  ;;  %v473_v0 = vsel %vm421_vm0, %v468_v45, %v472_v40  ;;  %v590_v12 = vshll.u32 %v7421_v57, 16  ;;  %v7062_v34 = vld [vmem:[%s8773_s1 + $0x8] sm:$0xff]  }
  0x25   : > { %6431 = vmatpush3.bf16.msra.mxu0 %v7026_v28  ;;  %7008 = vmatpush3.bf16.msra.mxu1 %v7026_v28  ;;  %v457_v28 = vsel %vm421_vm0, %v452_v11, %v456_v8  ;;  %v7438_v8 = vld [vmem:[%s7279_s26 + $0x50] sm:$0xff]  }
  0x26   : > { %6432 = vmatprep.subr.bf16.mxu0 %v7027_v33  ;;  %7001 = vmatprep.subr.bf16.mxu1 %v7027_v33  ;;  %v506_v40 = vshrl.u32 %v7438_v8, 16 }
  0x29   : > { %6433 = vmatpush3.bf16.msra.mxu0 %v7027_v33  ;;  %7009 = vmatpush3.bf16.msra.mxu1 %v7027_v33  ;;  %v7049_v33 = vld [vmem:[%s8773_s1 + $0xa0] sm:$0xff]  }
  0x2a   : > { %6482 = vmatprep.subr.bf16.mxu1 %v7034_v41  ;;  %6546 = vmatprep.subr.bf16.mxu0 %v7035_v42 }
  0x2c   : > { %6435 = vmatmul.mubr.bf16.vlgmr.msra.gmra.mxu0 %v441_v53  ;;  %6459 = vmatmul.mubr.bf16.vlgmr.msra.gmra.mxu1 %v537_v58  ;;  %v480_v53 = vrot.slane %v478_v37, 1  ;;  %v578_v58 = vshrl.u32 %v7387_v18, 16  ;;  %v594_v37 = vshrl.u32 %v7421_v57, 16 }
  0x2d   : > { %6483 = vmatpush3.bf16.msra.mxu1 %v7034_v41  ;;  %6547 = vmatpush3.bf16.msra.mxu0 %v7035_v42  ;;  %v7408_v41 = vld [vmem:[%s7279_s26 + $0x40] sm:$0xff]   ;;  %v568_v42 = vrot.slane %v566_v26, 1 }
  0x2e   : > { %6484 = vmatprep.subr.bf16.mxu1 %v7036_v54  ;;  %6438 = vmatprep.mubr.bf16.mxu0 %v449_v1  ;;  %v486_v60 = vshll.u32 %v7408_v41, 16  ;;  %v490_v62 = vshrl.u32 %v7408_v41, 16  ;;  %v484_v20 = vor.u32 %v482_v49, %v480_v53  ;;  %v580_v21 = vor.u32 %v578_v58, %v576_v55  ;;  %v7068_v58 = vld [vmem:[%s8773_s1 + $0x80] sm:$0xff]  }
  0x2f   : > { %6462 = vmatprep.mubr.bf16.mxu1 %v545_v4  ;;  %6548 = vmatprep.subr.bf16.mxu0 %v7041_v61  ;;  %v569_v1 = vsel %vm421_vm0, %v564_v46, %v568_v42  ;;  %v494_v4 = vshll.u32 %v7415_v50, 16  ;;  %v510_v49 = vshll.u32 %v7450_v23, 16 }
  0x30   : > { %v488_v15 = vrot.slane %v486_v60, 1 }
  0x31   : > { %6485 = vmatpush3.bf16.msra.mxu1 %v7036_v54  ;;  %6549 = vmatpush3.bf16.msra.mxu0 %v7041_v61  ;;  %v572_v54 = vor.u32 %v570_v35, %v568_v42  ;;  %v582_v61 = vshll.u32 %v7411_v43, 16  ;;  %v496_v22 = vrot.slane %v494_v4, 1  ;;  %v7063_v35 = vld [vmem:[%s8773_s1 + $0x88] sm:$0xff]   ;;  %v602_v42 = vshrl.u32 %v7444_v13, 16  ;;  %v7071_v4 = vld [vmem:[%s8773_s1 + $0x138] sm:$0xff]  }
  0x32   : > { %6486 = vmatprep.subr.bf16.mxu1 %v7042_v9  ;;  %6550 = vmatprep.subr.bf16.mxu0 %v7043_v14  ;;  %v492_v25 = vor.u32 %v490_v62, %v488_v15  ;;  %v489_v38 = vsel %vm421_vm0, %v484_v20, %v488_v15  ;;  %v512_v62 = vrot.slane %v510_v49, 1  ;;  %v7076_v49 = vld [vmem:[%s8773_s1 + $0xe0] sm:$0xff]  }
  0x33   : > { %v577_v11 = vsel %vm421_vm0, %v572_v54, %v576_v55  ;;  %v584_v16 = vrot.slane %v582_v61, 1  ;;  %v7474_v55 = vld [vmem:[%s7279_s26 + $0xc0] ss:$0 sps:$4 sm:$0x11]  }
  0x34   : > { %6439 = vmatmul.mubr.bf16.gmra.mxu0 %v457_v28  ;;  %6463 = vmatmul.mubr.bf16.gmra.mxu1 %v553_v29  ;;  %v592_v28 = vrot.slane %v590_v12, 1  ;;  %v7453_v29 = vld [vmem:[%s7279_s26 + $0xb8] sm:$0xff]   ;;  %v497_v45 = vsel %vm421_vm0, %v492_v25, %v496_v22  ;;  %v514_v12 = vshrl.u32 %v7450_v23, 16  ;;  %v614_v15 = vshll.u32 %v7474_v55, 16 }
  0x35   : > { %6487 = vmatpush3.bf16.msra.mxu1 %v7042_v9  ;;  %6442 = vmatprep.mubr.bf16.mxu0 %v465_v36  ;;  %v481_v9 = vsel %vm421_vm0, %v476_v51, %v480_v53  ;;  %v588_v26 = vor.u32 %v586_v63, %v584_v16  ;;  %v498_v36 = vshrl.u32 %v7415_v50, 16  ;;  %v606_v51 = vshll.u32 %v7453_v29, 16 }
  0x36   : > { %6466 = vmatprep.mubr.bf16.mxu1 %v561_v39  ;;  %6551 = vmatpush3.bf16.msra.mxu0 %v7043_v14  ;;  %v7061_v14 = vld [vmem:[%s8773_s1 + $0x90] sm:$0xff]   ;;  %v585_v39 = vsel %vm421_vm0, %v580_v21, %v584_v16  ;;  %v596_v60 = vor.u32 %v594_v37, %v592_v28 }
  0x37   : > { %6488 = vmatprep.subr.bf16.mxu1 %v7048_v31  ;;  %6552 = vmatprep.subr.bf16.mxu0 %v7049_v33  ;;  %v593_v46 = vsel %vm421_vm0, %v588_v26, %v592_v28  ;;  %v616_v26 = vrot.slane %v614_v15, 1  ;;  %v7219_v15 = vld [vmem:[%s7279_s26 + $0x68] sm:$0xff]  }
  0x39   : > { %6489 = vmatpush3.bf16.msra.mxu1 %v7048_v31  ;;  %v502_v31 = vshll.u32 %v7438_v8, 16 }
  0x3a   : > { %6553 = vmatpush3.bf16.msra.mxu0 %v7049_v33  ;;  %6490 = vmatprep.subr.bf16.mxu1 %v7054_v56  ;;  %v598_v33 = vshll.u32 %v7444_v13, 16 }
  0x3b   : > { %6554 = vmatprep.subr.bf16.mxu0 %v7055_v59  ;;  %v504_v53 = vrot.slane %v502_v31, 1  ;;  %v1235_v31 = vrot.slane %v7292_v7, 1 }
  0x3c   : > { %6443 = vmatmul.mubr.bf16.gmra.mxu0 %v473_v0  ;;  %6467 = vmatmul.mubr.bf16.gmra.mxu1 %v569_v1  ;;  %v600_v54 = vrot.slane %v598_v33, 1  ;;  %v608_v0 = vrot.slane %v606_v51, 1  ;;  %v1212_v1 = vld [vmem:[%s7279_s26] sm:$0xe] }
  0x3d   : > { %6446 = vmatprep.mubr.bf16.mxu0 %v481_v9  ;;  %6470 = vmatprep.mubr.bf16.mxu1 %v577_v11  ;;  %v508_v61 = vor.u32 %v506_v40, %v504_v53  ;;  %v5636_v21 = vcombine.low %v1212_v1, %v7286_v5  ;;  %v1243_v40 = vrot.slane %v7348_v48, 1  ;;  %v7077_v51 = vld [vmem:[%s8773_s1 + $0x120] sm:$0xff]  }
  0x3e   : > { %6491 = vmatpush3.bf16.msra.mxu1 %v7054_v56  ;;  %6555 = vmatpush3.bf16.msra.mxu0 %v7055_v59  ;;  %v7067_v56 = vld [vmem:[%s8773_s1] sm:$0xff]   ;;  %v500_v59 = vor.u32 %v498_v36, %v496_v22  ;;  %v604_v63 = vor.u32 %v602_v42, %v600_v54  ;;  %v601_v11 = vsel %vm421_vm0, %v596_v60, %v600_v54  ;;  %v1239_v36 = vrot.slane %v7321_v30, 1  ;;  %v7074_v42 = vld [vmem:[%s8773_s1 + $0xe8] sm:$0xff]   ;;  %v7078_v54 = vld [vmem:[%s8773_s1 + $0xd8] sm:$0xff]  }
  0x3f   : > { %6492 = vmatprep.subr.bf16.mxu1 %v7056_v2  ;;  %6556 = vmatprep.subr.bf16.mxu0 %v7061_v14  ;;  %v513_v16 = vsel %vm421_vm0, %v508_v61, %v512_v62  ;;  %v516_v22 = vor.u32 %v514_v12, %v512_v62  ;;  %v1234_v28 = vrot.slane %v5636_v21, 1  ;;  %v1249_v60 = vrot.slane %v7408_v41, 1  ;;  %v7082_v62 = vld [vmem:[%s8773_s1 + $0xc8] sm:$0xff]   ;;  %v7085_v1 = vld [vmem:[%s8773_s1 + $0x100] sm:$0xff]  }
  0x40   : > { %v505_v9 = vsel %vm421_vm0, %v500_v59, %v504_v53  ;;  %v609_v20 = vsel %vm421_vm0, %v604_v63, %v608_v0  ;;  %v1247_v53 = vrot.slane %v7384_v17, 1  ;;  %v7081_v59 = vld [vmem:[%s8773_s1 + $0x110] sm:$0xff]   ;;  %v1251_v61 = vrot.slane %v7415_v50, 1  ;;  %v7083_v63 = vld [vmem:[%s8773_s1 + $0x108] sm:$0xff]   ;;  %v7218_v12 = vld [vmem:[%s7279_s26 + $0x60] sm:$0xff]  }
  0x41   : > { %v521_v33 = vsel %vm421_vm0, %v516_v22, %v7302_v19  ;;  %v1236_v5 = vsel %vm1233_vm1, %v1234_v28, %v1235_v31  ;;  %v7072_v19 = vld [vmem:[%s8773_s1 + $0xf0] sm:$0xff]   ;;  %v1267_v28 = vrot.slane %v7352_v52, 1  ;;  %v1275_v52 = vrot.slane %v7421_v57, 1 }
  0x42   : > { %6493 = vmatpush3.bf16.msra.mxu1 %v7056_v2  ;;  %6557 = vmatpush3.bf16.msra.mxu0 %v7061_v14  ;;  %v7070_v2 = vld [vmem:[%s8773_s1 + $0xf8] sm:$0xff]   ;;  %v610_v14 = vshrl.u32 %v7453_v29, 16 }
  0x43   : > { %6494 = vmatprep.subr.bf16.mxu1 %v7062_v34  ;;  %6558 = vmatprep.subr.bf16.mxu0 %v7063_v35 }
  0x44   : > { %6447 = vmatmul.mubr.bf16.gmra.mxu0 %v489_v38  ;;  %6471 = vmatmul.mubr.bf16.gmra.mxu1 %v585_v39  ;;  %v612_v25 = vor.u32 %v610_v14, %v608_v0  ;;  %v7073_v39 = vld [vmem:[%s8773_s1 + $0x130] sm:$0xff]   ;;  %v7084_v0 = vld [vmem:[%s8773_s1 + $0xc0] sm:$0xff]   ;;  %v1257_v14 = vrot.slane %v7218_v12, 1 }
  0x45   : > { %6450 = vmatprep.mubr.bf16.mxu0 %v497_v45  ;;  %6474 = vmatprep.mubr.bf16.mxu1 %v593_v46  ;;  %v7075_v45 = vld [vmem:[%s8773_s1 + $0x128] sm:$0xff]  }
  0x46   : > { %6495 = vmatpush3.bf16.msra.mxu1 %v7062_v34  ;;  %6559 = vmatpush3.bf16.msra.mxu0 %v7063_v35  ;;  %v617_v34 = vsel %vm421_vm0, %v612_v25, %v616_v26  ;;  %v1237_v35 = vrot.slane %v7309_v24, 1  ;;  %v7220_v26 = vld [vmem:[%s7279_s26 + $0x70] sm:$0xff]  }
  0x47   : > { %6496 = vmatprep.subr.bf16.mxu1 %v7067_v56  ;;  %6560 = vmatprep.subr.bf16.mxu0 %v7068_v58 }
  0x48   : > { %v1238_v37 = vsel %vm1233_vm1, %v1235_v31, %v1237_v35  ;;  %v1240_v38 = vsel %vm1233_vm1, %v1237_v35, %v1239_v36  ;;  %v7221_v31 = vld [vmem:[%s7279_s26 + $0x78] sm:$0xff]   ;;  %v1273_v35 = vrot.slane %v7411_v43, 1 }
  0x4a   : > { %6497 = vmatpush3.bf16.msra.mxu1 %v7067_v56  ;;  %6561 = vmatpush3.bf16.msra.mxu0 %v7068_v58  ;;  %v7080_v58 = vld [vmem:[%s8773_s1 + $0xd0] sm:$0xff]  }
  0x4b   : > { %6610 = vmatprep.subr.bf16.mxu1 %v7070_v2  ;;  %6674 = vmatprep.subr.bf16.mxu0 %v7071_v4 }
  0x4c   : > { %6451 = vmatmul.mubr.bf16.gmra.mxu0 %v505_v9  ;;  %6475 = vmatmul.mubr.bf16.gmra.mxu1 %v601_v11  ;;  %v7574_v9 = vld [vmem:[%s8773_s1 + $0x178] sm:$0xff]  }
  0x4d   : > { %6454 = vmatprep.mubr.bf16.mxu0 %v513_v16  ;;  %6478 = vmatprep.mubr.bf16.mxu1 %v609_v20  ;;  %v1259_v16 = vrot.slane %v7219_v15, 1 }
  0x4f   : > { %v1260_v21 = vsel %vm1233_vm1, %v1257_v14, %v1259_v16 }
  0x54   : > { %6455 = vmatmul.mubr.bf16.gmra.mxu0 %v521_v33  ;;  %6479 = vmatmul.mubr.bf16.gmra.mxu1 %v617_v34  ;;  %v1269_v33 = vrot.slane %v7378_v10, 1  ;;  %v1271_v34 = vrot.slane %v7387_v18, 1 }
  0x55   : > { %6498 = vmatprep.mubr.bf16.mxu1 %v7289_v6  ;;  %6562 = vmatprep.mubr.bf16.mxu0 %v1236_v5  ;;  %v1241_v6 = vrot.slane %v7342_v44, 1 }
  0x56   : > { %v1270_v5 = vsel %vm1233_vm1, %v1267_v28, %v1269_v33 }
  0x57   : > { %v1244_v46 = vsel %vm1233_vm1, %v1241_v6, %v1243_v40 }
  0x5c   : > { %6499 = vmatmul.mubr.bf16.vlgmr.msra.gmra.mxu1 %v7292_v7  ;;  %6563 = vmatmul.mubr.bf16.vlgmr.msra.gmra.mxu0 %v1238_v37  ;;  %v1242_v7 = vsel %vm1233_vm1, %v1239_v36, %v1241_v6  ;;  %v2158_v36 = vld [vmem:[%s7279_s26 + $0xc] sm:$0xf]  ;;  %v1272_v37 = vsel %vm1233_vm1, %v1269_v33, %v1271_v34  ;;  %v1277_v6 = vrot.slane %v7444_v13, 1 }
  0x5d   : > { %6611 = vmatpush3.bf16.msra.mxu1 %v7070_v2  ;;  %6675 = vmatpush3.bf16.msra.mxu0 %v7071_v4  ;;  %v1253_v2 = vrot.slane %v7438_v8, 1  ;;  %v1255_v4 = vrot.slane %v7450_v23, 1 }
  0x5e   : > { %6502 = vmatprep.mubr.bf16.mxu1 %v7309_v24  ;;  %6566 = vmatprep.mubr.bf16.mxu0 %v1240_v38  ;;  %v1245_v24 = vrot.slane %v7371_v3, 1  ;;  %v7611_v38 = vld [vmem:[%s7279_s26 + $0x10] sm:$0xf] }
  0x5f   : > { %6612 = vmatprep.subr.bf16.mxu1 %v7072_v19  ;;  %6676 = vmatprep.subr.bf16.mxu0 %v7073_v39  ;;  %v1256_v11 = vsel %vm1233_vm1, %v1253_v2, %v1255_v4  ;;  %v1258_v20 = vsel %vm1233_vm1, %v1255_v4, %v1257_v14 }
  0x60   : > { %v1246_v56 = vsel %vm1233_vm1, %v1243_v40, %v1245_v24  ;;  %v1276_v40 = vsel %vm1233_vm1, %v1273_v35, %v1275_v52 }
  0x61   : > { %6613 = vmatpush3.bf16.msra.mxu1 %v7072_v19  ;;  %6677 = vmatpush3.bf16.msra.mxu0 %v7073_v39  ;;  %v7222_v19 = vld [vmem:[%s7279_s26 + $0x88] sm:$0xff]   ;;  %v1274_v39 = vsel %vm1233_vm1, %v1271_v34, %v1273_v35 }
  0x62   : > { %6614 = vmatprep.subr.bf16.mxu1 %v7074_v42  ;;  %6678 = vmatprep.subr.bf16.mxu0 %v7075_v45  ;;  %v7688_v34 = vld [vmem:[%s7279_s26 + $0x4c] sm:$0xff]  }
  0x64   : > { %6503 = vmatmul.mubr.bf16.gmra.mxu1 %v7321_v30  ;;  %6567 = vmatmul.mubr.bf16.gmra.mxu0 %v1242_v7  ;;  %v7079_v30 = vld [vmem:[%s8773_s1 + $0x118] sm:$0xff]  }
  0x65   : > { %6506 = vmatprep.mubr.bf16.mxu1 %v7342_v44  ;;  %6570 = vmatprep.mubr.bf16.mxu0 %v1244_v46  ;;  %v1248_v44 = vsel %vm1233_vm1, %v1245_v24, %v1247_v53  ;;  %v7621_v7 = vld [vmem:[%s7279_s26 + $0x14] sm:$0xff]   ;;  %v1278_v46 = vsel %vm1233_vm1, %v1275_v52, %v1277_v6  ;;  %v7114_v52 = vld [vmem:[%s8773_s1 + $0x1a0] sm:$0xff]  }
  0x66   : > { %6615 = vmatpush3.bf16.msra.mxu1 %v7074_v42  ;;  %6679 = vmatpush3.bf16.msra.mxu0 %v7075_v45  ;;  %v1279_v42 = vrot.slane %v7453_v29, 1 }
  0x67   : > { %6616 = vmatprep.subr.bf16.mxu1 %v7076_v49  ;;  %6680 = vmatprep.subr.bf16.mxu0 %v7077_v51 }
  0x68   : > { %v1280_v24 = vsel %vm1233_vm1, %v1277_v6, %v1279_v42 }
  0x6a   : > { %6617 = vmatpush3.bf16.msra.mxu1 %v7076_v49  ;;  %6681 = vmatpush3.bf16.msra.mxu0 %v7077_v51  ;;  %v1281_v49 = vrot.slane %v7474_v55, 1  ;;  %v2355_v51 = vshll.u32 %v7621_v7, 16 }
  0x6b   : > { %6618 = vmatprep.subr.bf16.mxu1 %v7078_v54  ;;  %6682 = vmatprep.subr.bf16.mxu0 %v7079_v30 }
  0x6c   : > { %6507 = vmatmul.mubr.bf16.gmra.mxu1 %v7348_v48  ;;  %6571 = vmatmul.mubr.bf16.gmra.mxu0 %v1246_v56  ;;  %v1250_v48 = vsel %vm1233_vm1, %v1247_v53, %v1249_v60  ;;  %v2357_v55 = vrot.slane %v2355_v51, 1  ;;  %v7642_v56 = vld [vmem:[%s7279_s26 + $0x34] sm:$0xff]  }
  0x6d   : > { %6510 = vmatprep.mubr.bf16.mxu1 %v7371_v3  ;;  %6574 = vmatprep.mubr.bf16.mxu0 %v1248_v44  ;;  %v1252_v3 = vsel %vm1233_vm1, %v1249_v60, %v1251_v61 }
  0x6e   : > { %6619 = vmatpush3.bf16.msra.mxu1 %v7078_v54  ;;  %6683 = vmatpush3.bf16.msra.mxu0 %v7079_v30  ;;  %v7634_v30 = vld [vmem:[%s7279_s26 + $0x24] sm:$0xff]  }
  0x6f   : > { %6620 = vmatprep.subr.bf16.mxu1 %v7080_v58  ;;  %6684 = vmatprep.subr.bf16.mxu0 %v7081_v59 }
  0x72   : > { %6621 = vmatpush3.bf16.msra.mxu1 %v7080_v58  ;;  %6685 = vmatpush3.bf16.msra.mxu0 %v7081_v59  ;;  %v7086_v58 = vld [vmem:[%s7279_s26 + $0xc] sm:$0xff]   ;;  %v2359_v59 = vshrl.u32 %v7621_v7, 16 }
  0x73   : > { %6622 = vmatprep.subr.bf16.mxu1 %v7082_v62  ;;  %6686 = vmatprep.subr.bf16.mxu0 %v7083_v63 }
  0x74   : > { %6511 = vmatmul.mubr.bf16.gmra.mxu1 %v7384_v17  ;;  %6575 = vmatmul.mubr.bf16.gmra.mxu0 %v1250_v48  ;;  %v7579_v17 = vld [vmem:[%s8773_s1 + $0x1b8] sm:$0xff]   ;;  %v2387_v48 = vshll.u32 %v7642_v56, 16 }
  0x75   : > { %6514 = vmatprep.mubr.bf16.mxu1 %v7408_v41  ;;  %6578 = vmatprep.mubr.bf16.mxu0 %v1252_v3  ;;  %v1254_v41 = vsel %vm1233_vm1, %v1251_v61, %v1253_v2  ;;  %v1282_v61 = vsel %vm1233_vm1, %v1279_v42, %v1281_v49  ;;  %v7654_v3 = vld [vmem:[%s7279_s26 + $0x3c] sm:$0xff]   ;;  %v2411_v42 = vshll.u32 %v7688_v34, 16 }
  0x76   : > { %6623 = vmatpush3.bf16.msra.mxu1 %v7082_v62  ;;  %6687 = vmatpush3.bf16.msra.mxu0 %v7083_v63  ;;  %v2371_v62 = vshll.u32 %v7634_v30, 16  ;;  %v2399_v33 = vshrl.u32 %v7654_v3, 16 }
  0x77   : > { %6624 = vmatprep.subr.bf16.mxu1 %v7084_v0  ;;  %6688 = vmatprep.subr.bf16.mxu0 %v7085_v1 }
  0x78   : > { %v2373_v4 = vrot.slane %v2371_v62, 1  ;;  %v7140_v62 = vld [vmem:[%s8773_s1 + $0x188] sm:$0xff]  }
  0x7a   : > { %6625 = vmatpush3.bf16.msra.mxu1 %v7084_v0  ;;  %6689 = vmatpush3.bf16.msra.mxu0 %v7085_v1  ;;  %v2361_v0 = vor.u32 %v2359_v59, %v2357_v55  ;;  %v7089_v1 = vld [vmem:[%s7279_s26 + $0x14] sm:$0xff]  }
  0x7b   : > { %6738 = vmatprep.subr.bf16.mxu1 %v7574_v9  ;;  %6802 = vmatprep.subr.bf16.mxu0 %v7579_v17 }
  0x7c   : > { %6515 = vmatmul.mubr.bf16.gmra.mxu1 %v7415_v50  ;;  %6579 = vmatmul.mubr.bf16.gmra.mxu0 %v1254_v41  ;;  %v1261_v50 = vrot.slane %v7314_v27, 1  ;;  %v7093_v41 = vld [vmem:[%s7279_s26 + $0x1c] sm:$0xff]  }
  0x7d   : > { %6518 = vmatprep.mubr.bf16.mxu1 %v7438_v8  ;;  %6582 = vmatprep.mubr.bf16.mxu0 %v1256_v11  ;;  %v1263_v8 = vrot.slane %v7325_v32, 1  ;;  %v2375_v11 = vshrl.u32 %v7634_v30, 16 }
  0x7e   : > { %v1262_v22 = vsel %vm1233_vm1, %v1259_v16, %v1261_v50 }
  0x7f   : > { %v1264_v25 = vsel %vm1233_vm1, %v1261_v50, %v1263_v8 }
  0x84   : > { %6519 = vmatmul.mubr.bf16.gmra.mxu1 %v7450_v23  ;;  %6583 = vmatmul.mubr.bf16.gmra.mxu0 %v1258_v20  ;;  %v1265_v23 = vrot.slane %v7345_v47, 1  ;;  %v2389_v20 = vrot.slane %v2387_v48, 1 }
  0x85   : > { %6522 = vmatprep.mubr.bf16.mxu1 %v7218_v12  ;;  %6586 = vmatprep.mubr.bf16.mxu0 %v1260_v21  ;;  %v2395_v21 = vshll.u32 %v7654_v3, 16 }
  0x86   : > { %v1266_v27 = vsel %vm1233_vm1, %v1263_v8, %v1265_v23  ;;  %v1268_v32 = vsel %vm1233_vm1, %v1265_v23, %v1267_v28  ;;  %v7670_v8 = vld [vmem:[%s7279_s26 + $0x44] sm:$0xff]  }
  0x87   : > { %v7095_v23 = vld [vmem:[%s7279_s26 + $0x24] sm:$0xff]   ;;  %v2397_v35 = vrot.slane %v2395_v21, 1  ;;  %v2407_v49 = vshrl.u32 %v7670_v8, 16  ;;  %v7749_v21 = vld [vmem:[%s7279_s26 + $0x74] sm:$0xff]  }
  0x89   : > { %v2401_v6 = vor.u32 %v2399_v33, %v2397_v35  ;;  %v7772_v33 = vld [vmem:[%s7279_s26 + $0x7c] sm:$0xff]  }
  0x8c   : > { %6523 = vmatmul.mubr.bf16.gmra.mxu1 %v7219_v15  ;;  %6587 = vmatmul.mubr.bf16.gmra.mxu0 %v1262_v22  ;;  %v7098_v15 = vld [vmem:[%s8773_s1 + $0x1b0] sm:$0xff]   ;;  %v7107_v22 = vld [vmem:[%s8773_s1 + $0x168] sm:$0xff]  }
  0x8d   : > { %6526 = vmatprep.mubr.bf16.mxu1 %v7220_v26  ;;  %6590 = vmatprep.mubr.bf16.mxu0 %v1264_v25  ;;  %v7108_v25 = vld [vmem:[%s8773_s1 + $0x1a8] sm:$0xff]   ;;  %v2377_v26 = vor.u32 %v2375_v11, %v2373_v4  ;;  %v7145_v11 = vld [vmem:[%s8773_s1 + $0x140] sm:$0xff]  }
  0x94   : > { %6527 = vmatmul.mubr.bf16.gmra.mxu1 %v7221_v31  ;;  %6591 = vmatmul.mubr.bf16.gmra.mxu0 %v1266_v27  ;;  %v7099_v27 = vld [vmem:[%s7279_s26 + $0x2c] sm:$0xff]   ;;  %v2391_v31 = vshrl.u32 %v7642_v56, 16 }
  0x95   : > { %6530 = vmatprep.mubr.bf16.mxu1 %v7345_v47  ;;  %6594 = vmatprep.mubr.bf16.mxu0 %v1268_v32  ;;  %v5709_v47 = vcombine.low %v2158_v36, %v7611_v38  ;;  %v7697_v36 = vld [vmem:[%s7279_s26 + $0x54] sm:$0xff]  }
  0x97   : > { %v2350_v45 = vshll.u32 %v5709_v47, 16  ;;  %v2348_v53 = vshrl.u32 %v5709_v47, 16  ;;  %v7123_v47 = vld [vmem:[%s8773_s1 + $0x158] sm:$0xff]  }
  0x99   : > { %v2352_v54 = vrot.slane %v2350_v45, 1 }
  0x9b   : > { %v2353_v44 = vor.u32 %v2352_v54, %v2348_v53  ;;  %v2419_v53 = vshll.u32 %v7697_v36, 16  ;;  %v7129_v54 = vld [vmem:[%s8773_s1 + $0x150] sm:$0xff]  }
  0x9c   : > { %6531 = vmatmul.mubr.bf16.gmra.mxu1 %v7222_v19  ;;  %6595 = vmatmul.mubr.bf16.gmra.mxu0 %v1270_v5  ;;  %v7113_v5 = vld [vmem:[%s8773_s1 + $0x160] sm:$0xff]  }
  0x9d   : > { %6534 = vmatprep.mubr.bf16.mxu1 %v7378_v10  ;;  %6598 = vmatprep.mubr.bf16.mxu0 %v1272_v37  ;;  %v7626_v10 = vld [vmem:[%s7279_s26 + $0x1c] sm:$0xff]   ;;  %v2393_v37 = vor.u32 %v2391_v31, %v2389_v20 }
  0x9f   : > { %v2398_v45 = vsel %vm421_vm0, %v2393_v37, %v2397_v35  ;;  %v7775_v37 = vld [vmem:[%s7279_s26 + $0x84] sm:$0xff]  }
  0xa4   : > { %6535 = vmatmul.mubr.bf16.gmra.mxu1 %v7387_v18  ;;  %6599 = vmatmul.mubr.bf16.gmra.mxu0 %v1274_v39  ;;  %v2363_v18 = vshll.u32 %v7626_v10, 16  ;;  %v7124_v39 = vld [vmem:[%s8773_s1 + $0x198] sm:$0xff]  }
  0xa5   : > { %6538 = vmatprep.mubr.bf16.mxu1 %v7411_v43  ;;  %6602 = vmatprep.mubr.bf16.mxu0 %v1276_v40  ;;  %v7638_v43 = vld [vmem:[%s7279_s26 + $0x2c] sm:$0xff]   ;;  %v7101_v40 = vld [vmem:[%s7279_s26 + $0x34] sm:$0xff]  }
  0xa6   : > { %v2365_v60 = vrot.slane %v2363_v18, 1  ;;  %v2379_v63 = vshll.u32 %v7638_v43, 16  ;;  %v2383_v16 = vshrl.u32 %v7638_v43, 16  ;;  %v7130_v18 = vld [vmem:[%s8773_s1 + $0x190] sm:$0xff]  }
  0xa8   : > { %v2366_v12 = vsel %vm421_vm0, %v2361_v0, %v2365_v60  ;;  %v2381_v14 = vrot.slane %v2379_v63, 1  ;;  %v7109_v0 = vld [vmem:[%s7279_s26 + $0x4c] sm:$0xff]  }
  0xaa   : > { %v2385_v28 = vor.u32 %v2383_v16, %v2381_v14  ;;  %v2382_v32 = vsel %vm421_vm0, %v2377_v26, %v2381_v14 }
  0xac   : > { %6539 = vmatmul.mubr.bf16.gmra.mxu1 %v7421_v57  ;;  %6603 = vmatmul.mubr.bf16.gmra.mxu0 %v1278_v46  ;;  %v2367_v57 = vshrl.u32 %v7626_v10, 16  ;;  %v7103_v46 = vld [vmem:[%s7279_s26 + $0x3c] sm:$0xff]  }
  0xad   : > { %6542 = vmatprep.mubr.bf16.mxu1 %v7444_v13  ;;  %6606 = vmatprep.mubr.bf16.mxu0 %v1280_v24  ;;  %v2358_v13 = vsel %vm421_vm0, %v2353_v44, %v2357_v55  ;;  %v2415_v24 = vshrl.u32 %v7688_v34, 16  ;;  %v2413_v55 = vrot.slane %v2411_v42, 1  ;;  %v7720_v44 = vld [vmem:[%s7279_s26 + $0x5c] sm:$0xff]  }
  0xae   : > { %v2369_v2 = vor.u32 %v2367_v57, %v2365_v60  ;;  %v2421_v60 = vrot.slane %v2419_v53, 1  ;;  %v7139_v57 = vld [vmem:[%s8773_s1 + $0x148] sm:$0xff]   ;;  %v2427_v63 = vshll.u32 %v7720_v44, 16 }
  0xaf   : > { %v2417_v59 = vor.u32 %v2415_v24, %v2413_v55 }
  0xb0   : > { %v2374_v50 = vsel %vm421_vm0, %v2369_v2, %v2373_v4  ;;  %v2431_v4 = vshrl.u32 %v7720_v44, 16  ;;  %v2429_v14 = vrot.slane %v2427_v63, 1 }
  0xb1   : > { %v2422_v2 = vsel %vm421_vm0, %v2417_v59, %v2421_v60 }
  0xb2   : > { %v2433_v16 = vor.u32 %v2431_v4, %v2429_v14 }
  0xb4   : > { %6543 = vmatmul.mubr.bf16.gmra.mxu1 %v7453_v29  ;;  %6607 = vmatmul.mubr.bf16.gmra.mxu0 %v1282_v61  ;;  %v7097_v29 = vld [vmem:[%s8773_s1 + $0x170] sm:$0xff]   ;;  %v7723_v61 = vld [vmem:[%s7279_s26 + $0x64] sm:$0xff]  }
  0xb5   : > { %6626 = vmatprep.mubr.bf16.mxu1 %v7086_v58  ;;  %6690 = vmatprep.mubr.bf16.mxu0 %v2358_v13  ;;  %v7105_v13 = vld [vmem:[%s7279_s26 + $0x44] sm:$0xff]  }
  0xbc   : > { %6627 = vmatmul.mubr.bf16.vlgmr.msra.gmra.mxu1 %v7089_v1  ;;  %6691 = vmatmul.mubr.bf16.vlgmr.msra.gmra.mxu0 %v2366_v12  ;;  %v2423_v1 = vshrl.u32 %v7697_v36, 16  ;;  %v7146_v12 = vld [vmem:[%s8773_s1 + $0x180] sm:$0xff]  }
  0xbd   : > { %6739 = vmatpush3.bf16.msra.mxu1 %v7574_v9  ;;  %6803 = vmatpush3.bf16.msra.mxu0 %v7579_v17  ;;  %v2403_v9 = vshll.u32 %v7670_v8, 16  ;;  %v2390_v17 = vsel %vm421_vm0, %v2385_v28, %v2389_v20  ;;  %v7115_v28 = vld [vmem:[%s7279_s26 + $0x5c] sm:$0xff]  }
  0xbe   : > { %6630 = vmatprep.mubr.bf16.mxu1 %v7093_v41  ;;  %6694 = vmatprep.mubr.bf16.mxu0 %v2374_v50  ;;  %v2435_v41 = vshll.u32 %v7723_v61, 16  ;;  %v7754_v50 = vld [vmem:[%s8773_s1 + $0x1f8] sm:$0xff]  }
  0xbf   : > { %6740 = vmatprep.subr.bf16.mxu1 %v7097_v29  ;;  %6804 = vmatprep.subr.bf16.mxu0 %v7098_v15  ;;  %v2405_v19 = vrot.slane %v2403_v9, 1  ;;  %v2451_v9 = vshll.u32 %v7749_v21, 16 }
  0xc0   : > { %v2437_v20 = vrot.slane %v2435_v41, 1 }
  0xc1   : > { %6741 = vmatpush3.bf16.msra.mxu1 %v7097_v29  ;;  %6805 = vmatpush3.bf16.msra.mxu0 %v7098_v15  ;;  %v2406_v51 = vsel %vm421_vm0, %v2401_v6, %v2405_v19  ;;  %v2409_v58 = vor.u32 %v2407_v49, %v2405_v19  ;;  %v7746_v29 = vld [vmem:[%s7279_s26 + $0x6c] sm:$0xff]   ;;  %v2425_v15 = vor.u32 %v2423_v1, %v2421_v60  ;;  %v7117_v19 = vld [vmem:[%s7279_s26 + $0x64] sm:$0xff]   ;;  %v7125_v60 = vld [vmem:[%s7279_s26 + $0x7c] sm:$0xff]  }
  0xc2   : > { %6742 = vmatprep.subr.bf16.mxu1 %v7107_v22  ;;  %6806 = vmatprep.subr.bf16.mxu0 %v7108_v25  ;;  %v2443_v26 = vshll.u32 %v7746_v29, 16  ;;  %v2447_v31 = vshrl.u32 %v7746_v29, 16  ;;  %v7119_v6 = vld [vmem:[%s7279_s26 + $0x6c] sm:$0xff]  }
  0xc3   : > { %v2414_v48 = vsel %vm421_vm0, %v2409_v58, %v2413_v55  ;;  %v7121_v55 = vld [vmem:[%s7279_s26 + $0x74] sm:$0xff]  }
  0xc4   : > { %6631 = vmatmul.mubr.bf16.gmra.mxu1 %v7095_v23  ;;  %6695 = vmatmul.mubr.bf16.gmra.mxu0 %v2382_v32  ;;  %v2430_v23 = vsel %vm421_vm0, %v2425_v15, %v2429_v14  ;;  %v2438_v32 = vsel %vm421_vm0, %v2433_v16, %v2437_v20  ;;  %v7811_v15 = vld [vmem:[%s7279_s26 + $0xa4] sm:$0xff]  }
  0xc5   : > { %6634 = vmatprep.mubr.bf16.mxu1 %v7099_v27  ;;  %6698 = vmatprep.mubr.bf16.mxu0 %v2390_v17  ;;  %v2439_v27 = vshrl.u32 %v7723_v61, 16  ;;  %v2445_v17 = vrot.slane %v2443_v26, 1 }
  0xc6   : > { %6743 = vmatpush3.bf16.msra.mxu1 %v7107_v22  ;;  %6807 = vmatpush3.bf16.msra.mxu0 %v7108_v25  ;;  %v7759_v22 = vld [vmem:[%s8773_s1 + $0x238] sm:$0xff]  }
  0xc7   : > { %6744 = vmatprep.subr.bf16.mxu1 %v7113_v5  ;;  %6808 = vmatprep.subr.bf16.mxu0 %v7114_v52  ;;  %v7111_v25 = vld [vmem:[%s7279_s26 + $0x54] sm:$0xff]   ;;  %v2449_v35 = vor.u32 %v2447_v31, %v2445_v17 }
  0xca   : > { %6745 = vmatpush3.bf16.msra.mxu1 %v7113_v5  ;;  %6809 = vmatpush3.bf16.msra.mxu0 %v7114_v52  ;;  %v2441_v5 = vor.u32 %v2439_v27, %v2437_v20  ;;  %v2453_v52 = vrot.slane %v2451_v9, 1 }
  0xcb   : > { %6746 = vmatprep.subr.bf16.mxu1 %v7123_v47  ;;  %6810 = vmatprep.subr.bf16.mxu0 %v7124_v39 }
  0xcc   : > { %6635 = vmatmul.mubr.bf16.gmra.mxu1 %v7101_v40  ;;  %6699 = vmatmul.mubr.bf16.gmra.mxu0 %v2398_v45  ;;  %v2455_v40 = vshrl.u32 %v7749_v21, 16  ;;  %v2454_v42 = vsel %vm421_vm0, %v2449_v35, %v2453_v52  ;;  %v2463_v45 = vshrl.u32 %v7772_v33, 16 }
  0xcd   : > { %6638 = vmatprep.mubr.bf16.mxu1 %v7103_v46  ;;  %6702 = vmatprep.mubr.bf16.mxu0 %v2406_v51  ;;  %v2467_v46 = vshll.u32 %v7775_v37, 16  ;;  %v7786_v51 = vld [vmem:[%s7279_s26 + $0x8c] sm:$0xff]  }
  0xce   : > { %6747 = vmatpush3.bf16.msra.mxu1 %v7123_v47  ;;  %6811 = vmatpush3.bf16.msra.mxu0 %v7124_v39  ;;  %v2459_v47 = vshll.u32 %v7772_v33, 16  ;;  %v2446_v39 = vsel %vm421_vm0, %v2441_v5, %v2445_v17  ;;  %v2457_v24 = vor.u32 %v2455_v40, %v2453_v52  ;;  %v2475_v58 = vshll.u32 %v7786_v51, 16 }
  0xcf   : > { %6748 = vmatprep.subr.bf16.mxu1 %v7129_v54  ;;  %6812 = vmatprep.subr.bf16.mxu0 %v7130_v18  ;;  %v2499_v5 = vshll.u32 %v7811_v15, 16 }
  0xd0   : > { %v2461_v49 = vrot.slane %v2459_v47, 1  ;;  %v2477_v1 = vrot.slane %v2475_v58, 1  ;;  %v7834_v47 = vld [vmem:[%s7279_s26 + $0xac] sm:$0xff]   ;;  %v7135_v58 = vld [vmem:[%s7279_s26 + $0x9c] sm:$0xff]  }
  0xd1   : > { %8782 = vst [vmem:[#allocation2_spill] sm:$0xff] %v7834_v47 }
  0xd2   : > { %6749 = vmatpush3.bf16.msra.mxu1 %v7129_v54  ;;  %6813 = vmatpush3.bf16.msra.mxu0 %v7130_v18  ;;  %v2465_v53 = vor.u32 %v2463_v45, %v2461_v49  ;;  %v2469_v54 = vrot.slane %v2467_v46, 1  ;;  %v7789_v18 = vld [vmem:[%s7279_s26 + $0x94] sm:$0xff]   ;;  %v2462_v59 = vsel %vm421_vm0, %v2457_v24, %v2461_v49  ;;  %v2501_v45 = vrot.slane %v2499_v5, 1 }
  0xd3   : > { %6750 = vmatprep.subr.bf16.mxu1 %v7139_v57  ;;  %6814 = vmatprep.subr.bf16.mxu0 %v7140_v62  ;;  %v2483_v63 = vshll.u32 %v7789_v18, 16  ;;  %v2487_v27 = vshrl.u32 %v7789_v18, 16  ;;  %v7841_v46 = vld [vmem:[%s7279_s26 + $0xb4] sm:$0xff]  }
  0xd4   : > { %6639 = vmatmul.mubr.bf16.gmra.mxu1 %v7105_v13  ;;  %6703 = vmatmul.mubr.bf16.gmra.mxu0 %v2414_v48  ;;  %v2479_v13 = vshrl.u32 %v7786_v51, 16  ;;  %8784 = vst [vmem:[#allocation4_spill] sm:$0xff] %v7841_v46 }
  0xd5   : > { %6642 = vmatprep.mubr.bf16.mxu1 %v7109_v0  ;;  %6706 = vmatprep.mubr.bf16.mxu0 %v2422_v2  ;;  %v7804_v2 = vld [vmem:[%s7279_s26 + $0x9c] sm:$0xff]   ;;  %v2485_v14 = vrot.slane %v2483_v63, 1  ;;  %v2515_v63 = vshll.u32 %v7841_v46, 16 }
  0xd6   : > { %6751 = vmatpush3.bf16.msra.mxu1 %v7139_v57  ;;  %6815 = vmatpush3.bf16.msra.mxu0 %v7140_v62  ;;  %v2471_v57 = vshrl.u32 %v7775_v37, 16  ;;  %v2470_v62 = vsel %vm421_vm0, %v2465_v53, %v2469_v54  ;;  %v2491_v26 = vshll.u32 %v7804_v2, 16  ;;  %v2495_v17 = vshrl.u32 %v7804_v2, 16  ;;  %v7133_v53 = vld [vmem:[%s7279_s26 + $0x94] sm:$0xff]  }
  0xd7   : > { %6752 = vmatprep.subr.bf16.mxu1 %v7145_v11  ;;  %6816 = vmatprep.subr.bf16.mxu0 %v7146_v12 }
  0xd8   : > { %v2473_v4 = vor.u32 %v2471_v57, %v2469_v54  ;;  %v2507_v54 = vshll.u32 %v7834_v47, 16 }
  0xda   : > { %6753 = vmatpush3.bf16.msra.mxu1 %v7145_v11  ;;  %6817 = vmatpush3.bf16.msra.mxu0 %v7146_v12  ;;  %v2481_v12 = vor.u32 %v2479_v13, %v2477_v1  ;;  %v2511_v13 = vshrl.u32 %v7834_v47, 16 }
  0xdb   : > { %6866 = vmatprep.subr.bf16.mxu1 %v7754_v50  ;;  %6930 = vmatprep.subr.bf16.mxu0 %v7759_v22 }
  0xdc   : > { %6643 = vmatmul.mubr.bf16.gmra.mxu1 %v7111_v25  ;;  %6707 = vmatmul.mubr.bf16.gmra.mxu0 %v2430_v23  ;;  %v7127_v25 = vld [vmem:[%s7279_s26 + $0x84] sm:$0xff]   ;;  %v2478_v23 = vsel %vm421_vm0, %v2473_v4, %v2477_v1  ;;  %v2486_v9 = vsel %vm421_vm0, %v2481_v12, %v2485_v14  ;;  %v2509_v12 = vrot.slane %v2507_v54, 1 }
  0xdd   : > { %6646 = vmatprep.mubr.bf16.mxu1 %v7115_v28  ;;  %6710 = vmatprep.mubr.bf16.mxu0 %v2438_v32  ;;  %v7131_v28 = vld [vmem:[%s7279_s26 + $0x8c] sm:$0xff]  }
  0xe4   : > { %6647 = vmatmul.mubr.bf16.gmra.mxu1 %v7117_v19  ;;  %6711 = vmatmul.mubr.bf16.gmra.mxu0 %v2446_v39  ;;  %v2493_v19 = vrot.slane %v2491_v26, 1  ;;  %v2489_v39 = vor.u32 %v2487_v27, %v2485_v14  ;;  %v7864_v14 = vld [vmem:[%s7279_s26 + $0xbc] sm:$0xff]   ;;  %v2517_v27 = vrot.slane %v2515_v63, 1 }
  0xe5   : > { %6650 = vmatprep.mubr.bf16.mxu1 %v7119_v6  ;;  %6714 = vmatprep.mubr.bf16.mxu0 %v2454_v42  ;;  %8788 = vst [vmem:[#allocation8_spill] sm:$0xff] %v7864_v14 }
  0xe6   : > { %v2497_v42 = vor.u32 %v2495_v17, %v2493_v19 }
  0xec   : > { %v7799_v48 = vpop.f32.mrf.mxu0  ;;  %v7801_v0 = vpop.f32.mrf.mxu1  ;;  %6651 = vmatmul.mubr.bf16.gmra.mxu1 %v7121_v55  ;;  %6715 = vmatmul.mubr.bf16.gmra.mxu0 %v2462_v59  ;;  %v2494_v55 = vsel %vm421_vm0, %v2489_v39, %v2493_v19  ;;  %v2503_v59 = vshrl.u32 %v7811_v15, 16  ;;  %v7137_v19 = vld [vmem:[%s7279_s26 + $0xa4] sm:$0xff]   ;;  %v2523_v39 = vshll.u32 %v7864_v14, 16 }
  0xed   : > { %6654 = vmatprep.mubr.bf16.mxu1 %v7125_v60  ;;  %6718 = vmatprep.mubr.bf16.mxu0 %v2470_v62  ;;  %v2502_v62 = vsel %vm421_vm0, %v2497_v42, %v2501_v45 }
  0xee   : > { %v7806_v41 = vpop.f32.mrf.mxu0  ;;  %v7808_v11 = vpop.f32.mrf.mxu1 }
  0xf0   : > { %v7813_v16 = vpop.f32.mrf.mxu0  ;;  %v7815_v20 = vpop.f32.mrf.mxu1 }
  0xf2   : > { %v7822_v32 = vpop.f32.mrf.mxu0  ;;  %v7824_v31 = vpop.f32.mrf.mxu1 }
  0xf4   : > { %v7829_v35 = vpop.f32.mrf.mxu0  ;;  %v7831_v52 = vpop.f32.mrf.mxu1  ;;  %6655 = vmatmul.mubr.bf16.gmra.mxu1 %v7127_v25  ;;  %6719 = vmatmul.mubr.bf16.gmra.mxu0 %v2478_v23  ;;  %v2505_v25 = vor.u32 %v2503_v59, %v2501_v45  ;;  %v2519_v45 = vshrl.u32 %v7841_v46, 16  ;;  %v2527_v59 = vshrl.u32 %v7864_v14, 16  ;;  %v2888_v46 = vld [vmem:[%s7279_s26 + $0xc] sm:$0xe] }
  0xf5   : > { %6658 = vmatprep.mubr.bf16.mxu1 %v7131_v28  ;;  %6722 = vmatprep.mubr.bf16.mxu0 %v2486_v9  ;;  %v2513_v28 = vor.u32 %v2511_v13, %v2509_v12  ;;  %v7871_v9 = vld [vmem:[%s7279_s26 + $0xc4] sm:$0xff]  }
  0xf6   : > { %v7836_v6 = vpop.f32.mrf.mxu0  ;;  %v7838_v40 = vpop.f32.mrf.mxu1  ;;  %8790 = vst [vmem:[#allocation10_spill] sm:$0xff] %v7871_v9  ;;  %v2510_v42 = vsel %vm421_vm0, %v2505_v25, %v2509_v12  ;;  %v2525_v12 = vrot.slane %v2523_v39, 1  ;;  %v2521_v25 = vor.u32 %v2519_v45, %v2517_v27  ;;  %v7147_v39 = vld [vmem:[%s7279_s26 + $0xbc] sm:$0xff]  }
  0xf7   : > { %8783 = vst [vmem:[#allocation3_spill] sm:$0xff] %v7838_v40 }
  0xf8   : > { %v7843_v49 = vpop.f32.mrf.mxu0  ;;  %v7845_v24 = vpop.f32.mrf.mxu1  ;;  %v2529_v14 = vor.u32 %v2527_v59, %v2525_v12 }
  0xf9   : > { %8785 = vst [vmem:[#allocation5_spill] sm:$0xff] %v7845_v24 }
  0xfa   : > { %v7852_v60 = vpop.f32.mrf.mxu0  ;;  %v7854_v57 = vpop.f32.mrf.mxu1 }
  0xfb   : > { %8786 = vst [vmem:[#allocation6_spill] sm:$0xff] %v7854_v57  ;;  %v7160_v57 = vld [vmem:[%s7279_s26 + $0x38] sm:$0xff]  }
  0xfc   : > { %v7859_v1 = vpop.f32.mrf.mxu0  ;;  %v7861_v4 = vpop.f32.mrf.mxu1  ;;  %6659 = vmatmul.mubr.bf16.gmra.mxu1 %v7133_v53  ;;  %6723 = vmatmul.mubr.bf16.gmra.mxu0 %v2494_v55  ;;  %v7141_v53 = vld [vmem:[%s7279_s26 + $0xac] sm:$0xff]  }
  0xfd   : > { %8787 = vst [vmem:[#allocation7_spill] sm:$0xff] %v7861_v4  ;;  %6662 = vmatprep.mubr.bf16.mxu1 %v7135_v58  ;;  %6726 = vmatprep.mubr.bf16.mxu0 %v2502_v62  ;;  %v2518_v58 = vsel %vm421_vm0, %v2513_v28, %v2517_v27  ;;  %v2531_v62 = vshll.u32 %v7871_v9, 16 }
  0xfe   : > { %v7866_v26 = vpop.f32.mrf.mxu0  ;;  %v7868_v23 = vpop.f32.mrf.mxu1 }
  0xff   : > { %8789 = vst [vmem:[#allocation9_spill] sm:$0xff] %v7868_v23  ;;  %v2533_v23 = vrot.slane %v2531_v62, 1  ;;  %v5758_v62 = vcombine.low %v2888_v46, %v7611_v38  ;;  %v7149_v46 = vld [vmem:[%s7279_s26 + $0xc4] sm:$0xff]  }
 0x100   : > { %v7873_v17 = vpop.f32.mrf.mxu0  ;;  %v7875_v5 = vpop.f32.mrf.mxu1 }
 0x101   : > { %8791 = vst [vmem:[#allocation11_spill] sm:$0xff] %v7875_v5  ;;  %v2534_v59 = vsel %vm421_vm0, %v2529_v14, %v2533_v23  ;;  %v2910_v14 = vrot.slane %v7621_v7, 1  ;;  %v2912_v7 = vrot.slane %v7626_v10, 1 }
 0x102   : > { %v7882_v54 = vpop.f32.mrf.mxu0  ;;  %v7884_v55 = vpop.f32.mrf.mxu1 }
 0x103   : > { %8792 = vst [vmem:[#allocation12_spill] sm:$0xff] %v7884_v55  ;;  %v7894_v55 = vld [vmem:[%s7279_s26 + $0xcc] ss:$0 sps:$4 sm:$0x11]  }
 0x104   : > { %v7889_v13 = vpop.f32.mrf.mxu0  ;;  %v7891_v63 = vpop.f32.mrf.mxu1  ;;  %6663 = vmatmul.mubr.bf16.gmra.mxu1 %v7137_v19  ;;  %6727 = vmatmul.mubr.bf16.gmra.mxu0 %v2510_v42  ;;  %8794 = vst [vmem:[#allocation14_spill] sm:$0xff] %v7894_v55  ;;  %v7143_v19 = vld [vmem:[%s7279_s26 + $0xb4] sm:$0xff]   ;;  %v2526_v42 = vsel %vm421_vm0, %v2521_v25, %v2525_v12  ;;  %v2539_v27 = vshll.u32 %v7894_v55, 16 }
 0x105   : > { %8793 = vst [vmem:[#allocation13_spill] sm:$0xff] %v7891_v63  ;;  %6666 = vmatprep.mubr.bf16.mxu1 %v7141_v53  ;;  %6730 = vmatprep.mubr.bf16.mxu0 %v2518_v58  ;;  %v2535_v53 = vshrl.u32 %v7871_v9, 16 }
 0x106   : > { %v7896_v28 = vpop.f32.mrf.mxu0  ;;  %v7898_v5 = vpop.f32.mrf.mxu1  ;;  %v2541_v25 = vrot.slane %v2539_v27, 1 }
 0x107   : > { %8795 = vst [vmem:[#allocation15_spill] sm:$0xff] %v7898_v5  ;;  %v2537_v12 = vor.u32 %v2535_v53, %v2533_v23 }
 0x108   : > { %v7901_v47 = vpop.f32.mrf.mxu0  ;;  %v7903_v4 = vpop.f32.mrf.mxu1 }
 0x109   : > { %8796 = vst [vmem:[#allocation16_spill] sm:$0xff] %v7903_v4 }
 0x10a   : > { %v7910_v45 = vpop.f32.mrf.mxu0  ;;  %v7912_v58 = vpop.f32.mrf.mxu1 }
 0x10b   : > { %8797 = vst [vmem:[#allocation17_spill] sm:$0xff] %v7912_v58  ;;  %v2909_v58 = vrot.slane %v5758_v62, 1 }
 0x10c   : > { %v7916_v5 = vpop.f32.mrf.mxu0  ;;  %v7918_v4 = vpop.f32.mrf.mxu1  ;;  %6667 = vmatmul.mubr.bf16.gmra.mxu1 %v7143_v19  ;;  %6731 = vmatmul.mubr.bf16.gmra.mxu0 %v2526_v42  ;;  %v7152_v19 = vld [vmem:[%s7279_s26 + $0x18] sm:$0xff]  }
 0x10d   : > { %8798 = vst [vmem:[#allocation18_spill] sm:$0xff] %v7918_v4  ;;  %6670 = vmatprep.mubr.bf16.mxu1 %v7147_v39  ;;  %6734 = vmatprep.mubr.bf16.mxu0 %v2534_v59  ;;  %v2542_v4 = vsel %vm421_vm0, %v2537_v12, %v2541_v25  ;;  %v2911_v39 = vsel %vm1233_vm1, %v2909_v58, %v2910_v14  ;;  %v2914_v12 = vrot.slane %v7634_v30, 1  ;;  %v7159_v30 = vld [vmem:[%s8773_s1 + $0x230] sm:$0xff]  }
 0x10e   : > { %v7920_v55 = vpop.f32.mrf.mxu0  ;;  %v7922_v9 = vpop.f32.mrf.mxu1 }
 0x10f   : > { %8799 = vst [vmem:[#allocation19_spill] sm:$0xff] %v7922_v9  ;;  %v2915_v10 = vsel %vm1233_vm1, %v2912_v7, %v2914_v12  ;;  %v2918_v9 = vrot.slane %v7642_v56, 1 }
 0x110   : > { %v7925_v63 = vpop.f32.mrf.mxu0  ;;  %v7927_v38 = vpop.f32.mrf.mxu1 }
 0x111   : > { %8800 = vst [vmem:[#allocation20_spill] sm:$0xff] %v7927_v38  ;;  %v2913_v38 = vsel %vm1233_vm1, %v2910_v14, %v2912_v7  ;;  %v2916_v7 = vrot.slane %v7638_v43, 1 }
 0x112   : > { %v7932_v42 = vpop.f32.mrf.mxu0  ;;  %v7934_v23 = vpop.f32.mrf.mxu1 }
 0x113   : > { %8801 = vst [vmem:[#allocation21_spill] sm:$0xff] %v7934_v23  ;;  %v7153_v23 = vld [vmem:[%s7279_s26 + $0x20] sm:$0xff]  }
 0x114   : > { %v7937_v53 = vpop.f32.mrf.mxu0  ;;  %v7939_v27 = vpop.f32.mrf.mxu1  ;;  %6671 = vmatmul.mubr.bf16.gmra.mxu1 %v7149_v46  ;;  %6735 = vmatmul.mubr.bf16.gmra.mxu0 %v2542_v4  ;;  %v7156_v46 = vld [vmem:[%s7279_s26 + $0x28] sm:$0xff]  }
 0x115   : > { %8802 = vst [vmem:[#allocation22_spill] sm:$0xff] %v7939_v27  ;;  %6754 = vmatprep.mubr.bf16.mxu1 %v2911_v39  ;;  %6818 = vmatprep.mubr.bf16.mxu0 %v7152_v19  ;;  %v7158_v19 = vld [vmem:[%s8773_s1 + $0x1f0] sm:$0xff]  }
 0x116   : > { %v7942_v59 = vpop.f32.mrf.mxu0  ;;  %v7944_v62 = vpop.f32.mrf.mxu1 }
 0x117   : > { %8803 = vst [vmem:[#allocation23_spill] sm:$0xff] %v7944_v62 }
 0x118   : > { %v7947_v25 = vpop.f32.mrf.mxu0  ;;  %v7949_v58 = vpop.f32.mrf.mxu1 }
 0x119   : > { %8804 = vst [vmem:[#allocation24_spill] sm:$0xff] %v7949_v58 }
 0x11a   : > { %v7953_v27 = vpop.f32.mrf.mxu0  ;;  %v7955_v4 = vpop.f32.mrf.mxu1 }
 0x11b   : > { %8805 = vst [vmem:[#allocation25_spill] sm:$0xff] %v7955_v4 }
 0x11c   : > { %v6500_v39 = vpop.f32.mrf.mxu1  ;;  %v6564_v58 = vpop.f32.mrf.mxu0  ;;  %6755 = vmatmul.mubr.bf16.vlgmr.msra.gmra.mxu1 %v2913_v38  ;;  %6819 = vmatmul.mubr.bf16.vlgmr.msra.gmra.mxu0 %v7153_v23  ;;  %v7164_v38 = vld [vmem:[%s8773_s1 + $0x1e8] sm:$0xff]  }
 0x11d   : > { %v1030_v14 = vadd.f32 %v6500_v39, %v7799_v48  ;;  %6867 = vmatpush3.bf16.msra.mxu1 %v7754_v50  ;;  %6931 = vmatpush3.bf16.msra.mxu0 %v7759_v22  ;;  %v7165_v50 = vld [vmem:[%s8773_s1 + $0x228] sm:$0xff]   ;;  %v2917_v39 = vsel %vm1233_vm1, %v2914_v12, %v2916_v7 }
 0x11e   : > { %v1021_v4 = vpop.f32.mrf.mxu1  ;;  %v1389_v62 = vpop.f32.mrf.mxu0  ;;  %6758 = vmatprep.mubr.bf16.mxu1 %v2915_v10  ;;  %6822 = vmatprep.mubr.bf16.mxu0 %v7156_v46  ;;  %v7157_v10 = vld [vmem:[%s7279_s26 + $0x30] sm:$0xff]  }
 0x11f   : > { %v7976_v48 = vadd.f32 %v6564_v58, %v1030_v14  ;;  %v1022_v22 = vadd.f32 %v1021_v4, %v7806_v41  ;;  %6868 = vmatprep.subr.bf16.mxu1 %v7158_v19  ;;  %6932 = vmatprep.subr.bf16.mxu0 %v7159_v30  ;;  %v2919_v58 = vsel %vm1233_vm1, %v2916_v7, %v2918_v9 }
 0x120   : > { %v6501_v43 = vpop.f32.mrf.mxu1  ;;  %v6565_v23 = vpop.f32.mrf.mxu0 }
 0x121   : > { %v7980_v46 = vadd.f32 %v1389_v62, %v1022_v22  ;;  %v1033_v56 = vadd.f32 %v6501_v43, %v7813_v16  ;;  %6869 = vmatpush3.bf16.msra.mxu1 %v7158_v19  ;;  %6933 = vmatpush3.bf16.msra.mxu0 %v7159_v30  ;;  %v7168_v62 = vld [vmem:[%s8773_s1 + $0x1e0] sm:$0xff]   ;;  %v2922_v22 = vrot.slane %v7670_v8, 1 }
 0x122   : > { %v1024_v24 = vpop.f32.mrf.mxu1  ;;  %v1392_v40 = vpop.f32.mrf.mxu0  ;;  %6870 = vmatprep.subr.bf16.mxu1 %v7164_v38  ;;  %6934 = vmatprep.subr.bf16.mxu0 %v7165_v50  ;;  %v7169_v16 = vld [vmem:[%s8773_s1 + $0x220] sm:$0xff]  }
 0x123   : > { %v7986_v41 = vadd.f32 %v6565_v23, %v1033_v56  ;;  %v1025_v4 = vadd.f32 %v1024_v24, %v7822_v32  ;;  %v2920_v32 = vrot.slane %v7654_v3, 1  ;;  %v7175_v3 = vld [vmem:[%s8773_s1 + $0x218] sm:$0xff]  }
 0x124   : > { %v6504_v12 = vpop.f32.mrf.mxu1  ;;  %v6568_v19 = vpop.f32.mrf.mxu0  ;;  %6759 = vmatmul.mubr.bf16.gmra.mxu1 %v2917_v39  ;;  %6823 = vmatmul.mubr.bf16.gmra.mxu0 %v7157_v10  ;;  %v7161_v10 = vld [vmem:[%s7279_s26 + $0x40] sm:$0xff]  }
 0x125   : > { %v7995_v30 = vadd.f32 %v1392_v40, %v1025_v4  ;;  %v1046_v14 = vadd.f32 %v6504_v12, %v7829_v35  ;;  %6762 = vmatprep.mubr.bf16.mxu1 %v2919_v58  ;;  %6826 = vmatprep.mubr.bf16.mxu0 %v7160_v57  ;;  %v7174_v35 = vld [vmem:[%s8773_s1 + $0x1d8] sm:$0xff]   ;;  %v2923_v58 = vsel %vm1233_vm1, %v2920_v32, %v2922_v22 }
 0x126   : > { %v1037_v24 = vpop.f32.mrf.mxu1  ;;  %v1405_v7 = vpop.f32.mrf.mxu0  ;;  %6871 = vmatpush3.bf16.msra.mxu1 %v7164_v38  ;;  %6935 = vmatpush3.bf16.msra.mxu0 %v7165_v50  ;;  %v2921_v50 = vsel %vm1233_vm1, %v2918_v9, %v2920_v32 }
 0x127   : > { %v8000_v43 = vadd.f32 %v6568_v19, %v1046_v14  ;;  %v1038_v23 = vadd.f32 %v1037_v24, %v7836_v6  ;;  %6872 = vmatprep.subr.bf16.mxu1 %v7168_v62  ;;  %6936 = vmatprep.subr.bf16.mxu0 %v7169_v16  ;;  %v7162_v6 = vld [vmem:[%s7279_s26 + $0x48] sm:$0xff]   ;;  %v7178_v19 = vld [vmem:[%s8773_s1 + $0x1d0] sm:$0xff]  }
 0x128   : > { %v6505_v40 = vpop.f32.mrf.mxu1  ;;  %v6569_v57 = vpop.f32.mrf.mxu0 }
 0x129   : > { %v8010_v8 = vadd.f32 %v1405_v7, %v1038_v23  ;;  %v1049_v38 = vadd.f32 %v6505_v40, %v7843_v49  ;;  %v7179_v49 = vld [vmem:[%s8773_s1 + $0x210] sm:$0xff]   ;;  %v2926_v7 = vrot.slane %v7697_v36, 1 }
 0x12a   : > { %v1040_v56 = vpop.f32.mrf.mxu1  ;;  %v1408_v39 = vpop.f32.mrf.mxu0  ;;  %6873 = vmatpush3.bf16.msra.mxu1 %v7168_v62  ;;  %6937 = vmatpush3.bf16.msra.mxu0 %v7169_v16 }
 0x12b   : > { %v8016_v4 = vadd.f32 %v6569_v57, %v1049_v38  ;;  %v1041_v12 = vadd.f32 %v1040_v56, %v7852_v60  ;;  %6874 = vmatprep.subr.bf16.mxu1 %v7174_v35  ;;  %6938 = vmatprep.subr.bf16.mxu0 %v7175_v3  ;;  %v2924_v60 = vrot.slane %v7688_v34, 1  ;;  %v7185_v34 = vld [vmem:[%s8773_s1 + $0x208] sm:$0xff]   ;;  %v7163_v38 = vld [vmem:[%s7279_s26 + $0x50] sm:$0xff]  }
 0x12c   : > { %v6508_v9 = vpop.f32.mrf.mxu1  ;;  %v6572_v14 = vpop.f32.mrf.mxu0  ;;  %6763 = vmatmul.mubr.bf16.gmra.mxu1 %v2921_v50  ;;  %6827 = vmatmul.mubr.bf16.gmra.mxu0 %v7161_v10 }
 0x12d   : > { %v8025_v62 = vadd.f32 %v1408_v39, %v1041_v12  ;;  %v1062_v16 = vadd.f32 %v6508_v9, %v7859_v1  ;;  %6766 = vmatprep.mubr.bf16.mxu1 %v2923_v58  ;;  %6830 = vmatprep.mubr.bf16.mxu0 %v7162_v6  ;;  %v7184_v1 = vld [vmem:[%s8773_s1 + $0x1c8] sm:$0xff]   ;;  %v2927_v56 = vsel %vm1233_vm1, %v2924_v60, %v2926_v7  ;;  %v7188_v12 = vld [vmem:[%s8773_s1 + $0x1c0] sm:$0xff]  }
 0x12e   : > { %v1053_v32 = vpop.f32.mrf.mxu1  ;;  %v1421_v24 = vpop.f32.mrf.mxu0  ;;  %6875 = vmatpush3.bf16.msra.mxu1 %v7174_v35  ;;  %6939 = vmatpush3.bf16.msra.mxu0 %v7175_v3  ;;  %v2925_v3 = vsel %vm1233_vm1, %v2922_v22, %v2924_v60  ;;  %v2930_v60 = vrot.slane %v7723_v61, 1 }
 0x12f   : > { %v8030_v23 = vadd.f32 %v6572_v14, %v1062_v16  ;;  %v1054_v40 = vadd.f32 %v1053_v32, %v7866_v26  ;;  %6876 = vmatprep.subr.bf16.mxu1 %v7178_v19  ;;  %6940 = vmatprep.subr.bf16.mxu0 %v7179_v49  ;;  %v7166_v26 = vld [vmem:[%s7279_s26 + $0x58] sm:$0xff]  }
 0x130   : > { %v6509_v57 = vpop.f32.mrf.mxu1  ;;  %v6573_v10 = vpop.f32.mrf.mxu0 }
 0x131   : > { %v8040_v36 = vadd.f32 %v1421_v24, %v1054_v40  ;;  %v1065_v35 = vadd.f32 %v6509_v57, %v7873_v17  ;;  %v7189_v17 = vld [vmem:[%s8773_s1 + $0x200] sm:$0xff]  }
 0x132   : > { %v1056_v50 = vpop.f32.mrf.mxu1  ;;  %v1424_v6 = vpop.f32.mrf.mxu0  ;;  %6877 = vmatpush3.bf16.msra.mxu1 %v7178_v19  ;;  %6941 = vmatpush3.bf16.msra.mxu0 %v7179_v49 }
 0x133   : > { %v8046_v39 = vadd.f32 %v6573_v10, %v1065_v35  ;;  %v1057_v58 = vadd.f32 %v1056_v50, %v7882_v54  ;;  %6878 = vmatprep.subr.bf16.mxu1 %v7184_v1  ;;  %6942 = vmatprep.subr.bf16.mxu0 %v7185_v34  ;;  %v2928_v54 = vrot.slane %v7720_v44, 1  ;;  %v7170_v35 = vld [vmem:[%s7279_s26 + $0x68] sm:$0xff]  }
 0x134   : > { %v6512_v22 = vpop.f32.mrf.mxu1  ;;  %v6576_v9 = vpop.f32.mrf.mxu0  ;;  %6767 = vmatmul.mubr.bf16.gmra.mxu1 %v2925_v3  ;;  %6831 = vmatmul.mubr.bf16.gmra.mxu0 %v7163_v38 }
 0x135   : > { %v8055_v19 = vadd.f32 %v1424_v6, %v1057_v58  ;;  %v1078_v49 = vadd.f32 %v6512_v22, %v7889_v13  ;;  %6770 = vmatprep.mubr.bf16.mxu1 %v2927_v56  ;;  %6834 = vmatprep.mubr.bf16.mxu0 %v7166_v26  ;;  %v7167_v13 = vld [vmem:[%s7279_s26 + $0x60] sm:$0xff]   ;;  %v2929_v38 = vsel %vm1233_vm1, %v2926_v7, %v2928_v54  ;;  %v2932_v7 = vrot.slane %v7746_v29, 1 }
 0x136   : > { %v1069_v14 = vpop.f32.mrf.mxu1  ;;  %v1437_v16 = vpop.f32.mrf.mxu0  ;;  %6879 = vmatpush3.bf16.msra.mxu1 %v7184_v1  ;;  %6943 = vmatpush3.bf16.msra.mxu0 %v7185_v34  ;;  %v2931_v1 = vsel %vm1233_vm1, %v2928_v54, %v2930_v60 }
 0x137   : > { %v8060_v32 = vadd.f32 %v6576_v9, %v1078_v49  ;;  %v1070_v24 = vadd.f32 %v1069_v14, %v7896_v28  ;;  %6880 = vmatprep.subr.bf16.mxu1 %v7188_v12  ;;  %6944 = vmatprep.subr.bf16.mxu0 %v7189_v17  ;;  %v7171_v49 = vld [vmem:[%s7279_s26 + $0x70] sm:$0xff]  }
 0x138   : > { %v6513_v40 = vpop.f32.mrf.mxu1  ;;  %v6577_v57 = vpop.f32.mrf.mxu0 }
 0x139   : > { %v8064_v10 = vadd.f32 %v1437_v16, %v1070_v24  ;;  %v1081_v44 = vadd.f32 %v6513_v40, %v7901_v47  ;;  %v7172_v16 = vld [vmem:[%s7279_s26 + $0x78] sm:$0xff]  }
 0x13a   : > { %v1072_v3 = vpop.f32.mrf.mxu1  ;;  %v1440_v61 = vpop.f32.mrf.mxu0  ;;  %6881 = vmatpush3.bf16.msra.mxu1 %v7188_v12  ;;  %6945 = vmatpush3.bf16.msra.mxu0 %v7189_v17  ;;  %v2934_v12 = vrot.slane %v7749_v21, 1 }
 0x13b   : > { %v8070_v34 = vadd.f32 %v6577_v57, %v1081_v44  ;;  %v1073_v28 = vadd.f32 %v1072_v3, %v7910_v45  ;;  %v2938_v3 = vrot.slane %v7775_v37, 1 }
 0x13c   : > { %v6516_v26 = vpop.f32.mrf.mxu1  ;;  %v6580_v50 = vpop.f32.mrf.mxu0  ;;  %6771 = vmatmul.mubr.bf16.gmra.mxu1 %v2929_v38  ;;  %6835 = vmatmul.mubr.bf16.gmra.mxu0 %v7167_v13  ;;  %v2935_v40 = vsel %vm1233_vm1, %v2932_v7, %v2934_v12 }
 0x13d   : > { %v8073_v6 = vadd.f32 %v1440_v61, %v1073_v28  ;;  %v1094_v47 = vadd.f32 %v6516_v26, %v7916_v5  ;;  %6774 = vmatprep.mubr.bf16.mxu1 %v2931_v1  ;;  %6838 = vmatprep.mubr.bf16.mxu0 %v7170_v35  ;;  %v2933_v5 = vsel %vm1233_vm1, %v2930_v60, %v2932_v7  ;;  %v2936_v60 = vrot.slane %v7772_v33, 1  ;;  %v7173_v26 = vld [vmem:[%s7279_s26 + $0x80] sm:$0xff]   ;;  %v7176_v7 = vld [vmem:[%s7279_s26 + $0x88] sm:$0xff]  }
 0x13e   : > { %v1085_v56 = vpop.f32.mrf.mxu1  ;;  %v1453_v58 = vpop.f32.mrf.mxu0 }
 0x13f   : > { %v8078_v17 = vadd.f32 %v6580_v50, %v1094_v47  ;;  %v1086_v45 = vadd.f32 %v1085_v56, %v7920_v55 }
 0x140   : > { %v6517_v22 = vpop.f32.mrf.mxu1  ;;  %v6581_v9 = vpop.f32.mrf.mxu0 }
 0x141   : > { %v8082_v54 = vadd.f32 %v1453_v58, %v1086_v45  ;;  %v1097_v14 = vadd.f32 %v6517_v22, %v7925_v63  ;;  %v2939_v58 = vsel %vm1233_vm1, %v2936_v60, %v2938_v3 }
 0x142   : > { %v1088_v24 = vpop.f32.mrf.mxu1  ;;  %v1456_v29 = vpop.f32.mrf.mxu0 }
 0x143   : > { %v8088_v57 = vadd.f32 %v6581_v9, %v1097_v14  ;;  %v1089_v21 = vadd.f32 %v1088_v24, %v7932_v42 }
 0x144   : > { %v6520_v13 = vpop.f32.mrf.mxu1  ;;  %v6584_v55 = vpop.f32.mrf.mxu0  ;;  %6775 = vmatmul.mubr.bf16.gmra.mxu1 %v2933_v5  ;;  %6839 = vmatmul.mubr.bf16.gmra.mxu0 %v7171_v49  ;;  %v2942_v5 = vrot.slane %v7789_v18, 1 }
 0x145   : > { %v8091_v44 = vadd.f32 %v1456_v29, %v1089_v21  ;;  %v1110_v63 = vadd.f32 %v6520_v13, %v7937_v53  ;;  %6778 = vmatprep.mubr.bf16.mxu1 %v2935_v40  ;;  %6842 = vmatprep.mubr.bf16.mxu0 %v7172_v16  ;;  %v2937_v53 = vsel %vm1233_vm1, %v2934_v12, %v2936_v60  ;;  %v2940_v12 = vrot.slane %v7786_v51, 1  ;;  %v7177_v40 = vld [vmem:[%s7279_s26 + $0x90] sm:$0xff]  }
 0x146   : > { %v1101_v38 = vpop.f32.mrf.mxu1  ;;  %v1469_v35 = vpop.f32.mrf.mxu0 }
 0x147   : > { %v8096_v61 = vadd.f32 %v6584_v55, %v1110_v63  ;;  %v1102_v42 = vadd.f32 %v1101_v38, %v7942_v59  ;;  %v7180_v55 = vld [vmem:[%s7279_s26 + $0x98] sm:$0xff]   ;;  %v2943_v60 = vsel %vm1233_vm1, %v2940_v12, %v2942_v5 }
 0x148   : > { %v6521_v1 = vpop.f32.mrf.mxu1  ;;  %v6585_v28 = vpop.f32.mrf.mxu0 }
 0x149   : > { %v8100_v50 = vadd.f32 %v1469_v35, %v1102_v42  ;;  %v1113_v47 = vadd.f32 %v6521_v1, %v7947_v25 }
 0x14a   : > { %v1104_v56 = vpop.f32.mrf.mxu1  ;;  %v1472_v33 = vpop.f32.mrf.mxu0 }
 0x14b   : > { %v8106_v45 = vadd.f32 %v6585_v28, %v1113_v47  ;;  %v1105_v37 = vadd.f32 %v1104_v56, %v7953_v27 }
 0x14c   : > { %v6524_v22 = vpop.f32.mrf.mxu1  ;;  %v6588_v59 = vpop.f32.mrf.mxu0  ;;  %6779 = vmatmul.mubr.bf16.gmra.mxu1 %v2937_v53  ;;  %6843 = vmatmul.mubr.bf16.gmra.mxu0 %v7173_v26  ;;  %v2946_v26 = vrot.slane %v7811_v15, 1  ;;  %v8808_v15 = vld [vmem:[#allocation6_spill] sm:$0xff] }
 0x14d   : > { %v8109_v9 = vadd.f32 %v1472_v33, %v1105_v37  ;;  %v1126_v25 = vadd.f32 %v6524_v22, %v7801_v0  ;;  %6782 = vmatprep.mubr.bf16.mxu1 %v2939_v58  ;;  %6846 = vmatprep.mubr.bf16.mxu0 %v7176_v7  ;;  %v2941_v0 = vsel %vm1233_vm1, %v2938_v3, %v2940_v12  ;;  %v2944_v3 = vrot.slane %v7804_v2, 1  ;;  %v7181_v33 = vld [vmem:[%s7279_s26 + $0xa0] sm:$0xff]   ;;  %v8807_v37 = vld [vmem:[#allocation5_spill] sm:$0xff] }
 0x14e   : > { %v1117_v49 = vpop.f32.mrf.mxu1  ;;  %v1485_v14 = vpop.f32.mrf.mxu0 }
 0x14f   : > { %v8114_v16 = vadd.f32 %v6588_v59, %v1126_v25  ;;  %v1118_v27 = vadd.f32 %v1117_v49, %v7808_v11  ;;  %v7182_v59 = vld [vmem:[%s7279_s26 + $0xa8] sm:$0xff]   ;;  %v2947_v12 = vsel %vm1233_vm1, %v2944_v3, %v2946_v26 }
 0x150   : > { %v6525_v24 = vpop.f32.mrf.mxu1  ;;  %v6589_v29 = vpop.f32.mrf.mxu0 }
 0x151   : > { %v8118_v21 = vadd.f32 %v1485_v14, %v1118_v27  ;;  %v1129_v13 = vadd.f32 %v6525_v24, %v7815_v20 }
 0x152   : > { %v1120_v63 = vpop.f32.mrf.mxu1  ;;  %v1488_v51 = vpop.f32.mrf.mxu0 }
 0x153   : > { %v8124_v38 = vadd.f32 %v6589_v29, %v1129_v13  ;;  %v1121_v18 = vadd.f32 %v1120_v63, %v7824_v31  ;;  %v8806_v31 = vld [vmem:[#allocation3_spill] sm:$0xff]  ;;  %v8810_v13 = vld [vmem:[#allocation2_spill] sm:$0xff] }
 0x154   : > { %v6528_v35 = vpop.f32.mrf.mxu1  ;;  %v6592_v11 = vpop.f32.mrf.mxu0  ;;  %6783 = vmatmul.mubr.bf16.gmra.mxu1 %v2941_v0  ;;  %6847 = vmatmul.mubr.bf16.gmra.mxu0 %v7177_v40  ;;  %v8809_v40 = vld [vmem:[#allocation7_spill] sm:$0xff]  ;;  %v2948_v0 = vrot.slane %v8810_v13, 1 }
 0x155   : > { %v8127_v42 = vadd.f32 %v1488_v51, %v1121_v18  ;;  %v1142_v20 = vadd.f32 %v6528_v35, %v7831_v52  ;;  %6786 = vmatprep.mubr.bf16.mxu1 %v2943_v60  ;;  %6850 = vmatprep.mubr.bf16.mxu0 %v7180_v55  ;;  %v2945_v52 = vsel %vm1233_vm1, %v2942_v5, %v2944_v3  ;;  %v8811_v51 = vld [vmem:[#allocation4_spill] sm:$0xff]  ;;  %v8812_v35 = vld [vmem:[#allocation9_spill] sm:$0xff] }
 0x156   : > { %v1133_v1 = vpop.f32.mrf.mxu1  ;;  %v1501_v28 = vpop.f32.mrf.mxu0  ;;  %v2950_v60 = vrot.slane %v8811_v51, 1  ;;  %v3834_v3 = vld [vmem:[%s7279_s26 + $0x1c] sm:$0xf] }
 0x157   : > { %v8132_v47 = vadd.f32 %v6592_v11, %v1142_v20  ;;  %v1134_v53 = vadd.f32 %v1133_v1, %v8806_v31  ;;  %v3833_v20 = vld [vmem:[%s7279_s26 + $0x18] sm:$0xf]  ;;  %v7183_v31 = vld [vmem:[%s7279_s26 + $0xb0] sm:$0xff]  }
 0x158   : > { %v6529_v7 = vpop.f32.mrf.mxu1  ;;  %v6593_v56 = vpop.f32.mrf.mxu0 }
 0x159   : > { %v8136_v58 = vadd.f32 %v1501_v28, %v1134_v53  ;;  %v1145_v22 = vadd.f32 %v6529_v7, %v8807_v37  ;;  %v8813_v7 = vld [vmem:[#allocation11_spill] sm:$0xff]  ;;  %v7186_v37 = vld [vmem:[%s7279_s26 + $0xb8] sm:$0xff]  }
 0x15a   : > { %v1136_v25 = vpop.f32.mrf.mxu1  ;;  %v1504_v2 = vpop.f32.mrf.mxu0 }
 0x15b   : > { %v8142_v49 = vadd.f32 %v6593_v56, %v1145_v22  ;;  %v1137_v14 = vadd.f32 %v1136_v25, %v8808_v15  ;;  %v5831_v25 = vcombine.low %v3833_v20, %v3834_v3 }
 0x15c   : > { %v6532_v27 = vpop.f32.mrf.mxu1  ;;  %v6596_v24 = vpop.f32.mrf.mxu0  ;;  %6787 = vmatmul.mubr.bf16.gmra.mxu1 %v2945_v52  ;;  %6851 = vmatmul.mubr.bf16.gmra.mxu0 %v7181_v33  ;;  %v2949_v33 = vsel %vm1233_vm1, %v2946_v26, %v2948_v0  ;;  %v8815_v26 = vld [vmem:[#allocation13_spill] sm:$0xff] }
 0x15d   : > { %v8145_v29 = vadd.f32 %v1504_v2, %v1137_v14  ;;  %v1158_v5 = vadd.f32 %v6532_v27, %v8809_v40  ;;  %6790 = vmatprep.mubr.bf16.mxu1 %v2947_v12  ;;  %6854 = vmatprep.mubr.bf16.mxu0 %v7182_v59  ;;  %v2951_v59 = vsel %vm1233_vm1, %v2948_v0, %v2950_v60  ;;  %v8814_v12 = vld [vmem:[#allocation12_spill] sm:$0xff]  ;;  %v8817_v0 = vld [vmem:[#allocation10_spill] sm:$0xff] }
 0x15e   : > { %v1149_v55 = vpop.f32.mrf.mxu1  ;;  %v1517_v63 = vpop.f32.mrf.mxu0 }
 0x15f   : > { %v8150_v18 = vadd.f32 %v6596_v24, %v1158_v5  ;;  %v1150_v11 = vadd.f32 %v1149_v55, %v8812_v35  ;;  %v8816_v5 = vld [vmem:[#allocation8_spill] sm:$0xff]  ;;  %v2954_v55 = vrot.slane %v8817_v0, 1  ;;  %v8171_v35 = vld [vmem:[%s7279_s26 + $0x20] sm:$0xff]  }
 0x160   : > { %v6533_v1 = vpop.f32.mrf.mxu1  ;;  %v6597_v28 = vpop.f32.mrf.mxu0  ;;  %v2952_v13 = vrot.slane %v8816_v5, 1  ;;  %v4030_v5 = vshll.u32 %v8171_v35, 16 }
 0x161   : > { %v8156_v53 = vadd.f32 %v1517_v63, %v1150_v11  ;;  %v1161_v56 = vadd.f32 %v6533_v1, %v8813_v7  ;;  %v4025_v11 = vshll.u32 %v5831_v25, 16  ;;  %v8819_v1 = vld [vmem:[#allocation15_spill] sm:$0xff] }
 0x162   : > { %v1152_v22 = vpop.f32.mrf.mxu1  ;;  %v1520_v52 = vpop.f32.mrf.mxu0 }
 0x163   : > { %v8162_v2 = vadd.f32 %v6597_v28, %v1161_v56  ;;  %v1153_v15 = vadd.f32 %v1152_v22, %v8814_v12  ;;  %v2955_v12 = vsel %vm1233_vm1, %v2952_v13, %v2954_v55 }
 0x164   : > { %v6536_v14 = vpop.f32.mrf.mxu1  ;;  %v6600_v27 = vpop.f32.mrf.mxu0  ;;  %6791 = vmatmul.mubr.bf16.gmra.mxu1 %v2949_v33  ;;  %6855 = vmatmul.mubr.bf16.gmra.mxu0 %v7183_v31  ;;  %v4563_v31 = vld [vmem:[%s7279_s26 + $0x18] sm:$0xe]  ;;  %v7187_v33 = vld [vmem:[%s7279_s26 + $0xc0] sm:$0xff]  }
 0x165   : > { %v8165_v24 = vadd.f32 %v1520_v52, %v1153_v15  ;;  %v1174_v40 = vadd.f32 %v6536_v14, %v8815_v26  ;;  %6794 = vmatprep.mubr.bf16.mxu1 %v2951_v59  ;;  %6858 = vmatprep.mubr.bf16.mxu0 %v7186_v37  ;;  %v8821_v37 = vld [vmem:[#allocation16_spill] sm:$0xff]  ;;  %v2953_v59 = vsel %vm1233_vm1, %v2950_v60, %v2952_v13  ;;  %v7190_v15 = vld [vmem:[%s7279_s26 + $0xc8] sm:$0xff]  }
 0x166   : > { %v1165_v63 = vpop.f32.mrf.mxu1  ;;  %v1533_v51 = vpop.f32.mrf.mxu0  ;;  %v5880_v0 = vcombine.low %v4563_v31, %v3834_v3  ;;  %v8189_v60 = vld [vmem:[%s7279_s26 + $0x28] sm:$0xff]  }
 0x167   : > { %v8173_v20 = vadd.f32 %v6600_v27, %v1174_v40  ;;  %v1166_v28 = vadd.f32 %v1165_v63, %v8819_v1  ;;  %v4023_v27 = vshrl.u32 %v5831_v25, 16  ;;  %v4027_v40 = vrot.slane %v4025_v11, 1  ;;  %v8823_v1 = vld [vmem:[#allocation17_spill] sm:$0xff]  ;;  %v8826_v11 = vld [vmem:[#allocation14_spill] sm:$0xff] }
 0x168   : > { %v6537_v7 = vpop.f32.mrf.mxu1  ;;  %v6601_v56 = vpop.f32.mrf.mxu0  ;;  %v2956_v3 = vrot.slane %v8826_v11, 1 }
 0x169   : > { %8818 = vst [vmem:[#allocation3_spill] sm:$0xff] %v8173_v20  ;;  %v8178_v22 = vadd.f32 %v1533_v51, %v1166_v28  ;;  %v1177_v52 = vadd.f32 %v6537_v7, %v8821_v37  ;;  %v8825_v37 = vld [vmem:[#allocation18_spill] sm:$0xff] }
 0x16a   : > { %v1168_v14 = vpop.f32.mrf.mxu1  ;;  %v1536_v26 = vpop.f32.mrf.mxu0 }
 0x16b   : > { %8820 = vst [vmem:[#allocation5_spill] sm:$0xff] %v8178_v22  ;;  %v8185_v63 = vadd.f32 %v6601_v56, %v1177_v52  ;;  %v1169_v51 = vadd.f32 %v1168_v14, %v8823_v1  ;;  %v4028_v52 = vor.u32 %v4027_v40, %v4023_v27  ;;  %v4032_v14 = vrot.slane %v4030_v5, 1  ;;  %v8830_v27 = vld [vmem:[#allocation20_spill] sm:$0xff] }
 0x16c   : > { %v6540_v28 = vpop.f32.mrf.mxu1  ;;  %v6604_v7 = vpop.f32.mrf.mxu0  ;;  %6795 = vmatmul.mubr.bf16.gmra.mxu1 %v2953_v59  ;;  %6859 = vmatmul.mubr.bf16.gmra.mxu0 %v7187_v33  ;;  %v4584_v1 = vrot.slane %v5880_v0, 1  ;;  %v8197_v59 = vld [vmem:[%s7279_s26 + $0x30] sm:$0xff]   ;;  %v2957_v5 = vsel %vm1233_vm1, %v2954_v55, %v2956_v3  ;;  %v8217_v3 = vld [vmem:[%s7279_s26 + $0x38] sm:$0xff]  }
 0x16d   : > { %8822 = vst [vmem:[#allocation6_spill] sm:$0xff] %v8185_v63  ;;  %v8191_v13 = vadd.f32 %v1536_v26, %v1169_v51  ;;  %v1190_v25 = vadd.f32 %v6540_v28, %v8825_v37  ;;  %6798 = vmatprep.mubr.bf16.mxu1 %v2955_v12  ;;  %6862 = vmatprep.mubr.bf16.mxu0 %v7190_v15  ;;  %v4585_v63 = vrot.slane %v8171_v35, 1  ;;  %v8828_v26 = vld [vmem:[#allocation19_spill] sm:$0xff]  ;;  %v7191_v28 = vld [vmem:[%s7279_s26 + $0xd0] sm:$0xff]   ;;  %v4034_v12 = vshrl.u32 %v8171_v35, 16 }
 0x16e   : > { %v1181_v31 = vpop.f32.mrf.mxu1  ;;  %v1549_v56 = vpop.f32.mrf.mxu0  ;;  %v4038_v15 = vshll.u32 %v8189_v60, 16  ;;  %v4589_v20 = vrot.slane %v8197_v59, 1 }
 0x16f   : > { %8824 = vst [vmem:[#allocation7_spill] sm:$0xff] %v8191_v13  ;;  %v8199_v33 = vadd.f32 %v6604_v7, %v1190_v25  ;;  %v1182_v51 = vadd.f32 %v1181_v31, %v8828_v26  ;;  %v4033_v7 = vsel %vm421_vm0, %v4028_v52, %v4032_v14  ;;  %v4586_v25 = vsel %vm1233_vm1, %v4584_v1, %v4585_v63  ;;  %v8833_v1 = vld [vmem:[#allocation22_spill] sm:$0xff] }
 0x170   : > { %v6541_v13 = vpop.f32.mrf.mxu1  ;;  %v6605_v22 = vpop.f32.mrf.mxu0  ;;  %v4042_v31 = vshrl.u32 %v8189_v60, 16  ;;  %v4046_v26 = vshll.u32 %v8197_v59, 16  ;;  %v4036_v55 = vor.u32 %v4034_v12, %v4032_v14 }
 0x171   : > { %8827 = vst [vmem:[#allocation2_spill] sm:$0xff] %v8199_v33  ;;  %v8205_v37 = vadd.f32 %v1549_v56, %v1182_v51  ;;  %v1193_v40 = vadd.f32 %v6541_v13, %v8830_v27  ;;  %v8832_v33 = vld [vmem:[#allocation21_spill] sm:$0xff]  ;;  %v4040_v13 = vrot.slane %v4038_v15, 1 }
 0x172   : > { %v1184_v0 = vpop.f32.mrf.mxu1  ;;  %v1552_v11 = vpop.f32.mrf.mxu0 }
 0x173   : > { %8829 = vst [vmem:[#allocation4_spill] sm:$0xff] %v8205_v37  ;;  %v8213_v35 = vadd.f32 %v6605_v22, %v1193_v40  ;;  %v1185_v56 = vadd.f32 %v1184_v0, %v8832_v33  ;;  %v4587_v22 = vrot.slane %v8189_v60, 1  ;;  %v4044_v33 = vor.u32 %v4042_v31, %v4040_v13  ;;  %v8837_v60 = vld [vmem:[#allocation24_spill] sm:$0xff] }
 0x174   : > { %v6544_v51 = vpop.f32.mrf.mxu1  ;;  %v6608_v37 = vpop.f32.mrf.mxu0  ;;  %6799 = vmatmul.mubr.bf16.gmra.mxu1 %v2957_v5  ;;  %6863 = vmatmul.mubr.bf16.gmra.mxu0 %v7191_v28  ;;  %v4048_v0 = vrot.slane %v4046_v26, 1  ;;  %v8225_v5 = vld [vmem:[%s7279_s26 + $0x40] sm:$0xff]   ;;  %v8835_v28 = vld [vmem:[#allocation23_spill] sm:$0xff]  ;;  %v4050_v26 = vshrl.u32 %v8197_v59, 16 }
 0x175   : > { %8831 = vst [vmem:[#allocation9_spill] sm:$0xff] %v8213_v35  ;;  %v8219_v52 = vadd.f32 %v1552_v11, %v1185_v56  ;;  %v1206_v27 = vadd.f32 %v6544_v51, %v8833_v1  ;;  %6882 = vmatprep.mubr.bf16.mxu1 %v4033_v7  ;;  %6946 = vmatprep.mubr.bf16.mxu0 %v4586_v25  ;;  %v4054_v7 = vshll.u32 %v8217_v3, 16  ;;  %v8245_v59 = vld [vmem:[%s7279_s26 + $0x48] sm:$0xff]  }
 0x176   : > { %v1197_v40 = vpop.f32.mrf.mxu1  ;;  %v1565_v35 = vpop.f32.mrf.mxu0  ;;  %v4041_v56 = vsel %vm421_vm0, %v4036_v55, %v4040_v13  ;;  %v4588_v31 = vsel %vm1233_vm1, %v4585_v63, %v4587_v22  ;;  %v4062_v55 = vshll.u32 %v8225_v5, 16 }
 0x177   : > { %v8227_v14 = vadd.f32 %v6608_v37, %v1206_v27  ;;  %v1198_v12 = vadd.f32 %v1197_v40, %v8835_v28  ;;  %v4049_v27 = vsel %vm421_vm0, %v4044_v33, %v4048_v0  ;;  %v4590_v40 = vsel %vm1233_vm1, %v4587_v22, %v4589_v20 }
 0x178   : > { %v6545_v15 = vpop.f32.mrf.mxu1  ;;  %v6609_v11 = vpop.f32.mrf.mxu0  ;;  %v4058_v28 = vshrl.u32 %v8217_v3, 16  ;;  %v4056_v63 = vrot.slane %v4054_v7, 1  ;;  %v4052_v33 = vor.u32 %v4050_v26, %v4048_v0  ;;  %v4070_v0 = vshll.u32 %v8245_v59, 16 }
 0x179   : > { %8834 = vst [vmem:[#allocation11_spill] sm:$0xff] %v8227_v14  ;;  %v8232_v25 = vadd.f32 %v1565_v35, %v1198_v12  ;;  %v1209_v51 = vadd.f32 %v6545_v15, %v8837_v60  ;;  %v8839_v35 = vld [vmem:[#allocation25_spill] sm:$0xff]  ;;  %v4593_v14 = vrot.slane %v8225_v5, 1 }
 0x17a   : > { %v1200_v1 = vpop.f32.mrf.mxu1  ;;  %v1568_v37 = vpop.f32.mrf.mxu0 }
 0x17b   : > { %8836 = vst [vmem:[#allocation12_spill] sm:$0xff] %v8232_v25  ;;  %v8241_v13 = vadd.f32 %v6609_v11, %v1209_v51  ;;  %v1201_v12 = vadd.f32 %v1200_v1, %v8839_v35  ;;  %v4591_v11 = vrot.slane %v8217_v3, 1  ;;  %v4060_v1 = vor.u32 %v4058_v28, %v4056_v63 }
 0x17c   : > { %v6628_v15 = vpop.f32.mrf.mxu1  ;;  %v6692_v60 = vpop.f32.mrf.mxu0  ;;  %6883 = vmatmul.mubr.bf16.vlgmr.msra.gmra.mxu1 %v4041_v56  ;;  %6947 = vmatmul.mubr.bf16.vlgmr.msra.gmra.mxu0 %v4588_v31  ;;  %v4064_v35 = vrot.slane %v4062_v55, 1  ;;  %v8253_v56 = vld [vmem:[%s7279_s26 + $0x50] sm:$0xff]  }
 0x17d   : > { %8838 = vst [vmem:[#allocation13_spill] sm:$0xff] %v8241_v13  ;;  %v8247_v25 = vadd.f32 %v1568_v37, %v1201_v12  ;;  %v2112_v22 = vadd.f32 %v6628_v15, %v7976_v48  ;;  %6886 = vmatprep.mubr.bf16.mxu1 %v4049_v27  ;;  %6950 = vmatprep.mubr.bf16.mxu0 %v4590_v40  ;;  %v4066_v48 = vshrl.u32 %v8225_v5, 16  ;;  %v4078_v5 = vshll.u32 %v8253_v56, 16 }
 0x17e   : > { %v1919_v51 = vpop.f32.mrf.mxu1  ;;  %v2649_v13 = vpop.f32.mrf.mxu0  ;;  %v4057_v27 = vsel %vm421_vm0, %v4052_v33, %v4056_v63  ;;  %v4592_v40 = vsel %vm1233_vm1, %v4589_v20, %v4591_v11  ;;  %v4065_v15 = vsel %vm421_vm0, %v4060_v1, %v4064_v35  ;;  %v4072_v63 = vrot.slane %v4070_v0, 1  ;;  %v8273_v33 = vld [vmem:[%s7279_s26 + $0x58] sm:$0xff]  }
 0x17f   : > { %v8255_v7 = vadd.f32 %v6692_v60, %v2112_v22  ;;  %v2110_v31 = vadd.f32 %v1919_v51, %v7980_v46  ;;  %v4594_v46 = vsel %vm1233_vm1, %v4591_v11, %v4593_v14  ;;  %v4074_v60 = vshrl.u32 %v8245_v59, 16 }
 0x180   : > { %v6629_v37 = vpop.f32.mrf.mxu1  ;;  %v6693_v12 = vpop.f32.mrf.mxu0  ;;  %v4068_v20 = vor.u32 %v4066_v48, %v4064_v35 }
 0x181   : > { %v8260_v26 = vadd.f32 %v2649_v13, %v2110_v31  ;;  %v2113_v3 = vadd.f32 %v6629_v37, %v7986_v41  ;;  %v4595_v31 = vrot.slane %v8245_v59, 1 }
 0x182   : > { %v1922_v28 = vpop.f32.mrf.mxu1  ;;  %v2652_v55 = vpop.f32.mrf.mxu0 }
 0x183   : > { %v8269_v22 = vadd.f32 %v6693_v12, %v2113_v3  ;;  %v2111_v13 = vadd.f32 %v1922_v28, %v7995_v30  ;;  %v4076_v30 = vor.u32 %v4074_v60, %v4072_v63  ;;  %v4080_v3 = vrot.slane %v4078_v5, 1 }
 0x184   : > { %v6632_v41 = vpop.f32.mrf.mxu1  ;;  %v6696_v51 = vpop.f32.mrf.mxu0  ;;  %6887 = vmatmul.mubr.bf16.gmra.mxu1 %v4057_v27  ;;  %6951 = vmatmul.mubr.bf16.gmra.mxu0 %v4592_v40  ;;  %v4597_v28 = vrot.slane %v8253_v56, 1  ;;  %v8281_v27 = vld [vmem:[%s7279_s26 + $0x60] sm:$0xff]   ;;  %v4082_v60 = vshrl.u32 %v8253_v56, 16  ;;  %v8301_v56 = vld [vmem:[%s7279_s26 + $0x68] sm:$0xff]  }
 0x185   : > { %v8275_v1 = vadd.f32 %v2652_v55, %v2111_v13  ;;  %v2116_v11 = vadd.f32 %v6632_v41, %v8000_v43  ;;  %6890 = vmatprep.mubr.bf16.mxu1 %v4065_v15  ;;  %6954 = vmatprep.mubr.bf16.mxu0 %v4594_v46  ;;  %v4073_v43 = vsel %vm421_vm0, %v4068_v20, %v4072_v63  ;;  %v4086_v55 = vshll.u32 %v8273_v33, 16 }
 0x186   : > { %v1935_v37 = vpop.f32.mrf.mxu1  ;;  %v2665_v12 = vpop.f32.mrf.mxu0  ;;  %v4596_v46 = vsel %vm1233_vm1, %v4593_v14, %v4595_v31  ;;  %v4081_v41 = vsel %vm421_vm0, %v4076_v30, %v4080_v3  ;;  %v4094_v20 = vshll.u32 %v8281_v27, 16  ;;  %v4084_v30 = vor.u32 %v4082_v60, %v4080_v3 }
 0x187   : > { %v8283_v35 = vadd.f32 %v6696_v51, %v2116_v11  ;;  %v2114_v48 = vadd.f32 %v1935_v37, %v8010_v8  ;;  %v4598_v8 = vsel %vm1233_vm1, %v4595_v31, %v4597_v28  ;;  %v4090_v51 = vshrl.u32 %v8273_v33, 16 }
 0x188   : > { %v6633_v0 = vpop.f32.mrf.mxu1  ;;  %v6697_v40 = vpop.f32.mrf.mxu0  ;;  %v4088_v14 = vrot.slane %v4086_v55, 1  ;;  %v4102_v3 = vshll.u32 %v8301_v56, 16 }
 0x189   : > { %v8288_v15 = vadd.f32 %v2665_v12, %v2114_v48  ;;  %v2117_v59 = vadd.f32 %v6633_v0, %v8016_v4  ;;  %v4599_v48 = vrot.slane %v8273_v33, 1 }
 0x18a   : > { %v1938_v5 = vpop.f32.mrf.mxu1  ;;  %v2668_v13 = vpop.f32.mrf.mxu0 }
 0x18b   : > { %v8297_v63 = vadd.f32 %v6697_v40, %v2117_v59  ;;  %v2115_v11 = vadd.f32 %v1938_v5, %v8025_v62  ;;  %v4092_v62 = vor.u32 %v4090_v51, %v4088_v14  ;;  %v4096_v59 = vrot.slane %v4094_v20, 1 }
 0x18c   : > { %v6636_v4 = vpop.f32.mrf.mxu1  ;;  %v6700_v37 = vpop.f32.mrf.mxu0  ;;  %6891 = vmatmul.mubr.bf16.gmra.mxu1 %v4073_v43  ;;  %6955 = vmatmul.mubr.bf16.gmra.mxu0 %v4596_v46  ;;  %v4601_v5 = vrot.slane %v8281_v27, 1  ;;  %v8309_v43 = vld [vmem:[%s7279_s26 + $0x70] sm:$0xff]  }
 0x18d   : > { %v8303_v12 = vadd.f32 %v2668_v13, %v2115_v11  ;;  %v2120_v31 = vadd.f32 %v6636_v4, %v8030_v23  ;;  %6894 = vmatprep.mubr.bf16.mxu1 %v4081_v41  ;;  %6958 = vmatprep.mubr.bf16.mxu0 %v4598_v8  ;;  %v4098_v23 = vshrl.u32 %v8281_v27, 16  ;;  %v4089_v41 = vsel %vm421_vm0, %v4084_v30, %v4088_v14  ;;  %v8329_v30 = vld [vmem:[%s7279_s26 + $0x78] sm:$0xff]  }
 0x18e   : > { %v1951_v0 = vpop.f32.mrf.mxu1  ;;  %v2681_v40 = vpop.f32.mrf.mxu0  ;;  %v4600_v8 = vsel %vm1233_vm1, %v4597_v28, %v4599_v48  ;;  %v4097_v4 = vsel %vm421_vm0, %v4092_v62, %v4096_v59  ;;  %v4110_v27 = vshll.u32 %v8309_v43, 16  ;;  %v4104_v14 = vrot.slane %v4102_v3, 1 }
 0x18f   : > { %v8311_v55 = vadd.f32 %v6700_v37, %v2120_v31  ;;  %v2118_v46 = vadd.f32 %v1951_v0, %v8040_v36  ;;  %v4602_v36 = vsel %vm1233_vm1, %v4599_v48, %v4601_v5  ;;  %v4106_v37 = vshrl.u32 %v8301_v56, 16 }
 0x190   : > { %v6637_v13 = vpop.f32.mrf.mxu1  ;;  %v6701_v11 = vpop.f32.mrf.mxu0  ;;  %v4100_v28 = vor.u32 %v4098_v23, %v4096_v59 }
 0x191   : > { %v8316_v60 = vadd.f32 %v2681_v40, %v2118_v46  ;;  %v2121_v33 = vadd.f32 %v6637_v13, %v8046_v39  ;;  %v4603_v46 = vrot.slane %v8301_v56, 1 }
 0x192   : > { %v1954_v51 = vpop.f32.mrf.mxu1  ;;  %v2684_v20 = vpop.f32.mrf.mxu0 }
 0x193   : > { %v8325_v31 = vadd.f32 %v6701_v11, %v2121_v33  ;;  %v2119_v0 = vadd.f32 %v1954_v51, %v8055_v19  ;;  %v4108_v19 = vor.u32 %v4106_v37, %v4104_v14  ;;  %v4112_v33 = vrot.slane %v4110_v27, 1 }
 0x194   : > { %v6640_v39 = vpop.f32.mrf.mxu1  ;;  %v6704_v40 = vpop.f32.mrf.mxu0  ;;  %6895 = vmatmul.mubr.bf16.gmra.mxu1 %v4089_v41  ;;  %6959 = vmatmul.mubr.bf16.gmra.mxu0 %v4600_v8  ;;  %v4605_v51 = vrot.slane %v8309_v43, 1  ;;  %v8337_v41 = vld [vmem:[%s7279_s26 + $0x80] sm:$0xff]   ;;  %v4114_v37 = vshrl.u32 %v8309_v43, 16  ;;  %v4607_v43 = vrot.slane %v8329_v30, 1 }
 0x195   : > { %v8331_v62 = vadd.f32 %v2684_v20, %v2119_v0  ;;  %v2124_v48 = vadd.f32 %v6640_v39, %v8060_v32  ;;  %6898 = vmatprep.mubr.bf16.mxu1 %v4097_v4  ;;  %6962 = vmatprep.mubr.bf16.mxu0 %v4602_v36  ;;  %v4105_v32 = vsel %vm421_vm0, %v4100_v28, %v4104_v14  ;;  %v4118_v20 = vshll.u32 %v8329_v30, 16 }
 0x196   : > { %v1967_v13 = vpop.f32.mrf.mxu1  ;;  %v2697_v11 = vpop.f32.mrf.mxu0  ;;  %v4604_v36 = vsel %vm1233_vm1, %v4601_v5, %v4603_v46  ;;  %v4113_v39 = vsel %vm421_vm0, %v4108_v19, %v4112_v33  ;;  %v4126_v28 = vshll.u32 %v8337_v41, 16 }
 0x197   : > { %v8339_v59 = vadd.f32 %v6704_v40, %v2124_v48  ;;  %v2122_v23 = vadd.f32 %v1967_v13, %v8064_v10  ;;  %v4606_v10 = vsel %vm1233_vm1, %v4603_v46, %v4605_v51  ;;  %v4122_v40 = vshrl.u32 %v8329_v30, 16 }
 0x198   : > { %v6641_v3 = vpop.f32.mrf.mxu1  ;;  %v6705_v8 = vpop.f32.mrf.mxu0  ;;  %v4120_v5 = vrot.slane %v4118_v20, 1 }
 0x199   : > { %v8344_v4 = vadd.f32 %v2697_v11, %v2122_v23  ;;  %v2125_v56 = vadd.f32 %v6641_v3, %v8070_v34  ;;  %v8358_v11 = vld [vmem:[%s7279_s26 + $0x88] sm:$0xff]   ;;  %v4116_v23 = vor.u32 %v4114_v37, %v4112_v33 }
 0x19a   : > { %v1970_v27 = vpop.f32.mrf.mxu1  ;;  %v2700_v0 = vpop.f32.mrf.mxu0 }
 0x19b   : > { %v8353_v14 = vadd.f32 %v6705_v8, %v2125_v56  ;;  %v2123_v48 = vadd.f32 %v1970_v27, %v8073_v6  ;;  %v4124_v6 = vor.u32 %v4122_v40, %v4120_v5  ;;  %v4128_v56 = vrot.slane %v4126_v28, 1 }
 0x19c   : > { %v6644_v34 = vpop.f32.mrf.mxu1  ;;  %v6708_v13 = vpop.f32.mrf.mxu0  ;;  %6899 = vmatmul.mubr.bf16.gmra.mxu1 %v4105_v32  ;;  %6963 = vmatmul.mubr.bf16.gmra.mxu0 %v4604_v36  ;;  %v4609_v27 = vrot.slane %v8337_v41, 1  ;;  %v8365_v32 = vld [vmem:[%s7279_s26 + $0x90] sm:$0xff]   ;;  %v4121_v37 = vsel %vm421_vm0, %v4116_v23, %v4120_v5  ;;  %v4611_v5 = vrot.slane %v8358_v11, 1  ;;  %v8386_v23 = vld [vmem:[%s7279_s26 + $0x98] sm:$0xff]  }
 0x19d   : > { %v8360_v19 = vadd.f32 %v2700_v0, %v2123_v48  ;;  %v2128_v46 = vadd.f32 %v6644_v34, %v8078_v17  ;;  %6902 = vmatprep.mubr.bf16.mxu1 %v4113_v39  ;;  %6966 = vmatprep.mubr.bf16.mxu0 %v4606_v10  ;;  %v4608_v48 = vsel %vm1233_vm1, %v4605_v51, %v4607_v43  ;;  %v4134_v17 = vshll.u32 %v8358_v11, 16 }
 0x19e   : > { %v1983_v3 = vpop.f32.mrf.mxu1  ;;  %v2713_v8 = vpop.f32.mrf.mxu0  ;;  %v4130_v10 = vshrl.u32 %v8337_v41, 16  ;;  %v4129_v34 = vsel %vm421_vm0, %v4124_v6, %v4128_v56  ;;  %v4142_v51 = vshll.u32 %v8365_v32, 16 }
 0x19f   : > { %v8367_v20 = vadd.f32 %v6708_v13, %v2128_v46  ;;  %v2126_v30 = vadd.f32 %v1983_v3, %v8082_v54  ;;  %v4610_v54 = vsel %vm1233_vm1, %v4607_v43, %v4609_v27  ;;  %v4138_v13 = vshrl.u32 %v8358_v11, 16 }
 0x1a0   : > { %v6645_v36 = vpop.f32.mrf.mxu1  ;;  %v6709_v0 = vpop.f32.mrf.mxu0  ;;  %v4136_v41 = vrot.slane %v4134_v17, 1 }
 0x1a1   : > { %v8372_v39 = vadd.f32 %v2713_v8, %v2126_v30  ;;  %v2129_v33 = vadd.f32 %v6645_v36, %v8088_v57  ;;  %v4132_v30 = vor.u32 %v4130_v10, %v4128_v56 }
 0x1a2   : > { %v1986_v40 = vpop.f32.mrf.mxu1  ;;  %v2716_v28 = vpop.f32.mrf.mxu0 }
 0x1a3   : > { %v8381_v46 = vadd.f32 %v6709_v0, %v2129_v33  ;;  %v2127_v3 = vadd.f32 %v1986_v40, %v8091_v44  ;;  %v4140_v44 = vor.u32 %v4138_v13, %v4136_v41  ;;  %v4144_v33 = vrot.slane %v4142_v51, 1 }
 0x1a4   : > { %v6648_v57 = vpop.f32.mrf.mxu1  ;;  %v6712_v8 = vpop.f32.mrf.mxu0  ;;  %6903 = vmatmul.mubr.bf16.gmra.mxu1 %v4121_v37  ;;  %6967 = vmatmul.mubr.bf16.gmra.mxu0 %v4608_v48  ;;  %v4613_v40 = vrot.slane %v8365_v32, 1  ;;  %v8393_v37 = vld [vmem:[%s7279_s26 + $0xa0] sm:$0xff]   ;;  %v4137_v10 = vsel %vm421_vm0, %v4132_v30, %v4136_v41  ;;  %v4615_v41 = vrot.slane %v8386_v23, 1  ;;  %v8414_v30 = vld [vmem:[%s7279_s26 + $0xa8] sm:$0xff]  }
 0x1a5   : > { %v8388_v6 = vadd.f32 %v2716_v28, %v2127_v3  ;;  %v2132_v43 = vadd.f32 %v6648_v57, %v8096_v61  ;;  %6906 = vmatprep.mubr.bf16.mxu1 %v4129_v34  ;;  %6970 = vmatprep.mubr.bf16.mxu0 %v4610_v54  ;;  %v4612_v3 = vsel %vm1233_vm1, %v4609_v27, %v4611_v5  ;;  %v4150_v61 = vshll.u32 %v8386_v23, 16 }
 0x1a6   : > { %v1999_v36 = vpop.f32.mrf.mxu1  ;;  %v2729_v0 = vpop.f32.mrf.mxu0  ;;  %v4146_v54 = vshrl.u32 %v8365_v32, 16  ;;  %v4145_v57 = vsel %vm421_vm0, %v4140_v44, %v4144_v33  ;;  %v4158_v27 = vshll.u32 %v8393_v37, 16 }
 0x1a7   : > { %v8395_v48 = vadd.f32 %v6712_v8, %v2132_v43  ;;  %v2130_v11 = vadd.f32 %v1999_v36, %v8100_v50  ;;  %v4614_v50 = vsel %vm1233_vm1, %v4611_v5, %v4613_v40  ;;  %v4154_v8 = vshrl.u32 %v8386_v23, 16 }
 0x1a8   : > { %v6649_v17 = vpop.f32.mrf.mxu1  ;;  %v6713_v28 = vpop.f32.mrf.mxu0  ;;  %v4152_v32 = vrot.slane %v4150_v61, 1 }
 0x1a9   : > { %v8400_v34 = vadd.f32 %v2729_v0, %v2130_v11  ;;  %v2133_v56 = vadd.f32 %v6649_v17, %v8106_v45  ;;  %v4148_v11 = vor.u32 %v4146_v54, %v4144_v33 }
 0x1aa   : > { %v2002_v13 = vpop.f32.mrf.mxu1  ;;  %v2732_v51 = vpop.f32.mrf.mxu0 }
 0x1ab   : > { %v8409_v43 = vadd.f32 %v6713_v28, %v2133_v56  ;;  %v2131_v36 = vadd.f32 %v2002_v13, %v8109_v9  ;;  %v4156_v9 = vor.u32 %v4154_v8, %v4152_v32  ;;  %v4160_v56 = vrot.slane %v4158_v27, 1 }
 0x1ac   : > { %v6652_v45 = vpop.f32.mrf.mxu1  ;;  %v6716_v0 = vpop.f32.mrf.mxu0  ;;  %6907 = vmatmul.mubr.bf16.gmra.mxu1 %v4137_v10  ;;  %6971 = vmatmul.mubr.bf16.gmra.mxu0 %v4612_v3  ;;  %v4617_v13 = vrot.slane %v8393_v37, 1  ;;  %v8421_v10 = vld [vmem:[%s7279_s26 + $0xb0] sm:$0xff]   ;;  %v4153_v54 = vsel %vm421_vm0, %v4148_v11, %v4152_v32  ;;  %v4619_v32 = vrot.slane %v8414_v30, 1  ;;  %v8442_v11 = vld [vmem:[%s7279_s26 + $0xb8] sm:$0xff]  }
 0x1ad   : > { %v8416_v44 = vadd.f32 %v2732_v51, %v2131_v36  ;;  %v2136_v5 = vadd.f32 %v6652_v45, %v8114_v16  ;;  %6910 = vmatprep.mubr.bf16.mxu1 %v4145_v57  ;;  %6974 = vmatprep.mubr.bf16.mxu0 %v4614_v50  ;;  %v4616_v36 = vsel %vm1233_vm1, %v4613_v40, %v4615_v41  ;;  %v4166_v16 = vshll.u32 %v8414_v30, 16 }
 0x1ae   : > { %v2015_v17 = vpop.f32.mrf.mxu1  ;;  %v2745_v28 = vpop.f32.mrf.mxu0  ;;  %v4162_v50 = vshrl.u32 %v8393_v37, 16  ;;  %v4161_v45 = vsel %vm421_vm0, %v4156_v9, %v4160_v56  ;;  %v4174_v40 = vshll.u32 %v8421_v10, 16 }
 0x1af   : > { %v8423_v3 = vadd.f32 %v6716_v0, %v2136_v5  ;;  %v2134_v23 = vadd.f32 %v2015_v17, %v8118_v21  ;;  %v4618_v21 = vsel %vm1233_vm1, %v4615_v41, %v4617_v13  ;;  %v4170_v0 = vshrl.u32 %v8414_v30, 16 }
 0x1b0   : > { %v6653_v61 = vpop.f32.mrf.mxu1  ;;  %v6717_v51 = vpop.f32.mrf.mxu0  ;;  %v4168_v37 = vrot.slane %v4166_v16, 1 }
 0x1b1   : > { %v8428_v57 = vadd.f32 %v2745_v28, %v2134_v23  ;;  %v2137_v33 = vadd.f32 %v6653_v61, %v8124_v38  ;;  %v4164_v23 = vor.u32 %v4162_v50, %v4160_v56 }
 0x1b2   : > { %v2018_v8 = vpop.f32.mrf.mxu1  ;;  %v2748_v27 = vpop.f32.mrf.mxu0 }
 0x1b3   : > { %v8437_v5 = vadd.f32 %v6717_v51, %v2137_v33  ;;  %v2135_v17 = vadd.f32 %v2018_v8, %v8127_v42  ;;  %v4172_v42 = vor.u32 %v4170_v0, %v4168_v37  ;;  %v4176_v33 = vrot.slane %v4174_v40, 1 }
 0x1b4   : > { %v6656_v38 = vpop.f32.mrf.mxu1  ;;  %v6720_v28 = vpop.f32.mrf.mxu0  ;;  %6911 = vmatmul.mubr.bf16.gmra.mxu1 %v4153_v54  ;;  %6975 = vmatmul.mubr.bf16.gmra.mxu0 %v4616_v36  ;;  %v4621_v8 = vrot.slane %v8421_v10, 1  ;;  %v8449_v54 = vld [vmem:[%s7279_s26 + $0xc0] sm:$0xff]   ;;  %v4169_v50 = vsel %vm421_vm0, %v4164_v23, %v4168_v37  ;;  %v4623_v37 = vrot.slane %v8442_v11, 1  ;;  %v7215_v23 = vld [vmem:[%s7279_s26 + $0xc8] sm:$0xff]  }
 0x1b5   : > { %v8444_v9 = vadd.f32 %v2748_v27, %v2135_v17  ;;  %v2140_v41 = vadd.f32 %v6656_v38, %v8132_v47  ;;  %6914 = vmatprep.mubr.bf16.mxu1 %v4161_v45  ;;  %6978 = vmatprep.mubr.bf16.mxu0 %v4618_v21  ;;  %v4620_v17 = vsel %vm1233_vm1, %v4617_v13, %v4619_v32  ;;  %v4182_v47 = vshll.u32 %v8442_v11, 16 }
 0x1b6   : > { %v2031_v61 = vpop.f32.mrf.mxu1  ;;  %v2761_v51 = vpop.f32.mrf.mxu0  ;;  %v4178_v21 = vshrl.u32 %v8421_v10, 16  ;;  %v4177_v38 = vsel %vm421_vm0, %v4172_v42, %v4176_v33  ;;  %v4190_v13 = vshll.u32 %v8449_v54, 16 }
 0x1b7   : > { %v8451_v36 = vadd.f32 %v6720_v28, %v2140_v41  ;;  %v2138_v30 = vadd.f32 %v2031_v61, %v8136_v58  ;;  %v4622_v58 = vsel %vm1233_vm1, %v4619_v32, %v4621_v8  ;;  %v4186_v28 = vshrl.u32 %v8442_v11, 16 }
 0x1b8   : > { %v6657_v16 = vpop.f32.mrf.mxu1  ;;  %v6721_v27 = vpop.f32.mrf.mxu0  ;;  %v4184_v10 = vrot.slane %v4182_v47, 1 }
 0x1b9   : > { %v8456_v45 = vadd.f32 %v2761_v51, %v2138_v30  ;;  %v2141_v56 = vadd.f32 %v6657_v16, %v8142_v49  ;;  %v4180_v30 = vor.u32 %v4178_v21, %v4176_v33 }
 0x1ba   : > { %v2034_v0 = vpop.f32.mrf.mxu1  ;;  %v2764_v40 = vpop.f32.mrf.mxu0 }
 0x1bb   : > { %v8465_v41 = vadd.f32 %v6721_v27, %v2141_v56  ;;  %v2139_v61 = vadd.f32 %v2034_v0, %v8145_v29  ;;  %v4188_v56 = vor.u32 %v4186_v28, %v4184_v10  ;;  %v4192_v29 = vrot.slane %v4190_v13, 1 }
 0x1bc   : > { %v6660_v49 = vpop.f32.mrf.mxu1  ;;  %v6724_v51 = vpop.f32.mrf.mxu0  ;;  %6915 = vmatmul.mubr.bf16.gmra.mxu1 %v4169_v50  ;;  %6979 = vmatmul.mubr.bf16.gmra.mxu0 %v4620_v17  ;;  %v4625_v0 = vrot.slane %v8449_v54, 1  ;;  %v4185_v21 = vsel %vm421_vm0, %v4180_v30, %v4184_v10 }
 0x1bd   : > { %8840 = vst [vmem:[#allocation8_spill] sm:$0xff] %v8465_v41  ;;  %v8470_v42 = vadd.f32 %v2764_v40, %v2139_v61  ;;  %v2144_v32 = vadd.f32 %v6660_v49, %v8150_v18  ;;  %6918 = vmatprep.mubr.bf16.mxu1 %v4177_v38  ;;  %6982 = vmatprep.mubr.bf16.mxu0 %v4622_v58  ;;  %v8475_v41 = vld [vmem:[%s7279_s26 + $0xd0] sm:$0xff]   ;;  %v4198_v18 = vshll.u32 %v7215_v23, 16  ;;  %v4194_v58 = vshrl.u32 %v8449_v54, 16 }
 0x1be   : > { %v2047_v16 = vpop.f32.mrf.mxu1  ;;  %v2777_v27 = vpop.f32.mrf.mxu0  ;;  %v4624_v40 = vsel %vm1233_vm1, %v4621_v8, %v4623_v37  ;;  %v4193_v61 = vsel %vm421_vm0, %v4188_v56, %v4192_v29  ;;  %v4626_v49 = vsel %vm1233_vm1, %v4623_v37, %v4625_v0  ;;  %v4627_v54 = vrot.slane %v7215_v23, 1 }
 0x1bf   : > { %v8477_v17 = vadd.f32 %v6724_v51, %v2144_v32  ;;  %v2142_v11 = vadd.f32 %v2047_v16, %v8156_v53  ;;  %v4202_v53 = vshrl.u32 %v7215_v23, 16  ;;  %v4206_v51 = vshll.u32 %v8475_v41, 16 }
 0x1c0   : > { %v6661_v47 = vpop.f32.mrf.mxu1  ;;  %v6725_v50 = vpop.f32.mrf.mxu0  ;;  %v4200_v10 = vrot.slane %v4198_v18, 1  ;;  %v4196_v37 = vor.u32 %v4194_v58, %v4192_v29  ;;  %v8845_v29 = vld [vmem:[#allocation6_spill] sm:$0xff] }
 0x1c1   : > { %v8481_v38 = vadd.f32 %v2777_v27, %v2142_v11  ;;  %v2145_v33 = vadd.f32 %v6661_v47, %v8162_v2  ;;  %v8842_v27 = vld [vmem:[#allocation3_spill] sm:$0xff]  ;;  %v7217_v11 = vld [vmem:[%s7279_s26 + $0xd8] ss:$0 sps:$4 sm:$0x11]   ;;  %s7011_s26 = smul.u32 192, %s8869_s16 }
 0x1c2   : > { %v2050_v28 = vpop.f32.mrf.mxu1  ;;  %v2780_v13 = vpop.f32.mrf.mxu0 }
 0x1c3   : > { %8841 = vst [vmem:[#allocation10_spill] sm:$0xff] %v8481_v38  ;;  %v8489_v8 = vadd.f32 %v6725_v50, %v2145_v33  ;;  %v2143_v32 = vadd.f32 %v2050_v28, %v8165_v24  ;;  %v4204_v50 = vor.u32 %v4202_v53, %v4200_v10  ;;  %v4208_v33 = vrot.slane %v4206_v51, 1  ;;  %s8691_s29 = scalar_lea.vmem %s8774_s2, %s7011_s26 }
 0x1c4   : > { %v6664_v16 = vpop.f32.mrf.mxu1  ;;  %v6728_v2 = vpop.f32.mrf.mxu0  ;;  %6919 = vmatmul.mubr.bf16.gmra.mxu1 %v4185_v21  ;;  %6983 = vmatmul.mubr.bf16.gmra.mxu0 %v4624_v40  ;;  %v4629_v24 = vrot.slane %v8475_v41, 1  ;;  %v8844_v21 = vld [vmem:[#allocation5_spill] sm:$0xff]  ;;  %v4214_v53 = vshll.u32 %v7217_v11, 16 }
 0x1c5   : > { %v8492_v30 = vadd.f32 %v2780_v13, %v2143_v32  ;;  %v2148_v56 = vadd.f32 %v6664_v16, %v8842_v27  ;;  %6922 = vmatprep.mubr.bf16.mxu1 %v4193_v61  ;;  %6986 = vmatprep.mubr.bf16.mxu0 %v4626_v49  ;;  %v4628_v13 = vsel %vm1233_vm1, %v4625_v0, %v4627_v54  ;;  %v4210_v32 = vshrl.u32 %v8475_v41, 16 }
 0x1c6   : > { %v2063_v47 = vpop.f32.mrf.mxu1  ;;  %v2793_v38 = vpop.f32.mrf.mxu0  ;;  %v4201_v49 = vsel %vm421_vm0, %v4196_v37, %v4200_v10  ;;  %v4630_v27 = vsel %vm1233_vm1, %v4627_v54, %v4629_v24  ;;  %v4216_v37 = vrot.slane %v4214_v53, 1 }
 0x1c7   : > { %v8497_v28 = vadd.f32 %v6728_v2, %v2148_v56  ;;  %v2146_v40 = vadd.f32 %v2063_v47, %v8844_v21  ;;  %v4209_v2 = vsel %vm421_vm0, %v4204_v50, %v4208_v33  ;;  %v8847_v47 = vld [vmem:[#allocation7_spill] sm:$0xff]  ;;  %v4212_v41 = vor.u32 %v4210_v32, %v4208_v33 }
 0x1c8   : > { %v6665_v18 = vpop.f32.mrf.mxu1  ;;  %v6729_v23 = vpop.f32.mrf.mxu0 }
 0x1c9   : > { %8843 = vst [vmem:[#allocation15_spill] sm:$0xff] %v8497_v28  ;;  %v8502_v61 = vadd.f32 %v2793_v38, %v2146_v40  ;;  %v2149_v58 = vadd.f32 %v6665_v18, %v8845_v29  ;;  %v8848_v40 = vld [vmem:[#allocation2_spill] sm:$0xff]  ;;  %v4631_v18 = vrot.slane %v7217_v11, 1  ;;  %v4217_v32 = vsel %vm421_vm0, %v4212_v41, %v4216_v37  ;;  %v8852_v41 = vld [vmem:[#allocation12_spill] sm:$0xff] }
 0x1ca   : > { %v2066_v51 = vpop.f32.mrf.mxu1  ;;  %v2796_v16 = vpop.f32.mrf.mxu0 }
 0x1cb   : > { %v8508_v56 = vadd.f32 %v6729_v23, %v2149_v58  ;;  %v2147_v21 = vadd.f32 %v2066_v51, %v8847_v47  ;;  %v8849_v23 = vld [vmem:[#allocation4_spill] sm:$0xff] }
 0x1cc   : > { %v6668_v0 = vpop.f32.mrf.mxu1  ;;  %v6732_v28 = vpop.f32.mrf.mxu0  ;;  %6923 = vmatmul.mubr.bf16.gmra.mxu1 %v4201_v49  ;;  %6987 = vmatmul.mubr.bf16.gmra.mxu0 %v4628_v13  ;;  %v8850_v13 = vld [vmem:[#allocation9_spill] sm:$0xff]  ;;  %v4632_v49 = vsel %vm1233_vm1, %v4629_v24, %v4631_v18 }
 0x1cd   : > { %8846 = vst [vmem:[#allocation16_spill] sm:$0xff] %v8508_v56  ;;  %v8511_v38 = vadd.f32 %v2796_v16, %v2147_v21  ;;  %v2152_v10 = vadd.f32 %v6668_v0, %v8848_v40  ;;  %6926 = vmatprep.mubr.bf16.mxu1 %v4209_v2  ;;  %6990 = vmatprep.mubr.bf16.mxu0 %v4630_v27  ;;  %v8851_v0 = vld [vmem:[#allocation11_spill] sm:$0xff] }
 0x1ce   : > { %v2079_v50 = vpop.f32.mrf.mxu1  ;;  %v2809_v29 = vpop.f32.mrf.mxu0 }
 0x1cf   : > { %v8514_v54 = vadd.f32 %v6732_v28, %v2152_v10  ;;  %v2150_v58 = vadd.f32 %v2079_v50, %v8849_v23 }
 0x1d0   : > { %v6669_v51 = vpop.f32.mrf.mxu1  ;;  %v6733_v47 = vpop.f32.mrf.mxu0 }
 0x1d1   : > { %v8517_v56 = vadd.f32 %v2809_v29, %v2150_v58  ;;  %v2153_v33 = vadd.f32 %v6669_v51, %v8850_v13  ;;  %v8853_v58 = vld [vmem:[#allocation13_spill] sm:$0xff] }
 0x1d2   : > { %v2082_v16 = vpop.f32.mrf.mxu1  ;;  %v2812_v2 = vpop.f32.mrf.mxu0 }
 0x1d3   : > { %v8522_v53 = vadd.f32 %v6733_v47, %v2153_v33  ;;  %v2151_v11 = vadd.f32 %v2082_v16, %v8219_v52 }
 0x1d4   : > { %v6672_v28 = vpop.f32.mrf.mxu1  ;;  %v6736_v27 = vpop.f32.mrf.mxu0  ;;  %6927 = vmatmul.mubr.bf16.gmra.mxu1 %v4217_v32  ;;  %6991 = vmatmul.mubr.bf16.gmra.mxu0 %v4632_v49 }
 0x1d5   : > { %v8525_v21 = vadd.f32 %v2812_v2, %v2151_v11  ;;  %v2156_v40 = vadd.f32 %v6672_v28, %v8851_v0 }
 0x1d6   : > { %v2095_v10 = vpop.f32.mrf.mxu1  ;;  %v2825_v50 = vpop.f32.mrf.mxu0 }
 0x1d7   : > { %v8528_v29 = vadd.f32 %v6736_v27, %v2156_v40  ;;  %v2154_v24 = vadd.f32 %v2095_v10, %v8852_v41 }
 0x1d8   : > { %v6673_v37 = vpop.f32.mrf.mxu1  ;;  %v6737_v18 = vpop.f32.mrf.mxu0 }
 0x1d9   : > { %v8531_v23 = vadd.f32 %v2825_v50, %v2154_v24  ;;  %v2157_v52 = vadd.f32 %v6673_v37, %v8853_v58 }
 0x1da   : > { %v2098_v51 = vpop.f32.mrf.mxu1  ;;  %v2828_v47 = vpop.f32.mrf.mxu0 }
 0x1db   : > { %v8534_v13 = vadd.f32 %v6737_v18, %v2157_v52  ;;  %v2155_v33 = vadd.f32 %v2098_v51, %v8247_v25 }
 0x1dc   : > { %v6756_v32 = vpop.f32.mrf.mxu1  ;;  %v6820_v49 = vpop.f32.mrf.mxu0 }
 0x1dd   : > { %v8537_v16 = vadd.f32 %v2828_v47, %v2155_v33  ;;  %v3257_v2 = vadd.f32 %v6756_v32, %v8255_v7 }
 0x1de   : > { %v3064_v11 = vpop.f32.mrf.mxu1  ;;  %v3594_v28 = vpop.f32.mrf.mxu0 }
 0x1df   : > { %v8540_v27 = vadd.f32 %v6820_v49, %v3257_v2  ;;  %v3255_v0 = vadd.f32 %v3064_v11, %v8260_v26 }
 0x1e0   : > { %v6757_v40 = vpop.f32.mrf.mxu1  ;;  %v6821_v10 = vpop.f32.mrf.mxu0 }
 0x1e1   : > { %v8543_v50 = vadd.f32 %v3594_v28, %v3255_v0  ;;  %v3258_v41 = vadd.f32 %v6757_v40, %v8269_v22 }
 0x1e2   : > { %v3067_v24 = vpop.f32.mrf.mxu1  ;;  %v3597_v25 = vpop.f32.mrf.mxu0 }
 0x1e3   : > { %v8546_v37 = vadd.f32 %v6821_v10, %v3258_v41  ;;  %v3256_v18 = vadd.f32 %v3067_v24, %v8275_v1 }
 0x1e4   : > { %v6760_v58 = vpop.f32.mrf.mxu1  ;;  %v6824_v7 = vpop.f32.mrf.mxu0 }
 0x1e5   : > { %v8549_v52 = vadd.f32 %v3597_v25, %v3256_v18  ;;  %v3261_v51 = vadd.f32 %v6760_v58, %v8283_v35 }
 0x1e6   : > { %v3080_v47 = vpop.f32.mrf.mxu1  ;;  %v3610_v26 = vpop.f32.mrf.mxu0 }
 0x1e7   : > { %v8552_v33 = vadd.f32 %v6824_v7, %v3261_v51  ;;  %v3259_v32 = vadd.f32 %v3080_v47, %v8288_v15 }
 0x1e8   : > { %v6761_v49 = vpop.f32.mrf.mxu1  ;;  %v6825_v22 = vpop.f32.mrf.mxu0 }
 0x1e9   : > { %v8555_v2 = vadd.f32 %v3610_v26, %v3259_v32  ;;  %v3262_v11 = vadd.f32 %v6761_v49, %v8297_v63 }
 0x1ea   : > { %v3083_v28 = vpop.f32.mrf.mxu1  ;;  %v3613_v1 = vpop.f32.mrf.mxu0 }
 0x1eb   : > { %v8558_v0 = vadd.f32 %v6825_v22, %v3262_v11  ;;  %v3260_v40 = vadd.f32 %v3083_v28, %v8303_v12 }
 0x1ec   : > { %v6764_v10 = vpop.f32.mrf.mxu1  ;;  %v6828_v35 = vpop.f32.mrf.mxu0 }
 0x1ed   : > { %v8561_v41 = vadd.f32 %v3613_v1, %v3260_v40  ;;  %v3265_v24 = vadd.f32 %v6764_v10, %v8311_v55 }
 0x1ee   : > { %v3096_v25 = vpop.f32.mrf.mxu1  ;;  %v3626_v15 = vpop.f32.mrf.mxu0 }
 0x1ef   : > { %v8564_v18 = vadd.f32 %v6828_v35, %v3265_v24  ;;  %v3263_v58 = vadd.f32 %v3096_v25, %v8316_v60 }
 0x1f0   : > { %v6765_v7 = vpop.f32.mrf.mxu1  ;;  %v6829_v63 = vpop.f32.mrf.mxu0 }
 0x1f1   : > { %v8567_v51 = vadd.f32 %v3626_v15, %v3263_v58  ;;  %v3266_v47 = vadd.f32 %v6765_v7, %v8325_v31 }
 0x1f2   : > { %v3099_v26 = vpop.f32.mrf.mxu1  ;;  %v3629_v12 = vpop.f32.mrf.mxu0 }
 0x1f3   : > { %v8570_v32 = vadd.f32 %v6829_v63, %v3266_v47  ;;  %v3264_v49 = vadd.f32 %v3099_v26, %v8331_v62 }
 0x1f4   : > { %v6768_v22 = vpop.f32.mrf.mxu1  ;;  %v6832_v55 = vpop.f32.mrf.mxu0 }
 0x1f5   : > { %v8573_v11 = vadd.f32 %v3629_v12, %v3264_v49  ;;  %v3269_v28 = vadd.f32 %v6768_v22, %v8339_v59 }
 0x1f6   : > { %v3112_v1 = vpop.f32.mrf.mxu1  ;;  %v3642_v60 = vpop.f32.mrf.mxu0 }
 0x1f7   : > { %v8576_v40 = vadd.f32 %v6832_v55, %v3269_v28  ;;  %v3267_v10 = vadd.f32 %v3112_v1, %v8344_v4 }
 0x1f8   : > { %v6769_v35 = vpop.f32.mrf.mxu1  ;;  %v6833_v31 = vpop.f32.mrf.mxu0 }
 0x1f9   : > { %v8579_v24 = vadd.f32 %v3642_v60, %v3267_v10  ;;  %v3270_v25 = vadd.f32 %v6769_v35, %v8353_v14 }
 0x1fa   : > { %v3115_v15 = vpop.f32.mrf.mxu1  ;;  %v3645_v62 = vpop.f32.mrf.mxu0 }
 0x1fb   : > { %v8582_v58 = vadd.f32 %v6833_v31, %v3270_v25  ;;  %v3268_v7 = vadd.f32 %v3115_v15, %v8360_v19 }
 0x1fc   : > { %v6772_v63 = vpop.f32.mrf.mxu1  ;;  %v6836_v59 = vpop.f32.mrf.mxu0 }
 0x1fd   : > { %v8585_v47 = vadd.f32 %v3645_v62, %v3268_v7  ;;  %v3273_v26 = vadd.f32 %v6772_v63, %v8367_v20 }
 0x1fe   : > { %v3128_v12 = vpop.f32.mrf.mxu1  ;;  %v3658_v4 = vpop.f32.mrf.mxu0 }
 0x1ff   : > { %v8588_v49 = vadd.f32 %v6836_v59, %v3273_v26  ;;  %v3271_v22 = vadd.f32 %v3128_v12, %v8372_v39 }
 0x200   : > { %v6773_v55 = vpop.f32.mrf.mxu1  ;;  %v6837_v14 = vpop.f32.mrf.mxu0 }
 0x201   : > { %v8591_v28 = vadd.f32 %v3658_v4, %v3271_v22  ;;  %v3274_v1 = vadd.f32 %v6773_v55, %v8381_v46 }
 0x202   : > { %v3131_v60 = vpop.f32.mrf.mxu1  ;;  %v3661_v19 = vpop.f32.mrf.mxu0 }
 0x203   : > { %v8594_v10 = vadd.f32 %v6837_v14, %v3274_v1  ;;  %v3272_v35 = vadd.f32 %v3131_v60, %v8388_v6 }
 0x204   : > { %v6776_v31 = vpop.f32.mrf.mxu1  ;;  %v6840_v20 = vpop.f32.mrf.mxu0 }
 0x205   : > { %v8597_v25 = vadd.f32 %v3661_v19, %v3272_v35  ;;  %v3277_v15 = vadd.f32 %v6776_v31, %v8395_v48 }
 0x206   : > { %v3144_v62 = vpop.f32.mrf.mxu1  ;;  %v3674_v39 = vpop.f32.mrf.mxu0 }
 0x207   : > { %v8600_v7 = vadd.f32 %v6840_v20, %v3277_v15  ;;  %v3275_v63 = vadd.f32 %v3144_v62, %v8400_v34 }
 0x208   : > { %v6777_v59 = vpop.f32.mrf.mxu1  ;;  %v6841_v46 = vpop.f32.mrf.mxu0 }
 0x209   : > { %v8603_v26 = vadd.f32 %v3674_v39, %v3275_v63  ;;  %v3278_v12 = vadd.f32 %v6777_v59, %v8409_v43 }
 0x20a   : > { %v3147_v4 = vpop.f32.mrf.mxu1  ;;  %v3677_v6 = vpop.f32.mrf.mxu0 }
 0x20b   : > { %v8606_v22 = vadd.f32 %v6841_v46, %v3278_v12  ;;  %v3276_v55 = vadd.f32 %v3147_v4, %v8416_v44 }
 0x20c   : > { %v6780_v14 = vpop.f32.mrf.mxu1  ;;  %v6844_v48 = vpop.f32.mrf.mxu0 }
 0x20d   : > { %v8609_v1 = vadd.f32 %v3677_v6, %v3276_v55  ;;  %v3281_v60 = vadd.f32 %v6780_v14, %v8423_v3 }
 0x20e   : > { %v3160_v19 = vpop.f32.mrf.mxu1  ;;  %v3690_v34 = vpop.f32.mrf.mxu0 }
 0x20f   : > { %v8612_v35 = vadd.f32 %v6844_v48, %v3281_v60  ;;  %v3279_v31 = vadd.f32 %v3160_v19, %v8428_v57  ;;  %v8854_v19 = vld [vmem:[#allocation8_spill] sm:$0xff] }
 0x210   : > { %v6781_v20 = vpop.f32.mrf.mxu1  ;;  %v6845_v43 = vpop.f32.mrf.mxu0 }
 0x211   : > { %v8615_v15 = vadd.f32 %v3690_v34, %v3279_v31  ;;  %v3282_v62 = vadd.f32 %v6781_v20, %v8437_v5 }
 0x212   : > { %v3163_v39 = vpop.f32.mrf.mxu1  ;;  %v3693_v44 = vpop.f32.mrf.mxu0 }
 0x213   : > { %v8618_v63 = vadd.f32 %v6845_v43, %v3282_v62  ;;  %v3280_v59 = vadd.f32 %v3163_v39, %v8444_v9 }
 0x214   : > { %v6784_v46 = vpop.f32.mrf.mxu1  ;;  %v6848_v3 = vpop.f32.mrf.mxu0 }
 0x215   : > { %v8621_v12 = vadd.f32 %v3693_v44, %v3280_v59  ;;  %v3285_v4 = vadd.f32 %v6784_v46, %v8451_v36 }
 0x216   : > { %v3176_v6 = vpop.f32.mrf.mxu1  ;;  %v3706_v57 = vpop.f32.mrf.mxu0 }
 0x217   : > { %v8624_v55 = vadd.f32 %v6848_v3, %v3285_v4  ;;  %v3283_v14 = vadd.f32 %v3176_v6, %v8456_v45  ;;  %v8855_v3 = vld [vmem:[#allocation10_spill] sm:$0xff] }
 0x218   : > { %v6785_v48 = vpop.f32.mrf.mxu1  ;;  %v6849_v5 = vpop.f32.mrf.mxu0 }
 0x219   : > { %v8627_v60 = vadd.f32 %v3706_v57, %v3283_v14  ;;  %v3286_v34 = vadd.f32 %v6785_v48, %v8854_v19 }
 0x21a   : > { %v3179_v31 = vpop.f32.mrf.mxu1  ;;  %v3709_v9 = vpop.f32.mrf.mxu0 }
 0x21b   : > { %v8630_v20 = vadd.f32 %v6849_v5, %v3286_v34  ;;  %v3284_v43 = vadd.f32 %v3179_v31, %v8470_v42 }
 0x21c   : > { %v6788_v62 = vpop.f32.mrf.mxu1  ;;  %v6852_v36 = vpop.f32.mrf.mxu0 }
 0x21d   : > { %v8633_v39 = vadd.f32 %v3709_v9, %v3284_v43  ;;  %v3289_v44 = vadd.f32 %v6788_v62, %v8477_v17  ;;  %v8856_v43 = vld [vmem:[#allocation15_spill] sm:$0xff] }
 0x21e   : > { %v3192_v59 = vpop.f32.mrf.mxu1  ;;  %v3722_v45 = vpop.f32.mrf.mxu0 }
 0x21f   : > { %v8636_v46 = vadd.f32 %v6852_v36, %v3289_v44  ;;  %v3287_v4 = vadd.f32 %v3192_v59, %v8855_v3 }
 0x220   : > { %v6789_v6 = vpop.f32.mrf.mxu1  ;;  %v6853_v57 = vpop.f32.mrf.mxu0 }
 0x221   : > { %v8639_v14 = vadd.f32 %v3722_v45, %v3287_v4  ;;  %v3290_v48 = vadd.f32 %v6789_v6, %v8489_v8  ;;  %v8857_v6 = vld [vmem:[#allocation16_spill] sm:$0xff] }
 0x222   : > { %v3195_v5 = vpop.f32.mrf.mxu1  ;;  %v3725_v42 = vpop.f32.mrf.mxu0 }
 0x223   : > { %v8642_v19 = vadd.f32 %v6853_v57, %v3290_v48  ;;  %v3288_v34 = vadd.f32 %v3195_v5, %v8492_v30 }
 0x224   : > { %v6792_v31 = vpop.f32.mrf.mxu1  ;;  %v6856_v17 = vpop.f32.mrf.mxu0 }
 0x225   : > { %v8645_v9 = vadd.f32 %v3725_v42, %v3288_v34  ;;  %v3293_v62 = vadd.f32 %v6792_v31, %v8856_v43 }
 0x226   : > { %v3208_v36 = vpop.f32.mrf.mxu1  ;;  %v3738_v44 = vpop.f32.mrf.mxu0 }
 0x227   : > { %v8648_v59 = vadd.f32 %v6856_v17, %v3293_v62  ;;  %v3291_v45 = vadd.f32 %v3208_v36, %v8502_v61 }
 0x228   : > { %v6793_v3 = vpop.f32.mrf.mxu1  ;;  %v6857_v8 = vpop.f32.mrf.mxu0 }
 0x229   : > { %v8651_v4 = vadd.f32 %v3738_v44, %v3291_v45  ;;  %v3294_v57 = vadd.f32 %v6793_v3, %v8857_v6 }
 0x22a   : > { %v3211_v48 = vpop.f32.mrf.mxu1  ;;  %v3741_v30 = vpop.f32.mrf.mxu0 }
 0x22b   : > { %v8654_v5 = vadd.f32 %v6857_v8, %v3294_v57  ;;  %v3292_v42 = vadd.f32 %v3211_v48, %v8511_v38 }
 0x22c   : > { %v6796_v34 = vpop.f32.mrf.mxu1  ;;  %v6860_v31 = vpop.f32.mrf.mxu0 }
 0x22d   : > { %v8657_v43 = vadd.f32 %v3741_v30, %v3292_v42  ;;  %v3297_v17 = vadd.f32 %v6796_v34, %v8514_v54 }
 0x22e   : > { %v3224_v62 = vpop.f32.mrf.mxu1  ;;  %v3754_v61 = vpop.f32.mrf.mxu0 }
 0x22f   : > { %v8660_v36 = vadd.f32 %v6860_v31, %v3297_v17  ;;  %v3295_v44 = vadd.f32 %v3224_v62, %v8517_v56 }
 0x230   : > { %v6797_v45 = vpop.f32.mrf.mxu1  ;;  %v6861_v3 = vpop.f32.mrf.mxu0 }
 0x231   : > { %v8663_v6 = vadd.f32 %v3754_v61, %v3295_v44  ;;  %v3298_v8 = vadd.f32 %v6797_v45, %v8522_v53 }
 0x232   : > { %v3227_v57 = vpop.f32.mrf.mxu1  ;;  %v3757_v38 = vpop.f32.mrf.mxu0 }
 0x233   : > { %v8666_v48 = vadd.f32 %v6861_v3, %v3298_v8  ;;  %v3296_v30 = vadd.f32 %v3227_v57, %v8525_v21 }
 0x234   : > { %v6800_v42 = vpop.f32.mrf.mxu1  ;;  %v6864_v54 = vpop.f32.mrf.mxu0 }
 0x235   : > { %v8669_v34 = vadd.f32 %v3757_v38, %v3296_v30  ;;  %v3301_v31 = vadd.f32 %v6800_v42, %v8528_v29 }
 0x236   : > { %v3240_v17 = vpop.f32.mrf.mxu1  ;;  %v3770_v56 = vpop.f32.mrf.mxu0 }
 0x237   : > { %8858 = vst [vmem:[#allocation17_spill] sm:$0xff] %v8669_v34  ;;  %v8672_v62 = vadd.f32 %v6864_v54, %v3301_v31  ;;  %v3299_v61 = vadd.f32 %v3240_v17, %v8531_v23 }
 0x238   : > { %v6801_v44 = vpop.f32.mrf.mxu1  ;;  %v6865_v53 = vpop.f32.mrf.mxu0 }
 0x239   : > { %8859 = vst [vmem:[#allocation18_spill] sm:$0xff] %v8672_v62  ;;  %v8675_v45 = vadd.f32 %v3770_v56, %v3299_v61  ;;  %v3302_v3 = vadd.f32 %v6801_v44, %v8534_v13 }
 0x23a   : > { %v3243_v21 = vpop.f32.mrf.mxu1  ;;  %v3773_v8 = vpop.f32.mrf.mxu0 }
 0x23b   : > { %8860 = vst [vmem:[#allocation14_spill] sm:$0xff] %v8675_v45  ;;  %v8678_v57 = vadd.f32 %v6865_v53, %v3302_v3  ;;  %v3300_v38 = vadd.f32 %v3243_v21, %v8537_v16 }
 0x23c   : > { %v6884_v29 = vpop.f32.mrf.mxu1  ;;  %v6948_v30 = vpop.f32.mrf.mxu0 }
 0x23d   : > { %8861 = vst [vmem:[#allocation19_spill] sm:$0xff] %v8678_v57  ;;  %v8681_v42 = vadd.f32 %v3773_v8, %v3300_v38  ;;  %v4517_v23 = vadd.f32 %v6884_v29, %v8540_v27 }
 0x23e   : > { %v4324_v54 = vpop.f32.mrf.mxu1  ;;  %v4739_v31 = vpop.f32.mrf.mxu0 }
 0x23f   : > { %8862 = vst [vmem:[#allocation20_spill] sm:$0xff] %v8681_v42  ;;  %v4515_v17 = vadd.f32 %v4324_v54, %v8543_v50  ;;  %v4932_v3 = vadd.f32 %v6948_v30, %v4517_v23 }
 0x240   : > { %v6885_v56 = vpop.f32.mrf.mxu1  ;;  %v6949_v61 = vpop.f32.mrf.mxu0 }
 0x241   : > { %v4518_v13 = vadd.f32 %v6885_v56, %v8546_v37  ;;  %v4930_v57 = vadd.f32 %v4739_v31, %v4515_v17 }
 0x242   : > { %v4327_v44 = vpop.f32.mrf.mxu1  ;;  %v4742_v53 = vpop.f32.mrf.mxu0 }
 0x243   : > { %v4933_v16 = vadd.f32 %v6949_v61, %v4518_v13  ;;  %v4516_v21 = vadd.f32 %v4327_v44, %v8549_v52  ;;  %v5349_v30 = vmul.f32 %v4930_v57, %v4930_v57 }
 0x244   : > { %v6888_v27 = vpop.f32.mrf.mxu1  ;;  %v6952_v50 = vpop.f32.mrf.mxu0 }
 0x245   : > { %v5995_v8 = vpack.c.bf16 %v4933_v16, %v4932_v3  ;;  %v4931_v38 = vadd.f32 %v4742_v53, %v4516_v21  ;;  %v4521_v37 = vadd.f32 %v6888_v27, %v8552_v33  ;;  %v5352_v13 = vmul.f32 %v4933_v16, %v4933_v16 }
 0x246   : > { %v4340_v29 = vpop.f32.mrf.mxu1  ;;  %v4755_v54 = vpop.f32.mrf.mxu0 }
 0x247   : > { %6107 = vst [vmem:[%s8691_s29 + $0x8] sm:$0xff] %v5995_v8   ;;  %v5990_v31 = vpack.c.bf16 %v4931_v38, %v4930_v57  ;;  %v5295_v23 = vadd.f32 %v4931_v38, %v4930_v57  ;;  %v5350_v52 = vmul.f32 %v4931_v38, %v4931_v38  ;;  %v4519_v17 = vadd.f32 %v4340_v29, %v8555_v2 }
 0x248   : > { %v6889_v56 = vpop.f32.mrf.mxu1  ;;  %v6953_v61 = vpop.f32.mrf.mxu0  ;;  %v4936_v53 = vadd.f32 %v6952_v50, %v4521_v37 }
 0x249   : > { %5991 = vst [vmem:[%s8691_s29] sm:$0xff] %v5990_v31   ;;  %v5397_v44 = vadd.f32 %v5350_v52, %v5349_v30  ;;  %v5297_v42 = vadd.f32 %v5295_v23, %v4933_v16  ;;  %v4522_v3 = vadd.f32 %v6889_v56, %v8558_v0  ;;  %v4934_v21 = vadd.f32 %v4755_v54, %v4519_v17 }
 0x24a   : > { %v4343_v33 = vpop.f32.mrf.mxu1  ;;  %v4758_v27 = vpop.f32.mrf.mxu0  ;;  %v5355_v30 = vmul.f32 %v4936_v53, %v4936_v53 }
 0x24b   : > { %v5399_v45 = vadd.f32 %v5397_v44, %v5352_v13  ;;  %v4937_v8 = vadd.f32 %v6953_v61, %v4522_v3  ;;  %v4520_v57 = vadd.f32 %v4343_v33, %v8561_v41  ;;  %v5298_v38 = vadd.f32 %v5297_v42, %v4934_v21 }
 0x24c   : > { %v5353_v62 = vmul.f32 %v4934_v21, %v4934_v21  ;;  %v6892_v2 = vpop.f32.mrf.mxu1  ;;  %v6956_v29 = vpop.f32.mrf.mxu0 }
 0x24d   : > { %v6005_v34 = vpack.c.bf16 %v4937_v8, %v4936_v53  ;;  %v4935_v31 = vadd.f32 %v4758_v27, %v4520_v57  ;;  %v5300_v23 = vadd.f32 %v5298_v38, %v4936_v53  ;;  %v4525_v54 = vadd.f32 %v6892_v2, %v8564_v18 }
 0x24e   : > { %v5400_v16 = vadd.f32 %v5399_v45, %v5353_v62  ;;  %v4356_v0 = vpop.f32.mrf.mxu1  ;;  %v4771_v50 = vpop.f32.mrf.mxu0  ;;  %v5356_v17 = vmul.f32 %v4937_v8, %v4937_v8 }
 0x24f   : > { %6109 = vst [vmem:[%s8691_s29 + $0x18] sm:$0xff] %v6005_v34   ;;  %v6000_v37 = vpack.c.bf16 %v4935_v31, %v4934_v21  ;;  %v5301_v52 = vadd.f32 %v5300_v23, %v4937_v8  ;;  %v4523_v61 = vadd.f32 %v4356_v0, %v8567_v51  ;;  %v4940_v3 = vadd.f32 %v6956_v29, %v4525_v54 }
 0x250   : > { %v5402_v56 = vadd.f32 %v5400_v16, %v5355_v30  ;;  %v6893_v41 = vpop.f32.mrf.mxu1  ;;  %v6957_v42 = vpop.f32.mrf.mxu0 }
 0x251   : > { %6108 = vst [vmem:[%s8691_s29 + $0x10] sm:$0xff] %v6000_v37   ;;  %v4526_v13 = vadd.f32 %v6893_v41, %v8570_v32  ;;  %v4938_v33 = vadd.f32 %v4771_v50, %v4523_v61  ;;  %v5359_v23 = vmul.f32 %v4940_v3, %v4940_v3 }
 0x252   : > { %v5403_v44 = vadd.f32 %v5402_v56, %v5356_v17  ;;  %v4359_v62 = vpop.f32.mrf.mxu1  ;;  %v4774_v45 = vpop.f32.mrf.mxu0 }
 0x253   : > { %v4941_v53 = vadd.f32 %v6957_v42, %v4526_v13  ;;  %v4524_v34 = vadd.f32 %v4359_v62, %v8573_v11 }
 0x254   : > { %v6896_v21 = vpop.f32.mrf.mxu1  ;;  %v6960_v18 = vpop.f32.mrf.mxu0 }
 0x255   : > { %v6015_v27 = vpack.c.bf16 %v4941_v53, %v4940_v3  ;;  %v4939_v8 = vadd.f32 %v4774_v45, %v4524_v34  ;;  %v4529_v32 = vadd.f32 %v6896_v21, %v8576_v40 }
 0x256   : > { %v4372_v57 = vpop.f32.mrf.mxu1  ;;  %v4787_v38 = vpop.f32.mrf.mxu0 }
 0x257   : > { %6111 = vst [vmem:[%s8691_s29 + $0x28] sm:$0xff] %v6015_v27   ;;  %v6010_v2 = vpack.c.bf16 %v4939_v8, %v4938_v33  ;;  %v5303_v51 = vadd.f32 %v5301_v52, %v4939_v8  ;;  %v5358_v31 = vmul.f32 %v4939_v8, %v4939_v8  ;;  %v4527_v30 = vadd.f32 %v4372_v57, %v8579_v24 }
 0x258   : > { %v6897_v29 = vpop.f32.mrf.mxu1  ;;  %v6961_v16 = vpop.f32.mrf.mxu0  ;;  %v4944_v56 = vadd.f32 %v6960_v18, %v4529_v32 }
 0x259   : > { %6110 = vst [vmem:[%s8691_s29 + $0x20] sm:$0xff] %v6010_v2   ;;  %v5405_v11 = vadd.f32 %v5403_v44, %v5358_v31  ;;  %v5304_v0 = vadd.f32 %v5303_v51, %v4940_v3  ;;  %v4530_v50 = vadd.f32 %v6897_v29, %v8582_v58  ;;  %v4942_v37 = vadd.f32 %v4787_v38, %v4527_v30 }
 0x25a   : > { %v4375_v54 = vpop.f32.mrf.mxu1  ;;  %v4790_v17 = vpop.f32.mrf.mxu0 }
 0x25b   : > { %v5406_v41 = vadd.f32 %v5405_v11, %v5359_v23  ;;  %v4945_v52 = vadd.f32 %v6961_v16, %v4530_v50  ;;  %v4528_v42 = vadd.f32 %v4375_v54, %v8585_v47  ;;  %v5306_v40 = vadd.f32 %v5304_v0, %v4942_v37 }
 0x25c   : > { %v5361_v61 = vmul.f32 %v4942_v37, %v4942_v37  ;;  %v6900_v24 = vpop.f32.mrf.mxu1  ;;  %v6964_v13 = vpop.f32.mrf.mxu0 }
 0x25d   : > { %v6025_v62 = vpack.c.bf16 %v4945_v52, %v4944_v56  ;;  %v4943_v45 = vadd.f32 %v4790_v17, %v4528_v42  ;;  %v4533_v3 = vadd.f32 %v6900_v24, %v8588_v49  ;;  %v5364_v8 = vmul.f32 %v4945_v52, %v4945_v52 }
 0x25e   : > { %v5408_v44 = vadd.f32 %v5406_v41, %v5361_v61  ;;  %v4388_v58 = vpop.f32.mrf.mxu1  ;;  %v4803_v53 = vpop.f32.mrf.mxu0 }
 0x25f   : > { %6113 = vst [vmem:[%s8691_s29 + $0x38] sm:$0xff] %v6025_v62   ;;  %v6020_v34 = vpack.c.bf16 %v4943_v45, %v4942_v37  ;;  %v5307_v21 = vadd.f32 %v5306_v40, %v4943_v45  ;;  %v5362_v18 = vmul.f32 %v4943_v45, %v4943_v45  ;;  %v4531_v33 = vadd.f32 %v4388_v58, %v8591_v28 }
 0x260   : > { %v6901_v27 = vpop.f32.mrf.mxu1  ;;  %v6965_v47 = vpop.f32.mrf.mxu0  ;;  %v4948_v51 = vadd.f32 %v6964_v13, %v4533_v3 }
 0x261   : > { %6112 = vst [vmem:[%s8691_s29 + $0x30] sm:$0xff] %v6020_v34   ;;  %v5409_v57 = vadd.f32 %v5408_v44, %v5362_v18  ;;  %v5309_v38 = vadd.f32 %v5307_v21, %v4945_v52  ;;  %v4534_v2 = vadd.f32 %v6901_v27, %v8594_v10  ;;  %v4946_v31 = vadd.f32 %v4803_v53, %v4531_v33 }
 0x262   : > { %v4391_v32 = vpop.f32.mrf.mxu1  ;;  %v4806_v49 = vpop.f32.mrf.mxu0  ;;  %v5367_v54 = vmul.f32 %v4948_v51, %v4948_v51 }
 0x263   : > { %v5411_v30 = vadd.f32 %v5409_v57, %v5364_v8  ;;  %v4949_v29 = vadd.f32 %v6965_v47, %v4534_v2  ;;  %v4532_v16 = vadd.f32 %v4391_v32, %v8597_v25  ;;  %v5310_v23 = vadd.f32 %v5309_v38, %v4946_v31 }
 0x264   : > { %v5365_v11 = vmul.f32 %v4946_v31, %v4946_v31  ;;  %v6904_v28 = vpop.f32.mrf.mxu1  ;;  %v6968_v0 = vpop.f32.mrf.mxu0 }
 0x265   : > { %v6035_v50 = vpack.c.bf16 %v4949_v29, %v4948_v51  ;;  %v4947_v37 = vadd.f32 %v4806_v49, %v4532_v16  ;;  %v5312_v56 = vadd.f32 %v5310_v23, %v4948_v51  ;;  %v4537_v42 = vadd.f32 %v6904_v28, %v8600_v7 }
 0x266   : > { %v5412_v17 = vadd.f32 %v5411_v30, %v5365_v11  ;;  %v4404_v10 = vpop.f32.mrf.mxu1  ;;  %v4819_v41 = vpop.f32.mrf.mxu0  ;;  %v5368_v61 = vmul.f32 %v4949_v29, %v4949_v29 }
 0x267   : > { %6115 = vst [vmem:[%s8691_s29 + $0x48] sm:$0xff] %v6035_v50   ;;  %v6030_v52 = vpack.c.bf16 %v4947_v37, %v4946_v31  ;;  %v5313_v40 = vadd.f32 %v5312_v56, %v4949_v29  ;;  %v4535_v62 = vadd.f32 %v4404_v10, %v8603_v26  ;;  %v4952_v53 = vadd.f32 %v6968_v0, %v4537_v42 }
 0x268   : > { %v5414_v24 = vadd.f32 %v5412_v17, %v5367_v54  ;;  %v6905_v25 = vpop.f32.mrf.mxu1  ;;  %v6969_v13 = vpop.f32.mrf.mxu0 }
 0x269   : > { %6114 = vst [vmem:[%s8691_s29 + $0x40] sm:$0xff] %v6030_v52   ;;  %v4538_v45 = vadd.f32 %v6905_v25, %v8606_v22  ;;  %v4950_v33 = vadd.f32 %v4819_v41, %v4535_v62  ;;  %v5371_v49 = vmul.f32 %v4952_v53, %v4952_v53 }
 0x26a   : > { %v5415_v44 = vadd.f32 %v5414_v24, %v5368_v61  ;;  %v4407_v3 = vpop.f32.mrf.mxu1  ;;  %v4822_v58 = vpop.f32.mrf.mxu0 }
 0x26b   : > { %v4953_v34 = vadd.f32 %v6969_v13, %v4538_v45  ;;  %v4536_v21 = vadd.f32 %v4407_v3, %v8609_v1 }
 0x26c   : > { %v6908_v18 = vpop.f32.mrf.mxu1  ;;  %v6972_v7 = vpop.f32.mrf.mxu0 }
 0x26d   : > { %v6045_v27 = vpack.c.bf16 %v4953_v34, %v4952_v53  ;;  %v4951_v47 = vadd.f32 %v4822_v58, %v4536_v21  ;;  %v4541_v22 = vadd.f32 %v6908_v18, %v8612_v35 }
 0x26e   : > { %v4420_v8 = vpop.f32.mrf.mxu1  ;;  %v4835_v57 = vpop.f32.mrf.mxu0 }
 0x26f   : > { %6117 = vst [vmem:[%s8691_s29 + $0x58] sm:$0xff] %v6045_v27   ;;  %v6040_v38 = vpack.c.bf16 %v4951_v47, %v4950_v33  ;;  %v5315_v26 = vadd.f32 %v5313_v40, %v4951_v47  ;;  %v5370_v2 = vmul.f32 %v4951_v47, %v4951_v47  ;;  %v4539_v51 = vadd.f32 %v4420_v8, %v8615_v15 }
 0x270   : > { %v6909_v31 = vpop.f32.mrf.mxu1  ;;  %v6973_v32 = vpop.f32.mrf.mxu0  ;;  %v4956_v28 = vadd.f32 %v6972_v7, %v4541_v22 }
 0x271   : > { %6116 = vst [vmem:[%s8691_s29 + $0x50] sm:$0xff] %v6040_v38   ;;  %v5417_v1 = vadd.f32 %v5415_v44, %v5370_v2  ;;  %v5316_v30 = vadd.f32 %v5315_v26, %v4952_v53  ;;  %v4542_v29 = vadd.f32 %v6909_v31, %v8618_v63  ;;  %v4954_v16 = vadd.f32 %v4835_v57, %v4539_v51 }
 0x272   : > { %v4423_v23 = vpop.f32.mrf.mxu1  ;;  %v4838_v11 = vpop.f32.mrf.mxu0 }
 0x273   : > { %v5418_v0 = vadd.f32 %v5417_v1, %v5371_v49  ;;  %v4957_v50 = vadd.f32 %v6973_v32, %v4542_v29  ;;  %v4540_v37 = vadd.f32 %v4423_v23, %v8621_v12  ;;  %v5318_v35 = vadd.f32 %v5316_v30, %v4954_v16 }
 0x274   : > { %v5373_v54 = vmul.f32 %v4954_v16, %v4954_v16  ;;  %v6912_v15 = vpop.f32.mrf.mxu1  ;;  %v6976_v17 = vpop.f32.mrf.mxu0 }
 0x275   : > { %v6055_v56 = vpack.c.bf16 %v4957_v50, %v4956_v28  ;;  %v4955_v10 = vadd.f32 %v4838_v11, %v4540_v37  ;;  %v4545_v52 = vadd.f32 %v6912_v15, %v8624_v55  ;;  %v5376_v62 = vmul.f32 %v4957_v50, %v4957_v50 }
 0x276   : > { %v5420_v41 = vadd.f32 %v5418_v0, %v5373_v54  ;;  %v4436_v63 = vpop.f32.mrf.mxu1  ;;  %v4851_v42 = vpop.f32.mrf.mxu0 }
 0x277   : > { %6119 = vst [vmem:[%s8691_s29 + $0x68] sm:$0xff] %v6055_v56   ;;  %v6050_v40 = vpack.c.bf16 %v4955_v10, %v4954_v16  ;;  %v5319_v61 = vadd.f32 %v5318_v35, %v4955_v10  ;;  %v5374_v24 = vmul.f32 %v4955_v10, %v4955_v10  ;;  %v4543_v25 = vadd.f32 %v4436_v63, %v8627_v60 }
 0x278   : > { %v6913_v13 = vpop.f32.mrf.mxu1  ;;  %v6977_v12 = vpop.f32.mrf.mxu0  ;;  %v4960_v58 = vadd.f32 %v6976_v17, %v4545_v52 }
 0x279   : > { %6118 = vst [vmem:[%s8691_s29 + $0x60] sm:$0xff] %v6050_v40   ;;  %v5421_v45 = vadd.f32 %v5420_v41, %v5374_v24  ;;  %v5321_v44 = vadd.f32 %v5319_v61, %v4957_v50  ;;  %v4546_v3 = vadd.f32 %v6913_v13, %v8630_v20  ;;  %v4958_v53 = vadd.f32 %v4851_v42, %v4543_v25 }
 0x27a   : > { %v4439_v34 = vpop.f32.mrf.mxu1  ;;  %v4854_v55 = vpop.f32.mrf.mxu0  ;;  %v5379_v38 = vmul.f32 %v4960_v58, %v4960_v58 }
 0x27b   : > { %v5423_v21 = vadd.f32 %v5421_v45, %v5376_v62  ;;  %v4961_v18 = vadd.f32 %v6977_v12, %v4546_v3  ;;  %v4544_v7 = vadd.f32 %v4439_v34, %v8633_v39  ;;  %v5322_v33 = vadd.f32 %v5321_v44, %v4958_v53 }
 0x27c   : > { %v5377_v27 = vmul.f32 %v4958_v53, %v4958_v53  ;;  %v6916_v60 = vpop.f32.mrf.mxu1  ;;  %v6980_v47 = vpop.f32.mrf.mxu0 }
 0x27d   : > { %v6065_v8 = vpack.c.bf16 %v4961_v18, %v4960_v58  ;;  %v4959_v57 = vadd.f32 %v4854_v55, %v4544_v7  ;;  %v5324_v2 = vadd.f32 %v5322_v33, %v4960_v58  ;;  %v4549_v31 = vadd.f32 %v6916_v60, %v8636_v46 }
 0x27e   : > { %v5424_v26 = vadd.f32 %v5423_v21, %v5377_v27  ;;  %v4452_v20 = vpop.f32.mrf.mxu1  ;;  %v4867_v22 = vpop.f32.mrf.mxu0  ;;  %v5380_v49 = vmul.f32 %v4961_v18, %v4961_v18 }
 0x27f   : > { %6121 = vst [vmem:[%s8691_s29 + $0x78] sm:$0xff] %v6065_v8   ;;  %v6060_v51 = vpack.c.bf16 %v4959_v57, %v4958_v53  ;;  %v5325_v32 = vadd.f32 %v5324_v2, %v4961_v18  ;;  %v4547_v29 = vadd.f32 %v4452_v20, %v8639_v14  ;;  %v4964_v0 = vadd.f32 %v6980_v47, %v4549_v31 }
 0x280   : > { %v5426_v1 = vadd.f32 %v5424_v26, %v5379_v38  ;;  %v6917_v39 = vpop.f32.mrf.mxu1  ;;  %v6981_v30 = vpop.f32.mrf.mxu0 }
 0x281   : > { %6120 = vst [vmem:[%s8691_s29 + $0x70] sm:$0xff] %v6060_v51   ;;  %v4550_v16 = vadd.f32 %v6917_v39, %v8642_v19  ;;  %v4962_v54 = vadd.f32 %v4867_v22, %v4547_v29  ;;  %v5383_v61 = vmul.f32 %v4964_v0, %v4964_v0 }
 0x282   : > { %v5427_v23 = vadd.f32 %v5426_v1, %v5380_v49  ;;  %v4455_v11 = vpop.f32.mrf.mxu1  ;;  %v4870_v28 = vpop.f32.mrf.mxu0  ;;  %v8863_v1 = vld [vmem:[#allocation17_spill] sm:$0xff] }
 0x283   : > { %v4965_v50 = vadd.f32 %v6981_v30, %v4550_v16  ;;  %v4548_v37 = vadd.f32 %v4455_v11, %v8645_v9 }
 0x284   : > { %v6920_v35 = vpop.f32.mrf.mxu1  ;;  %v6984_v46 = vpop.f32.mrf.mxu0 }
 0x285   : > { %v6075_v15 = vpack.c.bf16 %v4965_v50, %v4964_v0  ;;  %v4963_v17 = vadd.f32 %v4870_v28, %v4548_v37  ;;  %v4553_v19 = vadd.f32 %v6920_v35, %v8648_v59 }
 0x286   : > { %v4468_v56 = vpop.f32.mrf.mxu1  ;;  %v4883_v10 = vpop.f32.mrf.mxu0 }
 0x287   : > { %6123 = vst [vmem:[%s8691_s29 + $0x88] sm:$0xff] %v6075_v15   ;;  %v6070_v41 = vpack.c.bf16 %v4963_v17, %v4962_v54  ;;  %v5327_v14 = vadd.f32 %v5325_v32, %v4963_v17  ;;  %v5382_v52 = vmul.f32 %v4963_v17, %v4963_v17  ;;  %v4551_v63 = vadd.f32 %v4468_v56, %v8651_v4 }
 0x288   : > { %v6921_v42 = vpop.f32.mrf.mxu1  ;;  %v6985_v40 = vpop.f32.mrf.mxu0  ;;  %v4968_v45 = vadd.f32 %v6984_v46, %v4553_v19  ;;  %v8864_v46 = vld [vmem:[#allocation18_spill] sm:$0xff]  ;;  %v8866_v19 = vld [vmem:[#allocation19_spill] sm:$0xff] }
 0x289   : > { %6122 = vst [vmem:[%s8691_s29 + $0x80] sm:$0xff] %v6070_v41   ;;  %v5429_v9 = vadd.f32 %v5427_v23, %v5382_v52  ;;  %v5328_v24 = vadd.f32 %v5327_v14, %v4964_v0  ;;  %v4554_v25 = vadd.f32 %v6921_v42, %v8654_v5  ;;  %v4966_v13 = vadd.f32 %v4883_v10, %v4551_v63  ;;  %v8865_v14 = vld [vmem:[#allocation14_spill] sm:$0xff] }
 0x28a   : > { %v4471_v12 = vpop.f32.mrf.mxu1  ;;  %v4886_v62 = vpop.f32.mrf.mxu0 }
 0x28b   : > { %v5430_v44 = vadd.f32 %v5429_v9, %v5383_v61  ;;  %v4969_v3 = vadd.f32 %v6985_v40, %v4554_v25  ;;  %v4552_v58 = vadd.f32 %v4471_v12, %v8657_v43  ;;  %v5330_v59 = vadd.f32 %v5328_v24, %v4966_v13  ;;  %v8867_v24 = vld [vmem:[#allocation20_spill] sm:$0xff] }
 0x28c   : > { %v5385_v53 = vmul.f32 %v4966_v13, %v4966_v13  ;;  %v6924_v4 = vpop.f32.mrf.mxu1  ;;  %v6988_v34 = vpop.f32.mrf.mxu0 }
 0x28d   : > { %v6085_v55 = vpack.c.bf16 %v4969_v3, %v4968_v45  ;;  %v4967_v21 = vadd.f32 %v4886_v62, %v4552_v58  ;;  %v4557_v7 = vadd.f32 %v6924_v4, %v8660_v36  ;;  %v5388_v38 = vmul.f32 %v4969_v3, %v4969_v3 }
 0x28e   : > { %v5432_v18 = vadd.f32 %v5430_v44, %v5385_v53  ;;  %v4484_v5 = vpop.f32.mrf.mxu1  ;;  %v4899_v33 = vpop.f32.mrf.mxu0 }
 0x28f   : > { %6125 = vst [vmem:[%s8691_s29 + $0x98] sm:$0xff] %v6085_v55   ;;  %v6080_v27 = vpack.c.bf16 %v4967_v21, %v4966_v13  ;;  %v5331_v60 = vadd.f32 %v5330_v59, %v4967_v21  ;;  %v5386_v47 = vmul.f32 %v4967_v21, %v4967_v21  ;;  %v4555_v8 = vadd.f32 %v4484_v5, %v8663_v6 }
 0x290   : > { %v6925_v57 = vpop.f32.mrf.mxu1  ;;  %v6989_v43 = vpop.f32.mrf.mxu0  ;;  %v4972_v22 = vadd.f32 %v6988_v34, %v4557_v7 }
 0x291   : > { %6124 = vst [vmem:[%s8691_s29 + $0x90] sm:$0xff] %v6080_v27   ;;  %v5433_v26 = vadd.f32 %v5432_v18, %v5386_v47  ;;  %v5333_v2 = vadd.f32 %v5331_v60, %v4969_v3  ;;  %v4558_v20 = vadd.f32 %v6925_v57, %v8666_v48  ;;  %v4970_v51 = vadd.f32 %v4899_v33, %v4555_v8 }
 0x292   : > { %v4487_v31 = vpop.f32.mrf.mxu1  ;;  %v4902_v36 = vpop.f32.mrf.mxu0  ;;  %v5391_v28 = vmul.f32 %v4972_v22, %v4972_v22 }
 0x293   : > { %v5435_v32 = vadd.f32 %v5433_v26, %v5388_v38  ;;  %v4973_v49 = vadd.f32 %v6989_v43, %v4558_v20  ;;  %v4556_v39 = vadd.f32 %v4487_v31, %v8863_v1  ;;  %v5334_v30 = vadd.f32 %v5333_v2, %v4970_v51 }
 0x294   : > { %v5389_v29 = vmul.f32 %v4970_v51, %v4970_v51  ;;  %v6928_v6 = vpop.f32.mrf.mxu1  ;;  %v6992_v16 = vpop.f32.mrf.mxu0 }
 0x295   : > { %v6095_v23 = vpack.c.bf16 %v4973_v49, %v4972_v22  ;;  %v4971_v11 = vadd.f32 %v4902_v36, %v4556_v39  ;;  %v5336_v50 = vadd.f32 %v5334_v30, %v4972_v22  ;;  %v4561_v54 = vadd.f32 %v6928_v6, %v8864_v46 }
 0x296   : > { %v5436_v0 = vadd.f32 %v5435_v32, %v5389_v29  ;;  %v4500_v48 = vpop.f32.mrf.mxu1  ;;  %v4915_v37 = vpop.f32.mrf.mxu0  ;;  %v5392_v17 = vmul.f32 %v4973_v49, %v4973_v49 }
 0x297   : > { %6127 = vst [vmem:[%s8691_s29 + $0xa8] sm:$0xff] %v6095_v23   ;;  %v6090_v35 = vpack.c.bf16 %v4971_v11, %v4970_v51  ;;  %v5337_v15 = vadd.f32 %v5336_v50, %v4973_v49  ;;  %v4559_v52 = vadd.f32 %v4500_v48, %v8865_v14  ;;  %v4976_v61 = vadd.f32 %v6992_v16, %v4561_v54 }
 0x298   : > { %v5438_v56 = vadd.f32 %v5436_v0, %v5391_v28  ;;  %v6929_v10 = vpop.f32.mrf.mxu1  ;;  %v6993_v41 = vpop.f32.mrf.mxu0 }
 0x299   : > { %6126 = vst [vmem:[%s8691_s29 + $0xa0] sm:$0xff] %v6090_v35   ;;  %v4562_v63 = vadd.f32 %v6929_v10, %v8866_v19  ;;  %v4974_v12 = vadd.f32 %v4915_v37, %v4559_v52  ;;  %v5395_v59 = vmul.f32 %v4976_v61, %v4976_v61 }
 0x29a   : > { %v5439_v42 = vadd.f32 %v5438_v56, %v5392_v17  ;;  %v4503_v40 = vpop.f32.mrf.mxu1  ;;  %v4918_v13 = vpop.f32.mrf.mxu0 }
 0x29b   : > { %v4977_v9 = vadd.f32 %v6993_v41, %v4562_v63  ;;  %v4560_v25 = vadd.f32 %v4503_v40, %v8867_v24 }
 0x29d   : > { %v6105_v62 = vpack.c.bf16 %v4977_v9, %v4976_v61  ;;  %v4975_v45 = vadd.f32 %v4918_v13, %v4560_v25 }
 0x29f   : > { %6129 = vst [vmem:[%s8691_s29 + $0xb8] sm:$0xff] %v6105_v62   ;;  %v6100_v44 = vpack.c.bf16 %v4975_v45, %v4974_v12  ;;  %v5339_v3 = vadd.f32 %v5337_v15, %v4975_v45  ;;  %v5394_v58 = vmul.f32 %v4975_v45, %v4975_v45 }
 0x2a1   : > { %6128 = vst [vmem:[%s8691_s29 + $0xb0] sm:$0xff] %v6100_v44   ;;  %v5340_v53 = vadd.f32 %v5339_v3, %v4976_v61  ;;  %v5441_v4 = vadd.f32 %v5439_v42, %v5394_v58 }
 0x2a3   : > { %v5342_v34 = vrot.slane %v5340_v53, 4  ;;  %v5442_v55 = vadd.f32 %v5441_v4, %v5395_v59 }
 0x2a5   : > { %v5343_v21 = vadd.f32 %v5342_v34, %v5340_v53  ;;  %v5444_v18 = vrot.slane %v5442_v55, 4 }
 0x2a7   : > { %v5344_v7 = vrot.slane %v5343_v21, 2  ;;  %v5445_v5 = vadd.f32 %v5444_v18, %v5442_v55 }
 0x2a9   : > { %v5345_v33 = vadd.f32 %v5344_v7, %v5343_v21  ;;  %v5446_v27 = vrot.slane %v5445_v5, 2 }
 0x2ab   : > { %v5346_v60 = vrot.slane %v5345_v33, 1  ;;  %v5447_v47 = vadd.f32 %v5446_v27, %v5445_v5 }
 0x2ad   : > { %v5347_v8 = vadd.f32 %v5346_v60, %v5345_v33  ;;  %v5448_v57 = vrot.slane %v5447_v47, 1 }
 0x2af   : > { %5348 = vst [vmem:[%s211_s6] sm:$0x1] %v5347_v8  ;;  %v5449_v43 = vadd.f32 %v5448_v57, %v5447_v47 }
 0x2b1   : > { %5450 = vst [vmem:[%s214_s9] sm:$0x1] %v5449_v43 }
 0x2b2 PF: > { %s15_s15 = sadd.s32 1, %s7229_s15  }
 0x2b3   : > { %p12_p4 = scmp.ge.s32.totalorder %s15_s15, 4  }
 0x2b5   :  { %14 = sbr.rel (!%p12_p4) target bundleno = 1 (0x1), region = 90 }

// kernel: basic_block_forward.4
= control target key start
LH: loop header
LB: loop body
LE: loop exit
PB: predicated region body
PF: predicated region fallthrough
CT: control target
= control target key end

     0   :  { %s8473_s21 = smov 0   ;;  %s10084_s0 = inlined_call_operand.vmem [shape: bf16[2,16,24,128], index: 0, kind: input, shape index: {}]   ;;  %s10085_s1 = inlined_call_operand.vmem [shape: f32[1,128], index: 1, kind: input, shape index: {}]   ;;  %s10086_s2 = inlined_call_operand.vmem [shape: f32[1,128], index: 2, kind: input, shape index: {}]   ;;  %s10087_s3 = inlined_call_operand.vmem [shape: bf16[9,128,128], index: 3, kind: input, shape index: {}]   ;;  %s10088_s4 = inlined_call_operand.vmem [shape: bf16[2,16,24,128], index: 4, kind: output, shape index: {0}]   ;;  %s10089_s5 = inlined_call_operand.vmem [shape: f32[2,1,128], index: 5, kind: output, shape index: {1}]   ;;  %s10090_s6 = inlined_call_operand.vmem [shape: f32[2,1,128], index: 6, kind: output, shape index: {2}]  }
   0x1 LB: > { %s6627_s22 = sadd.s32 4294967295, %s8434_s21   ;;  %p6631_p0 = scmp.ge.s32.totalorder %s8434_s21, 1  ;;  %s8434_s21 = sphi %s8473_s21, %s17_s21  }
   0x2   : > { %p217_p1 = scmp.lt.s32.totalorder %s8434_s21, 3 }
   0x4   : > { %p218_p2 = pnand %p6631_p0, %p217_p1 }
   0x6   : > { %221 = sbr.rel (%p218_p2) target bundleno = 758 (0x2f6), region = 36 }
   0xb   : > { %v8213_v0 = vld [vmem:[%s10087_s3 + $0x78] sm:$0xff]   ;;  %p253_p3 = scmp.lt.s32.totalorder %s6627_s22, 1  ;;  %v8214_v1 = vld [vmem:[%s10087_s3 + $0x70] sm:$0xff]   ;;  %v8436_v2 = vmov 0   ;;  %v8215_v3 = vld [vmem:[%s10087_s3 + $0x68] sm:$0xff]   ;;  %vm273_vm0 = vcmask 1040384  }
   0xc   : > { %7610 = vmatprep.subr.bf16.mxu0 %v8213_v0  ;;  %8186 = vmatprep.subr.bf16.mxu1 %v8213_v0  ;;  %270 = vst [vmem:[#allocation2] sm:$0xf] %v8436_v2  ;;  %271 = vst [vmem:[#allocation2 + $0x4] sm:$0xf] %v8436_v2  ;;  %v8437_v4 = vmov 0.0|0.0   ;;  %v8216_v6 = vld [vmem:[%s10087_s3 + $0x60] sm:$0xff]  }
   0xd   : > { %s10211_s22 = smov (!%p253_p3, %s6627_s22), 1  ;;  %272 = vst [vmem:[#allocation2 + $0x8] sm:$0xf] %v8436_v2  ;;  %285 = vst [vmem:[#allocation2 + $0xd0] sm:$0xf] %v8436_v2  ;;  %7611 = vmatpush3.bf16.msra.mxu0 %v8213_v0  ;;  %8194 = vmatpush3.bf16.msra.mxu1 %v8213_v0  ;;  %v6638_v5 = vcombine.low %v8437_v4, %v8437_v4  ;;  %v8217_v17 = vld [vmem:[%s10087_s3 + $0x58] sm:$0xff]  }
   0xe   : > { %286 = vst [vmem:[#allocation2 + $0xd4] sm:$0xf] %v8436_v2  ;;  %287 = vst [vmem:[#allocation2 + $0xd8] sm:$0xf] %v8436_v2  ;;  %7612 = vmatprep.subr.bf16.mxu0 %v8214_v1  ;;  %8187 = vmatprep.subr.bf16.mxu1 %v8214_v1  ;;  %s8202_s29 = smul.u32 192, %s10211_s22  ;;  %vm279_vm3 = vcmask 1043456   ;;  %s265_s17 = scalar_lea.vmem %s10089_s5, %s10211_s22 }
   0xf   : > { %vm274_vm1 = vsmask.f32 256  ;;  %v276_v7 = vld [vmem:[#allocation2 + $0xc] sm:$0x1]  ;;  %v8512_v10 = vld [vmem:[%s10085_s1] ss:$0 sm:$0xff]  ;;  %s268_s20 = scalar_lea.vmem %s10090_s6, %s10211_s22 }
  0x10   : > { %s8498_s8 = scalar_lea.vmem %s10084_s0, %s8202_s29  ;;  %vm8504_vm2 = vmand %vm273_vm0, %vm274_vm1  ;;  %v785_v11 = vshrl.u32 %v6638_v5, 16  ;;  %v8519_v14 = vld [vmem:[%s10086_s2] ss:$0 sm:$0xff]  ;;  %v788_v19 = vshll.u32 %v6638_v5, 16  ;;  %vm280_vm4 = vsmask.f32 7938  ;;  %s10003_s15 = scalar_lea.vmem %s10088_s4, %s8202_s29 }
  0x11   : > { %7613 = vmatpush3.bf16.msra.mxu0 %v8214_v1  ;;  %8195 = vmatpush3.bf16.msra.mxu1 %v8214_v1  ;;  %v7141_v9 = vld [vmem:[%s8498_s8] sm:$0xff]   ;;  %v277_v12 = vsel %vm8504_vm2, 0, %v276_v7  ;;  %v318_v24 = vld [vmem:[%s8498_s8 + $0x54] sm:$0xff]   ;;  %vm765_vm5 = vsmask.f32 4368  ;;  %v300_v37 = vld [vmem:[%s8498_s8 + $0xc] sm:$0xff]  }
  0x12   : > { %7614 = vmatprep.subr.bf16.mxu0 %v8215_v3  ;;  %8188 = vmatprep.subr.bf16.mxu1 %v8215_v3  ;;  %v7142_v13 = vunpack.c.l.bf16 %v7141_v9  ;;  %v7143_v16 = vunpack.c.h.bf16 %v7141_v9  ;;  %278 = vst [vmem:[#allocation2 + $0xc] sm:$0x1] %v277_v12  ;;  %v787_v23 = vrot.slane %v785_v11, 7  ;;  %v7295_v25 = vld [vmem:[%s8498_s8 + $0x60] sm:$0xff]   ;;  %v366_v27 = vunpack.c.l.bf16 %v318_v24  ;;  %v8218_v38 = vld [vmem:[%s10087_s3 + $0x50] sm:$0xff]   ;;  %v8219_v51 = vld [vmem:[%s10087_s3 + $0x48] sm:$0xff]  }
  0x13   : > { %v1300_v15 = vld [vmem:[#allocation2] sm:$0xf]  ;;  %v1301_v18 = vld [vmem:[#allocation2 + $0x4] sm:$0xf]  ;;  %v7158_v26 = vunpack.c.l.bf16 %v7295_v25  ;;  %v367_v28 = vunpack.c.h.bf16 %v318_v24  ;;  %v7159_v29 = vunpack.c.h.bf16 %v7295_v25  ;;  %v348_v50 = vunpack.c.l.bf16 %v300_v37  ;;  %vm8559_vm6 = vmand %vm279_vm3, %vm280_vm4 }
  0x14   : > { %v400_v20 = vmul.f32 %v7142_v13, %v8512_v10  ;;  %v8525_v21 = vcombine.low %v1300_v15, %v1301_v18  ;;  %v401_v22 = vmul.f32 %v7143_v16, %v8512_v10  ;;  %v8534_v34 = vor.u32 %v788_v19, %v787_v23  ;;  %v8220_v12 = vld [vmem:[%s10087_s3 + $0x40] sm:$0xff]   ;;  %vm8568_vm7 = vmor %vm274_vm1, %vm765_vm5 }
  0x15   : > { %7615 = vmatpush3.bf16.msra.mxu0 %v8215_v3  ;;  %8196 = vmatpush3.bf16.msra.mxu1 %v8215_v3  ;;  %v421_v35 = vmul.f32 %v8512_v10, %v366_v27  ;;  %v422_v36 = vmul.f32 %v8512_v10, %v367_v28  ;;  %v424_v41 = vmul.f32 %v7158_v26, %v8512_v10  ;;  %v8543_v42 = vrot.slane %v787_v23, 4  ;;  %v8582_v28 = vld [vmem:[%s10087_s3 + $0x38] sm:$0xff]  }
  0x16   : > { %7616 = vmatprep.subr.bf16.mxu0 %v8216_v6  ;;  %8189 = vmatprep.subr.bf16.mxu1 %v8216_v6  ;;  %v455_v30 = vadd.f32 %v8519_v14, %v400_v20  ;;  %v1509_v31 = vshll.u32 %v8525_v21, 16  ;;  %v456_v32 = vadd.f32 %v8519_v14, %v401_v22  ;;  %v1507_v33 = vshrl.u32 %v8525_v21, 16 }
  0x17   : > { %v476_v44 = vadd.f32 %v8519_v14, %v421_v35  ;;  %v477_v45 = vadd.f32 %v8519_v14, %v422_v36  ;;  %v425_v46 = vmul.f32 %v7159_v29, %v8512_v10  ;;  %v479_v49 = vadd.f32 %v8519_v14, %v424_v41  ;;  %v8585_v29 = vld [vmem:[%s8498_s8 + $0x18] sm:$0xff]   ;;  %v324_v41 = vld [vmem:[%s8498_s8 + $0x6c] sm:$0xff]  }
  0x18   : > { %v503_v39 = vmax.f32 %v455_v30, 0.0  ;;  %v504_v40 = vmax.f32 %v456_v32, 0.0  ;;  %v8545_v43 = vrot.slane %v1509_v31, 1  ;;  %v349_v55 = vunpack.c.h.bf16 %v300_v37 }
  0x19   : > { %7617 = vmatpush3.bf16.msra.mxu0 %v8216_v6  ;;  %8197 = vmatpush3.bf16.msra.mxu1 %v8216_v6  ;;  %v524_v52 = vmax.f32 %v476_v44, 0.0  ;;  %v525_v53 = vmax.f32 %v477_v45, 0.0  ;;  %v480_v54 = vadd.f32 %v8519_v14, %v425_v46  ;;  %v527_v60 = vmax.f32 %v479_v49, 0.0  ;;  %v1247_v1 = vld [vmem:[#allocation2 + $0xc] sm:$0xf] }
  0x1a   : > { %7618 = vmatprep.subr.bf16.mxu0 %v8217_v17  ;;  %8190 = vmatprep.subr.bf16.mxu1 %v8217_v17  ;;  %v7060_v47 = vpack.c.bf16 %v503_v39, %v503_v39  ;;  %v7061_v48 = vpack.c.bf16 %v504_v40, %v504_v40  ;;  %v403_v3 = vmul.f32 %v8512_v10, %v348_v50  ;;  %vm1505_vm8 = vsmask.f32 7424 }
  0x1b   : > { %v7074_v61 = vpack.c.bf16 %v524_v52, %v524_v52  ;;  %v7075_v62 = vpack.c.bf16 %v525_v53, %v525_v53  ;;  %v528_v63 = vmax.f32 %v480_v54, 0.0  ;;  %v404_v4 = vmul.f32 %v8512_v10, %v349_v55 }
  0x1c   : > { %v768_v56 = vshrl.u32 %v7060_v47, 16  ;;  %v771_v57 = vshll.u32 %v7060_v47, 16  ;;  %v776_v58 = vshrl.u32 %v7061_v48, 16  ;;  %v779_v59 = vshll.u32 %v7061_v48, 16  ;;  %v8605_v48 = vld [vmem:[%s8498_s8 + $0x78] sm:$0xff]  }
  0x1d   : > { %7619 = vmatpush3.bf16.msra.mxu0 %v8217_v17  ;;  %8198 = vmatpush3.bf16.msra.mxu1 %v8217_v17  ;;  %v7076_v6 = vpack.c.bf16 %v527_v60, %v527_v60  ;;  %v956_v7 = vshrl.u32 %v7074_v61, 16  ;;  %v959_v9 = vshll.u32 %v7074_v61, 16  ;;  %v965_v11 = vshrl.u32 %v7075_v62, 16 }
  0x1e   : > { %7620 = vmatprep.subr.bf16.mxu0 %v8218_v38  ;;  %8191 = vmatprep.subr.bf16.mxu1 %v8218_v38  ;;  %v770_v0 = vrot.slane %v768_v56, 7  ;;  %v778_v2 = vrot.slane %v776_v58, 7  ;;  %v968_v22 = vshll.u32 %v7075_v62, 16  ;;  %v7077_v37 = vpack.c.bf16 %v528_v63, %v528_v63 }
  0x1f   : > { %v958_v19 = vrot.slane %v956_v7, 7  ;;  %v967_v20 = vrot.slane %v965_v11, 7  ;;  %v983_v23 = vshrl.u32 %v7076_v6, 16  ;;  %v986_v27 = vshll.u32 %v7076_v6, 16 }
  0x20   : > { %v773_v13 = vor.u32 %v771_v57, %v770_v0  ;;  %v774_v15 = vrot.slane %v770_v0, 4  ;;  %v781_v16 = vor.u32 %v779_v59, %v778_v2  ;;  %v783_v17 = vrot.slane %v778_v2, 4 }
  0x21   : > { %7621 = vmatpush3.bf16.msra.mxu0 %v8218_v38  ;;  %8199 = vmatpush3.bf16.msra.mxu1 %v8218_v38  ;;  %v961_v30 = vor.u32 %v959_v9, %v958_v19  ;;  %v963_v31 = vrot.slane %v958_v19, 4  ;;  %v970_v32 = vor.u32 %v968_v22, %v967_v20  ;;  %v972_v35 = vrot.slane %v967_v20, 4  ;;  %v8590_v38 = vld [vmem:[%s10087_s3 + $0xb8] sm:$0xff]  }
  0x22   : > { %7622 = vmatprep.subr.bf16.mxu0 %v8219_v51  ;;  %8192 = vmatprep.subr.bf16.mxu1 %v8219_v51  ;;  %v1248_v24 = vsel %vm8559_vm6, %v773_v13, %v1247_v1  ;;  %v782_v25 = vsel %vm8568_vm7, %v774_v15, %v781_v16  ;;  %v791_v26 = vsel %vm8568_vm7, %v783_v17, %v8534_v34  ;;  %v985_v36 = vrot.slane %v983_v23, 7 }
  0x23   : > { %1249 = vst [vmem:[#allocation2 + $0xc] sm:$0xf] %v1248_v24  ;;  %1250 = vst [vmem:[#allocation2 + $0x10] sm:$0xf] %v782_v25  ;;  %v458_v39 = vadd.f32 %v8519_v14, %v403_v3  ;;  %v459_v40 = vadd.f32 %v8519_v14, %v404_v4  ;;  %v962_v44 = vsel %vm8568_vm7, %v8543_v42, %v961_v30  ;;  %v7146_v47 = vunpack.c.l.bf16 %v8585_v29 }
  0x24   : > { %1251 = vst [vmem:[#allocation2 + $0x14] sm:$0xf] %v791_v26  ;;  %v971_v45 = vsel %vm8568_vm7, %v963_v31, %v970_v32  ;;  %v980_v46 = vsel %vm8568_vm7, %v972_v35, %v8534_v34  ;;  %v988_v49 = vor.u32 %v986_v27, %v985_v36  ;;  %1270 = vst [vmem:[#allocation2 + $0x60] sm:$0xf] %v962_v44  ;;  %v990_v50 = vrot.slane %v985_v36, 4 }
  0x25   : > { %7623 = vmatpush3.bf16.msra.mxu0 %v8219_v51  ;;  %8200 = vmatpush3.bf16.msra.mxu1 %v8219_v51  ;;  %1271 = vst [vmem:[#allocation2 + $0x64] sm:$0xf] %v971_v45  ;;  %1272 = vst [vmem:[#allocation2 + $0x68] sm:$0xf] %v980_v46  ;;  %v992_v51 = vshrl.u32 %v7077_v37, 16  ;;  %v995_v52 = vshll.u32 %v7077_v37, 16  ;;  %v406_v55 = vmul.f32 %v7146_v47, %v8512_v10  ;;  %v372_v56 = vunpack.c.l.bf16 %v324_v41 }
  0x26   : > { %7624 = vmatprep.subr.bf16.mxu0 %v8220_v12  ;;  %8193 = vmatprep.subr.bf16.mxu1 %v8220_v12  ;;  %v506_v53 = vmax.f32 %v458_v39, 0.0  ;;  %v507_v54 = vmax.f32 %v459_v40, 0.0  ;;  %v989_v57 = vsel %vm8568_vm7, %v8543_v42, %v988_v49  ;;  %v373_v59 = vunpack.c.h.bf16 %v324_v41  ;;  %v8233_v46 = vld [vmem:[%s10087_s3 + $0xb0] sm:$0xff]   ;;  %v8637_v49 = vld [vmem:[%s8498_s8 + $0x24] sm:$0xff]  }
  0x27   : > { %v994_v58 = vrot.slane %v992_v51, 7  ;;  %v7162_v60 = vunpack.c.l.bf16 %v8605_v48  ;;  %v1512_v61 = vor.u32 %v8545_v43, %v1507_v33  ;;  %1273 = vst [vmem:[#allocation2 + $0x6c] sm:$0xf] %v989_v57  ;;  %v427_v0 = vmul.f32 %v8512_v10, %v372_v56 }
  0x28   : > { %v7062_v62 = vpack.c.bf16 %v506_v53, %v506_v53  ;;  %v7063_v63 = vpack.c.bf16 %v507_v54, %v507_v54  ;;  %v461_v4 = vadd.f32 %v8519_v14, %v406_v55  ;;  %v428_v6 = vmul.f32 %v8512_v10, %v373_v59 }
  0x29   : > { %7625 = vmatpush3.bf16.msra.mxu0 %v8220_v12  ;;  %8201 = vmatpush3.bf16.msra.mxu1 %v8220_v12  ;;  %v997_v2 = vor.u32 %v995_v52, %v994_v58  ;;  %v999_v3 = vrot.slane %v994_v58, 4  ;;  %v430_v13 = vmul.f32 %v7162_v60, %v8512_v10  ;;  %v482_v20 = vadd.f32 %v8519_v14, %v427_v0 }
  0x2a   : > { %7674 = vmatprep.subr.bf16.mxu1 %v8582_v28  ;;  %7738 = vmatprep.subr.bf16.mxu0 %v8590_v38  ;;  %v8222_v1 = vld [vmem:[#allocation2 + $0x8] sm:$0xff]   ;;  %v794_v9 = vshrl.u32 %v7062_v62, 16  ;;  %v797_v11 = vshll.u32 %v7062_v62, 16  ;;  %v803_v12 = vshrl.u32 %v7063_v63, 16  ;;  %v483_v22 = vadd.f32 %v8519_v14, %v428_v6 }
  0x2b   : > { %v8223_v7 = vld [vmem:[#allocation2 + $0x10] sm:$0xff]   ;;  %v1514_v15 = vshll.u32 %v8222_v1, 16  ;;  %v1518_v33 = vshrl.u32 %v8222_v1, 16  ;;  %v998_v43 = vsel %vm8568_vm7, %v990_v50, %v997_v2  ;;  %v1007_v16 = vsel %vm8568_vm7, %v999_v3, %v8534_v34  ;;  %v8236_v3 = vld [vmem:[%s10087_s3 + $0xa8] sm:$0xff]  }
  0x2c   : > { %v1522_v17 = vshll.u32 %v8223_v7, 16  ;;  %v8224_v19 = vld [vmem:[#allocation2 + $0x60] sm:$0xff]   ;;  %1274 = vst [vmem:[#allocation2 + $0x70] sm:$0xf] %v998_v43  ;;  %1275 = vst [vmem:[#allocation2 + $0x74] sm:$0xf] %v1007_v16  ;;  %v7147_v23 = vunpack.c.h.bf16 %v8585_v29  ;;  %v485_v47 = vadd.f32 %v8519_v14, %v430_v13  ;;  %v354_v62 = vunpack.c.l.bf16 %v8637_v49 }
  0x2d   : > { %v1516_v24 = vrot.slane %v1514_v15, 1  ;;  %v796_v25 = vrot.slane %v794_v9, 7  ;;  %v805_v26 = vrot.slane %v803_v12, 7  ;;  %v806_v27 = vshll.u32 %v7063_v63, 16  ;;  %v8229_v9 = vld [vmem:[%s10087_s3 + $0x30] sm:$0xff]  }
  0x2e   : > { %v1524_v30 = vrot.slane %v1522_v17, 1  ;;  %v1602_v31 = vshll.u32 %v8224_v19, 16  ;;  %v1606_v32 = vshrl.u32 %v8224_v19, 16  ;;  %v1526_v35 = vshrl.u32 %v8223_v7, 16  ;;  %v8225_v39 = vld [vmem:[#allocation2 + $0x68] sm:$0xff]  }
  0x2f   : > { %v1517_v36 = vsel %vm1505_vm8, %v1512_v61, %v1516_v24  ;;  %v1520_v37 = vor.u32 %v1518_v33, %v1516_v24  ;;  %v799_v40 = vor.u32 %v797_v11, %v796_v25  ;;  %v801_v41 = vrot.slane %v796_v25, 4  ;;  %v8242_v33 = vld [vmem:[%s10087_s3 + $0xa0] sm:$0xff]  }
  0x30   : > { %7626 = vmatprep.mubr.bf16.mxu0 %v1517_v36  ;;  %v8630_v44 = vrot.slane %v1602_v31, 1  ;;  %v808_v45 = vor.u32 %v806_v27, %v805_v26  ;;  %v509_v29 = vmax.f32 %v461_v4, 0.0  ;;  %v1610_v51 = vshll.u32 %v8225_v39, 16 }
  0x31   : > { %v1525_v50 = vsel %vm1505_vm8, %v1520_v37, %v1524_v30  ;;  %v1614_v52 = vshrl.u32 %v8225_v39, 16  ;;  %v800_v53 = vsel %vm8568_vm7, %v8543_v42, %v799_v40  ;;  %v810_v57 = vrot.slane %v805_v26, 4  ;;  %v8235_v40 = vld [vmem:[%s10087_s3 + $0x28] sm:$0xff]  }
  0x32   : > { %7627 = vmatmul.mubr.bf16.vlgmr.msra.gmra.mxu0 %v1525_v50  ;;  %v1608_v54 = vor.u32 %v1606_v32, %v8630_v44  ;;  %v809_v55 = vsel %vm8568_vm7, %v801_v41, %v808_v45  ;;  %1252 = vst [vmem:[#allocation2 + $0x18] sm:$0xf] %v800_v53  ;;  %v7064_v56 = vpack.c.bf16 %v509_v29, %v509_v29  ;;  %v1612_v58 = vrot.slane %v1610_v51, 1 }
  0x33   : > { %v8646_v59 = vld [vmem:[#allocation2 + $0x70] sm:$0xff]   ;;  %7739 = vmatpush3.bf16.msra.mxu0 %v8590_v38  ;;  %1253 = vst [vmem:[#allocation2 + $0x1c] sm:$0xf] %v809_v55  ;;  %v8649_v60 = vor.u32 %v1526_v35, %v1524_v30  ;;  %v407_v61 = vmul.f32 %v7147_v23, %v8512_v10  ;;  %v818_v63 = vsel %vm8568_vm7, %v810_v57, %v8534_v34  ;;  %v530_v2 = vmax.f32 %v482_v20, 0.0  ;;  %v8693_v55 = vld [vmem:[%s8498_s8 + $0x84] sm:$0xff]  }
  0x34   : > { %v821_v0 = vshrl.u32 %v7064_v56, 16  ;;  %v824_v1 = vshll.u32 %v7064_v56, 16  ;;  %7740 = vmatprep.subr.bf16.mxu0 %v8233_v46  ;;  %v1613_v38 = vsel %vm1505_vm8, %v1608_v54, %v1612_v58  ;;  %v1616_v4 = vor.u32 %v1614_v52, %v1612_v58  ;;  %1254 = vst [vmem:[#allocation2 + $0x20] sm:$0xf] %v818_v63 }
  0x35   : > { %v1618_v6 = vshll.u32 %v8646_v59, 16  ;;  %v531_v7 = vmax.f32 %v483_v22, 0.0  ;;  %7650 = vmatprep.mubr.bf16.mxu1 %v1613_v38  ;;  %v7078_v12 = vpack.c.bf16 %v530_v2, %v530_v2  ;;  %v533_v13 = vmax.f32 %v485_v47, 0.0 }
  0x36   : > { %v8664_v11 = vrot.slane %v821_v0, 7  ;;  %v355_v15 = vunpack.c.h.bf16 %v8637_v49  ;;  %v1622_v17 = vshrl.u32 %v8646_v59, 16  ;;  %v462_v19 = vadd.f32 %v8519_v14, %v407_v61  ;;  %v8261_v59 = vld [vmem:[%s10087_s3 + $0x80] sm:$0xff]  }
  0x37   : > { %v8670_v43 = vrot.slane %v1618_v6, 1  ;;  %v7079_v16 = vpack.c.bf16 %v531_v7, %v531_v7  ;;  %7741 = vmatpush3.bf16.msra.mxu0 %v8233_v46  ;;  %v1010_v22 = vshrl.u32 %v7078_v12, 16  ;;  %v1013_v23 = vshll.u32 %v7078_v12, 16 }
  0x38   : > { %v826_v20 = vor.u32 %v824_v1, %v8664_v11  ;;  %v7080_v24 = vpack.c.bf16 %v533_v13, %v533_v13  ;;  %7742 = vmatprep.subr.bf16.mxu0 %v8236_v3  ;;  %v409_v30 = vmul.f32 %v8512_v10, %v354_v62  ;;  %v510_v41 = vmax.f32 %v462_v19, 0.0  ;;  %v8241_v62 = vld [vmem:[%s10087_s3 + $0x20] sm:$0xff]  }
  0x39   : > { %v1621_v25 = vsel %vm1505_vm8, %v1616_v4, %v8670_v43  ;;  %v1019_v26 = vshrl.u32 %v7079_v16, 16  ;;  %v1022_v27 = vshll.u32 %v7079_v16, 16  ;;  %v1012_v35 = vrot.slane %v1010_v22, 7  ;;  %v8724_v22 = vld [vmem:[%s8498_s8 + $0x30] sm:$0xff]  }
  0x3a   : > { %7651 = vmatmul.mubr.bf16.vlgmr.msra.gmra.mxu1 %v1621_v25  ;;  %v8230_v31 = vld [vmem:[#allocation2 + $0x18] sm:$0xff]   ;;  %v827_v32 = vsel %vm8568_vm7, %v8543_v42, %v826_v20  ;;  %v1037_v36 = vshrl.u32 %v7080_v24, 16  ;;  %v1040_v37 = vshll.u32 %v7080_v24, 16  ;;  %v828_v45 = vrot.slane %v8664_v11, 4  ;;  %v8249_v11 = vld [vmem:[%s10087_s3 + $0x10] sm:$0xff]  }
  0x3b   : > { %7675 = vmatpush3.bf16.msra.mxu1 %v8582_v28  ;;  %1255 = vst [vmem:[#allocation2 + $0x24] sm:$0xf] %v827_v32  ;;  %v1021_v39 = vrot.slane %v1019_v26, 7  ;;  %7743 = vmatpush3.bf16.msra.mxu0 %v8236_v3  ;;  %v410_v29 = vmul.f32 %v8512_v10, %v355_v15  ;;  %v1530_v46 = vshll.u32 %v8230_v31, 16  ;;  %v1534_v47 = vshrl.u32 %v8230_v31, 16  ;;  %v8248_v28 = vld [vmem:[%s10087_s3 + $0x98] sm:$0xff]  }
  0x3c   : > { %7676 = vmatprep.subr.bf16.mxu1 %v8229_v9  ;;  %v1015_v49 = vor.u32 %v1013_v23, %v1012_v35  ;;  %v1017_v50 = vrot.slane %v1012_v35, 4  ;;  %7744 = vmatprep.subr.bf16.mxu0 %v8242_v33  ;;  %v8690_v53 = vrot.slane %v1037_v36, 7  ;;  %v7065_v54 = vpack.c.bf16 %v510_v41, %v510_v41  ;;  %v8253_v3 = vld [vmem:[%s10087_s3 + $0x90] sm:$0xff]   ;;  %v8246_v23 = vld [vmem:[%s10087_s3 + $0x18] sm:$0xff]  }
  0x3d   : > { %v1024_v51 = vor.u32 %v1022_v27, %v1021_v39  ;;  %v1026_v52 = vrot.slane %v1021_v39, 4  ;;  %v1532_v56 = vrot.slane %v1530_v46, 1  ;;  %v464_v58 = vadd.f32 %v8519_v14, %v409_v30  ;;  %v8256_v27 = vld [vmem:[%s10087_s3 + $0x88] sm:$0xff]  }
  0x3e   : > { %v1016_v57 = vsel %vm8568_vm7, %v8543_v42, %v1015_v49  ;;  %v465_v61 = vadd.f32 %v8519_v14, %v410_v29  ;;  %v1042_v1 = vor.u32 %v1040_v37, %v8690_v53  ;;  %v830_v2 = vshrl.u32 %v7065_v54, 16 }
  0x3f   : > { %7677 = vmatpush3.bf16.msra.mxu1 %v8229_v9  ;;  %v1025_v63 = vsel %vm8568_vm7, %v1017_v50, %v1024_v51  ;;  %1276 = vst [vmem:[#allocation2 + $0x78] sm:$0xf] %v1016_v57  ;;  %v1034_v0 = vsel %vm8568_vm7, %v1026_v52, %v8534_v34  ;;  %7745 = vmatpush3.bf16.msra.mxu0 %v8242_v33  ;;  %v833_v6 = vshll.u32 %v7065_v54, 16  ;;  %v512_v7 = vmax.f32 %v464_v58, 0.0 }
  0x40   : > { %v1533_v38 = vsel %vm1505_vm8, %v8649_v60, %v1532_v56  ;;  %v1536_v4 = vor.u32 %v1534_v47, %v1532_v56  ;;  %1277 = vst [vmem:[#allocation2 + $0x7c] sm:$0xf] %v1025_v63  ;;  %1278 = vst [vmem:[#allocation2 + $0x80] sm:$0xf] %v1034_v0  ;;  %7678 = vmatprep.subr.bf16.mxu1 %v8235_v40  ;;  %7746 = vmatprep.subr.bf16.mxu0 %v8248_v28  ;;  %v832_v12 = vrot.slane %v830_v2, 7  ;;  %v8255_v2 = vld [vmem:[%s10087_s3 + $0x8] sm:$0xff]  }
  0x41   : > { %7630 = vmatprep.mubr.bf16.mxu0 %v1533_v38  ;;  %v1043_v9 = vsel %vm8568_vm7, %v8543_v42, %v1042_v1  ;;  %v513_v13 = vmax.f32 %v465_v61, 0.0  ;;  %v7163_v15 = vunpack.c.h.bf16 %v8605_v48  ;;  %v7066_v60 = vpack.c.bf16 %v512_v7, %v512_v7 }
  0x42   : > { %v8718_v33 = vld [vmem:[#allocation2 + $0x20] sm:$0xff]   ;;  %1279 = vst [vmem:[#allocation2 + $0x84] sm:$0xf] %v1043_v9  ;;  %v1044_v16 = vrot.slane %v8690_v53, 4  ;;  %v378_v19 = vunpack.c.l.bf16 %v8693_v55  ;;  %v379_v20 = vunpack.c.h.bf16 %v8693_v55  ;;  %v835_v24 = vor.u32 %v833_v6, %v832_v12 }
  0x43   : > { %7679 = vmatpush3.bf16.msra.mxu1 %v8235_v40  ;;  %v837_v25 = vrot.slane %v832_v12, 4  ;;  %v7067_v48 = vpack.c.bf16 %v513_v13, %v513_v13  ;;  %v431_v26 = vmul.f32 %v7163_v15, %v8512_v10  ;;  %7747 = vmatpush3.bf16.msra.mxu0 %v8248_v28  ;;  %v1538_v30 = vshll.u32 %v8718_v33, 16  ;;  %v8778_v15 = vld [vmem:[%s10087_s3 + $0x138] sm:$0xff]  }
  0x44   : > { %v1542_v31 = vshrl.u32 %v8718_v33, 16  ;;  %v848_v32 = vshrl.u32 %v7066_v60, 16  ;;  %v851_v35 = vshll.u32 %v7066_v60, 16  ;;  %7680 = vmatprep.subr.bf16.mxu1 %v8241_v62  ;;  %7748 = vmatprep.subr.bf16.mxu0 %v8253_v3  ;;  %v836_v36 = vsel %vm8568_vm7, %v828_v45, %v835_v24 }
  0x45   : > { %v845_v37 = vsel %vm8568_vm7, %v837_v25, %v8534_v34  ;;  %v857_v39 = vshrl.u32 %v7067_v48, 16  ;;  %v860_v40 = vshll.u32 %v7067_v48, 16  ;;  %v1540_v41 = vrot.slane %v1538_v30, 1  ;;  %1256 = vst [vmem:[#allocation2 + $0x28] sm:$0xf] %v836_v36 }
  0x46   : > { %1257 = vst [vmem:[#allocation2 + $0x2c] sm:$0xf] %v845_v37  ;;  %v850_v29 = vrot.slane %v848_v32, 7  ;;  %v486_v46 = vadd.f32 %v8519_v14, %v431_v26  ;;  %v433_v47 = vmul.f32 %v8512_v10, %v378_v19  ;;  %v1624_v45 = vor.u32 %v1622_v17, %v8670_v43  ;;  %v8260_v26 = vld [vmem:[%s10087_s3] sm:$0xff]  }
  0x47   : > { %v8232_v49 = vld [vmem:[#allocation2 + $0x78] sm:$0xff]   ;;  %v8750_v50 = vrot.slane %v857_v39, 7  ;;  %v434_v28 = vmul.f32 %v8512_v10, %v379_v20  ;;  %7681 = vmatpush3.bf16.msra.mxu1 %v8241_v62  ;;  %v7150_v51 = vunpack.c.l.bf16 %v8724_v22  ;;  %7749 = vmatpush3.bf16.msra.mxu0 %v8253_v3  ;;  %v1541_v52 = vsel %vm1505_vm8, %v1536_v4, %v1540_v41 }
  0x48   : > { %v853_v54 = vor.u32 %v851_v35, %v850_v29  ;;  %v855_v55 = vrot.slane %v850_v29, 4  ;;  %v7151_v56 = vunpack.c.h.bf16 %v8724_v22  ;;  %7682 = vmatprep.subr.bf16.mxu1 %v8246_v23  ;;  %7750 = vmatprep.subr.bf16.mxu0 %v8256_v27  ;;  %v1626_v43 = vshll.u32 %v8232_v49, 16  ;;  %v8423_v5 = vld [vmem:[#allocation2 + $0x78] sm:$0xff]  }
  0x49   : > { %7631 = vmatmul.mubr.bf16.gmra.mxu0 %v1541_v52  ;;  %v8759_v17 = vld [vmem:[#allocation2 + $0x80] sm:$0xff]   ;;  %v1630_v57 = vshrl.u32 %v8232_v49, 16  ;;  %v862_v58 = vor.u32 %v860_v40, %v8750_v50  ;;  %v534_v61 = vmax.f32 %v486_v46, 0.0  ;;  %v488_v63 = vadd.f32 %v8519_v14, %v433_v47 }
  0x4a   : > { %v854_v62 = vsel %vm8568_vm7, %v8543_v42, %v853_v54  ;;  %v489_v0 = vadd.f32 %v8519_v14, %v434_v28  ;;  %v412_v1 = vmul.f32 %v7150_v51, %v8512_v10  ;;  %v1628_v3 = vrot.slane %v1626_v43, 1  ;;  %v8813_v43 = vld [vmem:[%s10087_s3 + $0xf8] sm:$0xff]  }
  0x4b   : > { %v1634_v38 = vshll.u32 %v8759_v17, 16  ;;  %v863_v4 = vsel %vm8568_vm7, %v855_v55, %v862_v58  ;;  %1258 = vst [vmem:[#allocation2 + $0x30] sm:$0xf] %v854_v62  ;;  %v7081_v6 = vpack.c.bf16 %v534_v61, %v534_v61  ;;  %7683 = vmatpush3.bf16.msra.mxu1 %v8246_v23  ;;  %7751 = vmatpush3.bf16.msra.mxu0 %v8256_v27  ;;  %v1638_v9 = vshrl.u32 %v8759_v17, 16  ;;  %v312_v61 = vld [vmem:[%s8498_s8 + $0x3c] sm:$0xff]  }
  0x4c   : > { %v1544_v7 = vor.u32 %v1542_v31, %v1540_v41  ;;  %1259 = vst [vmem:[#allocation2 + $0x34] sm:$0xf] %v863_v4  ;;  %v536_v12 = vmax.f32 %v488_v63, 0.0  ;;  %v537_v13 = vmax.f32 %v489_v0, 0.0  ;;  %7684 = vmatprep.subr.bf16.mxu1 %v8249_v11  ;;  %7752 = vmatprep.subr.bf16.mxu0 %v8261_v59  ;;  %v1629_v33 = vsel %vm1505_vm8, %v1624_v45, %v1628_v3  ;;  %v8824_v0 = vld [vmem:[%s10086_s2] ss:$0 sm:$0xff] }
  0x4d   : > { %v1632_v60 = vor.u32 %v1630_v57, %v1628_v3  ;;  %v8781_v19 = vrot.slane %v1634_v38, 1  ;;  %v8783_v20 = vld [vmem:[#allocation2 + $0x28] sm:$0xff]   ;;  %v467_v22 = vadd.f32 %v8519_v14, %v412_v1  ;;  %7654 = vmatprep.mubr.bf16.mxu1 %v1629_v33  ;;  %v1046_v23 = vshrl.u32 %v7081_v6, 16 }
  0x4e   : > { %v1049_v24 = vshll.u32 %v7081_v6, 16  ;;  %v7082_v25 = vpack.c.bf16 %v536_v12, %v536_v12  ;;  %v7083_v48 = vpack.c.bf16 %v537_v13, %v537_v13  ;;  %v1546_v30 = vshll.u32 %v8783_v20, 16  ;;  %v8832_v12 = vld [vmem:[%s10085_s1] ss:$0 sm:$0xff] }
  0x4f   : > { %v1637_v27 = vsel %vm1505_vm8, %v1632_v60, %v8781_v19  ;;  %v1550_v31 = vshrl.u32 %v8783_v20, 16  ;;  %v413_v32 = vmul.f32 %v7151_v56, %v8512_v10  ;;  %7685 = vmatpush3.bf16.msra.mxu1 %v8249_v11  ;;  %7753 = vmatpush3.bf16.msra.mxu0 %v8261_v59  ;;  %v1048_v14 = vrot.slane %v1046_v23, 7  ;;  %v7297_v11 = vld [vmem:[%s8498_s8 + $0x90] sm:$0xff]  }
  0x50   : > { %7655 = vmatmul.mubr.bf16.gmra.mxu1 %v1637_v27  ;;  %v1064_v35 = vshrl.u32 %v7082_v25, 16  ;;  %v1067_v36 = vshll.u32 %v7082_v25, 16  ;;  %v1073_v37 = vshrl.u32 %v7083_v48, 16  ;;  %7686 = vmatprep.subr.bf16.mxu1 %v8255_v2  ;;  %v1548_v39 = vrot.slane %v1546_v30, 1 }
  0x51   : > { %v1076_v40 = vshll.u32 %v7083_v48, 16  ;;  %v515_v41 = vmax.f32 %v467_v22, 0.0  ;;  %v864_v29 = vrot.slane %v8750_v50, 4  ;;  %7866 = vmatprep.subr.bf16.mxu0 %v8778_v15  ;;  %v1051_v46 = vor.u32 %v1049_v24, %v1048_v14  ;;  %v8836_v22 = vld [vmem:[%s8498_s8 + $0x48] sm:$0xff]  }
  0x52   : > { %v1053_v47 = vrot.slane %v1048_v14, 4  ;;  %v1066_v49 = vrot.slane %v1064_v35, 7  ;;  %v1075_v10 = vrot.slane %v1073_v37, 7  ;;  %v1549_v45 = vsel %vm1505_vm8, %v1544_v7, %v1548_v39 }
  0x53   : > { %v8798_v28 = vld [vmem:[#allocation2 + $0x30] sm:$0xff]   ;;  %v1552_v51 = vor.u32 %v1550_v31, %v1548_v39  ;;  %v7068_v52 = vpack.c.bf16 %v515_v41, %v515_v41  ;;  %v872_v54 = vsel %vm8568_vm7, %v864_v29, %v8534_v34  ;;  %7687 = vmatpush3.bf16.msra.mxu1 %v8255_v2  ;;  %7634 = vmatprep.mubr.bf16.mxu0 %v1549_v45  ;;  %v7166_v2 = vunpack.c.l.bf16 %v7297_v11 }
  0x54   : > { %v1052_v50 = vsel %vm8568_vm7, %v1044_v16, %v1051_v46  ;;  %v1061_v55 = vsel %vm8568_vm7, %v1053_v47, %v8534_v34  ;;  %v1069_v56 = vor.u32 %v1067_v36, %v1066_v49  ;;  %v1071_v59 = vrot.slane %v1066_v49, 4  ;;  %1260 = vst [vmem:[#allocation2 + $0x38] sm:$0xf] %v872_v54  ;;  %7688 = vmatprep.subr.bf16.mxu1 %v8260_v26 }
  0x55   : > { %v1554_v57 = vshll.u32 %v8798_v28, 16  ;;  %1280 = vst [vmem:[#allocation2 + $0x88] sm:$0xf] %v1052_v50  ;;  %1281 = vst [vmem:[#allocation2 + $0x8c] sm:$0xf] %v1061_v55  ;;  %v1078_v53 = vor.u32 %v1076_v40, %v1075_v10  ;;  %v875_v58 = vshrl.u32 %v7068_v52, 16  ;;  %v468_v1 = vadd.f32 %v8824_v0, %v413_v32 }
  0x56   : > { %v878_v16 = vshll.u32 %v7068_v52, 16  ;;  %v1070_v62 = vsel %vm8568_vm7, %v8543_v42, %v1069_v56  ;;  %v1558_v63 = vshrl.u32 %v8798_v28, 16  ;;  %v1080_v6 = vrot.slane %v1075_v10, 4 }
  0x57   : > { %v1556_v3 = vrot.slane %v1554_v57, 1  ;;  %v1079_v38 = vsel %vm8568_vm7, %v1071_v59, %v1078_v53  ;;  %1282 = vst [vmem:[#allocation2 + $0x90] sm:$0xf] %v1070_v62  ;;  %v877_v4 = vrot.slane %v875_v58, 7  ;;  %7689 = vmatpush3.bf16.msra.mxu1 %v8260_v26  ;;  %v516_v7 = vmax.f32 %v468_v1, 0.0  ;;  %v8844_v26 = vld [vmem:[%s8498_s8 + $0x9c] sm:$0xff]  }
  0x58   : > { %1283 = vst [vmem:[#allocation2 + $0x94] sm:$0xf] %v1079_v38  ;;  %v436_v13 = vmul.f32 %v8832_v12, %v7166_v2  ;;  %v7167_v33 = vunpack.c.h.bf16 %v7297_v11  ;;  %v360_v60 = vunpack.c.l.bf16 %v312_v61  ;;  %7802 = vmatprep.subr.bf16.mxu1 %v8813_v43  ;;  %v1640_v24 = vor.u32 %v1638_v9, %v8781_v19 }
  0x59   : > { %v1557_v23 = vsel %vm1505_vm8, %v1552_v51, %v1556_v3  ;;  %v880_v25 = vor.u32 %v878_v16, %v877_v4  ;;  %v882_v48 = vrot.slane %v877_v4, 4  ;;  %v7069_v27 = vpack.c.bf16 %v516_v7, %v516_v7 }
  0x5a   : > { %7635 = vmatmul.mubr.bf16.gmra.mxu0 %v1557_v23  ;;  %v491_v30 = vadd.f32 %v8824_v0, %v436_v13  ;;  %v1088_v31 = vsel %vm8568_vm7, %v1080_v6, %v8534_v34  ;;  %v437_v32 = vmul.f32 %v8832_v12, %v7167_v33  ;;  %v361_v17 = vunpack.c.h.bf16 %v312_v61 }
  0x5b   : > { %v881_v14 = vsel %vm8568_vm7, %v8543_v42, %v880_v25  ;;  %1284 = vst [vmem:[#allocation2 + $0x98] sm:$0xf] %v1088_v31  ;;  %v415_v9 = vmul.f32 %v8832_v12, %v360_v60  ;;  %v7154_v19 = vunpack.c.l.bf16 %v8836_v22  ;;  %v1560_v36 = vor.u32 %v1558_v63, %v1556_v3 }
  0x5c   : > { %v8239_v35 = vld [vmem:[#allocation2 + $0x88] sm:$0xff]   ;;  %1261 = vst [vmem:[#allocation2 + $0x3c] sm:$0xf] %v881_v14  ;;  %v884_v37 = vshrl.u32 %v7069_v27, 16  ;;  %v492_v39 = vadd.f32 %v8824_v0, %v437_v32  ;;  %v384_v40 = vunpack.c.l.bf16 %v8844_v26  ;;  %v887_v41 = vshll.u32 %v7069_v27, 16 }
  0x5d   : > { %v539_v29 = vmax.f32 %v491_v30, 0.0  ;;  %v416_v46 = vmul.f32 %v8832_v12, %v361_v17  ;;  %v470_v47 = vadd.f32 %v8824_v0, %v415_v9  ;;  %v1642_v49 = vshll.u32 %v8239_v35, 16 }
  0x5e   : > { %v1646_v10 = vshrl.u32 %v8239_v35, 16  ;;  %v886_v11 = vrot.slane %v884_v37, 7  ;;  %v540_v45 = vmax.f32 %v492_v39, 0.0  ;;  %v418_v55 = vmul.f32 %v8832_v12, %v7154_v19 }
  0x5f   : > { %v8860_v51 = vld [vmem:[#allocation2 + $0x90] sm:$0xff]   ;;  %v7084_v52 = vpack.c.bf16 %v539_v29, %v539_v29  ;;  %v471_v54 = vadd.f32 %v8824_v0, %v416_v46  ;;  %v518_v50 = vmax.f32 %v470_v47, 0.0  ;;  %v1644_v56 = vrot.slane %v1642_v49, 1 }
  0x60   : > { %v889_v59 = vor.u32 %v887_v41, %v886_v11  ;;  %v891_v57 = vrot.slane %v886_v11, 4  ;;  %v7085_v53 = vpack.c.bf16 %v540_v45, %v540_v45  ;;  %v1650_v58 = vshll.u32 %v8860_v51, 16  ;;  %v8426_v8 = vld [vmem:[#allocation2 + $0x90] sm:$0xff]  }
  0x61   : > { %v1091_v16 = vshrl.u32 %v7084_v52, 16  ;;  %v1094_v61 = vshll.u32 %v7084_v52, 16  ;;  %v1654_v62 = vshrl.u32 %v8860_v51, 16  ;;  %v1645_v63 = vsel %vm1505_vm8, %v1640_v24, %v1644_v56 }
  0x62   : > { %v1648_v1 = vor.u32 %v1646_v10, %v1644_v56  ;;  %v890_v2 = vsel %vm8568_vm7, %v882_v48, %v889_v59  ;;  %v899_v3 = vsel %vm8568_vm7, %v891_v57, %v8534_v34  ;;  %7658 = vmatprep.mubr.bf16.mxu1 %v1645_v63  ;;  %v8872_v38 = vrot.slane %v1650_v58, 1 }
  0x63   : > { %v8874_v4 = vld [vmem:[#allocation2 + $0x38] sm:$0xff]   ;;  %1262 = vst [vmem:[#allocation2 + $0x40] sm:$0xf] %v890_v2  ;;  %1263 = vst [vmem:[#allocation2 + $0x44] sm:$0xf] %v899_v3  ;;  %v1093_v6 = vrot.slane %v1091_v16, 7  ;;  %v7070_v13 = vpack.c.bf16 %v518_v50, %v518_v50  ;;  %v473_v23 = vadd.f32 %v8824_v0, %v418_v55  ;;  %v385_v24 = vunpack.c.h.bf16 %v8844_v26 }
  0x64   : > { %v1100_v7 = vshrl.u32 %v7085_v53, 16  ;;  %v1103_v33 = vshll.u32 %v7085_v53, 16  ;;  %v519_v60 = vmax.f32 %v471_v54, 0.0  ;;  %v1653_v25 = vsel %vm1505_vm8, %v1648_v1, %v8872_v38  ;;  %v7298_v16 = vld [vmem:[%s8498_s8 + $0xa8] sm:$0xff]  }
  0x65   : > { %v1562_v48 = vshll.u32 %v8874_v4, 16  ;;  %v1566_v27 = vshrl.u32 %v8874_v4, 16  ;;  %v1096_v30 = vor.u32 %v1094_v61, %v1093_v6  ;;  %7659 = vmatmul.mubr.bf16.gmra.mxu1 %v1653_v25  ;;  %v1098_v31 = vrot.slane %v1093_v6, 4 }
  0x66   : > { %v1102_v32 = vrot.slane %v1100_v7, 7  ;;  %v7071_v14 = vpack.c.bf16 %v519_v60, %v519_v60  ;;  %v439_v17 = vmul.f32 %v8832_v12, %v384_v40  ;;  %v902_v26 = vshrl.u32 %v7070_v13, 16 }
  0x67   : > { %v1564_v9 = vrot.slane %v1562_v48, 1  ;;  %v1097_v19 = vsel %vm8568_vm7, %v8543_v42, %v1096_v30  ;;  %v905_v35 = vshll.u32 %v7070_v13, 16  ;;  %v521_v10 = vmax.f32 %v473_v23, 0.0 }
  0x68   : > { %1285 = vst [vmem:[#allocation2 + $0x9c] sm:$0xf] %v1097_v19  ;;  %v1105_v37 = vor.u32 %v1103_v33, %v1102_v32  ;;  %v1107_v39 = vrot.slane %v1102_v32, 4  ;;  %v911_v41 = vshrl.u32 %v7071_v14, 16  ;;  %v914_v29 = vshll.u32 %v7071_v14, 16 }
  0x69   : > { %v1565_v46 = vsel %vm1505_vm8, %v1560_v36, %v1564_v9  ;;  %v1568_v47 = vor.u32 %v1566_v27, %v1564_v9  ;;  %v904_v49 = vrot.slane %v902_v26, 7  ;;  %v440_v54 = vmul.f32 %v8832_v12, %v385_v24 }
  0x6a   : > { %7638 = vmatprep.mubr.bf16.mxu0 %v1565_v46  ;;  %v8887_v40 = vld [vmem:[#allocation2 + $0x40] sm:$0xff]   ;;  %v1106_v11 = vsel %vm8568_vm7, %v1098_v31, %v1105_v37  ;;  %v1115_v45 = vsel %vm8568_vm7, %v1107_v39, %v8534_v34  ;;  %v913_v52 = vrot.slane %v911_v41, 7  ;;  %v7072_v55 = vpack.c.bf16 %v521_v10, %v521_v10 }
  0x6b   : > { %1286 = vst [vmem:[#allocation2 + $0xa0] sm:$0xf] %v1106_v11  ;;  %1287 = vst [vmem:[#allocation2 + $0xa4] sm:$0xf] %v1115_v45  ;;  %v907_v36 = vor.u32 %v905_v35, %v904_v49  ;;  %v909_v50 = vrot.slane %v904_v49, 4  ;;  %v494_v56 = vadd.f32 %v8824_v0, %v439_v17  ;;  %v1570_v59 = vshll.u32 %v8887_v40, 16 }
  0x6c   : > { %v916_v57 = vor.u32 %v914_v29, %v913_v52  ;;  %v1574_v53 = vshrl.u32 %v8887_v40, 16  ;;  %v918_v58 = vrot.slane %v913_v52, 4  ;;  %v929_v63 = vshrl.u32 %v7072_v55, 16 }
  0x6d   : > { %v908_v61 = vsel %vm8568_vm7, %v8543_v42, %v907_v36  ;;  %v932_v1 = vshll.u32 %v7072_v55, 16  ;;  %v495_v2 = vadd.f32 %v8824_v0, %v440_v54  ;;  %v1572_v3 = vrot.slane %v1570_v59, 1 }
  0x6e   : > { %v917_v6 = vsel %vm8568_vm7, %v909_v50, %v916_v57  ;;  %1264 = vst [vmem:[#allocation2 + $0x48] sm:$0xf] %v908_v61  ;;  %v926_v7 = vsel %vm8568_vm7, %v918_v58, %v8534_v34  ;;  %v542_v13 = vmax.f32 %v494_v56, 0.0  ;;  %v8910_v60 = vrot.slane %v929_v63, 7 }
  0x6f   : > { %v8908_v33 = vld [vmem:[#allocation2 + $0x98] sm:$0xff]   ;;  %1265 = vst [vmem:[#allocation2 + $0x4c] sm:$0xf] %v917_v6  ;;  %1266 = vst [vmem:[#allocation2 + $0x50] sm:$0xf] %v926_v7  ;;  %v543_v23 = vmax.f32 %v495_v2, 0.0  ;;  %v7170_v24 = vunpack.c.l.bf16 %v7298_v16  ;;  %v7155_v25 = vunpack.c.h.bf16 %v8836_v22  ;;  %v1573_v48 = vsel %vm1505_vm8, %v1568_v47, %v1572_v3 }
  0x70   : > { %v1656_v27 = vor.u32 %v1654_v62, %v8872_v38  ;;  %v7086_v30 = vpack.c.bf16 %v542_v13, %v542_v13  ;;  %v7171_v31 = vunpack.c.h.bf16 %v7298_v16  ;;  %7639 = vmatmul.mubr.bf16.gmra.mxu0 %v1573_v48  ;;  %v1658_v32 = vshll.u32 %v8908_v33, 16 }
  0x71   : > { %v1662_v14 = vshrl.u32 %v8908_v33, 16  ;;  %v934_v17 = vor.u32 %v932_v1, %v8910_v60  ;;  %v7087_v9 = vpack.c.bf16 %v543_v23, %v543_v23  ;;  %v442_v22 = vmul.f32 %v8832_v12, %v7170_v24  ;;  %v342_v1 = vld [vmem:[%s8498_s8 + $0xb4] sm:$0xf] }
  0x72   : > { %v8920_v19 = vld [vmem:[#allocation2 + $0xa0] sm:$0xff]   ;;  %v1118_v26 = vshrl.u32 %v7086_v30, 16  ;;  %v419_v35 = vmul.f32 %v8832_v12, %v7155_v25  ;;  %v443_v51 = vmul.f32 %v8832_v12, %v7171_v31  ;;  %v1660_v62 = vrot.slane %v1658_v32, 1 }
  0x73   : > { %v935_v38 = vsel %vm8568_vm7, %v8543_v42, %v934_v17  ;;  %v1121_v37 = vshll.u32 %v7086_v30, 16  ;;  %v1127_v39 = vshrl.u32 %v7087_v9, 16  ;;  %v1666_v41 = vshll.u32 %v8920_v19, 16 }
  0x74   : > { %v1576_v29 = vor.u32 %v1574_v53, %v1572_v3  ;;  %1267 = vst [vmem:[#allocation2 + $0x54] sm:$0xf] %v935_v38  ;;  %v1120_v46 = vrot.slane %v1118_v26, 7  ;;  %v1130_v47 = vshll.u32 %v7087_v9, 16  ;;  %v1661_v49 = vsel %vm1505_vm8, %v1656_v27, %v1660_v62 }
  0x75   : > { %v1664_v10 = vor.u32 %v1662_v14, %v1660_v62  ;;  %v1129_v11 = vrot.slane %v1127_v39, 7  ;;  %v497_v45 = vadd.f32 %v8824_v0, %v442_v22  ;;  %7662 = vmatprep.mubr.bf16.mxu1 %v1661_v49  ;;  %v1668_v52 = vrot.slane %v1666_v41, 1 }
  0x76   : > { %v8931_v54 = vld [vmem:[#allocation2 + $0x48] sm:$0xff]   ;;  %v1123_v36 = vor.u32 %v1121_v37, %v1120_v46  ;;  %v474_v50 = vadd.f32 %v8824_v0, %v419_v35  ;;  %v498_v55 = vadd.f32 %v8824_v0, %v443_v51  ;;  %v1125_v56 = vrot.slane %v1120_v46, 4 }
  0x77   : > { %v1132_v59 = vor.u32 %v1130_v47, %v1129_v11  ;;  %v545_v57 = vmax.f32 %v497_v45, 0.0  ;;  %v1134_v53 = vrot.slane %v1129_v11, 4  ;;  %v1669_v58 = vsel %vm1505_vm8, %v1664_v10, %v1668_v52 }
  0x78   : > { %v1578_v16 = vshll.u32 %v8931_v54, 16  ;;  %v1582_v61 = vshrl.u32 %v8931_v54, 16  ;;  %v1124_v63 = vsel %vm8568_vm7, %v8543_v42, %v1123_v36  ;;  %7663 = vmatmul.mubr.bf16.gmra.mxu1 %v1669_v58  ;;  %v522_v13 = vmax.f32 %v474_v50, 0.0 }
  0x79   : > { %v1133_v2 = vsel %vm8568_vm7, %v1125_v56, %v1132_v59  ;;  %1288 = vst [vmem:[#allocation2 + $0xa8] sm:$0xf] %v1124_v63  ;;  %v7088_v3 = vpack.c.bf16 %v545_v57, %v545_v57  ;;  %v1142_v6 = vsel %vm8568_vm7, %v1134_v53, %v8534_v34  ;;  %v546_v23 = vmax.f32 %v498_v55, 0.0 }
  0x7a   : > { %v1580_v7 = vrot.slane %v1578_v16, 1  ;;  %1289 = vst [vmem:[#allocation2 + $0xac] sm:$0xf] %v1133_v2  ;;  %1290 = vst [vmem:[#allocation2 + $0xb0] sm:$0xf] %v1142_v6  ;;  %v390_v27 = vunpack.c.l.bf16 %v342_v1  ;;  %v7073_v31 = vpack.c.bf16 %v522_v13, %v522_v13  ;;  %v1670_v37 = vshrl.u32 %v8920_v19, 16 }
  0x7b   : > { %v8947_v24 = vld [vmem:[#allocation2 + $0x50] sm:$0xff]   ;;  %v1145_v25 = vshrl.u32 %v7088_v3, 16  ;;  %v1148_v48 = vshll.u32 %v7088_v3, 16  ;;  %v7089_v32 = vpack.c.bf16 %v546_v23, %v546_v23  ;;  %v2296_v2 = vld [vmem:[#allocation2] sm:$0xe]  ;;  %vm2317_vm9 = vcmask 1046528  }
  0x7c   : > { %v1581_v30 = vsel %vm1505_vm8, %v1576_v29, %v1580_v7  ;;  %v1584_v14 = vor.u32 %v1582_v61, %v1580_v7  ;;  %v1586_v17 = vshll.u32 %v8947_v24, 16  ;;  %v445_v26 = vmul.f32 %v8832_v12, %v390_v27 }
  0x7d   : > { %7642 = vmatprep.mubr.bf16.mxu0 %v1581_v30  ;;  %v1147_v9 = vrot.slane %v1145_v25, 7  ;;  %v938_v22 = vshrl.u32 %v7073_v31, 16  ;;  %v941_v35 = vshll.u32 %v7073_v31, 16  ;;  %v1154_v51 = vshrl.u32 %v7089_v32, 16 }
  0x7e   : > { %v1157_v62 = vshll.u32 %v7089_v32, 16  ;;  %v1588_v38 = vrot.slane %v1586_v17, 1  ;;  %v500_v41 = vadd.f32 %v8824_v0, %v445_v26  ;;  %v936_v29 = vrot.slane %v8910_v60, 4 }
  0x7f   : > { %v1150_v39 = vor.u32 %v1148_v48, %v1147_v9  ;;  %v940_v46 = vrot.slane %v938_v22, 7  ;;  %v1152_v47 = vrot.slane %v1147_v9, 4  ;;  %v1156_v49 = vrot.slane %v1154_v51, 7  ;;  %v8413_v48 = vld [vmem:[#allocation2 + $0x4] sm:$0xf] }
  0x80   : > { %v1589_v10 = vsel %vm1505_vm8, %v1584_v14, %v1588_v38  ;;  %v548_v36 = vmax.f32 %v500_v41, 0.0  ;;  %v1672_v59 = vor.u32 %v1670_v37, %v1668_v52  ;;  %v1590_v25 = vshrl.u32 %v8947_v24, 16 }
  0x81   : > { %v8956_v11 = vld [vmem:[#allocation2 + $0xa8] sm:$0xff]   ;;  %v1151_v45 = vsel %vm8568_vm7, %v8543_v42, %v1150_v39  ;;  %7643 = vmatmul.mubr.bf16.gmra.mxu0 %v1589_v10  ;;  %v943_v50 = vor.u32 %v941_v35, %v940_v46  ;;  %v945_v55 = vrot.slane %v940_v46, 4  ;;  %v1159_v56 = vor.u32 %v1157_v62, %v1156_v49 }
  0x82   : > { %1291 = vst [vmem:[#allocation2 + $0xb4] sm:$0xf] %v1151_v45  ;;  %v1161_v0 = vrot.slane %v1156_v49, 4  ;;  %v1674_v60 = vshll.u32 %v8956_v11, 16  ;;  %v7090_v57 = vpack.c.bf16 %v548_v36, %v548_v36  ;;  %v1678_v6 = vshrl.u32 %v8956_v11, 16 }
  0x83   : > { %v944_v53 = vsel %vm8568_vm7, %v936_v29, %v943_v50  ;;  %v953_v58 = vsel %vm8568_vm7, %v945_v55, %v8534_v34  ;;  %v1160_v16 = vsel %vm8568_vm7, %v1152_v47, %v1159_v56  ;;  %v6757_v27 = vcombine.low %v2296_v2, %v8413_v48  ;;  %v8414_v29 = vld [vmem:[#allocation2 + $0x8] sm:$0xff]  }
  0x84   : > { %v1169_v61 = vsel %vm8568_vm7, %v1161_v0, %v8534_v34  ;;  %v1676_v63 = vrot.slane %v1674_v60, 1  ;;  %1268 = vst [vmem:[#allocation2 + $0x58] sm:$0xf] %v944_v53  ;;  %1269 = vst [vmem:[#allocation2 + $0x5c] sm:$0xf] %v953_v58  ;;  %v1172_v52 = vshrl.u32 %v7090_v57, 16  ;;  %v1592_v22 = vor.u32 %v1590_v25, %v1588_v38 }
  0x85   : > { %1292 = vst [vmem:[#allocation2 + $0xb8] sm:$0xf] %v1160_v16  ;;  %1293 = vst [vmem:[#allocation2 + $0xbc] sm:$0xf] %v1169_v61  ;;  %v1175_v1 = vshll.u32 %v7090_v57, 16  ;;  %v2318_v62 = vrot.slane %v6757_v27, 1 }
  0x86   : > { %v1677_v3 = vsel %vm1505_vm8, %v1672_v59, %v1676_v63  ;;  %v8974_v7 = vrot.slane %v1172_v52, 7  ;;  %v1680_v30 = vor.u32 %v1678_v6, %v1676_v63  ;;  %v2319_v46 = vrot.slane %v8414_v29, 1  ;;  %v8415_v60 = vld [vmem:[#allocation2 + $0x10] sm:$0xff]   ;;  %v8416_v58 = vld [vmem:[#allocation2 + $0x18] sm:$0xff]   ;;  %v8267_v25 = vld [vmem:[%s10087_s3 + $0xe8] sm:$0xff]  }
  0x87   : > { %7666 = vmatprep.mubr.bf16.mxu1 %v1677_v3  ;;  %v2321_v57 = vrot.slane %v8415_v60, 1  ;;  %v2323_v16 = vrot.slane %v8416_v58, 1  ;;  %v8266_v52 = vld [vmem:[%s10087_s3 + $0x130] sm:$0xff]   ;;  %v2327_v3 = vrot.slane %v8783_v20, 1  ;;  %v8270_v20 = vld [vmem:[%s10087_s3 + $0x120] sm:$0xff]   ;;  %v2329_v48 = vrot.slane %v8798_v28, 1 }
  0x88   : > { %v1177_v23 = vor.u32 %v1175_v1, %v8974_v7  ;;  %v2320_v55 = vsel %vm2317_vm9, %v2318_v62, %v2319_v46  ;;  %v8417_v1 = vld [vmem:[#allocation2 + $0x20] sm:$0xff]   ;;  %v8265_v6 = vld [vmem:[%s10087_s3 + $0xf0] sm:$0xff]   ;;  %v8276_v62 = vld [vmem:[%s10087_s3 + $0x108] sm:$0xff]  }
  0x89   : > { %v8976_v13 = vld [vmem:[#allocation2 + $0xb0] sm:$0xff]   ;;  %v2322_v63 = vsel %vm2317_vm9, %v2319_v46, %v2321_v57  ;;  %v2325_v2 = vrot.slane %v8417_v1, 1  ;;  %v8269_v27 = vld [vmem:[%s10087_s3 + $0xe0] sm:$0xff]   ;;  %v8275_v46 = vld [vmem:[%s10087_s3 + $0xc8] sm:$0xff]  }
  0x8a   : > { %v1682_v31 = vshll.u32 %v8976_v13, 16  ;;  %v1686_v32 = vshrl.u32 %v8976_v13, 16  ;;  %v1178_v14 = vsel %vm8568_vm7, %v8543_v42, %v1177_v23 }
  0x8b   : > { %v8985_v17 = vld [vmem:[#allocation2 + $0x58] sm:$0xff]   ;;  %1294 = vst [vmem:[#allocation2 + $0xc0] sm:$0xf] %v1178_v14  ;;  %v2326_v23 = vsel %vm2317_vm9, %v2323_v16, %v2325_v2  ;;  %v8274_v14 = vld [vmem:[%s10087_s3 + $0x110] sm:$0xff]  }
  0x8c   : > { %v1684_v9 = vrot.slane %v1682_v31, 1  ;;  %v8987_v26 = vld [vmem:[#allocation2 + $0xb8] sm:$0xff]   ;;  %v1594_v35 = vshll.u32 %v8985_v17, 16  ;;  %v1598_v51 = vshrl.u32 %v8985_v17, 16  ;;  %v2330_v31 = vsel %vm2317_vm9, %v2327_v3, %v2329_v48 }
  0x8d   : > { %v1690_v41 = vshll.u32 %v8987_v26, 16  ;;  %v1694_v10 = vshrl.u32 %v8987_v26, 16 }
  0x8e   : > { %v1685_v37 = vsel %vm1505_vm8, %v1680_v30, %v1684_v9  ;;  %v1688_v39 = vor.u32 %v1686_v32, %v1684_v9  ;;  %v1596_v47 = vrot.slane %v1594_v35, 1  ;;  %v8272_v30 = vld [vmem:[%s10087_s3 + $0x118] sm:$0xff]   ;;  %v2335_v35 = vrot.slane %v8931_v54, 1 }
  0x8f   : > { %7667 = vmatmul.mubr.bf16.gmra.mxu1 %v1685_v37  ;;  %v1692_v49 = vrot.slane %v1690_v41, 1  ;;  %v8271_v9 = vld [vmem:[%s10087_s3 + $0xd8] sm:$0xff]   ;;  %v8418_v37 = vld [vmem:[#allocation2 + $0x28] sm:$0xff]  }
  0x90   : > { %v1597_v38 = vsel %vm1505_vm8, %v1592_v22, %v1596_v47  ;;  %v1600_v45 = vor.u32 %v1598_v51, %v1596_v47  ;;  %v2333_v22 = vrot.slane %v8887_v40, 1  ;;  %v8273_v51 = vld [vmem:[%s10087_s3 + $0xd0] sm:$0xff]   ;;  %v2337_v47 = vrot.slane %v8947_v24, 1 }
  0x91   : > { %7646 = vmatprep.mubr.bf16.mxu0 %v1597_v38  ;;  %v1693_v36 = vsel %vm1505_vm8, %v1688_v39, %v1692_v49  ;;  %v1696_v0 = vor.u32 %v1694_v10, %v1692_v49  ;;  %v2339_v49 = vrot.slane %v8985_v17, 1  ;;  %v343_v10 = vld [vmem:[%s8498_s8 + $0xb8] sm:$0xf] }
  0x92   : > { %v8996_v50 = vld [vmem:[#allocation2 + $0xc0] ss:$0 sps:$4 sm:$0x11]   ;;  %v1605_v56 = vsel %vm1505_vm8, %v1600_v45, %v8630_v44  ;;  %7670 = vmatprep.mubr.bf16.mxu1 %v1693_v36  ;;  %v2324_v44 = vsel %vm2317_vm9, %v2321_v57, %v2323_v16  ;;  %v2336_v41 = vsel %vm2317_vm9, %v2333_v22, %v2335_v35  ;;  %v9068_v38 = vld [vmem:[%s10087_s3 + $0x1b8] sm:$0xff]   ;;  %v391_v45 = vunpack.c.l.bf16 %v343_v10  ;;  %v8421_v57 = vld [vmem:[#allocation2 + $0x68] sm:$0xff]  }
  0x93   : > { %7647 = vmatmul.mubr.bf16.gmra.mxu0 %v1605_v56  ;;  %v1698_v59 = vshll.u32 %v8996_v50, 16  ;;  %v2338_v36 = vsel %vm2317_vm9, %v2335_v35, %v2337_v47  ;;  %v2340_v56 = vsel %vm2317_vm9, %v2337_v47, %v2339_v49  ;;  %v282_v16 = vld [vmem:[#allocation2 + $0xcc] sm:$0xf]  ;;  %v9108_v35 = vld [vmem:[#allocation2 + $0x10] sm:$0xf]  ;;  %v2363_v47 = vrot.slane %v8987_v26, 1 }
  0x94   : > { %7754 = vmatprep.mubr.bf16.mxu0 %v2320_v55  ;;  %v446_v55 = vmul.f32 %v8832_v12, %v391_v45  ;;  %v8420_v12 = vld [vmem:[#allocation2 + $0x60] sm:$0xff]   ;;  %v8427_v45 = vld [vmem:[#allocation2 + $0x98] sm:$0xff]  }
  0x95   : > { %v1700_v53 = vrot.slane %v1698_v59, 1 }
  0x97   : > { %v1701_v61 = vsel %vm1505_vm8, %v1696_v0, %v1700_v53  ;;  %v9078_v0 = vld [vmem:[%s10087_s3 + $0x178] sm:$0xff]   ;;  %v2343_v53 = vrot.slane %v8421_v57, 1 }
  0x98   : > { %7671 = vmatmul.mubr.bf16.gmra.mxu1 %v1701_v61  ;;  %v283_v61 = vsel %vm8559_vm6, 0, %v282_v16 }
  0x99   : > { %7690 = vmatprep.mubr.bf16.mxu1 %v8525_v21  ;;  %v8268_v21 = vld [vmem:[%s10087_s3 + $0x128] sm:$0xff]   ;;  %284 = vst [vmem:[#allocation2 + $0xcc] sm:$0xf] %v283_v61 }
  0x9a   : > { %v9136_v61 = vld [vmem:[#allocation2 + $0x2c] sm:$0xff]  }
  0x9b   : > { %7755 = vmatmul.mubr.bf16.vlgmr.msra.gmra.mxu0 %v2322_v63 }
  0x9c   : > { %7867 = vmatpush3.bf16.msra.mxu0 %v8778_v15  ;;  %7758 = vmatprep.mubr.bf16.mxu0 %v2324_v44  ;;  %v2328_v15 = vsel %vm2317_vm9, %v2325_v2, %v2327_v3  ;;  %v8422_v3 = vld [vmem:[#allocation2 + $0x70] sm:$0xff]  }
  0x9d   : > { %7868 = vmatprep.subr.bf16.mxu0 %v8266_v52 }
  0xa0   : > { %7691 = vmatmul.mubr.bf16.vlgmr.msra.gmra.mxu1 %v8414_v29  ;;  %7869 = vmatpush3.bf16.msra.mxu0 %v8266_v52  ;;  %v8278_v29 = vld [vmem:[%s10087_s3 + $0x100] sm:$0xff]  }
  0xa1   : > { %7803 = vmatpush3.bf16.msra.mxu1 %v8813_v43  ;;  %7694 = vmatprep.mubr.bf16.mxu1 %v8415_v60  ;;  %v2331_v43 = vrot.slane %v8874_v4, 1 }
  0xa2   : > { %7804 = vmatprep.subr.bf16.mxu1 %v8265_v6  ;;  %7870 = vmatprep.subr.bf16.mxu0 %v8268_v21 }
  0xa3   : > { %7759 = vmatmul.mubr.bf16.gmra.mxu0 %v2326_v23  ;;  %v2332_v32 = vsel %vm2317_vm9, %v2329_v48, %v2331_v43  ;;  %v2334_v39 = vsel %vm2317_vm9, %v2331_v43, %v2333_v22  ;;  %v2347_v23 = vrot.slane %v8423_v5, 1 }
  0xa4   : > { %7762 = vmatprep.mubr.bf16.mxu0 %v2328_v15  ;;  %7871 = vmatpush3.bf16.msra.mxu0 %v8268_v21  ;;  %v1179_v21 = vrot.slane %v8974_v7, 4 }
  0xa5   : > { %7805 = vmatpush3.bf16.msra.mxu1 %v8265_v6  ;;  %7872 = vmatprep.subr.bf16.mxu0 %v8270_v20  ;;  %v2345_v6 = vrot.slane %v8422_v3, 1 }
  0xa6   : > { %7806 = vmatprep.subr.bf16.mxu1 %v8267_v25 }
  0xa7   : > { %v2346_v48 = vsel %vm2317_vm9, %v2343_v53, %v2345_v6  ;;  %v2348_v43 = vsel %vm2317_vm9, %v2345_v6, %v2347_v23 }
  0xa8   : > { %7695 = vmatmul.mubr.bf16.gmra.mxu1 %v8416_v58  ;;  %7873 = vmatpush3.bf16.msra.mxu0 %v8270_v20 }
  0xa9   : > { %7698 = vmatprep.mubr.bf16.mxu1 %v8417_v1  ;;  %7807 = vmatpush3.bf16.msra.mxu1 %v8267_v25  ;;  %v1297_v25 = vld [vmem:[#allocation2 + $0xcc] sm:$0x1] }
  0xaa   : > { %7808 = vmatprep.subr.bf16.mxu1 %v8269_v27  ;;  %7874 = vmatprep.subr.bf16.mxu0 %v8272_v30  ;;  %v1298_v7 = vsel %vm8504_vm2, %v8543_v42, %v1297_v25  ;;  %v2353_v42 = vrot.slane %v8426_v8, 1 }
  0xab   : > { %7763 = vmatmul.mubr.bf16.gmra.mxu0 %v2330_v31  ;;  %1299 = vst [vmem:[#allocation2 + $0xcc] sm:$0x1] %v1298_v7  ;;  %v9153_v7 = vld [vmem:[#allocation2 + $0x44] sm:$0xff]  }
  0xac   : > { %7766 = vmatprep.mubr.bf16.mxu0 %v2332_v32  ;;  %7875 = vmatpush3.bf16.msra.mxu0 %v8272_v30  ;;  %v2355_v32 = vrot.slane %v8908_v33, 1 }
  0xad   : > { %7809 = vmatpush3.bf16.msra.mxu1 %v8269_v27  ;;  %7876 = vmatprep.subr.bf16.mxu0 %v8274_v14  ;;  %v8424_v27 = vld [vmem:[#allocation2 + $0x80] sm:$0xff]  }
  0xae   : > { %7810 = vmatprep.subr.bf16.mxu1 %v8271_v9  ;;  %v2349_v18 = vrot.slane %v8424_v27, 1  ;;  %v2356_v22 = vsel %vm2317_vm9, %v2353_v42, %v2355_v32 }
  0xb0   : > { %7699 = vmatmul.mubr.bf16.gmra.mxu1 %v8418_v37  ;;  %7877 = vmatpush3.bf16.msra.mxu0 %v8274_v14 }
  0xb1   : > { %7702 = vmatprep.mubr.bf16.mxu1 %v8798_v28  ;;  %7811 = vmatpush3.bf16.msra.mxu1 %v8271_v9  ;;  %v8277_v28 = vld [vmem:[%s10087_s3 + $0xc0] sm:$0xff]   ;;  %v3242_v9 = vld [vmem:[#allocation2 + $0xc] sm:$0xf] }
  0xb2   : > { %7812 = vmatprep.subr.bf16.mxu1 %v8273_v51  ;;  %7878 = vmatprep.subr.bf16.mxu0 %v8276_v62  ;;  %v6830_v37 = vcombine.low %v3242_v9, %v9108_v35  ;;  %v8289_v9 = vld [vmem:[#allocation2 + $0x24] sm:$0xff]  }
  0xb3   : > { %7767 = vmatmul.mubr.bf16.gmra.mxu0 %v2334_v39  ;;  %v9113_v39 = vld [vmem:[#allocation2 + $0x14] sm:$0xff]  }
  0xb4   : > { %7770 = vmatprep.mubr.bf16.mxu0 %v2336_v41  ;;  %7879 = vmatpush3.bf16.msra.mxu0 %v8276_v62  ;;  %v2359_v62 = vrot.slane %v8956_v11, 1  ;;  %v3439_v10 = vshll.u32 %v9113_v39, 16 }
  0xb5   : > { %7813 = vmatpush3.bf16.msra.mxu1 %v8273_v51  ;;  %7880 = vmatprep.subr.bf16.mxu0 %v8278_v29  ;;  %v2357_v51 = vrot.slane %v8920_v19, 1 }
  0xb6   : > { %7814 = vmatprep.subr.bf16.mxu1 %v8275_v46 }
  0xb7   : > { %v2358_v33 = vsel %vm2317_vm9, %v2355_v32, %v2357_v51  ;;  %v2360_v41 = vsel %vm2317_vm9, %v2357_v51, %v2359_v62  ;;  %v8293_v51 = vld [vmem:[#allocation2 + $0x2c] sm:$0xff]  }
  0xb8   : > { %7703 = vmatmul.mubr.bf16.gmra.mxu1 %v8874_v4  ;;  %7881 = vmatpush3.bf16.msra.mxu0 %v8278_v29  ;;  %v8419_v4 = vld [vmem:[%s10086_s2] ss:$0 sm:$0xff]  ;;  %v2361_v29 = vrot.slane %v8976_v13, 1 }
  0xb9   : > { %7706 = vmatprep.mubr.bf16.mxu1 %v8887_v40  ;;  %7815 = vmatpush3.bf16.msra.mxu1 %v8275_v46  ;;  %v501_v59 = vadd.f32 %v8419_v4, %v446_v55  ;;  %v2341_v40 = vrot.slane %v8420_v12, 1  ;;  %v3434_v46 = vshll.u32 %v6830_v37, 16  ;;  %v2365_v4 = vrot.slane %v8996_v50, 1 }
  0xba   : > { %7816 = vmatprep.subr.bf16.mxu1 %v8277_v28  ;;  %7994 = vmatprep.subr.bf16.mxu0 %v9068_v38  ;;  %v2364_v55 = vsel %vm2317_vm9, %v2361_v29, %v2363_v47 }
  0xbb   : > { %7771 = vmatmul.mubr.bf16.gmra.mxu0 %v2338_v36  ;;  %v549_v60 = vmax.f32 %v501_v59, 0.0  ;;  %v2342_v63 = vsel %vm2317_vm9, %v2339_v49, %v2341_v40  ;;  %v2344_v52 = vsel %vm2317_vm9, %v2341_v40, %v2343_v53  ;;  %v3432_v49 = vshrl.u32 %v6830_v37, 16  ;;  %v9126_v40 = vld [vmem:[#allocation2 + $0x24] sm:$0xff]  }
  0xbc   : > { %7774 = vmatprep.mubr.bf16.mxu0 %v2340_v56  ;;  %v2362_v36 = vsel %vm2317_vm9, %v2359_v62, %v2361_v29  ;;  %v9123_v56 = vld [vmem:[#allocation2 + $0x1c] sm:$0xff]   ;;  %v3455_v50 = vshll.u32 %v9126_v40, 16 }
  0xbd   : > { %7817 = vmatpush3.bf16.msra.mxu1 %v8277_v28  ;;  %v7091_v58 = vpack.c.bf16 %v549_v60, %v549_v60  ;;  %v3436_v28 = vrot.slane %v3434_v46, 1  ;;  %v3447_v60 = vshll.u32 %v9123_v56, 16  ;;  %v8317_v29 = vld [vmem:[%s10087_s3 + $0x198] sm:$0xff]  }
  0xbe   : > { %7930 = vmatprep.subr.bf16.mxu1 %v9078_v0 }
  0xbf   : > { %v1181_v44 = vshrl.u32 %v7091_v58, 16  ;;  %v1184_v2 = vshll.u32 %v7091_v58, 16  ;;  %v3437_v59 = vor.u32 %v3436_v28, %v3432_v49  ;;  %v3451_v58 = vshrl.u32 %v9123_v56, 16 }
  0xc0   : > { %7707 = vmatmul.mubr.bf16.gmra.mxu1 %v8931_v54  ;;  %v3449_v16 = vrot.slane %v3447_v60, 1  ;;  %v3491_v28 = vshrl.u32 %v9153_v7, 16 }
  0xc1   : > { %7710 = vmatprep.mubr.bf16.mxu1 %v8947_v24  ;;  %v1183_v1 = vrot.slane %v1181_v44, 7  ;;  %v8281_v44 = vld [vmem:[#allocation2 + $0xc] sm:$0xff]  }
  0xc3   : > { %7775 = vmatmul.mubr.bf16.gmra.mxu0 %v2342_v63  ;;  %v1186_v15 = vor.u32 %v1184_v2, %v1183_v1  ;;  %v1188_v54 = vrot.slane %v1183_v1, 4  ;;  %v9138_v1 = vld [vmem:[#allocation2 + $0x34] sm:$0xff]   ;;  %v3463_v2 = vshll.u32 %v9136_v61, 16 }
  0xc4   : > { %7778 = vmatprep.mubr.bf16.mxu0 %v2344_v52  ;;  %v3457_v52 = vrot.slane %v3455_v50, 1 }
  0xc5   : > { %v1187_v20 = vsel %vm8568_vm7, %v1179_v21, %v1186_v15  ;;  %v1196_v24 = vsel %vm8568_vm7, %v1188_v54, %v8534_v34  ;;  %v8425_v34 = vld [vmem:[#allocation2 + $0x88] sm:$0xff]   ;;  %v8291_v21 = vld [vmem:[%s10087_s3 + $0x1b0] sm:$0xff]   ;;  %v3465_v15 = vrot.slane %v3463_v2, 1  ;;  %v9150_v54 = vld [vmem:[#allocation2 + $0x3c] sm:$0xff]  }
  0xc6   : > { %1295 = vst [vmem:[#allocation2 + $0xc4] sm:$0xf] %v1187_v20  ;;  %1296 = vst [vmem:[#allocation2 + $0xc8] sm:$0xf] %v1196_v24  ;;  %v2351_v30 = vrot.slane %v8425_v34, 1  ;;  %v8287_v24 = vld [vmem:[#allocation2 + $0x1c] sm:$0xff]  }
  0xc8   : > { %7711 = vmatmul.mubr.bf16.gmra.mxu1 %v8985_v17  ;;  %v2350_v17 = vsel %vm2317_vm9, %v2347_v23, %v2349_v18  ;;  %v2352_v31 = vsel %vm2317_vm9, %v2349_v18, %v2351_v30  ;;  %v2354_v14 = vsel %vm2317_vm9, %v2351_v30, %v2353_v42  ;;  %v3471_v23 = vshll.u32 %v9138_v1, 16  ;;  %v8299_v42 = vld [vmem:[%s10087_s3 + $0x168] sm:$0xff]  }
  0xc9   : > { %7714 = vmatprep.mubr.bf16.mxu1 %v8420_v12  ;;  %v3441_v12 = vrot.slane %v3439_v10, 1  ;;  %v3479_v18 = vshll.u32 %v9150_v54, 16 }
  0xcb   : > { %7779 = vmatmul.mubr.bf16.gmra.mxu0 %v2346_v48  ;;  %v3442_v53 = vsel %vm1505_vm8, %v3437_v59, %v3441_v12  ;;  %v3473_v48 = vrot.slane %v3471_v23, 1  ;;  %v3481_v32 = vrot.slane %v3479_v18, 1  ;;  %v8339_v23 = vld [vmem:[%s10087_s3 + $0x180] sm:$0xff]  }
  0xcc   : > { %7782 = vmatprep.mubr.bf16.mxu0 %v2348_v43  ;;  %v8290_v43 = vld [vmem:[%s10087_s3 + $0x170] sm:$0xff]  }
  0xd0   : > { %7715 = vmatmul.mubr.bf16.gmra.mxu1 %v8421_v57  ;;  %v2366_v57 = vsel %vm2317_vm9, %v2363_v47, %v2365_v4  ;;  %v8315_v4 = vld [vmem:[%s10087_s3 + $0x158] sm:$0xff]  }
  0xd1   : > { %7718 = vmatprep.mubr.bf16.mxu1 %v8422_v3  ;;  %v3459_v3 = vshrl.u32 %v9126_v40, 16 }
  0xd3   : > { %7783 = vmatmul.mubr.bf16.gmra.mxu0 %v2350_v17  ;;  %v3461_v20 = vor.u32 %v3459_v3, %v3457_v52  ;;  %v3483_v17 = vshrl.u32 %v9150_v54, 16 }
  0xd4   : > { %7786 = vmatprep.mubr.bf16.mxu0 %v2352_v31  ;;  %v3487_v31 = vshll.u32 %v9153_v7, 16 }
  0xd5   : > { %v3485_v62 = vor.u32 %v3483_v17, %v3481_v32  ;;  %v8338_v17 = vld [vmem:[%s10087_s3 + $0x140] sm:$0xff]  }
  0xd6   : > { %v3489_v37 = vrot.slane %v3487_v31, 1  ;;  %v9244_v31 = vld [vmem:[%s10087_s3 + $0x238] sm:$0xff]  }
  0xd8   : > { %7719 = vmatmul.mubr.bf16.gmra.mxu1 %v8423_v5  ;;  %v3467_v5 = vshrl.u32 %v9136_v61, 16  ;;  %v3490_v10 = vsel %vm1505_vm8, %v3485_v62, %v3489_v37 }
  0xd9   : > { %7722 = vmatprep.mubr.bf16.mxu1 %v8424_v27  ;;  %v8301_v27 = vld [vmem:[%s10087_s3 + $0x1a8] sm:$0xff]  }
  0xda   : > { %v3469_v25 = vor.u32 %v3467_v5, %v3465_v15 }
  0xdb   : > { %7787 = vmatmul.mubr.bf16.gmra.mxu0 %v2354_v14 }
  0xdc   : > { %7790 = vmatprep.mubr.bf16.mxu0 %v2356_v22  ;;  %v3474_v30 = vsel %vm1505_vm8, %v3469_v25, %v3473_v48 }
  0xe0   : > { %7723 = vmatmul.mubr.bf16.gmra.mxu1 %v8425_v34  ;;  %v3475_v34 = vshrl.u32 %v9138_v1, 16 }
  0xe1   : > { %7726 = vmatprep.mubr.bf16.mxu1 %v8426_v8  ;;  %v8307_v8 = vld [vmem:[%s10087_s3 + $0x1a0] sm:$0xff]  }
  0xe2   : > { %v3477_v22 = vor.u32 %v3475_v34, %v3473_v48  ;;  %v8300_v48 = vld [vmem:[#allocation2 + $0x44] sm:$0xff]   ;;  %v9234_v34 = vld [vmem:[#allocation2 + $0x74] sm:$0xff]  }
  0xe3   : > { %7791 = vmatmul.mubr.bf16.gmra.mxu0 %v2358_v33  ;;  %v9178_v33 = vld [vmem:[#allocation2 + $0x54] sm:$0xff]   ;;  %v3535_v62 = vshll.u32 %v9234_v34, 16 }
  0xe4   : > { %7794 = vmatprep.mubr.bf16.mxu0 %v2360_v41  ;;  %v8306_v41 = vld [vmem:[%s10087_s3 + $0x160] sm:$0xff]   ;;  %v3482_v49 = vsel %vm1505_vm8, %v3477_v22, %v3481_v32  ;;  %v3507_v3 = vshrl.u32 %v9178_v33, 16 }
  0xe8   : > { %7727 = vmatmul.mubr.bf16.gmra.mxu1 %v8427_v45 }
  0xe9   : > { %7730 = vmatprep.mubr.bf16.mxu1 %v8920_v19  ;;  %v3443_v19 = vshrl.u32 %v9113_v39, 16 }
  0xeb   : > { %7795 = vmatmul.mubr.bf16.gmra.mxu0 %v2362_v36  ;;  %v3445_v63 = vor.u32 %v3443_v19, %v3441_v12  ;;  %v3503_v36 = vshll.u32 %v9178_v33, 16  ;;  %v9200_v12 = vld [vmem:[#allocation2 + $0x5c] sm:$0xff]   ;;  %v3493_v19 = vor.u32 %v3491_v28, %v3489_v37  ;;  %v8305_v28 = vld [vmem:[#allocation2 + $0x54] sm:$0xff]  }
  0xec   : > { %7798 = vmatprep.mubr.bf16.mxu0 %v2364_v55  ;;  %v8323_v55 = vld [vmem:[%s10087_s3 + $0x190] sm:$0xff]  }
  0xed   : > { %v3505_v50 = vrot.slane %v3503_v36, 1 }
  0xf0   : > { %7731 = vmatmul.mubr.bf16.gmra.mxu1 %v8956_v11  ;;  %v3453_v11 = vor.u32 %v3451_v58, %v3449_v16 }
  0xf1   : > { %7734 = vmatprep.mubr.bf16.mxu1 %v8976_v13  ;;  %v3450_v13 = vsel %vm1505_vm8, %v3445_v63, %v3449_v16  ;;  %v9204_v16 = vld [vmem:[#allocation2 + $0x64] sm:$0xff]  }
  0xf2   : > { %v3458_v6 = vsel %vm1505_vm8, %v3453_v11, %v3457_v52  ;;  %v9176_v14 = vpop.f32.mrf.mxu0  ;;  %v8333_v11 = vld [vmem:[%s10087_s3 + $0x188] sm:$0xff]   ;;  %v3511_v52 = vshll.u32 %v9200_v12, 16  ;;  %v3519_v5 = vshll.u32 %v9204_v16, 16 }
  0xf3   : > { %7799 = vmatmul.mubr.bf16.gmra.mxu0 %v2366_v57  ;;  %v8295_v57 = vld [vmem:[#allocation2 + $0x34] sm:$0xff]  }
  0xf4   : > { %7882 = vmatprep.mubr.bf16.mxu0 %v3442_v53  ;;  %v9187_v47 = vpop.f32.mrf.mxu0  ;;  %v8297_v53 = vld [vmem:[#allocation2 + $0x3c] sm:$0xff]  }
  0xf6   : > { %v9202_v60 = vpop.f32.mrf.mxu0 }
  0xf8   : > { %7735 = vmatmul.mubr.bf16.gmra.mxu1 %v8987_v26  ;;  %v8284_v26 = vld [vmem:[#allocation2 + $0x14] sm:$0xff]   ;;  %v9215_v2 = vpop.f32.mrf.mxu0 }
  0xf9   : > { %7818 = vmatprep.mubr.bf16.mxu1 %v8281_v44  ;;  %v8322_v44 = vld [vmem:[%s10087_s3 + $0x150] sm:$0xff]  }
  0xfa   : > { %v9206_v63 = vpop.f32.mrf.mxu1 }
  0xfb   : > { %7883 = vmatmul.mubr.bf16.vlgmr.msra.gmra.mxu0 %v3450_v13 }
  0xfc   : > { %7995 = vmatpush3.bf16.msra.mxu0 %v9068_v38  ;;  %7886 = vmatprep.mubr.bf16.mxu0 %v3458_v6  ;;  %v3466_v38 = vsel %vm1505_vm8, %v3461_v20, %v3465_v15  ;;  %v9225_v15 = vpop.f32.mrf.mxu1  ;;  %v3513_v20 = vrot.slane %v3511_v52, 1 }
  0xfd   : > { %7996 = vmatprep.subr.bf16.mxu0 %v8291_v21 }
 0x100   : > { %7819 = vmatmul.mubr.bf16.vlgmr.msra.gmra.mxu1 %v8284_v26  ;;  %7997 = vmatpush3.bf16.msra.mxu0 %v8291_v21  ;;  %v3515_v21 = vshrl.u32 %v9200_v12, 16  ;;  %v8331_v26 = vld [vmem:[%s10087_s3 + $0x148] sm:$0xff]  }
 0x101   : > { %7931 = vmatpush3.bf16.msra.mxu1 %v9078_v0  ;;  %7822 = vmatprep.mubr.bf16.mxu1 %v8287_v24  ;;  %v9174_v0 = vld [vmem:[#allocation2 + $0x4c] sm:$0xff]  }
 0x102   : > { %7932 = vmatprep.subr.bf16.mxu1 %v8290_v43  ;;  %7998 = vmatprep.subr.bf16.mxu0 %v8301_v27  ;;  %v3495_v46 = vshll.u32 %v9174_v0, 16  ;;  %v3499_v45 = vshrl.u32 %v9174_v0, 16  ;;  %v9230_v24 = vld [vmem:[#allocation2 + $0x6c] sm:$0xff]   ;;  %v3517_v18 = vor.u32 %v3515_v21, %v3513_v20  ;;  %v8311_v21 = vld [vmem:[#allocation2 + $0x64] sm:$0xff]  }
 0x103   : > { %7887 = vmatmul.mubr.bf16.gmra.mxu0 %v3466_v38  ;;  %v3521_v38 = vrot.slane %v3519_v5, 1 }
 0x104   : > { %7890 = vmatprep.mubr.bf16.mxu0 %v3474_v30  ;;  %7999 = vmatpush3.bf16.msra.mxu0 %v8301_v27  ;;  %v3497_v59 = vrot.slane %v3495_v46, 1  ;;  %v8303_v27 = vld [vmem:[#allocation2 + $0x4c] sm:$0xff]   ;;  %v9236_v30 = vpop.f32.mrf.mxu1  ;;  %v9262_v46 = vld [vmem:[#allocation2 + $0x7c] sm:$0xff]  }
 0x105   : > { %7933 = vmatpush3.bf16.msra.mxu1 %v8290_v43  ;;  %8000 = vmatprep.subr.bf16.mxu0 %v8307_v8  ;;  %v3509_v43 = vor.u32 %v3507_v3, %v3505_v50  ;;  %v3522_v22 = vsel %vm1505_vm8, %v3517_v18, %v3521_v38  ;;  %v9281_v3 = vld [vmem:[#allocation2 + $0x8c] sm:$0xff]  }
 0x106   : > { %7934 = vmatprep.subr.bf16.mxu1 %v8299_v42  ;;  %v3501_v58 = vor.u32 %v3499_v45, %v3497_v59  ;;  %v3498_v13 = vsel %vm1505_vm8, %v3493_v19, %v3497_v59  ;;  %v9254_v37 = vpop.f32.mrf.mxu1  ;;  %v8309_v45 = vld [vmem:[#allocation2 + $0x5c] sm:$0xff]  }
 0x107   : > { %v3514_v32 = vsel %vm1505_vm8, %v3509_v43, %v3513_v20 }
 0x108   : > { %7823 = vmatmul.mubr.bf16.gmra.mxu1 %v8289_v9  ;;  %8001 = vmatpush3.bf16.msra.mxu0 %v8307_v8  ;;  %v3506_v6 = vsel %vm1505_vm8, %v3501_v58, %v3505_v50  ;;  %v3527_v8 = vshll.u32 %v9230_v24, 16  ;;  %v3523_v9 = vshrl.u32 %v9204_v16, 16  ;;  %v3539_v58 = vshrl.u32 %v9234_v34, 16 }
 0x109   : > { %7826 = vmatprep.mubr.bf16.mxu1 %v8293_v51  ;;  %7935 = vmatpush3.bf16.msra.mxu1 %v8299_v42  ;;  %v9232_v25 = vpop.f32.mrf.mxu0  ;;  %v3531_v51 = vshrl.u32 %v9230_v24, 16 }
 0x10a   : > { %7936 = vmatprep.subr.bf16.mxu1 %v8306_v41  ;;  %8002 = vmatprep.subr.bf16.mxu0 %v8317_v29 }
 0x10b   : > { %7891 = vmatmul.mubr.bf16.gmra.mxu0 %v3482_v49  ;;  %v9247_v42 = vpop.f32.mrf.mxu0 }
 0x10c   : > { %7894 = vmatprep.mubr.bf16.mxu0 %v3490_v10  ;;  %8003 = vmatpush3.bf16.msra.mxu0 %v8317_v29  ;;  %v3529_v29 = vrot.slane %v3527_v8, 1  ;;  %v3525_v10 = vor.u32 %v3523_v9, %v3521_v38 }
 0x10d   : > { %7937 = vmatpush3.bf16.msra.mxu1 %v8306_v41  ;;  %8004 = vmatprep.subr.bf16.mxu0 %v8323_v55  ;;  %v9259_v41 = vld [vmem:[%s10087_s3 + $0x1f8] sm:$0xff]   ;;  %v9264_v49 = vpop.f32.mrf.mxu0 }
 0x10e   : > { %7938 = vmatprep.subr.bf16.mxu1 %v8315_v4  ;;  %v3533_v36 = vor.u32 %v3531_v51, %v3529_v29 }
 0x10f   : > { %v9272_v19 = vpop.f32.mrf.mxu0 }
 0x110   : > { %7827 = vmatmul.mubr.bf16.gmra.mxu1 %v8295_v57  ;;  %8005 = vmatpush3.bf16.msra.mxu0 %v8323_v55  ;;  %v3537_v55 = vrot.slane %v3535_v62, 1  ;;  %v9268_v59 = vpop.f32.mrf.mxu1  ;;  %v3543_v57 = vshll.u32 %v9262_v46, 16  ;;  %v9299_v62 = vld [vmem:[#allocation2 + $0x9c] sm:$0xff]  }
 0x111   : > { %7830 = vmatprep.mubr.bf16.mxu1 %v8297_v53  ;;  %7939 = vmatpush3.bf16.msra.mxu1 %v8315_v4  ;;  %v9266_v4 = vld [vmem:[#allocation2 + $0x84] sm:$0xff]   ;;  %10104 = vst [vmem:[#allocation3_spill] sm:$0xff] %v9268_v59  ;;  %v3530_v53 = vsel %vm1505_vm8, %v3525_v10, %v3529_v29  ;;  %10108 = vst [vmem:[#allocation7_spill] sm:$0xff] %v9299_v62 }
 0x112   : > { %7940 = vmatprep.subr.bf16.mxu1 %v8322_v44  ;;  %8006 = vmatprep.subr.bf16.mxu0 %v8333_v11  ;;  %v3538_v50 = vsel %vm1505_vm8, %v3533_v36, %v3537_v55  ;;  %v9279_v52 = vpop.f32.mrf.mxu1  ;;  %v3541_v5 = vor.u32 %v3539_v58, %v3537_v55  ;;  %v3575_v58 = vshll.u32 %v9299_v62, 16 }
 0x113   : > { %7895 = vmatmul.mubr.bf16.gmra.mxu0 %v3498_v13  ;;  %10105 = vst [vmem:[#allocation4_spill] sm:$0xff] %v9279_v52  ;;  %v3545_v13 = vrot.slane %v3543_v57, 1  ;;  %v9303_v57 = vld [vmem:[#allocation2 + $0xa4] sm:$0xff]  }
 0x114   : > { %7898 = vmatprep.mubr.bf16.mxu0 %v3506_v6  ;;  %8007 = vmatpush3.bf16.msra.mxu0 %v8333_v11  ;;  %v3551_v11 = vshll.u32 %v9266_v4, 16  ;;  %v9287_v43 = vpop.f32.mrf.mxu1  ;;  %10109 = vst [vmem:[#allocation8_spill] sm:$0xff] %v9303_v57 }
 0x115   : > { %7941 = vmatpush3.bf16.msra.mxu1 %v8322_v44  ;;  %8008 = vmatprep.subr.bf16.mxu0 %v8339_v23  ;;  %v3547_v44 = vshrl.u32 %v9262_v46, 16  ;;  %10106 = vst [vmem:[#allocation5_spill] sm:$0xff] %v9287_v43  ;;  %v3546_v38 = vsel %vm1505_vm8, %v3541_v5, %v3545_v13  ;;  %v3583_v5 = vshll.u32 %v9303_v57, 16  ;;  %v9355_v43 = vld [vmem:[#allocation2 + $0xcc] ss:$0 sps:$4 sm:$0x11]  }
 0x116   : > { %7942 = vmatprep.subr.bf16.mxu1 %v8331_v26  ;;  %v3553_v20 = vrot.slane %v3551_v11, 1  ;;  %10120 = vst [vmem:[#allocation19_spill] sm:$0xff] %v9355_v43 }
 0x118   : > { %7831 = vmatmul.mubr.bf16.gmra.mxu1 %v8300_v48  ;;  %8009 = vmatpush3.bf16.msra.mxu0 %v8339_v23  ;;  %v8313_v23 = vld [vmem:[#allocation2 + $0x6c] sm:$0xff]   ;;  %v9285_v48 = vld [vmem:[#allocation2 + $0x94] sm:$0xff]  }
 0x119   : > { %7834 = vmatprep.mubr.bf16.mxu1 %v8303_v27  ;;  %7943 = vmatpush3.bf16.msra.mxu1 %v8331_v26  ;;  %v3549_v26 = vor.u32 %v3547_v44, %v3545_v13  ;;  %v3559_v27 = vshll.u32 %v9281_v3, 16  ;;  %v3567_v9 = vshll.u32 %v9285_v48, 16  ;;  %v3571_v11 = vshrl.u32 %v9285_v48, 16 }
 0x11a   : > { %7944 = vmatprep.subr.bf16.mxu1 %v8338_v17  ;;  %8122 = vmatprep.subr.bf16.mxu0 %v9244_v31  ;;  %v9283_v6 = vpop.f32.mrf.mxu0 }
 0x11b   : > { %7899 = vmatmul.mubr.bf16.gmra.mxu0 %v3514_v32  ;;  %v3554_v8 = vsel %vm1505_vm8, %v3549_v26, %v3553_v20  ;;  %v3563_v32 = vshrl.u32 %v9281_v3, 16  ;;  %v3561_v51 = vrot.slane %v3559_v27, 1  ;;  %v3569_v55 = vrot.slane %v3567_v9, 1  ;;  %v9319_v27 = vld [vmem:[#allocation2 + $0xac] sm:$0xff]  }
 0x11c   : > { %7902 = vmatprep.mubr.bf16.mxu0 %v3522_v22  ;;  %v9290_v18 = vpop.f32.mrf.mxu0  ;;  %v9297_v22 = vpop.f32.mrf.mxu1  ;;  %v3577_v26 = vrot.slane %v3575_v58, 1  ;;  %10112 = vst [vmem:[#allocation11_spill] sm:$0xff] %v9319_v27  ;;  %v3585_v9 = vrot.slane %v3583_v5, 1  ;;  %v3587_v58 = vshrl.u32 %v9303_v57, 16 }
 0x11d   : > { %7945 = vmatpush3.bf16.msra.mxu1 %v8338_v17  ;;  %v3555_v17 = vshrl.u32 %v9266_v4, 16  ;;  %10107 = vst [vmem:[#allocation6_spill] sm:$0xff] %v9297_v22  ;;  %v3565_v36 = vor.u32 %v3563_v32, %v3561_v51  ;;  %v8332_v22 = vld [vmem:[#allocation2 + $0xa4] sm:$0xff]  }
 0x11e   : > { %8058 = vmatprep.subr.bf16.mxu1 %v9259_v41  ;;  %v9301_v29 = vpop.f32.mrf.mxu0 }
 0x11f   : > { %v3557_v10 = vor.u32 %v3555_v17, %v3553_v20  ;;  %v3570_v13 = vsel %vm1505_vm8, %v3565_v36, %v3569_v55  ;;  %v3573_v17 = vor.u32 %v3571_v11, %v3569_v55  ;;  %v3595_v55 = vshrl.u32 %v9319_v27, 16 }
 0x120   : > { %7835 = vmatmul.mubr.bf16.gmra.mxu1 %v8305_v28  ;;  %v8316_v28 = vld [vmem:[#allocation2 + $0x74] sm:$0xff]  }
 0x121   : > { %7838 = vmatprep.mubr.bf16.mxu1 %v8309_v45  ;;  %v8319_v45 = vld [vmem:[#allocation2 + $0x7c] sm:$0xff]   ;;  %v3562_v44 = vsel %vm1505_vm8, %v3557_v10, %v3561_v51  ;;  %v9321_v51 = vld [vmem:[#allocation2 + $0xb4] sm:$0xff]   ;;  %v3591_v10 = vshll.u32 %v9319_v27, 16  ;;  %v3578_v36 = vsel %vm1505_vm8, %v3573_v17, %v3577_v26 }
 0x122   : > { %10113 = vst [vmem:[#allocation12_spill] sm:$0xff] %v9321_v51  ;;  %v3599_v11 = vshll.u32 %v9321_v51, 16  ;;  %v8329_v17 = vld [vmem:[#allocation2 + $0x9c] sm:$0xff]  }
 0x123   : > { %7903 = vmatmul.mubr.bf16.gmra.mxu0 %v3530_v53 }
 0x124   : > { %7906 = vmatprep.mubr.bf16.mxu0 %v3538_v50  ;;  %v9308_v50 = vpop.f32.mrf.mxu0 }
 0x125   : > { %v9305_v53 = vpop.f32.mrf.mxu1 }
 0x126   : > { %10110 = vst [vmem:[#allocation9_spill] sm:$0xff] %v9305_v53  ;;  %v9339_v53 = vld [vmem:[#allocation2 + $0xc4] sm:$0xff]  }
 0x127   : > { %10117 = vst [vmem:[#allocation16_spill] sm:$0xff] %v9339_v53 }
 0x128   : > { %7839 = vmatmul.mubr.bf16.gmra.mxu1 %v8311_v21  ;;  %v3579_v21 = vshrl.u32 %v9299_v62, 16 }
 0x129   : > { %7842 = vmatprep.mubr.bf16.mxu1 %v8313_v23  ;;  %v9315_v23 = vpop.f32.mrf.mxu1 }
 0x12a   : > { %10111 = vst [vmem:[#allocation10_spill] sm:$0xff] %v9315_v23  ;;  %v3581_v32 = vor.u32 %v3579_v21, %v3577_v26  ;;  %v3593_v21 = vrot.slane %v3591_v10, 1  ;;  %v3589_v26 = vor.u32 %v3587_v58, %v3585_v9  ;;  %v3615_v58 = vshll.u32 %v9339_v53, 16 }
 0x12b   : > { %7907 = vmatmul.mubr.bf16.gmra.mxu0 %v3546_v38  ;;  %v8321_v38 = vld [vmem:[#allocation2 + $0x84] sm:$0xff]  }
 0x12c   : > { %7910 = vmatprep.mubr.bf16.mxu0 %v3554_v8  ;;  %v8325_v8 = vld [vmem:[#allocation2 + $0x8c] sm:$0xff]   ;;  %v3597_v23 = vor.u32 %v3595_v55, %v3593_v21  ;;  %v3594_v10 = vsel %vm1505_vm8, %v3589_v26, %v3593_v21 }
 0x12d   : > { %v8335_v21 = vld [vmem:[#allocation2 + $0xac] sm:$0xff]  }
 0x130   : > { %7843 = vmatmul.mubr.bf16.gmra.mxu1 %v8316_v28  ;;  %v9317_v20 = vpop.f32.mrf.mxu0  ;;  %v9323_v28 = vpop.f32.mrf.mxu1 }
 0x131   : > { %7846 = vmatprep.mubr.bf16.mxu1 %v8319_v45  ;;  %10114 = vst [vmem:[#allocation13_spill] sm:$0xff] %v9323_v28  ;;  %v9337_v28 = vld [vmem:[#allocation2 + $0xbc] sm:$0xff]  }
 0x132   : > { %v9326_v45 = vpop.f32.mrf.mxu0  ;;  %10116 = vst [vmem:[#allocation15_spill] sm:$0xff] %v9337_v28 }
 0x133   : > { %7911 = vmatmul.mubr.bf16.gmra.mxu0 %v3562_v44  ;;  %v3586_v44 = vsel %vm1505_vm8, %v3581_v32, %v3585_v9  ;;  %v3611_v9 = vshrl.u32 %v9337_v28, 16 }
 0x134   : > { %7914 = vmatprep.mubr.bf16.mxu0 %v3570_v13  ;;  %v9333_v13 = vpop.f32.mrf.mxu1  ;;  %v9335_v5 = vpop.f32.mrf.mxu0 }
 0x135   : > { %10115 = vst [vmem:[#allocation14_spill] sm:$0xff] %v9333_v13  ;;  %v3607_v13 = vshll.u32 %v9337_v28, 16 }
 0x136   : > { %v9343_v27 = vpop.f32.mrf.mxu0 }
 0x138   : > { %7847 = vmatmul.mubr.bf16.gmra.mxu1 %v8321_v38  ;;  %v8327_v38 = vld [vmem:[#allocation2 + $0x94] sm:$0xff]   ;;  %v9341_v32 = vpop.f32.mrf.mxu1 }
 0x139   : > { %7850 = vmatprep.mubr.bf16.mxu1 %v8325_v8  ;;  %v3601_v8 = vrot.slane %v3599_v11, 1  ;;  %10118 = vst [vmem:[#allocation17_spill] sm:$0xff] %v9341_v32  ;;  %v3609_v32 = vrot.slane %v3607_v13, 1 }
 0x13a   : > { %v9351_v55 = vpop.f32.mrf.mxu1 }
 0x13b   : > { %7915 = vmatmul.mubr.bf16.gmra.mxu0 %v3578_v36  ;;  %v3603_v36 = vshrl.u32 %v9321_v51, 16  ;;  %10119 = vst [vmem:[#allocation18_spill] sm:$0xff] %v9351_v55  ;;  %v3613_v26 = vor.u32 %v3611_v9, %v3609_v32  ;;  %v3623_v55 = vshll.u32 %v9355_v43, 16  ;;  %v8337_v9 = vld [vmem:[#allocation2 + $0xb4] sm:$0xff]  }
 0x13c   : > { %7918 = vmatprep.mubr.bf16.mxu0 %v3586_v44  ;;  %v3602_v44 = vsel %vm1505_vm8, %v3597_v23, %v3601_v8  ;;  %v9357_v51 = vpop.f32.mrf.mxu1 }
 0x13d   : > { %10121 = vst [vmem:[#allocation20_spill] sm:$0xff] %v9357_v51  ;;  %v3625_v51 = vrot.slane %v3623_v55, 1 }
 0x140   : > { %7851 = vmatmul.mubr.bf16.gmra.mxu1 %v8327_v38  ;;  %v3605_v38 = vor.u32 %v3603_v36, %v3601_v8  ;;  %v9365_v8 = vpop.f32.mrf.mxu1 }
 0x141   : > { %7854 = vmatprep.mubr.bf16.mxu1 %v8329_v17  ;;  %v9353_v11 = vpop.f32.mrf.mxu0  ;;  %v3617_v17 = vrot.slane %v3615_v58, 1  ;;  %10122 = vst [vmem:[#allocation21_spill] sm:$0xff] %v9365_v8 }
 0x142   : > { %v3610_v28 = vsel %vm1505_vm8, %v3605_v38, %v3609_v32 }
 0x143   : > { %7919 = vmatmul.mubr.bf16.gmra.mxu0 %v3594_v10  ;;  %v9359_v23 = vpop.f32.mrf.mxu0  ;;  %v3619_v10 = vshrl.u32 %v9339_v53, 16  ;;  %v3618_v13 = vsel %vm1505_vm8, %v3613_v26, %v3617_v17  ;;  %v4002_v53 = vrot.slane %v9138_v1, 1 }
 0x144   : > { %7922 = vmatprep.mubr.bf16.mxu0 %v3602_v44  ;;  %v3972_v44 = vld [vmem:[#allocation2 + $0xc] sm:$0xe] }
 0x145   : > { %v9367_v36 = vpop.f32.mrf.mxu0  ;;  %v3621_v58 = vor.u32 %v3619_v10, %v3617_v17  ;;  %v6879_v32 = vcombine.low %v3972_v44, %v9108_v35  ;;  %v3994_v17 = vrot.slane %v9113_v39, 1  ;;  %v8343_v35 = vld [vmem:[#allocation2 + $0xc4] sm:$0xff]   ;;  %v3996_v39 = vrot.slane %v9123_v56, 1 }
 0x147   : > { %v9372_v38 = vpop.f32.mrf.mxu0  ;;  %v3626_v26 = vsel %vm1505_vm8, %v3621_v58, %v3625_v51  ;;  %v3993_v8 = vrot.slane %v6879_v32, 1  ;;  %v8346_v51 = vld [vmem:[#allocation2 + $0x20] sm:$0xff]  }
 0x148   : > { %7855 = vmatmul.mubr.bf16.gmra.mxu1 %v8332_v22  ;;  %v8341_v22 = vld [vmem:[#allocation2 + $0xbc] sm:$0xff]  }
 0x149   : > { %7858 = vmatprep.mubr.bf16.mxu1 %v8335_v21  ;;  %v3995_v44 = vsel %vm2317_vm9, %v3993_v8, %v3994_v17  ;;  %v3998_v8 = vrot.slane %v9126_v40, 1  ;;  %v8358_v40 = vld [vmem:[%s10087_s3 + $0x228] sm:$0xff]  }
 0x14b   : > { %7923 = vmatmul.mubr.bf16.gmra.mxu0 %v3610_v28  ;;  %v8344_v28 = vld [vmem:[#allocation2 + $0x18] sm:$0xff]  }
 0x14c   : > { %7926 = vmatprep.mubr.bf16.mxu0 %v3618_v13 }
 0x14f   : > { %v9369_v52 = vpop.f32.mrf.mxu1 }
 0x150   : > { %10123 = vst [vmem:[#allocation22_spill] sm:$0xff] %v9369_v52  ;;  %7859 = vmatmul.mubr.bf16.gmra.mxu1 %v8337_v9 }
 0x151   : > { %v9374_v21 = vpop.f32.mrf.mxu1  ;;  %7862 = vmatprep.mubr.bf16.mxu1 %v8341_v22  ;;  %v8349_v22 = vld [vmem:[#allocation2 + $0x28] sm:$0xff]  }
 0x152   : > { %10124 = vst [vmem:[#allocation23_spill] sm:$0xff] %v9374_v21  ;;  %v8362_v21 = vld [vmem:[%s10087_s3 + $0x220] sm:$0xff]  }
 0x153   : > { %v9377_v43 = vpop.f32.mrf.mxu1  ;;  %v9380_v55 = vpop.f32.mrf.mxu0  ;;  %7927 = vmatmul.mubr.bf16.gmra.mxu0 %v3626_v26  ;;  %v8352_v26 = vld [vmem:[%s10087_s3 + $0x230] sm:$0xff]  }
 0x154   : > { %10125 = vst [vmem:[#allocation24_spill] sm:$0xff] %v9377_v43  ;;  %8010 = vmatprep.mubr.bf16.mxu0 %v8344_v28 }
 0x155   : > { %v9382_v10 = vpop.f32.mrf.mxu1  ;;  %v9384_v13 = vpop.f32.mrf.mxu0 }
 0x156   : > { %10126 = vst [vmem:[#allocation25_spill] sm:$0xff] %v9382_v10 }
 0x157   : > { %v9387_v9 = vpop.f32.mrf.mxu0 }
 0x158   : > { %v9389_v58 = vpop.f32.mrf.mxu1  ;;  %7863 = vmatmul.mubr.bf16.gmra.mxu1 %v8343_v35  ;;  %v3997_v35 = vsel %vm2317_vm9, %v3994_v17, %v3996_v39 }
 0x159   : > { %10127 = vst [vmem:[#allocation26_spill] sm:$0xff] %v9389_v58  ;;  %v9391_v32 = vpop.f32.mrf.mxu0  ;;  %7946 = vmatprep.mubr.bf16.mxu1 %v3995_v44  ;;  %v3999_v58 = vsel %vm2317_vm9, %v3996_v39, %v3998_v8  ;;  %v4000_v39 = vrot.slane %v9136_v61, 1 }
 0x15a   : > { %v9397_v28 = vpop.f32.mrf.mxu1 }
 0x15b   : > { %10128 = vst [vmem:[#allocation27_spill] sm:$0xff] %v9397_v28  ;;  %v7756_v10 = vpop.f32.mrf.mxu0  ;;  %8011 = vmatmul.mubr.bf16.vlgmr.msra.gmra.mxu0 %v8346_v51  ;;  %v8351_v28 = vld [vmem:[%s10087_s3 + $0x1f0] sm:$0xff]   ;;  %v4003_v59 = vsel %vm2317_vm9, %v4000_v39, %v4002_v53 }
 0x15c   : > { %v9400_v43 = vpop.f32.mrf.mxu1  ;;  %8123 = vmatpush3.bf16.msra.mxu0 %v9244_v31  ;;  %8014 = vmatprep.mubr.bf16.mxu0 %v8349_v22  ;;  %v8353_v22 = vld [vmem:[#allocation2 + $0x38] sm:$0xff]  }
 0x15d   : > { %10129 = vst [vmem:[#allocation28_spill] sm:$0xff] %v9400_v43  ;;  %v2473_v44 = vpop.f32.mrf.mxu0  ;;  %8124 = vmatprep.subr.bf16.mxu0 %v8352_v26  ;;  %v8350_v43 = vld [vmem:[#allocation2 + $0x30] sm:$0xff]  }
 0x15e   : > { %v9404_v56 = vpop.f32.mrf.mxu1 }
 0x15f   : > { %10130 = vst [vmem:[#allocation29_spill] sm:$0xff] %v9404_v56  ;;  %v7757_v51 = vpop.f32.mrf.mxu0 }
 0x160   : > { %v7692_v31 = vpop.f32.mrf.mxu1  ;;  %7947 = vmatmul.mubr.bf16.vlgmr.msra.gmra.mxu1 %v3997_v35  ;;  %8125 = vmatpush3.bf16.msra.mxu0 %v8352_v26  ;;  %v8357_v26 = vld [vmem:[%s10087_s3 + $0x1e8] sm:$0xff]  }
 0x161   : > { %v2114_v17 = vadd.f32 %v7692_v31, %v9176_v14  ;;  %8059 = vmatpush3.bf16.msra.mxu1 %v9259_v41  ;;  %v2476_v56 = vpop.f32.mrf.mxu0  ;;  %7950 = vmatprep.mubr.bf16.mxu1 %v3999_v58  ;;  %v4001_v31 = vsel %vm2317_vm9, %v3998_v8, %v4000_v39  ;;  %v8372_v39 = vld [vmem:[%s10087_s3 + $0x210] sm:$0xff]  }
 0x162   : > { %v2105_v52 = vpop.f32.mrf.mxu1  ;;  %8060 = vmatprep.subr.bf16.mxu1 %v8351_v28  ;;  %8126 = vmatprep.subr.bf16.mxu0 %v8358_v40 }
 0x163   : > { %v2106_v14 = vadd.f32 %v2105_v52, %v9187_v47  ;;  %v7760_v41 = vpop.f32.mrf.mxu0  ;;  %8015 = vmatmul.mubr.bf16.gmra.mxu0 %v8350_v43  ;;  %v9424_v58 = vadd.f32 %v7756_v10, %v2114_v17  ;;  %v8361_v47 = vld [vmem:[%s10087_s3 + $0x1e0] sm:$0xff]   ;;  %v8368_v52 = vld [vmem:[%s10087_s3 + $0x218] sm:$0xff]   ;;  %v4004_v17 = vrot.slane %v9150_v54, 1 }
 0x164   : > { %v7693_v61 = vpop.f32.mrf.mxu1  ;;  %8018 = vmatprep.mubr.bf16.mxu0 %v8353_v22  ;;  %8127 = vmatpush3.bf16.msra.mxu0 %v8358_v40  ;;  %v8354_v10 = vld [vmem:[#allocation2 + $0x40] sm:$0xff]  }
 0x165   : > { %v2117_v35 = vadd.f32 %v7693_v61, %v9202_v60  ;;  %v2489_v57 = vpop.f32.mrf.mxu0  ;;  %8061 = vmatpush3.bf16.msra.mxu1 %v8351_v28  ;;  %8128 = vmatprep.subr.bf16.mxu0 %v8362_v21  ;;  %v9428_v1 = vadd.f32 %v2473_v44, %v2106_v14  ;;  %v8355_v44 = vld [vmem:[#allocation2 + $0x48] sm:$0xff]   ;;  %v4005_v14 = vsel %vm2317_vm9, %v4002_v53, %v4004_v17 }
 0x166   : > { %v2108_v62 = vpop.f32.mrf.mxu1  ;;  %8062 = vmatprep.subr.bf16.mxu1 %v8357_v26 }
 0x167   : > { %v2109_v60 = vadd.f32 %v2108_v62, %v9215_v2  ;;  %v7761_v43 = vpop.f32.mrf.mxu0  ;;  %v9438_v28 = vadd.f32 %v7757_v51, %v2117_v35  ;;  %v4006_v51 = vrot.slane %v9153_v7, 1 }
 0x168   : > { %v7696_v8 = vpop.f32.mrf.mxu1  ;;  %7951 = vmatmul.mubr.bf16.gmra.mxu1 %v4001_v31  ;;  %8129 = vmatpush3.bf16.msra.mxu0 %v8362_v21  ;;  %v8367_v21 = vld [vmem:[%s10087_s3 + $0x1d8] sm:$0xff]  }
 0x169   : > { %v2130_v40 = vadd.f32 %v7696_v8, %v9232_v25  ;;  %v2492_v22 = vpop.f32.mrf.mxu0  ;;  %7954 = vmatprep.mubr.bf16.mxu1 %v4003_v59  ;;  %8063 = vmatpush3.bf16.msra.mxu1 %v8357_v26  ;;  %v9445_v2 = vadd.f32 %v2476_v56, %v2109_v60  ;;  %v4007_v31 = vsel %vm2317_vm9, %v4004_v17, %v4006_v51  ;;  %v8359_v60 = vld [vmem:[#allocation2 + $0x58] sm:$0xff]  }
 0x16a   : > { %v2121_v62 = vpop.f32.mrf.mxu1  ;;  %8064 = vmatprep.subr.bf16.mxu1 %v8361_v47  ;;  %8130 = vmatprep.subr.bf16.mxu0 %v8368_v52 }
 0x16b   : > { %v2122_v25 = vadd.f32 %v2121_v62, %v9247_v42  ;;  %v7764_v59 = vpop.f32.mrf.mxu0  ;;  %8019 = vmatmul.mubr.bf16.gmra.mxu0 %v8354_v10  ;;  %v9452_v54 = vadd.f32 %v7760_v41, %v2130_v40  ;;  %v8371_v42 = vld [vmem:[%s10087_s3 + $0x1d0] sm:$0xff]   ;;  %v8378_v41 = vld [vmem:[%s10087_s3 + $0x208] sm:$0xff]   ;;  %v8382_v40 = vld [vmem:[%s10087_s3 + $0x200] sm:$0xff]  }
 0x16c   : > { %v7697_v26 = vpop.f32.mrf.mxu1  ;;  %8022 = vmatprep.mubr.bf16.mxu0 %v8355_v44  ;;  %8131 = vmatpush3.bf16.msra.mxu0 %v8368_v52  ;;  %v8356_v52 = vld [vmem:[#allocation2 + $0x50] sm:$0xff]   ;;  %v4008_v44 = vrot.slane %v9174_v0, 1 }
 0x16d   : > { %v2133_v56 = vadd.f32 %v7697_v26, %v9264_v49  ;;  %v2505_v7 = vpop.f32.mrf.mxu0  ;;  %8065 = vmatpush3.bf16.msra.mxu1 %v8361_v47  ;;  %8132 = vmatprep.subr.bf16.mxu0 %v8372_v39  ;;  %v9456_v61 = vadd.f32 %v2489_v57, %v2122_v25 }
 0x16e   : > { %v2124_v35 = vpop.f32.mrf.mxu1  ;;  %8066 = vmatprep.subr.bf16.mxu1 %v8367_v21  ;;  %v4009_v25 = vsel %vm2317_vm9, %v4006_v51, %v4008_v44 }
 0x16f   : > { %v2125_v49 = vadd.f32 %v2124_v35, %v9272_v19  ;;  %v7765_v53 = vpop.f32.mrf.mxu0  ;;  %v9466_v47 = vadd.f32 %v7761_v43, %v2133_v56  ;;  %v4010_v43 = vrot.slane %v9178_v33, 1 }
 0x170   : > { %v7700_v57 = vpop.f32.mrf.mxu1  ;;  %7955 = vmatmul.mubr.bf16.gmra.mxu1 %v4005_v14  ;;  %8133 = vmatpush3.bf16.msra.mxu0 %v8372_v39  ;;  %v8377_v39 = vld [vmem:[%s10087_s3 + $0x1c8] sm:$0xff]  }
 0x171   : > { %v2146_v10 = vadd.f32 %v7700_v57, %v9283_v6  ;;  %v2508_v8 = vpop.f32.mrf.mxu0  ;;  %7958 = vmatprep.mubr.bf16.mxu1 %v4007_v31  ;;  %8067 = vmatpush3.bf16.msra.mxu1 %v8367_v21  ;;  %v9473_v19 = vadd.f32 %v2492_v22, %v2125_v49  ;;  %v4011_v14 = vsel %vm2317_vm9, %v4008_v44, %v4010_v43  ;;  %v8360_v31 = vld [vmem:[#allocation2 + $0x60] sm:$0xff]   ;;  %v4012_v49 = vrot.slane %v9200_v12, 1 }
 0x172   : > { %v2137_v17 = vpop.f32.mrf.mxu1  ;;  %8068 = vmatprep.subr.bf16.mxu1 %v8371_v42  ;;  %8134 = vmatprep.subr.bf16.mxu0 %v8378_v41 }
 0x173   : > { %v2138_v6 = vadd.f32 %v2137_v17, %v9290_v18  ;;  %v7768_v62 = vpop.f32.mrf.mxu0  ;;  %8023 = vmatmul.mubr.bf16.gmra.mxu0 %v8356_v52  ;;  %v9480_v0 = vadd.f32 %v7764_v59, %v2146_v10  ;;  %v8381_v18 = vld [vmem:[%s10087_s3 + $0x1c0] sm:$0xff]  }
 0x174   : > { %v7701_v21 = vpop.f32.mrf.mxu1  ;;  %8026 = vmatprep.mubr.bf16.mxu0 %v8359_v60  ;;  %8135 = vmatpush3.bf16.msra.mxu0 %v8378_v41 }
 0x175   : > { %v2149_v22 = vadd.f32 %v7701_v21, %v9301_v29  ;;  %v2521_v33 = vpop.f32.mrf.mxu0  ;;  %8069 = vmatpush3.bf16.msra.mxu1 %v8371_v42  ;;  %8136 = vmatprep.subr.bf16.mxu0 %v8382_v40  ;;  %v9484_v26 = vadd.f32 %v2505_v7, %v2138_v6  ;;  %v8363_v42 = vld [vmem:[#allocation2 + $0x68] sm:$0xff]   ;;  %v8364_v6 = vld [vmem:[#allocation2 + $0x70] sm:$0xff]  }
 0x176   : > { %v2140_v56 = vpop.f32.mrf.mxu1  ;;  %8070 = vmatprep.subr.bf16.mxu1 %v8377_v39 }
 0x177   : > { %v2141_v59 = vadd.f32 %v2140_v56, %v9308_v50  ;;  %v7769_v35 = vpop.f32.mrf.mxu0  ;;  %v9491_v29 = vadd.f32 %v7765_v53, %v2149_v22  ;;  %v4014_v50 = vrot.slane %v9204_v16, 1  ;;  %v8365_v22 = vld [vmem:[#allocation2 + $0x78] sm:$0xff]  }
 0x178   : > { %v7704_v51 = vpop.f32.mrf.mxu1  ;;  %7959 = vmatmul.mubr.bf16.gmra.mxu1 %v4009_v25  ;;  %8137 = vmatpush3.bf16.msra.mxu0 %v8382_v40  ;;  %v4013_v40 = vsel %vm2317_vm9, %v4010_v43, %v4012_v49  ;;  %v4016_v43 = vrot.slane %v9230_v24, 1 }
 0x179   : > { %v2162_v7 = vadd.f32 %v7704_v51, %v9317_v20  ;;  %v2524_v41 = vpop.f32.mrf.mxu0  ;;  %7962 = vmatprep.mubr.bf16.mxu1 %v4011_v14  ;;  %8071 = vmatpush3.bf16.msra.mxu1 %v8377_v39  ;;  %v9495_v52 = vadd.f32 %v2508_v8, %v2141_v59  ;;  %v4015_v16 = vsel %vm2317_vm9, %v4012_v49, %v4014_v50  ;;  %v4018_v14 = vrot.slane %v9234_v34, 1 }
 0x17a   : > { %v2153_v57 = vpop.f32.mrf.mxu1  ;;  %8072 = vmatprep.subr.bf16.mxu1 %v8381_v18 }
 0x17b   : > { %v2154_v53 = vadd.f32 %v2153_v57, %v9326_v45  ;;  %v7772_v60 = vpop.f32.mrf.mxu0  ;;  %8027 = vmatmul.mubr.bf16.gmra.mxu0 %v8360_v31  ;;  %v9499_v10 = vadd.f32 %v7768_v62, %v2162_v7  ;;  %v4019_v7 = vsel %vm2317_vm9, %v4016_v43, %v4018_v14 }
 0x17c   : > { %v7705_v44 = vpop.f32.mrf.mxu1  ;;  %8030 = vmatprep.mubr.bf16.mxu0 %v8363_v42 }
 0x17d   : > { %v2165_v20 = vadd.f32 %v7705_v44, %v9335_v5  ;;  %v2537_v12 = vpop.f32.mrf.mxu0  ;;  %8073 = vmatpush3.bf16.msra.mxu1 %v8381_v18  ;;  %v9503_v8 = vadd.f32 %v2521_v33, %v2154_v53  ;;  %v8369_v53 = vld [vmem:[#allocation2 + $0x88] sm:$0xff]  }
 0x17e   : > { %v2156_v17 = vpop.f32.mrf.mxu1 }
 0x17f   : > { %v2157_v39 = vadd.f32 %v2156_v17, %v9343_v27  ;;  %v7773_v45 = vpop.f32.mrf.mxu0  ;;  %v9507_v21 = vadd.f32 %v7769_v35, %v2165_v20 }
 0x180   : > { %v7708_v62 = vpop.f32.mrf.mxu1  ;;  %7963 = vmatmul.mubr.bf16.gmra.mxu1 %v4013_v40  ;;  %v4022_v40 = vrot.slane %v9266_v4, 1 }
 0x181   : > { %v2178_v5 = vadd.f32 %v7708_v62, %v9353_v11  ;;  %v2540_v25 = vpop.f32.mrf.mxu0  ;;  %7966 = vmatprep.mubr.bf16.mxu1 %v4015_v16  ;;  %v9511_v33 = vadd.f32 %v2524_v41, %v2157_v39  ;;  %v4017_v11 = vsel %vm2317_vm9, %v4014_v50, %v4016_v43  ;;  %v4020_v50 = vrot.slane %v9262_v46, 1  ;;  %v8373_v43 = vld [vmem:[#allocation2 + $0x98] sm:$0xff]  }
 0x182   : > { %v2169_v56 = vpop.f32.mrf.mxu1 }
 0x183   : > { %v2170_v27 = vadd.f32 %v2169_v56, %v9359_v23  ;;  %v7776_v18 = vpop.f32.mrf.mxu0  ;;  %8031 = vmatmul.mubr.bf16.gmra.mxu0 %v8364_v6  ;;  %v9515_v59 = vadd.f32 %v7772_v60, %v2178_v5  ;;  %v8366_v23 = vld [vmem:[#allocation2 + $0x80] sm:$0xff]   ;;  %v4023_v62 = vsel %vm2317_vm9, %v4020_v50, %v4022_v40 }
 0x184   : > { %v7709_v35 = vpop.f32.mrf.mxu1  ;;  %8034 = vmatprep.mubr.bf16.mxu0 %v8365_v22 }
 0x185   : > { %v2181_v31 = vadd.f32 %v7709_v35, %v9367_v36  ;;  %v2553_v51 = vpop.f32.mrf.mxu0  ;;  %v9519_v42 = vadd.f32 %v2537_v12, %v2170_v27  ;;  %v4026_v35 = vrot.slane %v9285_v48, 1 }
 0x186   : > { %v2172_v24 = vpop.f32.mrf.mxu1 }
 0x187   : > { %v2173_v34 = vadd.f32 %v2172_v24, %v9372_v38  ;;  %v7777_v41 = vpop.f32.mrf.mxu0  ;;  %v9523_v49 = vadd.f32 %v7773_v45, %v2181_v31 }
 0x188   : > { %v7712_v57 = vpop.f32.mrf.mxu1  ;;  %7967 = vmatmul.mubr.bf16.gmra.mxu1 %v4017_v11 }
 0x189   : > { %v2194_v60 = vadd.f32 %v7712_v57, %v9380_v55  ;;  %v2556_v36 = vpop.f32.mrf.mxu0  ;;  %7970 = vmatprep.mubr.bf16.mxu1 %v4019_v7  ;;  %v9527_v44 = vadd.f32 %v2540_v25, %v2173_v34  ;;  %v4021_v55 = vsel %vm2317_vm9, %v4018_v14, %v4020_v50  ;;  %v4024_v14 = vrot.slane %v9281_v3, 1 }
 0x18a   : > { %v2185_v20 = vpop.f32.mrf.mxu1 }
 0x18b   : > { %v2186_v38 = vadd.f32 %v2185_v20, %v9384_v13  ;;  %v7780_v12 = vpop.f32.mrf.mxu0  ;;  %8035 = vmatmul.mubr.bf16.gmra.mxu0 %v8366_v23  ;;  %v9531_v17 = vadd.f32 %v7776_v18, %v2194_v60  ;;  %v8370_v13 = vld [vmem:[#allocation2 + $0x90] sm:$0xff]   ;;  %v8375_v60 = vld [vmem:[#allocation2 + $0xa8] sm:$0xff]  }
 0x18c   : > { %v7713_v16 = vpop.f32.mrf.mxu1  ;;  %8038 = vmatprep.mubr.bf16.mxu0 %v8369_v53  ;;  %v10132_v20 = vld [vmem:[#allocation7_spill] sm:$0xff] }
 0x18d   : > { %v2197_v39 = vadd.f32 %v7713_v16, %v9387_v9  ;;  %v2569_v45 = vpop.f32.mrf.mxu0  ;;  %v9535_v6 = vadd.f32 %v2553_v51, %v2186_v38  ;;  %v10133_v16 = vld [vmem:[#allocation8_spill] sm:$0xff] }
 0x18e   : > { %v2188_v46 = vpop.f32.mrf.mxu1 }
 0x18f   : > { %v2189_v4 = vadd.f32 %v2188_v46, %v9391_v32  ;;  %v7781_v22 = vpop.f32.mrf.mxu0  ;;  %v9539_v5 = vadd.f32 %v7777_v41, %v2197_v39  ;;  %v4027_v41 = vsel %vm2317_vm9, %v4024_v14, %v4026_v35  ;;  %v4030_v39 = vrot.slane %v10133_v16, 1 }
 0x190   : > { %v7716_v25 = vpop.f32.mrf.mxu1  ;;  %7971 = vmatmul.mubr.bf16.gmra.mxu1 %v4021_v55  ;;  %v10134_v55 = vld [vmem:[#allocation4_spill] sm:$0xff] }
 0x191   : > { %v2210_v56 = vadd.f32 %v7716_v25, %v9206_v63  ;;  %v2572_v9 = vpop.f32.mrf.mxu0  ;;  %7974 = vmatprep.mubr.bf16.mxu1 %v4023_v62  ;;  %v9543_v27 = vadd.f32 %v2556_v36, %v2189_v4  ;;  %v4025_v63 = vsel %vm2317_vm9, %v4022_v40, %v4024_v14  ;;  %v10131_v36 = vld [vmem:[#allocation3_spill] sm:$0xff]  ;;  %v4028_v40 = vrot.slane %v10132_v20, 1  ;;  %v10135_v4 = vld [vmem:[#allocation5_spill] sm:$0xff]  ;;  %v10136_v14 = vld [vmem:[#allocation6_spill] sm:$0xff] }
 0x192   : > { %v2201_v18 = vpop.f32.mrf.mxu1 }
 0x193   : > { %v2202_v32 = vadd.f32 %v2201_v18, %v9225_v15  ;;  %v7784_v31 = vpop.f32.mrf.mxu0  ;;  %8039 = vmatmul.mubr.bf16.gmra.mxu0 %v8370_v13  ;;  %v9547_v11 = vadd.f32 %v7780_v12, %v2210_v56  ;;  %v8374_v15 = vld [vmem:[#allocation2 + $0xa0] sm:$0xff]   ;;  %v4029_v13 = vsel %vm2317_vm9, %v4026_v35, %v4028_v40 }
 0x194   : > { %v7717_v51 = vpop.f32.mrf.mxu1  ;;  %8042 = vmatprep.mubr.bf16.mxu0 %v8373_v43  ;;  %v10138_v35 = vld [vmem:[#allocation11_spill] sm:$0xff] }
 0x195   : > { %v2213_v24 = vadd.f32 %v7717_v51, %v9236_v30  ;;  %v2585_v7 = vpop.f32.mrf.mxu0  ;;  %v9551_v34 = vadd.f32 %v2569_v45, %v2202_v32  ;;  %v8376_v51 = vld [vmem:[#allocation2 + $0xb0] sm:$0xff]  }
 0x196   : > { %v2204_v3 = vpop.f32.mrf.mxu1 }
 0x197   : > { %v2205_v48 = vadd.f32 %v2204_v3, %v9254_v37  ;;  %v7785_v23 = vpop.f32.mrf.mxu0  ;;  %v9555_v57 = vadd.f32 %v7781_v22, %v2213_v24  ;;  %v10137_v3 = vld [vmem:[#allocation9_spill] sm:$0xff] }
 0x198   : > { %v7720_v53 = vpop.f32.mrf.mxu1  ;;  %7975 = vmatmul.mubr.bf16.gmra.mxu1 %v4025_v63  ;;  %v8379_v63 = vld [vmem:[#allocation2 + $0xb8] sm:$0xff]  }
 0x199   : > { %v2226_v50 = vadd.f32 %v7720_v53, %v10131_v36  ;;  %v2588_v30 = vpop.f32.mrf.mxu0  ;;  %7978 = vmatprep.mubr.bf16.mxu1 %v4027_v41  ;;  %v9559_v38 = vadd.f32 %v2572_v9, %v2205_v48  ;;  %v4031_v9 = vsel %vm2317_vm9, %v4028_v40, %v4030_v39 }
 0x19a   : > { %v2217_v12 = vpop.f32.mrf.mxu1 }
 0x19b   : > { %v2218_v37 = vadd.f32 %v2217_v12, %v10134_v55  ;;  %v7788_v45 = vpop.f32.mrf.mxu0  ;;  %8043 = vmatmul.mubr.bf16.gmra.mxu0 %v8374_v15  ;;  %v9563_v46 = vadd.f32 %v7784_v31, %v2226_v50  ;;  %v4032_v15 = vrot.slane %v10138_v35, 1  ;;  %v10140_v50 = vld [vmem:[#allocation10_spill] sm:$0xff] }
 0x19c   : > { %v7721_v62 = vpop.f32.mrf.mxu1  ;;  %8046 = vmatprep.mubr.bf16.mxu0 %v8375_v60  ;;  %v10139_v60 = vld [vmem:[#allocation12_spill] sm:$0xff]  ;;  %v4918_v12 = vld [vmem:[#allocation2 + $0x1c] sm:$0xf] }
 0x19d   : > { %v2229_v22 = vadd.f32 %v7721_v62, %v10135_v4  ;;  %v2601_v25 = vpop.f32.mrf.mxu0  ;;  %v9567_v43 = vadd.f32 %v2585_v7, %v2218_v37  ;;  %v4034_v36 = vrot.slane %v10139_v60, 1  ;;  %v10142_v37 = vld [vmem:[#allocation13_spill] sm:$0xff]  ;;  %v4033_v4 = vsel %vm2317_vm9, %v4030_v39, %v4032_v15 }
 0x19e   : > { %v2220_v56 = vpop.f32.mrf.mxu1  ;;  %v10147_v39 = vld [vmem:[#allocation17_spill] sm:$0xff] }
 0x19f   : > { %v2221_v18 = vadd.f32 %v2220_v56, %v10136_v14  ;;  %v7789_v32 = vpop.f32.mrf.mxu0  ;;  %v9571_v24 = vadd.f32 %v7785_v23, %v2229_v22  ;;  %v4917_v23 = vld [vmem:[#allocation2 + $0x18] sm:$0xf]  ;;  %v4035_v56 = vsel %vm2317_vm9, %v4032_v15, %v4034_v36 }
 0x1a0   : > { %v7724_v31 = vpop.f32.mrf.mxu1  ;;  %7979 = vmatmul.mubr.bf16.gmra.mxu1 %v4029_v13  ;;  %v5647_v14 = vld [vmem:[#allocation2 + $0x18] sm:$0xe] }
 0x1a1   : > { %v2242_v41 = vadd.f32 %v7724_v31, %v10137_v3  ;;  %v2604_v48 = vpop.f32.mrf.mxu0  ;;  %7982 = vmatprep.mubr.bf16.mxu1 %v4031_v9  ;;  %v9575_v7 = vadd.f32 %v2588_v30, %v2221_v18  ;;  %v6952_v9 = vcombine.low %v4917_v23, %v4918_v12  ;;  %v10144_v18 = vld [vmem:[#allocation14_spill] sm:$0xff]  ;;  %v10149_v23 = vld [vmem:[#allocation16_spill] sm:$0xff] }
 0x1a2   : > { %v2233_v53 = vpop.f32.mrf.mxu1  ;;  %v8380_v3 = vld [vmem:[#allocation2 + $0xc0] sm:$0xff]  }
 0x1a3   : > { %v2234_v20 = vadd.f32 %v2233_v53, %v10140_v50  ;;  %v7792_v40 = vpop.f32.mrf.mxu0  ;;  %8047 = vmatmul.mubr.bf16.gmra.mxu0 %v8376_v51  ;;  %v9579_v16 = vadd.f32 %v7788_v45, %v2242_v41  ;;  %v8383_v53 = vld [vmem:[#allocation2 + $0xc8] sm:$0xff]   ;;  %v7001_v50 = vcombine.low %v5647_v14, %v4918_v12 }
 0x1a4   : > { %v7725_v55 = vpop.f32.mrf.mxu1  ;;  %8050 = vmatprep.mubr.bf16.mxu0 %v8379_v63  ;;  %v10146_v63 = vld [vmem:[#allocation15_spill] sm:$0xff] }
 0x1a5   : > { %10141 = vst [vmem:[#allocation3_spill] sm:$0xff] %v9579_v16  ;;  %v2245_v62 = vadd.f32 %v7725_v55, %v10142_v37  ;;  %v2617_v22 = vpop.f32.mrf.mxu0  ;;  %v9583_v30 = vadd.f32 %v2601_v25, %v2234_v20  ;;  %v4036_v35 = vrot.slane %v10146_v63, 1  ;;  %v4038_v55 = vrot.slane %v10149_v23, 1  ;;  %v8386_v37 = vld [vmem:[#allocation2 + $0x20] sm:$0xff]   ;;  %v10161_v16 = vld [vmem:[#allocation24_spill] sm:$0xff] }
 0x1a6   : > { %v2236_v13 = vpop.f32.mrf.mxu1  ;;  %v5669_v14 = vrot.slane %v8386_v37, 1 }
 0x1a7   : > { %10143 = vst [vmem:[#allocation7_spill] sm:$0xff] %v9583_v30  ;;  %v2237_v51 = vadd.f32 %v2236_v13, %v10144_v18  ;;  %v7793_v31 = vpop.f32.mrf.mxu0  ;;  %v9587_v45 = vadd.f32 %v7789_v32, %v2245_v62  ;;  %v5109_v13 = vshll.u32 %v6952_v9, 16  ;;  %v10150_v18 = vld [vmem:[#allocation18_spill] sm:$0xff]  ;;  %v4039_v23 = vsel %vm2317_vm9, %v4036_v35, %v4038_v55 }
 0x1a8   : > { %v7728_v41 = vpop.f32.mrf.mxu1  ;;  %7983 = vmatmul.mubr.bf16.gmra.mxu1 %v4033_v4 }
 0x1a9   : > { %10145 = vst [vmem:[#allocation8_spill] sm:$0xff] %v9587_v45  ;;  %v2258_v60 = vadd.f32 %v7728_v41, %v10147_v39  ;;  %v2620_v25 = vpop.f32.mrf.mxu0  ;;  %7986 = vmatprep.mubr.bf16.mxu1 %v4035_v56  ;;  %v9591_v20 = vadd.f32 %v2604_v48, %v2237_v51  ;;  %v4037_v45 = vsel %vm2317_vm9, %v4034_v36, %v4036_v35  ;;  %v10152_v41 = vld [vmem:[#allocation20_spill] sm:$0xff]  ;;  %v5668_v48 = vrot.slane %v7001_v50, 1 }
 0x1aa   : > { %v2249_v15 = vpop.f32.mrf.mxu1 }
 0x1ab   : > { %10148 = vst [vmem:[#allocation4_spill] sm:$0xff] %v9591_v20  ;;  %v2250_v32 = vadd.f32 %v2249_v15, %v10150_v18  ;;  %v7796_v62 = vpop.f32.mrf.mxu0  ;;  %8051 = vmatmul.mubr.bf16.gmra.mxu0 %v8380_v3  ;;  %v9595_v4 = vadd.f32 %v7792_v40, %v2258_v60  ;;  %v5107_v20 = vshrl.u32 %v6952_v9, 16  ;;  %v5111_v15 = vrot.slane %v5109_v13, 1  ;;  %v10154_v3 = vld [vmem:[#allocation21_spill] sm:$0xff] }
 0x1ac   : > { %v7729_v63 = vpop.f32.mrf.mxu1  ;;  %8054 = vmatprep.mubr.bf16.mxu0 %v8383_v53  ;;  %v5114_v18 = vshll.u32 %v8386_v37, 16  ;;  %v8388_v53 = vld [vmem:[#allocation2 + $0x28] sm:$0xff]   ;;  %v5670_v35 = vsel %vm2317_vm9, %v5668_v48, %v5669_v14 }
 0x1ad   : > { %10151 = vst [vmem:[#allocation5_spill] sm:$0xff] %v9595_v4  ;;  %v2261_v56 = vadd.f32 %v7729_v63, %v10152_v41  ;;  %v2633_v12 = vpop.f32.mrf.mxu0  ;;  %v9599_v51 = vadd.f32 %v2617_v22, %v2250_v32  ;;  %v8384_v4 = vld [vmem:[#allocation2 + $0xd0] sm:$0xff]   ;;  %v10156_v63 = vld [vmem:[#allocation22_spill] sm:$0xff]  ;;  %v10157_v22 = vld [vmem:[#allocation19_spill] sm:$0xff] }
 0x1ae   : > { %v2252_v39 = vpop.f32.mrf.mxu1  ;;  %v4040_v32 = vrot.slane %v10157_v22, 1  ;;  %v5122_v22 = vshll.u32 %v8388_v53, 16 }
 0x1af   : > { %10153 = vst [vmem:[#allocation6_spill] sm:$0xff] %v9599_v51  ;;  %v2253_v40 = vadd.f32 %v2252_v39, %v10154_v3  ;;  %v7797_v60 = vpop.f32.mrf.mxu0  ;;  %v9603_v30 = vadd.f32 %v7793_v31, %v2261_v56  ;;  %v5112_v51 = vor.u32 %v5111_v15, %v5107_v20  ;;  %v5116_v39 = vrot.slane %v5114_v18, 1  ;;  %v9610_v3 = vld [vmem:[#allocation2 + $0x30] sm:$0xff]   ;;  %v10159_v31 = vld [vmem:[#allocation23_spill] sm:$0xff] }
 0x1b0   : > { %v7732_v36 = vpop.f32.mrf.mxu1  ;;  %7987 = vmatmul.mubr.bf16.gmra.mxu1 %v4037_v45  ;;  %v5673_v20 = vrot.slane %v9610_v3, 1 }
 0x1b1   : > { %10155 = vst [vmem:[#allocation9_spill] sm:$0xff] %v9603_v30  ;;  %v2274_v50 = vadd.f32 %v7732_v36, %v10156_v63  ;;  %v2636_v41 = vpop.f32.mrf.mxu0  ;;  %7990 = vmatprep.mubr.bf16.mxu1 %v4039_v23  ;;  %v9608_v9 = vadd.f32 %v2620_v25, %v2253_v40  ;;  %v5118_v23 = vshrl.u32 %v8386_v37, 16  ;;  %v5671_v63 = vrot.slane %v8388_v53, 1 }
 0x1b2   : > { %v2265_v13 = vpop.f32.mrf.mxu1  ;;  %v4041_v25 = vsel %vm2317_vm9, %v4038_v55, %v4040_v32  ;;  %v5124_v32 = vrot.slane %v5122_v22, 1 }
 0x1b3   : > { %10158 = vst [vmem:[#allocation11_spill] sm:$0xff] %v9608_v9  ;;  %v2266_v56 = vadd.f32 %v2265_v13, %v10159_v31  ;;  %v7800_v30 = vpop.f32.mrf.mxu0  ;;  %8055 = vmatmul.mubr.bf16.gmra.mxu0 %v8384_v4  ;;  %v9613_v45 = vadd.f32 %v7796_v62, %v2274_v50  ;;  %v5117_v13 = vsel %vm1505_vm8, %v5112_v51, %v5116_v39  ;;  %v5126_v4 = vshrl.u32 %v8388_v53, 16  ;;  %v10163_v50 = vld [vmem:[#allocation25_spill] sm:$0xff] }
 0x1b4   : > { %v7733_v36 = vpop.f32.mrf.mxu1  ;;  %8138 = vmatprep.mubr.bf16.mxu0 %v5670_v35  ;;  %v5130_v62 = vshll.u32 %v9610_v3, 16  ;;  %v5672_v55 = vsel %vm2317_vm9, %v5669_v14, %v5671_v63  ;;  %v5674_v51 = vsel %vm2317_vm9, %v5671_v63, %v5673_v20 }
 0x1b5   : > { %10160 = vst [vmem:[#allocation12_spill] sm:$0xff] %v9613_v45  ;;  %v2277_v48 = vadd.f32 %v7733_v36, %v10161_v16  ;;  %v2649_v40 = vpop.f32.mrf.mxu0  ;;  %v9618_v15 = vadd.f32 %v2633_v12, %v2266_v56  ;;  %v5120_v16 = vor.u32 %v5118_v23, %v5116_v39  ;;  %v8390_v36 = vld [vmem:[#allocation2 + $0x38] sm:$0xff]  }
 0x1b6   : > { %v2268_v18 = vpop.f32.mrf.mxu1  ;;  %v10165_v12 = vld [vmem:[#allocation26_spill] sm:$0xff]  ;;  %v5138_v22 = vshll.u32 %v8390_v36, 16 }
 0x1b7   : > { %10162 = vst [vmem:[#allocation10_spill] sm:$0xff] %v9618_v15  ;;  %v2269_v35 = vadd.f32 %v2268_v18, %v10163_v50  ;;  %v7801_v37 = vpop.f32.mrf.mxu0  ;;  %v9623_v31 = vadd.f32 %v7797_v60, %v2277_v48  ;;  %v5128_v18 = vor.u32 %v5126_v4, %v5124_v32  ;;  %v5132_v50 = vrot.slane %v5130_v62, 1  ;;  %v8391_v60 = vld [vmem:[#allocation2 + $0x40] sm:$0xff]  }
 0x1b8   : > { %v7736_v45 = vpop.f32.mrf.mxu1  ;;  %7991 = vmatmul.mubr.bf16.gmra.mxu1 %v4041_v25  ;;  %v10166_v48 = vld [vmem:[#allocation27_spill] sm:$0xff]  ;;  %v5125_v23 = vsel %vm1505_vm8, %v5120_v16, %v5124_v32  ;;  %v5677_v4 = vrot.slane %v8391_v60, 1 }
 0x1b9   : > { %10164 = vst [vmem:[#allocation13_spill] sm:$0xff] %v9623_v31  ;;  %v2290_v56 = vadd.f32 %v7736_v45, %v10165_v12  ;;  %v2652_v15 = vpop.f32.mrf.mxu0  ;;  %8074 = vmatprep.mubr.bf16.mxu1 %v5117_v13  ;;  %v9628_v53 = vadd.f32 %v2636_v41, %v2269_v35  ;;  %v5675_v45 = vrot.slane %v8390_v36, 1  ;;  %v10168_v13 = vld [vmem:[#allocation28_spill] sm:$0xff]  ;;  %v5134_v35 = vshrl.u32 %v9610_v3, 16 }
 0x1ba   : > { %v2281_v9 = vpop.f32.mrf.mxu1 }
 0x1bb   : > { %v2282_v31 = vadd.f32 %v2281_v9, %v10166_v48  ;;  %v7884_v25 = vpop.f32.mrf.mxu0  ;;  %8139 = vmatmul.mubr.bf16.vlgmr.msra.gmra.mxu0 %v5672_v55  ;;  %v9631_v39 = vadd.f32 %v7800_v30, %v2290_v56  ;;  %v5133_v9 = vsel %vm1505_vm8, %v5128_v18, %v5132_v50  ;;  %v5142_v55 = vshrl.u32 %v8390_v36, 16  ;;  %v10170_v56 = vld [vmem:[#allocation29_spill] sm:$0xff] }
 0x1bc   : > { %v7737_v14 = vpop.f32.mrf.mxu1  ;;  %8142 = vmatprep.mubr.bf16.mxu0 %v5674_v51  ;;  %v5146_v30 = vshll.u32 %v8391_v60, 16  ;;  %v5676_v51 = vsel %vm2317_vm9, %v5673_v20, %v5675_v45  ;;  %v5678_v18 = vsel %vm2317_vm9, %v5675_v45, %v5677_v4 }
 0x1bd   : > { %10167 = vst [vmem:[#allocation14_spill] sm:$0xff] %v9631_v39  ;;  %v2293_v63 = vadd.f32 %v7737_v14, %v10168_v13  ;;  %v3733_v41 = vpop.f32.mrf.mxu0  ;;  %v9636_v62 = vadd.f32 %v2649_v40, %v2282_v31  ;;  %v5140_v14 = vrot.slane %v5138_v22, 1  ;;  %v8392_v13 = vld [vmem:[#allocation2 + $0x48] sm:$0xff]   ;;  %v5136_v31 = vor.u32 %v5134_v35, %v5132_v50 }
 0x1be   : > { %v2284_v12 = vpop.f32.mrf.mxu1  ;;  %v5154_v50 = vshll.u32 %v8392_v13, 16 }
 0x1bf   : > { %10169 = vst [vmem:[#allocation15_spill] sm:$0xff] %v9636_v62  ;;  %v2285_v48 = vadd.f32 %v2284_v12, %v10170_v56  ;;  %v7885_v39 = vpop.f32.mrf.mxu0  ;;  %v9640_v16 = vadd.f32 %v7801_v37, %v2293_v63  ;;  %v5144_v12 = vor.u32 %v5142_v55, %v5140_v14  ;;  %v5148_v56 = vrot.slane %v5146_v30, 1  ;;  %v9647_v37 = vld [vmem:[#allocation2 + $0x50] sm:$0xff]  }
 0x1c0   : > { %v7820_v32 = vpop.f32.mrf.mxu1  ;;  %8075 = vmatmul.mubr.bf16.vlgmr.msra.gmra.mxu1 %v5125_v23  ;;  %v5681_v55 = vrot.slane %v9647_v37, 1 }
 0x1c1   : > { %v3196_v3 = vadd.f32 %v7820_v32, %v9424_v58  ;;  %v3736_v40 = vpop.f32.mrf.mxu0  ;;  %8078 = vmatprep.mubr.bf16.mxu1 %v5133_v9  ;;  %v9645_v36 = vadd.f32 %v2652_v15, %v2285_v48  ;;  %v5679_v58 = vrot.slane %v8392_v13, 1  ;;  %v5150_v9 = vshrl.u32 %v8391_v60, 16 }
 0x1c2   : > { %v3003_v62 = vpop.f32.mrf.mxu1  ;;  %v5141_v15 = vsel %vm1505_vm8, %v5136_v31, %v5140_v14  ;;  %v5156_v31 = vrot.slane %v5154_v50, 1 }
 0x1c3   : > { %v3194_v23 = vadd.f32 %v3003_v62, %v9428_v1  ;;  %v7888_v63 = vpop.f32.mrf.mxu0  ;;  %8143 = vmatmul.mubr.bf16.gmra.mxu0 %v5676_v51  ;;  %v9650_v20 = vadd.f32 %v7884_v25, %v3196_v3  ;;  %v5149_v1 = vsel %vm1505_vm8, %v5144_v12, %v5148_v56  ;;  %v5158_v62 = vshrl.u32 %v8392_v13, 16 }
 0x1c4   : > { %v7821_v22 = vpop.f32.mrf.mxu1  ;;  %8146 = vmatprep.mubr.bf16.mxu0 %v5678_v18  ;;  %v5162_v25 = vshll.u32 %v9647_v37, 16  ;;  %v5152_v14 = vor.u32 %v5150_v9, %v5148_v56  ;;  %v8394_v18 = vld [vmem:[#allocation2 + $0x58] sm:$0xff]   ;;  %v5682_v13 = vsel %vm2317_vm9, %v5679_v58, %v5681_v55 }
 0x1c5   : > { %v3197_v45 = vadd.f32 %v7821_v22, %v9438_v28  ;;  %v3749_v35 = vpop.f32.mrf.mxu0  ;;  %v9655_v30 = vadd.f32 %v3733_v41, %v3194_v23  ;;  %v5680_v28 = vsel %vm2317_vm9, %v5677_v4, %v5679_v58  ;;  %v5170_v50 = vshll.u32 %v8394_v18, 16 }
 0x1c6   : > { %v3006_v48 = vpop.f32.mrf.mxu1  ;;  %v5157_v9 = vsel %vm1505_vm8, %v5152_v14, %v5156_v31 }
 0x1c7   : > { %v3195_v32 = vadd.f32 %v3006_v48, %v9445_v2  ;;  %v7889_v51 = vpop.f32.mrf.mxu0  ;;  %v9660_v60 = vadd.f32 %v7885_v39, %v3197_v45  ;;  %v5160_v2 = vor.u32 %v5158_v62, %v5156_v31  ;;  %v5164_v48 = vrot.slane %v5162_v25, 1  ;;  %v8395_v39 = vld [vmem:[#allocation2 + $0x60] sm:$0xff]  }
 0x1c8   : > { %v7824_v3 = vpop.f32.mrf.mxu1  ;;  %8079 = vmatmul.mubr.bf16.gmra.mxu1 %v5141_v15  ;;  %v5685_v62 = vrot.slane %v8395_v39, 1 }
 0x1c9   : > { %v3200_v41 = vadd.f32 %v7824_v3, %v9452_v54  ;;  %v3752_v23 = vpop.f32.mrf.mxu0  ;;  %8082 = vmatprep.mubr.bf16.mxu1 %v5149_v1  ;;  %v9665_v12 = vadd.f32 %v3736_v40, %v3195_v32  ;;  %v5683_v54 = vrot.slane %v8394_v18, 1  ;;  %v5166_v1 = vshrl.u32 %v9647_v37, 16 }
 0x1ca   : > { %v3019_v22 = vpop.f32.mrf.mxu1  ;;  %v5174_v3 = vshrl.u32 %v8394_v18, 16 }
 0x1cb   : > { %v3198_v45 = vadd.f32 %v3019_v22, %v9456_v61  ;;  %v7892_v15 = vpop.f32.mrf.mxu0  ;;  %8147 = vmatmul.mubr.bf16.gmra.mxu0 %v5680_v28  ;;  %v9668_v4 = vadd.f32 %v7888_v63, %v3200_v41  ;;  %v5165_v61 = vsel %vm1505_vm8, %v5160_v2, %v5164_v48  ;;  %v5178_v63 = vshll.u32 %v8395_v39, 16  ;;  %v8396_v22 = vld [vmem:[#allocation2 + $0x68] sm:$0xff]  }
 0x1cc   : > { %v7825_v56 = vpop.f32.mrf.mxu1  ;;  %8150 = vmatprep.mubr.bf16.mxu0 %v5682_v13  ;;  %v5172_v13 = vrot.slane %v5170_v50, 1  ;;  %v5686_v2 = vsel %vm2317_vm9, %v5683_v54, %v5685_v62 }
 0x1cd   : > { %v3201_v58 = vadd.f32 %v7825_v56, %v9466_v47  ;;  %v3765_v40 = vpop.f32.mrf.mxu0  ;;  %v9673_v25 = vadd.f32 %v3749_v35, %v3198_v45  ;;  %v5684_v47 = vsel %vm2317_vm9, %v5681_v55, %v5683_v54  ;;  %v5168_v45 = vor.u32 %v5166_v1, %v5164_v48 }
 0x1ce   : > { %v3022_v32 = vpop.f32.mrf.mxu1  ;;  %v5186_v48 = vshll.u32 %v8396_v22, 16 }
 0x1cf   : > { %v3199_v28 = vadd.f32 %v3022_v32, %v9473_v19  ;;  %v7893_v41 = vpop.f32.mrf.mxu0  ;;  %v9677_v14 = vadd.f32 %v7889_v51, %v3201_v58  ;;  %v5176_v19 = vor.u32 %v5174_v3, %v5172_v13  ;;  %v5180_v32 = vrot.slane %v5178_v63, 1  ;;  %v9684_v51 = vld [vmem:[#allocation2 + $0x70] sm:$0xff]  }
 0x1d0   : > { %v7828_v31 = vpop.f32.mrf.mxu1  ;;  %8083 = vmatmul.mubr.bf16.gmra.mxu1 %v5157_v9  ;;  %v5689_v3 = vrot.slane %v9684_v51, 1 }
 0x1d1   : > { %v3204_v37 = vadd.f32 %v7828_v31, %v9480_v0  ;;  %v3768_v35 = vpop.f32.mrf.mxu0  ;;  %8086 = vmatprep.mubr.bf16.mxu1 %v5165_v61  ;;  %v9682_v18 = vadd.f32 %v3752_v23, %v3199_v28  ;;  %v5687_v0 = vrot.slane %v8396_v22, 1  ;;  %v5182_v61 = vshrl.u32 %v8395_v39, 16 }
 0x1d2   : > { %v3035_v56 = vpop.f32.mrf.mxu1  ;;  %v5173_v23 = vsel %vm1505_vm8, %v5168_v45, %v5172_v13  ;;  %v5190_v31 = vshrl.u32 %v8396_v22, 16  ;;  %v5188_v45 = vrot.slane %v5186_v48, 1 }
 0x1d3   : > { %v3202_v9 = vadd.f32 %v3035_v56, %v9484_v26  ;;  %v7896_v58 = vpop.f32.mrf.mxu0  ;;  %8151 = vmatmul.mubr.bf16.gmra.mxu0 %v5684_v47  ;;  %v9687_v55 = vadd.f32 %v7892_v15, %v3204_v37  ;;  %v5181_v26 = vsel %vm1505_vm8, %v5176_v19, %v5180_v32  ;;  %v5194_v15 = vshll.u32 %v9684_v51, 16  ;;  %v8398_v56 = vld [vmem:[#allocation2 + $0x78] sm:$0xff]  }
 0x1d4   : > { %v7829_v50 = vpop.f32.mrf.mxu1  ;;  %8154 = vmatprep.mubr.bf16.mxu0 %v5686_v2  ;;  %v5184_v13 = vor.u32 %v5182_v61, %v5180_v32  ;;  %v5690_v22 = vsel %vm2317_vm9, %v5687_v0, %v5689_v3  ;;  %v5202_v48 = vshll.u32 %v8398_v56, 16 }
 0x1d5   : > { %v3205_v54 = vadd.f32 %v7829_v50, %v9491_v29  ;;  %v3781_v1 = vpop.f32.mrf.mxu0  ;;  %v9692_v63 = vadd.f32 %v3765_v40, %v3202_v9  ;;  %v5688_v29 = vsel %vm2317_vm9, %v5685_v62, %v5687_v0 }
 0x1d6   : > { %v3038_v28 = vpop.f32.mrf.mxu1  ;;  %v5189_v61 = vsel %vm1505_vm8, %v5184_v13, %v5188_v45 }
 0x1d7   : > { %v3203_v47 = vadd.f32 %v3038_v28, %v9495_v52  ;;  %v7897_v37 = vpop.f32.mrf.mxu0  ;;  %v9697_v39 = vadd.f32 %v7893_v41, %v3205_v54  ;;  %v5192_v52 = vor.u32 %v5190_v31, %v5188_v45  ;;  %v5196_v28 = vrot.slane %v5194_v15, 1  ;;  %v8399_v41 = vld [vmem:[#allocation2 + $0x80] sm:$0xff]  }
 0x1d8   : > { %v7832_v2 = vpop.f32.mrf.mxu1  ;;  %8087 = vmatmul.mubr.bf16.gmra.mxu1 %v5173_v23  ;;  %v5693_v31 = vrot.slane %v8399_v41, 1 }
 0x1d9   : > { %v3208_v40 = vadd.f32 %v7832_v2, %v9499_v10  ;;  %v3784_v9 = vpop.f32.mrf.mxu0  ;;  %8090 = vmatprep.mubr.bf16.mxu1 %v5181_v26  ;;  %v9702_v19 = vadd.f32 %v3768_v35, %v3203_v47  ;;  %v5691_v10 = vrot.slane %v8398_v56, 1  ;;  %v5198_v26 = vshrl.u32 %v9684_v51, 16 }
 0x1da   : > { %v3051_v50 = vpop.f32.mrf.mxu1  ;;  %v5206_v2 = vshrl.u32 %v8398_v56, 16 }
 0x1db   : > { %v3206_v54 = vadd.f32 %v3051_v50, %v9503_v8  ;;  %v7900_v23 = vpop.f32.mrf.mxu0  ;;  %8155 = vmatmul.mubr.bf16.gmra.mxu0 %v5688_v29  ;;  %v9705_v62 = vadd.f32 %v7896_v58, %v3208_v40  ;;  %v5197_v8 = vsel %vm1505_vm8, %v5192_v52, %v5196_v28  ;;  %v5210_v58 = vshll.u32 %v8399_v41, 16  ;;  %v8400_v50 = vld [vmem:[#allocation2 + $0x88] sm:$0xff]  }
 0x1dc   : > { %v7833_v32 = vpop.f32.mrf.mxu1  ;;  %8158 = vmatprep.mubr.bf16.mxu0 %v5690_v22  ;;  %v5204_v22 = vrot.slane %v5202_v48, 1  ;;  %v5694_v52 = vsel %vm2317_vm9, %v5691_v10, %v5693_v31 }
 0x1dd   : > { %v3209_v0 = vadd.f32 %v7833_v32, %v9507_v21  ;;  %v3797_v35 = vpop.f32.mrf.mxu0  ;;  %v9710_v15 = vadd.f32 %v3781_v1, %v3206_v54  ;;  %v5692_v21 = vsel %vm2317_vm9, %v5689_v3, %v5691_v10  ;;  %v5200_v54 = vor.u32 %v5198_v26, %v5196_v28 }
 0x1de   : > { %v3054_v47 = vpop.f32.mrf.mxu1  ;;  %v5218_v28 = vshll.u32 %v8400_v50, 16 }
 0x1df   : > { %v3207_v29 = vadd.f32 %v3054_v47, %v9511_v33  ;;  %v7901_v40 = vpop.f32.mrf.mxu0  ;;  %v9714_v13 = vadd.f32 %v7897_v37, %v3209_v0  ;;  %v5208_v33 = vor.u32 %v5206_v2, %v5204_v22  ;;  %v5212_v47 = vrot.slane %v5210_v58, 1  ;;  %v9721_v37 = vld [vmem:[#allocation2 + $0x90] sm:$0xff]  }
 0x1e0   : > { %v7836_v45 = vpop.f32.mrf.mxu1  ;;  %8091 = vmatmul.mubr.bf16.gmra.mxu1 %v5189_v61  ;;  %v5697_v2 = vrot.slane %v9721_v37, 1 }
 0x1e1   : > { %v3212_v51 = vadd.f32 %v7836_v45, %v9515_v59  ;;  %v3800_v1 = vpop.f32.mrf.mxu0  ;;  %8094 = vmatprep.mubr.bf16.mxu1 %v5197_v8  ;;  %v9719_v56 = vadd.f32 %v3784_v9, %v3207_v29  ;;  %v5695_v59 = vrot.slane %v8400_v50, 1  ;;  %v5214_v8 = vshrl.u32 %v8399_v41, 16 }
 0x1e2   : > { %v3067_v32 = vpop.f32.mrf.mxu1  ;;  %v5205_v9 = vsel %vm1505_vm8, %v5200_v54, %v5204_v22  ;;  %v5222_v45 = vshrl.u32 %v8400_v50, 16  ;;  %v5220_v54 = vrot.slane %v5218_v28, 1 }
 0x1e3   : > { %v3210_v61 = vadd.f32 %v3067_v32, %v9519_v42  ;;  %v7904_v0 = vpop.f32.mrf.mxu0  ;;  %8159 = vmatmul.mubr.bf16.gmra.mxu0 %v5692_v21  ;;  %v9724_v3 = vadd.f32 %v7900_v23, %v3212_v51  ;;  %v5213_v42 = vsel %vm1505_vm8, %v5208_v33, %v5212_v47  ;;  %v5226_v23 = vshll.u32 %v9721_v37, 16  ;;  %v8402_v32 = vld [vmem:[#allocation2 + $0x98] sm:$0xff]  }
 0x1e4   : > { %v7837_v48 = vpop.f32.mrf.mxu1  ;;  %8162 = vmatprep.mubr.bf16.mxu0 %v5694_v52  ;;  %v5216_v22 = vor.u32 %v5214_v8, %v5212_v47  ;;  %v5698_v50 = vsel %vm2317_vm9, %v5695_v59, %v5697_v2  ;;  %v5234_v28 = vshll.u32 %v8402_v32, 16 }
 0x1e5   : > { %v3213_v10 = vadd.f32 %v7837_v48, %v9523_v49  ;;  %v3813_v26 = vpop.f32.mrf.mxu0  ;;  %v9729_v58 = vadd.f32 %v3797_v35, %v3210_v61  ;;  %v5696_v49 = vsel %vm2317_vm9, %v5693_v31, %v5695_v59 }
 0x1e6   : > { %v3070_v29 = vpop.f32.mrf.mxu1  ;;  %v5221_v8 = vsel %vm1505_vm8, %v5216_v22, %v5220_v54 }
 0x1e7   : > { %v3211_v21 = vadd.f32 %v3070_v29, %v9527_v44  ;;  %v7905_v51 = vpop.f32.mrf.mxu0  ;;  %v9734_v41 = vadd.f32 %v7901_v40, %v3213_v10  ;;  %v5224_v44 = vor.u32 %v5222_v45, %v5220_v54  ;;  %v5228_v29 = vrot.slane %v5226_v23, 1  ;;  %v8403_v40 = vld [vmem:[#allocation2 + $0xa0] sm:$0xff]  }
 0x1e8   : > { %v7840_v52 = vpop.f32.mrf.mxu1  ;;  %8095 = vmatmul.mubr.bf16.gmra.mxu1 %v5205_v9  ;;  %v5701_v45 = vrot.slane %v8403_v40, 1 }
 0x1e9   : > { %v3216_v35 = vadd.f32 %v7840_v52, %v9531_v17  ;;  %v3816_v61 = vpop.f32.mrf.mxu0  ;;  %8098 = vmatprep.mubr.bf16.mxu1 %v5213_v42  ;;  %v9739_v33 = vadd.f32 %v3800_v1, %v3211_v21  ;;  %v5699_v17 = vrot.slane %v8402_v32, 1  ;;  %v5230_v42 = vshrl.u32 %v9721_v37, 16 }
 0x1ea   : > { %v3083_v48 = vpop.f32.mrf.mxu1  ;;  %v5238_v52 = vshrl.u32 %v8402_v32, 16 }
 0x1eb   : > { %v3214_v10 = vadd.f32 %v3083_v48, %v9535_v6  ;;  %v7908_v9 = vpop.f32.mrf.mxu0  ;;  %8163 = vmatmul.mubr.bf16.gmra.mxu0 %v5696_v49  ;;  %v9742_v31 = vadd.f32 %v7904_v0, %v3216_v35  ;;  %v5229_v6 = vsel %vm1505_vm8, %v5224_v44, %v5228_v29  ;;  %v5242_v0 = vshll.u32 %v8403_v40, 16  ;;  %v8404_v48 = vld [vmem:[#allocation2 + $0xa8] sm:$0xff]  }
 0x1ec   : > { %v7841_v47 = vpop.f32.mrf.mxu1  ;;  %8166 = vmatprep.mubr.bf16.mxu0 %v5698_v50  ;;  %v5236_v50 = vrot.slane %v5234_v28, 1  ;;  %v5702_v44 = vsel %vm2317_vm9, %v5699_v17, %v5701_v45 }
 0x1ed   : > { %v3217_v59 = vadd.f32 %v7841_v47, %v9539_v5  ;;  %v3829_v1 = vpop.f32.mrf.mxu0  ;;  %v9747_v23 = vadd.f32 %v3813_v26, %v3214_v10  ;;  %v5700_v5 = vsel %vm2317_vm9, %v5697_v2, %v5699_v17  ;;  %v5232_v10 = vor.u32 %v5230_v42, %v5228_v29 }
 0x1ee   : > { %v3086_v21 = vpop.f32.mrf.mxu1  ;;  %v5250_v29 = vshll.u32 %v8404_v48, 16 }
 0x1ef   : > { %v3215_v49 = vadd.f32 %v3086_v21, %v9543_v27  ;;  %v7909_v35 = vpop.f32.mrf.mxu0  ;;  %v9751_v22 = vadd.f32 %v7905_v51, %v3217_v59  ;;  %v5240_v27 = vor.u32 %v5238_v52, %v5236_v50  ;;  %v5244_v21 = vrot.slane %v5242_v0, 1  ;;  %v9758_v51 = vld [vmem:[#allocation2 + $0xb0] sm:$0xff]  }
 0x1f0   : > { %v7844_v54 = vpop.f32.mrf.mxu1  ;;  %8099 = vmatmul.mubr.bf16.gmra.mxu1 %v5221_v8  ;;  %v5705_v52 = vrot.slane %v9758_v51, 1 }
 0x1f1   : > { %v3220_v37 = vadd.f32 %v7844_v54, %v9547_v11  ;;  %v3832_v26 = vpop.f32.mrf.mxu0  ;;  %8102 = vmatprep.mubr.bf16.mxu1 %v5229_v6  ;;  %v9756_v32 = vadd.f32 %v3816_v61, %v3215_v49  ;;  %v5703_v11 = vrot.slane %v8404_v48, 1  ;;  %v5246_v6 = vshrl.u32 %v8403_v40, 16 }
 0x1f2   : > { %v3099_v47 = vpop.f32.mrf.mxu1  ;;  %v5237_v61 = vsel %vm1505_vm8, %v5232_v10, %v5236_v50  ;;  %v5254_v54 = vshrl.u32 %v8404_v48, 16  ;;  %v5252_v10 = vrot.slane %v5250_v29, 1 }
 0x1f3   : > { %v3218_v8 = vadd.f32 %v3099_v47, %v9551_v34  ;;  %v7912_v59 = vpop.f32.mrf.mxu0  ;;  %8167 = vmatmul.mubr.bf16.gmra.mxu0 %v5700_v5  ;;  %v9761_v2 = vadd.f32 %v7908_v9, %v3220_v37  ;;  %v5245_v34 = vsel %vm1505_vm8, %v5240_v27, %v5244_v21  ;;  %v5258_v9 = vshll.u32 %v9758_v51, 16  ;;  %v8406_v47 = vld [vmem:[#allocation2 + $0xb8] sm:$0xff]  }
 0x1f4   : > { %v7845_v28 = vpop.f32.mrf.mxu1  ;;  %8170 = vmatprep.mubr.bf16.mxu0 %v5702_v44  ;;  %v5248_v50 = vor.u32 %v5246_v6, %v5244_v21  ;;  %v5706_v48 = vsel %vm2317_vm9, %v5703_v11, %v5705_v52  ;;  %v5266_v29 = vshll.u32 %v8406_v47, 16 }
 0x1f5   : > { %v3221_v17 = vadd.f32 %v7845_v28, %v9555_v57  ;;  %v3845_v42 = vpop.f32.mrf.mxu0  ;;  %v9766_v0 = vadd.f32 %v3829_v1, %v3218_v8  ;;  %v5704_v57 = vsel %vm2317_vm9, %v5701_v45, %v5703_v11 }
 0x1f6   : > { %v3102_v49 = vpop.f32.mrf.mxu1  ;;  %v5253_v6 = vsel %vm1505_vm8, %v5248_v50, %v5252_v10 }
 0x1f7   : > { %v3219_v5 = vadd.f32 %v3102_v49, %v9559_v38  ;;  %v7913_v37 = vpop.f32.mrf.mxu0  ;;  %v9771_v40 = vadd.f32 %v7909_v35, %v3221_v17  ;;  %v5256_v38 = vor.u32 %v5254_v54, %v5252_v10  ;;  %v5260_v49 = vrot.slane %v5258_v9, 1  ;;  %v8407_v35 = vld [vmem:[#allocation2 + $0xc0] sm:$0xff]  }
 0x1f8   : > { %v7848_v44 = vpop.f32.mrf.mxu1  ;;  %8103 = vmatmul.mubr.bf16.gmra.mxu1 %v5237_v61  ;;  %v5709_v54 = vrot.slane %v8407_v35, 1 }
 0x1f9   : > { %v3224_v1 = vadd.f32 %v7848_v44, %v9563_v46  ;;  %v3848_v8 = vpop.f32.mrf.mxu0  ;;  %8106 = vmatprep.mubr.bf16.mxu1 %v5245_v34  ;;  %v9776_v27 = vadd.f32 %v3832_v26, %v3219_v5  ;;  %v5707_v46 = vrot.slane %v8406_v47, 1  ;;  %v5262_v34 = vshrl.u32 %v9758_v51, 16  ;;  %v10173_v51 = vld [vmem:[#allocation3_spill] sm:$0xff] }
 0x1fa   : > { %v3115_v28 = vpop.f32.mrf.mxu1  ;;  %v5270_v44 = vshrl.u32 %v8406_v47, 16 }
 0x1fb   : > { %v3222_v17 = vadd.f32 %v3115_v28, %v9567_v43  ;;  %v7916_v61 = vpop.f32.mrf.mxu0  ;;  %8171 = vmatmul.mubr.bf16.gmra.mxu0 %v5704_v57  ;;  %v9779_v45 = vadd.f32 %v7912_v59, %v3224_v1  ;;  %v5261_v43 = vsel %vm1505_vm8, %v5256_v38, %v5260_v49  ;;  %v5274_v59 = vshll.u32 %v8407_v35, 16  ;;  %v8408_v28 = vld [vmem:[#allocation2 + $0xc8] sm:$0xff]  }
 0x1fc   : > { %v7849_v21 = vpop.f32.mrf.mxu1  ;;  %8174 = vmatprep.mubr.bf16.mxu0 %v5706_v48  ;;  %v5268_v48 = vrot.slane %v5266_v29, 1  ;;  %v5710_v38 = vsel %vm2317_vm9, %v5707_v46, %v5709_v54 }
 0x1fd   : > { %v3225_v11 = vadd.f32 %v7849_v21, %v9571_v24  ;;  %v3861_v26 = vpop.f32.mrf.mxu0  ;;  %v9784_v9 = vadd.f32 %v3845_v42, %v3222_v17  ;;  %v5708_v24 = vsel %vm2317_vm9, %v5705_v52, %v5707_v46  ;;  %v5264_v17 = vor.u32 %v5262_v34, %v5260_v49  ;;  %v10177_v49 = vld [vmem:[#allocation8_spill] sm:$0xff] }
 0x1fe   : > { %v3118_v5 = vpop.f32.mrf.mxu1 }
 0x1ff   : > { %10171 = vst [vmem:[#allocation17_spill] sm:$0xff] %v9784_v9  ;;  %v3223_v57 = vadd.f32 %v3118_v5, %v9575_v7  ;;  %v7917_v1 = vpop.f32.mrf.mxu0  ;;  %v9788_v50 = vadd.f32 %v7913_v37, %v3225_v11  ;;  %v5272_v7 = vor.u32 %v5270_v44, %v5268_v48  ;;  %v5276_v5 = vrot.slane %v5274_v59, 1  ;;  %v8409_v37 = vld [vmem:[#allocation2 + $0xd0] sm:$0xff]   ;;  %v10175_v11 = vld [vmem:[#allocation7_spill] sm:$0xff] }
 0x200   : > { %v7852_v10 = vpop.f32.mrf.mxu1  ;;  %8107 = vmatmul.mubr.bf16.gmra.mxu1 %v5253_v6 }
 0x201   : > { %10172 = vst [vmem:[#allocation16_spill] sm:$0xff] %v9788_v50  ;;  %v3228_v21 = vadd.f32 %v7852_v10, %v10173_v51  ;;  %v3864_v42 = vpop.f32.mrf.mxu0  ;;  %8110 = vmatprep.mubr.bf16.mxu1 %v5261_v43  ;;  %v9793_v47 = vadd.f32 %v3848_v8, %v3223_v57  ;;  %v5711_v10 = vrot.slane %v8408_v28, 1  ;;  %v5278_v51 = vshrl.u32 %v8407_v35, 16 }
 0x202   : > { %v3131_v9 = vpop.f32.mrf.mxu1  ;;  %v5282_v43 = vshll.u32 %v8408_v28, 16  ;;  %v5269_v8 = vsel %vm1505_vm8, %v5264_v17, %v5268_v48  ;;  %v5713_v57 = vrot.slane %v8409_v37, 1  ;;  %v8410_v17 = vld [vmem:[#allocation2 + $0xd8] ss:$0 sps:$4 sm:$0x11]  }
 0x203   : > { %10174 = vst [vmem:[#allocation18_spill] sm:$0xff] %v9793_v47  ;;  %v3226_v50 = vadd.f32 %v3131_v9, %v10175_v11  ;;  %v7920_v6 = vpop.f32.mrf.mxu0  ;;  %8175 = vmatmul.mubr.bf16.gmra.mxu0 %v5708_v24  ;;  %v9796_v52 = vadd.f32 %v7916_v61, %v3228_v21  ;;  %v5277_v9 = vsel %vm1505_vm8, %v5272_v7, %v5276_v5  ;;  %v5286_v11 = vshrl.u32 %v8408_v28, 16  ;;  %v10179_v61 = vld [vmem:[#allocation4_spill] sm:$0xff]  ;;  %v10181_v47 = vld [vmem:[#allocation5_spill] sm:$0xff] }
 0x204   : > { %v7853_v29 = vpop.f32.mrf.mxu1  ;;  %8178 = vmatprep.mubr.bf16.mxu0 %v5710_v38  ;;  %v5290_v24 = vshll.u32 %v8409_v37, 16  ;;  %v5284_v48 = vrot.slane %v5282_v43, 1  ;;  %v5714_v7 = vsel %vm2317_vm9, %v5711_v10, %v5713_v57 }
 0x205   : > { %10176 = vst [vmem:[#allocation20_spill] sm:$0xff] %v9796_v52  ;;  %v3229_v34 = vadd.f32 %v7853_v29, %v10177_v49  ;;  %v3877_v46 = vpop.f32.mrf.mxu0  ;;  %v9800_v44 = vadd.f32 %v3861_v26, %v3226_v50  ;;  %v5712_v29 = vsel %vm2317_vm9, %v5709_v54, %v5711_v10  ;;  %v5280_v49 = vor.u32 %v5278_v51, %v5276_v5  ;;  %v10183_v51 = vld [vmem:[#allocation9_spill] sm:$0xff] }
 0x206   : > { %v3134_v59 = vpop.f32.mrf.mxu1  ;;  %v5294_v10 = vshrl.u32 %v8409_v37, 16 }
 0x207   : > { %10178 = vst [vmem:[#allocation21_spill] sm:$0xff] %v9800_v44  ;;  %v3227_v21 = vadd.f32 %v3134_v59, %v10179_v61  ;;  %v7921_v52 = vpop.f32.mrf.mxu0  ;;  %v9804_v38 = vadd.f32 %v7917_v1, %v3229_v34  ;;  %v5288_v59 = vor.u32 %v5286_v11, %v5284_v48  ;;  %v5292_v61 = vrot.slane %v5290_v24, 1  ;;  %v10182_v1 = vld [vmem:[#allocation6_spill] sm:$0xff] }
 0x208   : > { %v7856_v35 = vpop.f32.mrf.mxu1  ;;  %8111 = vmatmul.mubr.bf16.gmra.mxu1 %v5269_v8  ;;  %v5285_v5 = vsel %vm1505_vm8, %v5280_v49, %v5284_v48  ;;  %v10185_v48 = vld [vmem:[#allocation12_spill] sm:$0xff] }
 0x209   : > { %10180 = vst [vmem:[#allocation22_spill] sm:$0xff] %v9804_v38  ;;  %v3232_v26 = vadd.f32 %v7856_v35, %v10181_v47  ;;  %v3880_v50 = vpop.f32.mrf.mxu0  ;;  %8114 = vmatprep.mubr.bf16.mxu1 %v5277_v9  ;;  %v9809_v28 = vadd.f32 %v3864_v42, %v3227_v21  ;;  %v5715_v47 = vrot.slane %v8410_v17, 1  ;;  %v5298_v42 = vshll.u32 %v8410_v17, 16 }
 0x20a   : > { %v3147_v44 = vpop.f32.mrf.mxu1  ;;  %v5293_v24 = vsel %vm1505_vm8, %v5288_v59, %v5292_v61  ;;  %v5296_v37 = vor.u32 %v5294_v10, %v5292_v61 }
 0x20b   : > { %v3230_v34 = vadd.f32 %v3147_v44, %v10182_v1  ;;  %v7924_v38 = vpop.f32.mrf.mxu0  ;;  %8179 = vmatmul.mubr.bf16.gmra.mxu0 %v5712_v29  ;;  %v9812_v8 = vadd.f32 %v7920_v6, %v3232_v26  ;;  %v10184_v44 = vld [vmem:[#allocation11_spill] sm:$0xff]  ;;  %v5716_v49 = vsel %vm2317_vm9, %v5713_v57, %v5715_v47  ;;  %v5300_v17 = vrot.slane %v5298_v42, 1 }
 0x20c   : > { %v7857_v54 = vpop.f32.mrf.mxu1  ;;  %8182 = vmatprep.mubr.bf16.mxu0 %v5714_v7 }
 0x20d   : > { %v3233_v43 = vadd.f32 %v7857_v54, %v10183_v51  ;;  %v3893_v9 = vpop.f32.mrf.mxu0  ;;  %v9816_v21 = vadd.f32 %v3877_v46, %v3230_v34  ;;  %v10186_v54 = vld [vmem:[#allocation10_spill] sm:$0xff]  ;;  %v5301_v57 = vsel %vm1505_vm8, %v5296_v37, %v5300_v17 }
 0x20e   : > { %v3150_v11 = vpop.f32.mrf.mxu1 }
 0x20f   : > { %v3231_v35 = vadd.f32 %v3150_v11, %v10184_v44  ;;  %v7925_v29 = vpop.f32.mrf.mxu0  ;;  %v9820_v6 = vadd.f32 %v7921_v52, %v3233_v43  ;;  %v10187_v43 = vld [vmem:[#allocation13_spill] sm:$0xff] }
 0x210   : > { %v7860_v26 = vpop.f32.mrf.mxu1  ;;  %8115 = vmatmul.mubr.bf16.gmra.mxu1 %v5285_v5 }
 0x211   : > { %v3236_v7 = vadd.f32 %v7860_v26, %v10185_v48  ;;  %v3896_v1 = vpop.f32.mrf.mxu0  ;;  %8118 = vmatprep.mubr.bf16.mxu1 %v5293_v24  ;;  %v9824_v46 = vadd.f32 %v3880_v50, %v3231_v35  ;;  %v10188_v35 = vld [vmem:[#allocation14_spill] sm:$0xff] }
 0x212   : > { %v3163_v34 = vpop.f32.mrf.mxu1 }
 0x213   : > { %v3234_v59 = vadd.f32 %v3163_v34, %v10186_v54  ;;  %v7928_v51 = vpop.f32.mrf.mxu0  ;;  %8183 = vmatmul.mubr.bf16.gmra.mxu0 %v5716_v49  ;;  %v9827_v11 = vadd.f32 %v7924_v38, %v3236_v7  ;;  %v10189_v7 = vld [vmem:[#allocation15_spill] sm:$0xff] }
 0x214   : > { %v7861_v52 = vpop.f32.mrf.mxu1 }
 0x215   : > { %v3237_v5 = vadd.f32 %v7861_v52, %v10187_v43  ;;  %v3909_v47 = vpop.f32.mrf.mxu0  ;;  %v9831_v44 = vadd.f32 %v3893_v9, %v3234_v59 }
 0x216   : > { %v3166_v24 = vpop.f32.mrf.mxu1 }
 0x217   : > { %v3235_v61 = vadd.f32 %v3166_v24, %v9628_v53  ;;  %v7929_v50 = vpop.f32.mrf.mxu0  ;;  %v9834_v10 = vadd.f32 %v7925_v29, %v3237_v5 }
 0x218   : > { %v7864_v42 = vpop.f32.mrf.mxu1  ;;  %8119 = vmatmul.mubr.bf16.gmra.mxu1 %v5301_v57 }
 0x219   : > { %v3240_v26 = vadd.f32 %v7864_v42, %v10188_v35  ;;  %v3912_v38 = vpop.f32.mrf.mxu0  ;;  %v9837_v49 = vadd.f32 %v3896_v1, %v3235_v61 }
 0x21a   : > { %v3179_v48 = vpop.f32.mrf.mxu1 }
 0x21b   : > { %v3238_v34 = vadd.f32 %v3179_v48, %v10189_v7  ;;  %v8012_v37 = vpop.f32.mrf.mxu0  ;;  %v9840_v17 = vadd.f32 %v7928_v51, %v3240_v26 }
 0x21c   : > { %v7865_v9 = vpop.f32.mrf.mxu1 }
 0x21d   : > { %v3241_v54 = vadd.f32 %v7865_v9, %v9640_v16  ;;  %v4678_v53 = vpop.f32.mrf.mxu0  ;;  %v9843_v59 = vadd.f32 %v3909_v47, %v3238_v34 }
 0x21e   : > { %v3182_v29 = vpop.f32.mrf.mxu1 }
 0x21f   : > { %v3239_v52 = vadd.f32 %v3182_v29, %v9645_v36  ;;  %v8013_v43 = vpop.f32.mrf.mxu0  ;;  %v9846_v5 = vadd.f32 %v7929_v50, %v3241_v54 }
 0x220   : > { %v7948_v1 = vpop.f32.mrf.mxu1 }
 0x221   : > { %v4341_v57 = vadd.f32 %v7948_v1, %v9650_v20  ;;  %v4681_v24 = vpop.f32.mrf.mxu0  ;;  %v9849_v61 = vadd.f32 %v3912_v38, %v3239_v52 }
 0x222   : > { %v4148_v51 = vpop.f32.mrf.mxu1 }
 0x223   : > { %v4339_v42 = vadd.f32 %v4148_v51, %v9655_v30  ;;  %v8016_v35 = vpop.f32.mrf.mxu0  ;;  %v9852_v16 = vadd.f32 %v8012_v37, %v4341_v57 }
 0x224   : > { %v7949_v47 = vpop.f32.mrf.mxu1 }
 0x225   : > { %v4342_v26 = vadd.f32 %v7949_v47, %v9660_v60  ;;  %v4694_v48 = vpop.f32.mrf.mxu0  ;;  %v9855_v36 = vadd.f32 %v4678_v53, %v4339_v42 }
 0x226   : > { %v4151_v50 = vpop.f32.mrf.mxu1 }
 0x227   : > { %v4340_v7 = vadd.f32 %v4151_v50, %v9665_v12  ;;  %v8017_v34 = vpop.f32.mrf.mxu0  ;;  %v9858_v20 = vadd.f32 %v8013_v43, %v4342_v26 }
 0x228   : > { %v7952_v38 = vpop.f32.mrf.mxu1 }
 0x229   : > { %v4345_v9 = vadd.f32 %v7952_v38, %v9668_v4  ;;  %v4697_v54 = vpop.f32.mrf.mxu0  ;;  %v9861_v30 = vadd.f32 %v4681_v24, %v4340_v7 }
 0x22a   : > { %v4164_v37 = vpop.f32.mrf.mxu1 }
 0x22b   : > { %v4343_v29 = vadd.f32 %v4164_v37, %v9673_v25  ;;  %v8020_v52 = vpop.f32.mrf.mxu0  ;;  %v9864_v60 = vadd.f32 %v8016_v35, %v4345_v9 }
 0x22c   : > { %v7953_v53 = vpop.f32.mrf.mxu1 }
 0x22d   : > { %v4346_v1 = vadd.f32 %v7953_v53, %v9677_v14  ;;  %v4710_v57 = vpop.f32.mrf.mxu0  ;;  %v9867_v12 = vadd.f32 %v4694_v48, %v4343_v29 }
 0x22e   : > { %v4167_v43 = vpop.f32.mrf.mxu1 }
 0x22f   : > { %v4344_v51 = vadd.f32 %v4167_v43, %v9682_v18  ;;  %v8021_v42 = vpop.f32.mrf.mxu0  ;;  %v9870_v4 = vadd.f32 %v8017_v34, %v4346_v1 }
 0x230   : > { %v7956_v24 = vpop.f32.mrf.mxu1 }
 0x231   : > { %v4349_v47 = vadd.f32 %v7956_v24, %v9687_v55  ;;  %v4713_v26 = vpop.f32.mrf.mxu0  ;;  %v9873_v25 = vadd.f32 %v4697_v54, %v4344_v51 }
 0x232   : > { %v4180_v35 = vpop.f32.mrf.mxu1 }
 0x233   : > { %v4347_v50 = vadd.f32 %v4180_v35, %v9692_v63  ;;  %v8024_v7 = vpop.f32.mrf.mxu0  ;;  %v9876_v14 = vadd.f32 %v8020_v52, %v4349_v47 }
 0x234   : > { %v7957_v48 = vpop.f32.mrf.mxu1 }
 0x235   : > { %v4350_v38 = vadd.f32 %v7957_v48, %v9697_v39  ;;  %v4726_v9 = vpop.f32.mrf.mxu0  ;;  %v9879_v18 = vadd.f32 %v4710_v57, %v4347_v50 }
 0x236   : > { %v4183_v34 = vpop.f32.mrf.mxu1 }
 0x237   : > { %v4348_v37 = vadd.f32 %v4183_v34, %v9702_v19  ;;  %v8025_v29 = vpop.f32.mrf.mxu0  ;;  %v9882_v55 = vadd.f32 %v8021_v42, %v4350_v38 }
 0x238   : > { %v7960_v54 = vpop.f32.mrf.mxu1 }
 0x239   : > { %v4353_v53 = vadd.f32 %v7960_v54, %v9705_v62  ;;  %v4729_v1 = vpop.f32.mrf.mxu0  ;;  %v9885_v63 = vadd.f32 %v4713_v26, %v4348_v37 }
 0x23a   : > { %v4196_v52 = vpop.f32.mrf.mxu1 }
 0x23b   : > { %v4351_v43 = vadd.f32 %v4196_v52, %v9710_v15  ;;  %v8028_v51 = vpop.f32.mrf.mxu0  ;;  %v9888_v39 = vadd.f32 %v8024_v7, %v4353_v53 }
 0x23c   : > { %v7961_v57 = vpop.f32.mrf.mxu1 }
 0x23d   : > { %v4354_v24 = vadd.f32 %v7961_v57, %v9714_v13  ;;  %v4742_v47 = vpop.f32.mrf.mxu0  ;;  %v9891_v19 = vadd.f32 %v4726_v9, %v4351_v43 }
 0x23e   : > { %v4199_v42 = vpop.f32.mrf.mxu1 }
 0x23f   : > { %v4352_v35 = vadd.f32 %v4199_v42, %v9719_v56  ;;  %v8029_v50 = vpop.f32.mrf.mxu0  ;;  %v9894_v62 = vadd.f32 %v8025_v29, %v4354_v24 }
 0x240   : > { %v7964_v26 = vpop.f32.mrf.mxu1 }
 0x241   : > { %v4357_v48 = vadd.f32 %v7964_v26, %v9724_v3  ;;  %v4745_v38 = vpop.f32.mrf.mxu0  ;;  %v9897_v15 = vadd.f32 %v4729_v1, %v4352_v35 }
 0x242   : > { %v4212_v7 = vpop.f32.mrf.mxu1 }
 0x243   : > { %v4355_v34 = vadd.f32 %v4212_v7, %v9729_v58  ;;  %v8032_v37 = vpop.f32.mrf.mxu0  ;;  %v9900_v13 = vadd.f32 %v8028_v51, %v4357_v48 }
 0x244   : > { %v7965_v9 = vpop.f32.mrf.mxu1 }
 0x245   : > { %v4358_v54 = vadd.f32 %v7965_v9, %v9734_v41  ;;  %v4758_v53 = vpop.f32.mrf.mxu0  ;;  %v9903_v56 = vadd.f32 %v4742_v47, %v4355_v34 }
 0x246   : > { %v4215_v29 = vpop.f32.mrf.mxu1 }
 0x247   : > { %v4356_v52 = vadd.f32 %v4215_v29, %v9739_v33  ;;  %v8033_v43 = vpop.f32.mrf.mxu0  ;;  %v9906_v3 = vadd.f32 %v8029_v50, %v4358_v54 }
 0x248   : > { %v7968_v1 = vpop.f32.mrf.mxu1 }
 0x249   : > { %v4361_v57 = vadd.f32 %v7968_v1, %v9742_v31  ;;  %v4761_v24 = vpop.f32.mrf.mxu0  ;;  %v9909_v58 = vadd.f32 %v4745_v38, %v4356_v52 }
 0x24a   : > { %v4228_v51 = vpop.f32.mrf.mxu1 }
 0x24b   : > { %v4359_v42 = vadd.f32 %v4228_v51, %v9747_v23  ;;  %v8036_v35 = vpop.f32.mrf.mxu0  ;;  %v9912_v41 = vadd.f32 %v8032_v37, %v4361_v57 }
 0x24c   : > { %v7969_v47 = vpop.f32.mrf.mxu1 }
 0x24d   : > { %v4362_v26 = vadd.f32 %v7969_v47, %v9751_v22  ;;  %v4774_v48 = vpop.f32.mrf.mxu0  ;;  %v9915_v33 = vadd.f32 %v4758_v53, %v4359_v42 }
 0x24e   : > { %v4231_v50 = vpop.f32.mrf.mxu1 }
 0x24f   : > { %v4360_v7 = vadd.f32 %v4231_v50, %v9756_v32  ;;  %v8037_v34 = vpop.f32.mrf.mxu0  ;;  %v9918_v31 = vadd.f32 %v8033_v43, %v4362_v26  ;;  %v10191_v50 = vld [vmem:[#allocation17_spill] sm:$0xff] }
 0x250   : > { %v7972_v38 = vpop.f32.mrf.mxu1 }
 0x251   : > { %v4365_v9 = vadd.f32 %v7972_v38, %v9761_v2  ;;  %v4777_v54 = vpop.f32.mrf.mxu0  ;;  %v9921_v23 = vadd.f32 %v4761_v24, %v4360_v7 }
 0x252   : > { %v4244_v37 = vpop.f32.mrf.mxu1 }
 0x253   : > { %v4363_v29 = vadd.f32 %v4244_v37, %v9766_v0  ;;  %v8040_v52 = vpop.f32.mrf.mxu0  ;;  %v9924_v22 = vadd.f32 %v8036_v35, %v4365_v9  ;;  %v10193_v9 = vld [vmem:[#allocation16_spill] sm:$0xff] }
 0x254   : > { %v7973_v53 = vpop.f32.mrf.mxu1 }
 0x255   : > { %v4366_v1 = vadd.f32 %v7973_v53, %v9771_v40  ;;  %v4790_v57 = vpop.f32.mrf.mxu0  ;;  %v9927_v32 = vadd.f32 %v4774_v48, %v4363_v29  ;;  %v10195_v53 = vld [vmem:[#allocation18_spill] sm:$0xff] }
 0x256   : > { %v4247_v43 = vpop.f32.mrf.mxu1 }
 0x257   : > { %v4364_v51 = vadd.f32 %v4247_v43, %v9776_v27  ;;  %v8041_v42 = vpop.f32.mrf.mxu0  ;;  %v9930_v2 = vadd.f32 %v8037_v34, %v4366_v1 }
 0x258   : > { %v7976_v24 = vpop.f32.mrf.mxu1 }
 0x259   : > { %v4369_v47 = vadd.f32 %v7976_v24, %v9779_v45  ;;  %v4793_v26 = vpop.f32.mrf.mxu0  ;;  %v9933_v0 = vadd.f32 %v4777_v54, %v4364_v51  ;;  %v10196_v51 = vld [vmem:[#allocation20_spill] sm:$0xff] }
 0x25a   : > { %v4260_v35 = vpop.f32.mrf.mxu1 }
 0x25b   : > { %10190 = vst [vmem:[#allocation19_spill] sm:$0xff] %v9933_v0  ;;  %v4367_v7 = vadd.f32 %v4260_v35, %v10191_v50  ;;  %v8044_v38 = vpop.f32.mrf.mxu0  ;;  %v9936_v40 = vadd.f32 %v8040_v52, %v4369_v47  ;;  %v10197_v47 = vld [vmem:[#allocation21_spill] sm:$0xff] }
 0x25c   : > { %v7977_v48 = vpop.f32.mrf.mxu1 }
 0x25d   : > { %10192 = vst [vmem:[#allocation23_spill] sm:$0xff] %v9936_v40  ;;  %v4370_v37 = vadd.f32 %v7977_v48, %v10193_v9  ;;  %v4806_v29 = vpop.f32.mrf.mxu0  ;;  %v9939_v27 = vadd.f32 %v4790_v57, %v4367_v7  ;;  %v10198_v7 = vld [vmem:[#allocation22_spill] sm:$0xff] }
 0x25e   : > { %v4263_v34 = vpop.f32.mrf.mxu1 }
 0x25f   : > { %10194 = vst [vmem:[#allocation24_spill] sm:$0xff] %v9939_v27  ;;  %v4368_v1 = vadd.f32 %v4263_v34, %v10195_v53  ;;  %v8045_v43 = vpop.f32.mrf.mxu0  ;;  %v9942_v45 = vadd.f32 %v8041_v42, %v4370_v37 }
 0x260   : > { %v7980_v54 = vpop.f32.mrf.mxu1 }
 0x261   : > { %v4373_v24 = vadd.f32 %v7980_v54, %v10196_v51  ;;  %v4809_v0 = vpop.f32.mrf.mxu0  ;;  %v9945_v35 = vadd.f32 %v4793_v26, %v4368_v1 }
 0x262   : > { %v4276_v52 = vpop.f32.mrf.mxu1 }
 0x263   : > { %v4371_v50 = vadd.f32 %v4276_v52, %v10197_v47  ;;  %v8048_v40 = vpop.f32.mrf.mxu0  ;;  %v9948_v48 = vadd.f32 %v8044_v38, %v4373_v24 }
 0x264   : > { %v7981_v57 = vpop.f32.mrf.mxu1 }
 0x265   : > { %v4374_v9 = vadd.f32 %v7981_v57, %v10198_v7  ;;  %v4822_v27 = vpop.f32.mrf.mxu0  ;;  %v9951_v34 = vadd.f32 %v4806_v29, %v4371_v50 }
 0x266   : > { %v4279_v42 = vpop.f32.mrf.mxu1 }
 0x267   : > { %v4372_v37 = vadd.f32 %v4279_v42, %v9809_v28  ;;  %v8049_v53 = vpop.f32.mrf.mxu0  ;;  %v9954_v54 = vadd.f32 %v8045_v43, %v4374_v9 }
 0x268   : > { %v7984_v26 = vpop.f32.mrf.mxu1 }
 0x269   : > { %v4377_v1 = vadd.f32 %v7984_v26, %v9812_v8  ;;  %v4825_v51 = vpop.f32.mrf.mxu0  ;;  %v9957_v52 = vadd.f32 %v4809_v0, %v4372_v37 }
 0x26a   : > { %v4292_v38 = vpop.f32.mrf.mxu1 }
 0x26b   : > { %v4375_v24 = vadd.f32 %v4292_v38, %v9816_v21  ;;  %v8052_v47 = vpop.f32.mrf.mxu0  ;;  %v9960_v57 = vadd.f32 %v8048_v40, %v4377_v1 }
 0x26c   : > { %v7985_v29 = vpop.f32.mrf.mxu1 }
 0x26d   : > { %v4378_v50 = vadd.f32 %v7985_v29, %v9820_v6  ;;  %v4838_v7 = vpop.f32.mrf.mxu0  ;;  %v9963_v28 = vadd.f32 %v4822_v27, %v4375_v24 }
 0x26e   : > { %v4295_v43 = vpop.f32.mrf.mxu1 }
 0x26f   : > { %v4376_v9 = vadd.f32 %v4295_v43, %v9824_v46  ;;  %v8053_v42 = vpop.f32.mrf.mxu0  ;;  %v9966_v8 = vadd.f32 %v8049_v53, %v4378_v50 }
 0x270   : > { %v7988_v0 = vpop.f32.mrf.mxu1 }
 0x271   : > { %v4381_v37 = vadd.f32 %v7988_v0, %v9827_v11  ;;  %v4841_v26 = vpop.f32.mrf.mxu0  ;;  %v9969_v21 = vadd.f32 %v4825_v51, %v4376_v9 }
 0x272   : > { %v4308_v40 = vpop.f32.mrf.mxu1 }
 0x273   : > { %v4379_v1 = vadd.f32 %v4308_v40, %v9831_v44  ;;  %v8056_v38 = vpop.f32.mrf.mxu0  ;;  %v9972_v6 = vadd.f32 %v8052_v47, %v4381_v37 }
 0x274   : > { %v7989_v27 = vpop.f32.mrf.mxu1 }
 0x275   : > { %v4382_v24 = vadd.f32 %v7989_v27, %v9834_v10  ;;  %v4854_v29 = vpop.f32.mrf.mxu0  ;;  %v9975_v46 = vadd.f32 %v4838_v7, %v4379_v1 }
 0x276   : > { %v4311_v53 = vpop.f32.mrf.mxu1 }
 0x277   : > { %v4380_v50 = vadd.f32 %v4311_v53, %v9837_v49  ;;  %v8057_v43 = vpop.f32.mrf.mxu0  ;;  %v9978_v11 = vadd.f32 %v8053_v42, %v4382_v24 }
 0x278   : > { %v7992_v51 = vpop.f32.mrf.mxu1 }
 0x279   : > { %v4385_v9 = vadd.f32 %v7992_v51, %v9840_v17  ;;  %v4857_v0 = vpop.f32.mrf.mxu0  ;;  %v9981_v44 = vadd.f32 %v4841_v26, %v4380_v50 }
 0x27a   : > { %v4324_v47 = vpop.f32.mrf.mxu1 }
 0x27b   : > { %v4383_v37 = vadd.f32 %v4324_v47, %v9843_v59  ;;  %v8140_v40 = vpop.f32.mrf.mxu0  ;;  %v9984_v10 = vadd.f32 %v8056_v38, %v4385_v9 }
 0x27c   : > { %v7993_v7 = vpop.f32.mrf.mxu1 }
 0x27d   : > { %10199 = vst [vmem:[#allocation25_spill] sm:$0xff] %v9984_v10  ;;  %v4386_v1 = vadd.f32 %v7993_v7, %v9846_v5  ;;  %v5823_v27 = vpop.f32.mrf.mxu0  ;;  %v9987_v49 = vadd.f32 %v4854_v29, %v4383_v37 }
 0x27e   : > { %v4327_v42 = vpop.f32.mrf.mxu1 }
 0x27f   : > { %10200 = vst [vmem:[#allocation26_spill] sm:$0xff] %v9987_v49  ;;  %v4384_v24 = vadd.f32 %v4327_v42, %v9849_v61  ;;  %v8141_v53 = vpop.f32.mrf.mxu0  ;;  %v9990_v17 = vadd.f32 %v8057_v43, %v4386_v1 }
 0x280   : > { %v8076_v26 = vpop.f32.mrf.mxu1 }
 0x281   : > { %10201 = vst [vmem:[#allocation27_spill] sm:$0xff] %v9990_v17  ;;  %v5826_v50 = vpop.f32.mrf.mxu0  ;;  %v9992_v51 = vadd.f32 %v4857_v0, %v4384_v24  ;;  %v5601_v38 = vadd.f32 %v8076_v26, %v9852_v16 }
 0x282   : > { %v5408_v59 = vpop.f32.mrf.mxu1 }
 0x283   : > { %10202 = vst [vmem:[#allocation28_spill] sm:$0xff] %v9992_v51  ;;  %v5599_v9 = vadd.f32 %v5408_v59, %v9855_v36  ;;  %v8144_v5 = vpop.f32.mrf.mxu0  ;;  %v6016_v61 = vadd.f32 %v8140_v40, %v5601_v38 }
 0x284   : > { %v8077_v47 = vpop.f32.mrf.mxu1 }
 0x285   : > { %v5602_v29 = vadd.f32 %v8077_v47, %v9858_v20  ;;  %v5839_v37 = vpop.f32.mrf.mxu0  ;;  %v6014_v42 = vadd.f32 %v5823_v27, %v5599_v9 }
 0x286   : > { %v5411_v7 = vpop.f32.mrf.mxu1 }
 0x287   : > { %v6017_v43 = vadd.f32 %v8141_v53, %v5602_v29  ;;  %v5600_v1 = vadd.f32 %v5411_v7, %v9861_v30  ;;  %v8145_v17 = vpop.f32.mrf.mxu0  ;;  %v6420_v27 = vmul.f32 %v6014_v42, %v6014_v42 }
 0x288   : > { %v8080_v16 = vpop.f32.mrf.mxu1 }
 0x289   : > { %v7180_v36 = vpack.c.bf16 %v6017_v43, %v6016_v61  ;;  %v6015_v0 = vadd.f32 %v5826_v50, %v5600_v1  ;;  %v5842_v20 = vpop.f32.mrf.mxu0  ;;  %v5605_v24 = vadd.f32 %v8080_v16, %v9864_v60  ;;  %v6423_v47 = vmul.f32 %v6017_v43, %v6017_v43 }
 0x28a   : > { %v5424_v40 = vpop.f32.mrf.mxu1 }
 0x28b   : > { %7299 = vst [vmem:[%s10003_s15 + $0x8] sm:$0xff] %v7180_v36   ;;  %v7175_v53 = vpack.c.bf16 %v6015_v0, %v6014_v42  ;;  %v6366_v30 = vadd.f32 %v6015_v0, %v6014_v42  ;;  %v6421_v26 = vmul.f32 %v6015_v0, %v6015_v0  ;;  %v8148_v59 = vpop.f32.mrf.mxu0  ;;  %v5603_v38 = vadd.f32 %v5424_v40, %v9867_v12 }
 0x28c   : > { %v8081_v9 = vpop.f32.mrf.mxu1  ;;  %v6020_v1 = vadd.f32 %v8144_v5, %v5605_v24 }
 0x28d   : > { %7176 = vst [vmem:[%s10003_s15] sm:$0xff] %v7175_v53   ;;  %v6468_v29 = vadd.f32 %v6421_v26, %v6420_v27  ;;  %v6368_v7 = vadd.f32 %v6366_v30, %v6017_v43  ;;  %v5606_v61 = vadd.f32 %v8081_v9, %v9870_v4  ;;  %v5855_v50 = vpop.f32.mrf.mxu0  ;;  %v6018_v51 = vadd.f32 %v5839_v37, %v5603_v38 }
 0x28e   : > { %v5427_v60 = vpop.f32.mrf.mxu1  ;;  %v6426_v43 = vmul.f32 %v6020_v1, %v6020_v1 }
 0x28f   : > { %v6470_v16 = vadd.f32 %v6468_v29, %v6423_v47  ;;  %v6021_v36 = vadd.f32 %v8145_v17, %v5606_v61  ;;  %v5604_v42 = vadd.f32 %v5427_v60, %v9873_v25  ;;  %v8149_v0 = vpop.f32.mrf.mxu0  ;;  %v6369_v49 = vadd.f32 %v6368_v7, %v6018_v51 }
 0x290   : > { %v6424_v10 = vmul.f32 %v6018_v51, %v6018_v51  ;;  %v8084_v12 = vpop.f32.mrf.mxu1 }
 0x291   : > { %v7190_v40 = vpack.c.bf16 %v6021_v36, %v6020_v1  ;;  %v6019_v53 = vadd.f32 %v5842_v20, %v5604_v42  ;;  %v5858_v27 = vpop.f32.mrf.mxu0  ;;  %v6371_v4 = vadd.f32 %v6369_v49, %v6020_v1  ;;  %v5609_v37 = vadd.f32 %v8084_v12, %v9876_v14 }
 0x292   : > { %v6471_v30 = vadd.f32 %v6470_v16, %v6424_v10  ;;  %v5440_v26 = vpop.f32.mrf.mxu1  ;;  %v6427_v38 = vmul.f32 %v6021_v36, %v6021_v36 }
 0x293   : > { %7301 = vst [vmem:[%s10003_s15 + $0x18] sm:$0xff] %v7190_v40   ;;  %v7185_v5 = vpack.c.bf16 %v6019_v53, %v6018_v51  ;;  %v8152_v24 = vpop.f32.mrf.mxu0  ;;  %v6372_v17 = vadd.f32 %v6371_v4, %v6021_v36  ;;  %v5607_v47 = vadd.f32 %v5440_v26, %v9879_v18  ;;  %v6024_v49 = vadd.f32 %v8148_v59, %v5609_v37 }
 0x294   : > { %v6473_v25 = vadd.f32 %v6471_v30, %v6426_v43  ;;  %v8085_v9 = vpop.f32.mrf.mxu1 }
 0x295   : > { %7300 = vst [vmem:[%s10003_s15 + $0x10] sm:$0xff] %v7185_v5   ;;  %v5610_v20 = vadd.f32 %v8085_v9, %v9882_v55  ;;  %v5871_v29 = vpop.f32.mrf.mxu0  ;;  %v6022_v60 = vadd.f32 %v5855_v50, %v5607_v47  ;;  %v6430_v30 = vmul.f32 %v6024_v49, %v6024_v49 }
 0x296   : > { %v6474_v7 = vadd.f32 %v6473_v25, %v6427_v38  ;;  %v5443_v10 = vpop.f32.mrf.mxu1 }
 0x297   : > { %v6025_v61 = vadd.f32 %v8149_v0, %v5610_v20  ;;  %v5608_v51 = vadd.f32 %v5443_v10, %v9885_v63  ;;  %v8153_v1 = vpop.f32.mrf.mxu0 }
 0x298   : > { %v8088_v14 = vpop.f32.mrf.mxu1 }
 0x299   : > { %v7200_v16 = vpack.c.bf16 %v6025_v61, %v6024_v49  ;;  %v6023_v36 = vadd.f32 %v5858_v27, %v5608_v51  ;;  %v5874_v42 = vpop.f32.mrf.mxu0  ;;  %v5613_v55 = vadd.f32 %v8088_v14, %v9888_v39 }
 0x29a   : > { %v5456_v12 = vpop.f32.mrf.mxu1 }
 0x29b   : > { %7303 = vst [vmem:[%s10003_s15 + $0x28] sm:$0xff] %v7200_v16   ;;  %v7195_v40 = vpack.c.bf16 %v6023_v36, %v6022_v60  ;;  %v6374_v18 = vadd.f32 %v6372_v17, %v6023_v36  ;;  %v6429_v53 = vmul.f32 %v6023_v36, %v6023_v36  ;;  %v8156_v43 = vpop.f32.mrf.mxu0  ;;  %v5611_v59 = vadd.f32 %v5456_v12, %v9891_v19 }
 0x29c   : > { %v8089_v0 = vpop.f32.mrf.mxu1  ;;  %v6028_v37 = vadd.f32 %v8152_v24, %v5613_v55 }
 0x29d   : > { %7302 = vst [vmem:[%s10003_s15 + $0x20] sm:$0xff] %v7195_v40   ;;  %v6476_v63 = vadd.f32 %v6474_v7, %v6429_v53  ;;  %v6375_v4 = vadd.f32 %v6374_v18, %v6024_v49  ;;  %v5614_v50 = vadd.f32 %v8089_v0, %v9894_v62  ;;  %v5887_v26 = vpop.f32.mrf.mxu0  ;;  %v6026_v27 = vadd.f32 %v5871_v29, %v5611_v59 }
 0x29e   : > { %v5459_v5 = vpop.f32.mrf.mxu1 }
 0x29f   : > { %v6477_v38 = vadd.f32 %v6476_v63, %v6430_v30  ;;  %v6029_v17 = vadd.f32 %v8153_v1, %v5614_v50  ;;  %v5612_v25 = vadd.f32 %v5459_v5, %v9897_v15  ;;  %v8157_v39 = vpop.f32.mrf.mxu0  ;;  %v6377_v9 = vadd.f32 %v6375_v4, %v6026_v27 }
 0x2a0   : > { %v6432_v47 = vmul.f32 %v6026_v27, %v6026_v27  ;;  %v8092_v19 = vpop.f32.mrf.mxu1 }
 0x2a1   : > { %v7210_v20 = vpack.c.bf16 %v6029_v17, %v6028_v37  ;;  %v6027_v10 = vadd.f32 %v5874_v42, %v5612_v25  ;;  %v5890_v7 = vpop.f32.mrf.mxu0  ;;  %v5617_v62 = vadd.f32 %v8092_v19, %v9900_v13  ;;  %v6435_v60 = vmul.f32 %v6029_v17, %v6029_v17 }
 0x2a2   : > { %v6479_v49 = vadd.f32 %v6477_v38, %v6432_v47  ;;  %v5472_v61 = vpop.f32.mrf.mxu1 }
 0x2a3   : > { %7305 = vst [vmem:[%s10003_s15 + $0x38] sm:$0xff] %v7210_v20   ;;  %v7205_v29 = vpack.c.bf16 %v6027_v10, %v6026_v27  ;;  %v6378_v51 = vadd.f32 %v6377_v9, %v6027_v10  ;;  %v6433_v24 = vmul.f32 %v6027_v10, %v6027_v10  ;;  %v8160_v14 = vpop.f32.mrf.mxu0  ;;  %v5615_v1 = vadd.f32 %v5472_v61, %v9903_v56 }
 0x2a4   : > { %v8093_v15 = vpop.f32.mrf.mxu1  ;;  %v6032_v40 = vadd.f32 %v8156_v43, %v5617_v62 }
 0x2a5   : > { %7304 = vst [vmem:[%s10003_s15 + $0x30] sm:$0xff] %v7205_v29   ;;  %v6480_v16 = vadd.f32 %v6479_v49, %v6433_v24  ;;  %v6380_v36 = vadd.f32 %v6378_v51, %v6029_v17  ;;  %v5618_v12 = vadd.f32 %v8093_v15, %v9906_v3  ;;  %v5903_v42 = vpop.f32.mrf.mxu0  ;;  %v6030_v18 = vadd.f32 %v5887_v26, %v5615_v1 }
 0x2a6   : > { %v5475_v13 = vpop.f32.mrf.mxu1  ;;  %v6438_v5 = vmul.f32 %v6032_v40, %v6032_v40 }
 0x2a7   : > { %v6482_v53 = vadd.f32 %v6480_v16, %v6435_v60  ;;  %v6033_v55 = vadd.f32 %v8157_v39, %v5618_v12  ;;  %v5616_v59 = vadd.f32 %v5475_v13, %v9909_v58  ;;  %v8161_v0 = vpop.f32.mrf.mxu0  ;;  %v6381_v30 = vadd.f32 %v6380_v36, %v6030_v18 }
 0x2a8   : > { %v6436_v63 = vmul.f32 %v6030_v18, %v6030_v18  ;;  %v8096_v56 = vpop.f32.mrf.mxu1 }
 0x2a9   : > { %v7220_v4 = vpack.c.bf16 %v6033_v55, %v6032_v40  ;;  %v6031_v50 = vadd.f32 %v5890_v7, %v5616_v59  ;;  %v5906_v27 = vpop.f32.mrf.mxu0  ;;  %v6383_v3 = vadd.f32 %v6381_v30, %v6032_v40  ;;  %v5621_v26 = vadd.f32 %v8096_v56, %v9912_v41  ;;  %v10203_v56 = vld [vmem:[#allocation19_spill] sm:$0xff] }
 0x2aa   : > { %v6483_v37 = vadd.f32 %v6482_v53, %v6436_v63  ;;  %v5488_v38 = vpop.f32.mrf.mxu1  ;;  %v6439_v39 = vmul.f32 %v6033_v55, %v6033_v55 }
 0x2ab   : > { %7307 = vst [vmem:[%s10003_s15 + $0x48] sm:$0xff] %v7220_v4   ;;  %v7215_v43 = vpack.c.bf16 %v6031_v50, %v6030_v18  ;;  %v8164_v17 = vpop.f32.mrf.mxu0  ;;  %v6384_v25 = vadd.f32 %v6383_v3, %v6033_v55  ;;  %v5619_v47 = vadd.f32 %v5488_v38, %v9915_v33  ;;  %v6036_v49 = vadd.f32 %v8160_v14, %v5621_v26 }
 0x2ac   : > { %v6485_v58 = vadd.f32 %v6483_v37, %v6438_v5  ;;  %v8097_v9 = vpop.f32.mrf.mxu1 }
 0x2ad   : > { %7306 = vst [vmem:[%s10003_s15 + $0x40] sm:$0xff] %v7215_v43   ;;  %v5622_v19 = vadd.f32 %v8097_v9, %v9918_v31  ;;  %v5919_v20 = vpop.f32.mrf.mxu0  ;;  %v6034_v51 = vadd.f32 %v5903_v42, %v5619_v47  ;;  %v6442_v18 = vmul.f32 %v6036_v49, %v6036_v49  ;;  %v10204_v43 = vld [vmem:[#allocation23_spill] sm:$0xff]  ;;  %v10205_v9 = vld [vmem:[#allocation24_spill] sm:$0xff] }
 0x2ae   : > { %v6486_v10 = vadd.f32 %v6485_v58, %v6439_v39  ;;  %v5491_v7 = vpop.f32.mrf.mxu1 }
 0x2af   : > { %v6037_v62 = vadd.f32 %v8161_v0, %v5622_v19  ;;  %v5620_v61 = vadd.f32 %v5491_v7, %v9921_v23  ;;  %v8165_v29 = vpop.f32.mrf.mxu0 }
 0x2b0   : > { %v8100_v41 = vpop.f32.mrf.mxu1 }
 0x2b1   : > { %v7230_v24 = vpack.c.bf16 %v6037_v62, %v6036_v49  ;;  %v6035_v1 = vadd.f32 %v5906_v27, %v5620_v61  ;;  %v5922_v15 = vpop.f32.mrf.mxu0  ;;  %v5625_v31 = vadd.f32 %v8100_v41, %v9924_v22 }
 0x2b2   : > { %v5504_v60 = vpop.f32.mrf.mxu1 }
 0x2b3   : > { %7309 = vst [vmem:[%s10003_s15 + $0x58] sm:$0xff] %v7230_v24   ;;  %v7225_v16 = vpack.c.bf16 %v6035_v1, %v6034_v51  ;;  %v6386_v33 = vadd.f32 %v6384_v25, %v6035_v1  ;;  %v6441_v36 = vmul.f32 %v6035_v1, %v6035_v1  ;;  %v8168_v12 = vpop.f32.mrf.mxu0  ;;  %v5623_v14 = vadd.f32 %v5504_v60, %v9927_v32 }
 0x2b4   : > { %v8101_v40 = vpop.f32.mrf.mxu1  ;;  %v6040_v0 = vadd.f32 %v8164_v17, %v5625_v31 }
 0x2b5   : > { %7308 = vst [vmem:[%s10003_s15 + $0x50] sm:$0xff] %v7225_v16   ;;  %v6488_v23 = vadd.f32 %v6486_v10, %v6441_v36  ;;  %v6387_v13 = vadd.f32 %v6386_v33, %v6036_v49  ;;  %v5626_v42 = vadd.f32 %v8101_v40, %v9930_v2  ;;  %v5935_v53 = vpop.f32.mrf.mxu0  ;;  %v6038_v55 = vadd.f32 %v5919_v20, %v5623_v14 }
 0x2b6   : > { %v5507_v59 = vpop.f32.mrf.mxu1 }
 0x2b7   : > { %v6489_v30 = vadd.f32 %v6488_v23, %v6442_v18  ;;  %v6041_v63 = vadd.f32 %v8165_v29, %v5626_v42  ;;  %v5624_v4 = vadd.f32 %v5507_v59, %v10203_v56  ;;  %v8169_v22 = vpop.f32.mrf.mxu0  ;;  %v6389_v50 = vadd.f32 %v6387_v13, %v6038_v55 }
 0x2b8   : > { %v6444_v27 = vmul.f32 %v6038_v55, %v6038_v55  ;;  %v8104_v32 = vpop.f32.mrf.mxu1 }
 0x2b9   : > { %v7240_v5 = vpack.c.bf16 %v6041_v63, %v6040_v0  ;;  %v6039_v37 = vadd.f32 %v5922_v15, %v5624_v4  ;;  %v5938_v3 = vpop.f32.mrf.mxu0  ;;  %v5629_v2 = vadd.f32 %v8104_v32, %v10204_v43  ;;  %v6447_v20 = vmul.f32 %v6041_v63, %v6041_v63 }
 0x2ba   : > { %v6491_v38 = vadd.f32 %v6489_v30, %v6444_v27  ;;  %v5520_v26 = vpop.f32.mrf.mxu1 }
 0x2bb   : > { %7311 = vst [vmem:[%s10003_s15 + $0x68] sm:$0xff] %v7240_v5   ;;  %v7235_v25 = vpack.c.bf16 %v6039_v37, %v6038_v55  ;;  %v6390_v39 = vadd.f32 %v6389_v50, %v6039_v37  ;;  %v6445_v17 = vmul.f32 %v6039_v37, %v6039_v37  ;;  %v8172_v58 = vpop.f32.mrf.mxu0  ;;  %v5627_v47 = vadd.f32 %v5520_v26, %v10205_v9 }
 0x2bc   : > { %v8105_v19 = vpop.f32.mrf.mxu1  ;;  %v6044_v61 = vadd.f32 %v8168_v12, %v5629_v2 }
 0x2bd   : > { %7310 = vst [vmem:[%s10003_s15 + $0x60] sm:$0xff] %v7235_v25   ;;  %v6492_v10 = vadd.f32 %v6491_v38, %v6445_v17  ;;  %v6392_v7 = vadd.f32 %v6390_v39, %v6041_v63  ;;  %v5630_v49 = vadd.f32 %v8105_v19, %v9942_v45  ;;  %v5951_v62 = vpop.f32.mrf.mxu0  ;;  %v6042_v29 = vadd.f32 %v5935_v53, %v5627_v47 }
 0x2be   : > { %v5523_v41 = vpop.f32.mrf.mxu1  ;;  %v6450_v40 = vmul.f32 %v6044_v61, %v6044_v61 }
 0x2bf   : > { %v6494_v51 = vadd.f32 %v6492_v10, %v6447_v20  ;;  %v6045_v24 = vadd.f32 %v8169_v22, %v5630_v49  ;;  %v5628_v1 = vadd.f32 %v5523_v41, %v9945_v35  ;;  %v8173_v15 = vpop.f32.mrf.mxu0  ;;  %v6393_v60 = vadd.f32 %v6392_v7, %v6042_v29 }
 0x2c0   : > { %v6448_v16 = vmul.f32 %v6042_v29, %v6042_v29  ;;  %v8108_v33 = vpop.f32.mrf.mxu1 }
 0x2c1   : > { %v7250_v36 = vpack.c.bf16 %v6045_v24, %v6044_v61  ;;  %v6043_v31 = vadd.f32 %v5938_v3, %v5628_v1  ;;  %v5954_v14 = vpop.f32.mrf.mxu0  ;;  %v6395_v45 = vadd.f32 %v6393_v60, %v6044_v61  ;;  %v5633_v13 = vadd.f32 %v8108_v33, %v9948_v48 }
 0x2c2   : > { %v6495_v18 = vadd.f32 %v6494_v51, %v6448_v16  ;;  %v5536_v23 = vpop.f32.mrf.mxu1  ;;  %v6451_v55 = vmul.f32 %v6045_v24, %v6045_v24 }
 0x2c3   : > { %7313 = vst [vmem:[%s10003_s15 + $0x78] sm:$0xff] %v7250_v36   ;;  %v7245_v12 = vpack.c.bf16 %v6043_v31, %v6042_v29  ;;  %v8176_v42 = vpop.f32.mrf.mxu0  ;;  %v6396_v53 = vadd.f32 %v6395_v45, %v6045_v24  ;;  %v5631_v0 = vadd.f32 %v5536_v23, %v9951_v34  ;;  %v6048_v22 = vadd.f32 %v8172_v58, %v5633_v13 }
 0x2c4   : > { %v6497_v35 = vadd.f32 %v6495_v18, %v6450_v40  ;;  %v8109_v59 = vpop.f32.mrf.mxu1 }
 0x2c5   : > { %7312 = vst [vmem:[%s10003_s15 + $0x70] sm:$0xff] %v7245_v12   ;;  %v5634_v30 = vadd.f32 %v8109_v59, %v9954_v54  ;;  %v5967_v63 = vpop.f32.mrf.mxu0  ;;  %v6046_v5 = vadd.f32 %v5951_v62, %v5631_v0  ;;  %v6454_v58 = vmul.f32 %v6048_v22, %v6048_v22 }
 0x2c6   : > { %v6498_v56 = vadd.f32 %v6497_v35, %v6451_v55  ;;  %v5539_v4 = vpop.f32.mrf.mxu1 }
 0x2c7   : > { %v6049_v50 = vadd.f32 %v8173_v15, %v5634_v30  ;;  %v5632_v27 = vadd.f32 %v5539_v4, %v9957_v52  ;;  %v8177_v32 = vpop.f32.mrf.mxu0 }
 0x2c8   : > { %v8112_v48 = vpop.f32.mrf.mxu1 }
 0x2c9   : > { %v7260_v37 = vpack.c.bf16 %v6049_v50, %v6048_v22  ;;  %v6047_v3 = vadd.f32 %v5954_v14, %v5632_v27  ;;  %v5970_v38 = vpop.f32.mrf.mxu0  ;;  %v5637_v54 = vadd.f32 %v8112_v48, %v9960_v57  ;;  %v10206_v27 = vld [vmem:[#allocation25_spill] sm:$0xff] }
 0x2ca   : > { %v5552_v43 = vpop.f32.mrf.mxu1 }
 0x2cb   : > { %7315 = vst [vmem:[%s10003_s15 + $0x88] sm:$0xff] %v7260_v37   ;;  %v7255_v2 = vpack.c.bf16 %v6047_v3, %v6046_v5  ;;  %v6398_v34 = vadd.f32 %v6396_v53, %v6047_v3  ;;  %v6453_v26 = vmul.f32 %v6047_v3, %v6047_v3  ;;  %v8180_v25 = vpop.f32.mrf.mxu0  ;;  %v5635_v39 = vadd.f32 %v5552_v43, %v9963_v28 }
 0x2cc   : > { %v8113_v17 = vpop.f32.mrf.mxu1  ;;  %v6052_v7 = vadd.f32 %v8176_v42, %v5637_v54 }
 0x2cd   : > { %7314 = vst [vmem:[%s10003_s15 + $0x80] sm:$0xff] %v7255_v2   ;;  %v6500_v52 = vadd.f32 %v6498_v56, %v6453_v26  ;;  %v6399_v9 = vadd.f32 %v6398_v34, %v6048_v22  ;;  %v5638_v47 = vadd.f32 %v8113_v17, %v9966_v8  ;;  %v5983_v19 = vpop.f32.mrf.mxu0  ;;  %v6050_v20 = vadd.f32 %v5967_v63, %v5635_v39  ;;  %v10208_v2 = vld [vmem:[#allocation27_spill] sm:$0xff]  ;;  %v10209_v17 = vld [vmem:[#allocation28_spill] sm:$0xff] }
 0x2ce   : > { %v5555_v10 = vpop.f32.mrf.mxu1 }
 0x2cf   : > { %v6501_v49 = vadd.f32 %v6500_v52, %v6454_v58  ;;  %v6053_v62 = vadd.f32 %v8177_v32, %v5638_v47  ;;  %v5636_v61 = vadd.f32 %v5555_v10, %v9969_v21  ;;  %v8181_v57 = vpop.f32.mrf.mxu0  ;;  %v6401_v29 = vadd.f32 %v6399_v9, %v6050_v20 }
 0x2d0   : > { %v6456_v41 = vmul.f32 %v6050_v20, %v6050_v20  ;;  %v8116_v28 = vpop.f32.mrf.mxu1 }
 0x2d1   : > { %v7270_v51 = vpack.c.bf16 %v6053_v62, %v6052_v7  ;;  %v6051_v24 = vadd.f32 %v5970_v38, %v5636_v61  ;;  %v5986_v1 = vpop.f32.mrf.mxu0  ;;  %v5641_v8 = vadd.f32 %v8116_v28, %v9972_v6  ;;  %v6459_v40 = vmul.f32 %v6053_v62, %v6053_v62  ;;  %v10207_v38 = vld [vmem:[#allocation26_spill] sm:$0xff] }
 0x2d2   : > { %v6503_v15 = vadd.f32 %v6501_v49, %v6456_v41  ;;  %v5568_v60 = vpop.f32.mrf.mxu1 }
 0x2d3   : > { %7317 = vst [vmem:[%s10003_s15 + $0x98] sm:$0xff] %v7270_v51   ;;  %v7265_v16 = vpack.c.bf16 %v6051_v24, %v6050_v20  ;;  %v6402_v33 = vadd.f32 %v6401_v29, %v6051_v24  ;;  %v6457_v36 = vmul.f32 %v6051_v24, %v6051_v24  ;;  %v5639_v31 = vadd.f32 %v5568_v60, %v9975_v46  ;;  %v8184_v21 = vpop.f32.mrf.mxu0 }
 0x2d4   : > { %v8117_v14 = vpop.f32.mrf.mxu1  ;;  %v6056_v12 = vadd.f32 %v8180_v25, %v5641_v8 }
 0x2d5   : > { %7316 = vst [vmem:[%s10003_s15 + $0x90] sm:$0xff] %v7265_v16   ;;  %v6504_v18 = vadd.f32 %v6503_v15, %v6457_v36  ;;  %v6404_v45 = vadd.f32 %v6402_v33, %v6053_v62  ;;  %v5642_v23 = vadd.f32 %v8117_v14, %v9978_v11  ;;  %v6054_v13 = vadd.f32 %v5983_v19, %v5639_v31  ;;  %v5999_v46 = vpop.f32.mrf.mxu0 }
 0x2d6   : > { %v5571_v42 = vpop.f32.mrf.mxu1  ;;  %v6462_v56 = vmul.f32 %v6056_v12, %v6056_v12 }
 0x2d7   : > { %v6506_v6 = vadd.f32 %v6504_v18, %v6459_v40  ;;  %v6057_v53 = vadd.f32 %v8181_v57, %v5642_v23  ;;  %v5640_v55 = vadd.f32 %v5571_v42, %v9981_v44  ;;  %v6405_v35 = vadd.f32 %v6404_v45, %v6054_v13  ;;  %v8185_v44 = vpop.f32.mrf.mxu0 }
 0x2d8   : > { %v6460_v59 = vmul.f32 %v6054_v13, %v6054_v13  ;;  %v8120_v0 = vpop.f32.mrf.mxu1 }
 0x2d9   : > { %v7280_v30 = vpack.c.bf16 %v6057_v53, %v6056_v12  ;;  %v6055_v63 = vadd.f32 %v5986_v1, %v5640_v55  ;;  %v6407_v22 = vadd.f32 %v6405_v35, %v6056_v12  ;;  %v5645_v32 = vadd.f32 %v8120_v0, %v10206_v27  ;;  %v6002_v52 = vpop.f32.mrf.mxu0 }
 0x2da   : > { %v6507_v4 = vadd.f32 %v6506_v6, %v6460_v59  ;;  %v5584_v50 = vpop.f32.mrf.mxu1  ;;  %v6463_v5 = vmul.f32 %v6057_v53, %v6057_v53 }
 0x2db   : > { %7319 = vst [vmem:[%s10003_s15 + $0xa8] sm:$0xff] %v7280_v30   ;;  %v7275_v11 = vpack.c.bf16 %v6055_v63, %v6054_v13  ;;  %v6408_v48 = vadd.f32 %v6407_v22, %v6057_v53  ;;  %v5643_v43 = vadd.f32 %v5584_v50, %v10207_v38  ;;  %v6060_v25 = vadd.f32 %v8184_v21, %v5645_v32 }
 0x2dc   : > { %v6509_v37 = vadd.f32 %v6507_v4, %v6462_v56  ;;  %v8121_v3 = vpop.f32.mrf.mxu1 }
 0x2dd   : > { %7318 = vst [vmem:[%s10003_s15 + $0xa0] sm:$0xff] %v7275_v11   ;;  %v5646_v34 = vadd.f32 %v8121_v3, %v10208_v2  ;;  %v6058_v9 = vadd.f32 %v5999_v46, %v5643_v43  ;;  %v6466_v49 = vmul.f32 %v6060_v25, %v6060_v25 }
 0x2de   : > { %v6510_v26 = vadd.f32 %v6509_v37, %v6463_v5  ;;  %v5587_v54 = vpop.f32.mrf.mxu1 }
 0x2df   : > { %v6061_v39 = vadd.f32 %v8185_v44, %v5646_v34  ;;  %v5644_v58 = vadd.f32 %v5587_v54, %v10209_v17 }
 0x2e1   : > { %v7290_v47 = vpack.c.bf16 %v6061_v39, %v6060_v25  ;;  %v6059_v19 = vadd.f32 %v6002_v52, %v5644_v58 }
 0x2e3   : > { %7321 = vst [vmem:[%s10003_s15 + $0xb8] sm:$0xff] %v7290_v47   ;;  %v7285_v20 = vpack.c.bf16 %v6059_v19, %v6058_v9  ;;  %v6410_v10 = vadd.f32 %v6408_v48, %v6059_v19  ;;  %v6465_v7 = vmul.f32 %v6059_v19, %v6059_v19 }
 0x2e5   : > { %7320 = vst [vmem:[%s10003_s15 + $0xb0] sm:$0xff] %v7285_v20   ;;  %v6411_v62 = vadd.f32 %v6410_v10, %v6060_v25  ;;  %v6512_v61 = vadd.f32 %v6510_v26, %v6465_v7 }
 0x2e7   : > { %v6413_v57 = vrot.slane %v6411_v62, 4  ;;  %v6513_v29 = vadd.f32 %v6512_v61, %v6466_v49 }
 0x2e9   : > { %v6414_v41 = vadd.f32 %v6413_v57, %v6411_v62  ;;  %v6515_v28 = vrot.slane %v6513_v29, 4 }
 0x2eb   : > { %v6415_v51 = vrot.slane %v6414_v41, 2  ;;  %v6516_v24 = vadd.f32 %v6515_v28, %v6513_v29 }
 0x2ed   : > { %v6416_v1 = vadd.f32 %v6415_v51, %v6414_v41  ;;  %v6517_v15 = vrot.slane %v6516_v24, 2 }
 0x2ef   : > { %v6417_v8 = vrot.slane %v6416_v1, 1  ;;  %v6518_v60 = vadd.f32 %v6517_v15, %v6516_v24 }
 0x2f1   : > { %v6418_v16 = vadd.f32 %v6417_v8, %v6416_v1  ;;  %v6519_v33 = vrot.slane %v6518_v60, 1 }
 0x2f3   : > { %6419 = vst [vmem:[%s265_s17] sm:$0x1] %v6418_v16  ;;  %v6520_v36 = vadd.f32 %v6519_v33, %v6518_v60 }
 0x2f5   : > { %6521 = vst [vmem:[%s268_s20] sm:$0x1] %v6520_v36 }
 0x2f6 PF: > { %s17_s21 = sadd.s32 1, %s8434_s21  }
 0x2f7   : > { %p14_p4 = scmp.ge.s32.totalorder %s17_s21, 4  }
 0x2f9   :  { %16 = sbr.rel (!%p14_p4) target bundleno = 1 (0x1), region = 98 }

</bundles_post_ra>
